<compile_context>
chip_gen: v6e
topology: v6e:2x2x1
jax: 0.10.0
libtpu: 0.0.40
codegen_flags: <defaults>
</compile_context>

<pallas_src>
import numpy as np
import jax
import jax.numpy as jnp
from jax.experimental import pallas as pl
from jax.experimental.pallas import tpu as pltpu

# ----------------------------------------------------------------------------
# Fixed convolution stencils from the PyTorch source (frozen buffers there)
# ----------------------------------------------------------------------------
op10 = [[[[0, 0, 0], [0, 1, 0], [0, -1, 0]]]]
op11 = [[[[0, 0, 0], [0, 1, 0], [-1, 0, 0]]]]
op4 = [[[[0, 0, 0], [-1, 1, 0], [0, 0, 0]]]]
op5 = [[[[-1, 0, 0], [0, 1, 0], [0, 0, 0]]]]
op6 = [[[[0, -1, 0], [0, 1, 0], [0, 0, 0]]]]
op7 = [[[[0, 0, -1], [0, 1, 0], [0, 0, 0]]]]
op8 = [[[[0, 0, 0], [0, 1, -1], [0, 0, 0]]]]
op9 = [[[[0, 0, 0], [0, 1, 0], [0, 0, -1]]]]
cnnKernel1 = np.transpose(
    np.concatenate((op4, op5, op6, op7, op8, op9, op10, op11), axis=0),
    (0, 1, 3, 2)).astype(np.float64)            # (8, 1, 3, 3)

op0 = [[[[0, 0, 0], [-1, 1, 0], [0, 0, 0]]]]
op1 = [[[[0, -1, 0], [0, 1, 0], [0, 0, 0]]]]
op2 = [[[[0, 0, 0], [0, 1, -1], [0, 0, 0]]]]
op3 = [[[[0, 0, 0], [0, 1, 0], [0, -1, 0]]]]
cnnKernel2 = np.transpose(
    np.concatenate((op0, op1, op2, op3), axis=0),
    (0, 1, 3, 2)).astype(np.float64)            # (4, 1, 3, 3)


def _stencil_shifts(kernels, dilation):
    """Each stencil is +1 at the center and -1 at exactly one tap.
    Return the (di, dj) offset of the -1 tap relative to the center,
    scaled by the dilation (trace-time constants baked into the kernel)."""
    shifts = []
    for c in range(kernels.shape[0]):
        k = kernels[c, 0]
        assert k[1, 1] == 1.0 and np.count_nonzero(k) == 2
        neg = np.argwhere(k == -1.0)
        assert neg.shape == (1, 2)
        ki, kj = int(neg[0, 0]), int(neg[0, 1])
        shifts.append((dilation * (ki - 1), dilation * (kj - 1)))
    return tuple(shifts)


SHIFTS1 = _stencil_shifts(cnnKernel1, 1)   # 8 shifts, |di|,|dj| <= 1
SHIFTS2 = _stencil_shifts(cnnKernel2, 2)   # 4 axis-aligned shifts of +-2


# ----------------------------------------------------------------------------
# Pallas kernel
# ----------------------------------------------------------------------------
def cnn_branch_kernel(pscale_ref, alpha_ref, sc_ref, hp1_ref, hp2_ref, out_ref):
    # pscale : SMEM (12,) = [cnnP1 (8), cnnP2 (4)]  (per-conv-channel scales)
    # alpha  : SMEM (12,) = [alpha1*1e6 (8), alpha2*1e6 (4)]
    # sc_ref : SMEM (8,)  = [beta*1e4, gamma*1e2, delta0*1, delta1*10, delta2*1, dt, 0, 0]
    # hp1    : VMEM (1, 6, H+2, W+2)  replicate-padded input (cnn_1 windows)
    # hp2    : VMEM (1, 6, H+4, W+4)  custom-padded input (dilated cnn_2 windows)
    # out    : VMEM (1, 3, H, W)
    H = out_ref.shape[2]
    W = out_ref.shape[3]

    beta_ = sc_ref[0]
    gamma_ = sc_ref[1]
    dsum0 = sc_ref[2]
    dsum1 = sc_ref[3]
    dsum2 = sc_ref[4]
    dt = sc_ref[5]

    # Center window == the unpadded image; shared by all 12 channels.  Hoisted.
    cen = [hp1_ref[0, c, 1:1 + H, 1:1 + W] for c in range(6)]

    zero = jnp.zeros((H, W), jnp.float32)
    ax, ay, az = zero, zero, zero        # alpha * conv  (large-magnitude terms)
    bx, by, bz = zero, zero, zero        # beta/gamma * normal terms

    for k in range(12):
        p = pscale_ref[k]                # SMEM scalar, read once per k
        ak = alpha_ref[k]
        if k < 8:
            di, dj = SHIFTS1[k]
            nb = [hp1_ref[0, c, 1 + di:1 + di + H, 1 + dj:1 + dj + W]
                  for c in range(6)]
        else:
            di, dj = SHIFTS2[k - 8]
            nb = [hp2_ref[0, c, 2 + di:2 + di + H, 2 + dj:2 + dj + W]
                  for c in range(6)]

        # conv channel k for the 6 input fields: P[k] * (center - neighbor)
        xk = p * (cen[0] - nb[0])
        yk = p * (cen[1] - nb[1])
        zk = p * (cen[2] - nb[2])
        uk = p * (cen[3] - nb[3])
        vk = p * (cen[4] - nb[4])
        wk = p * (cen[5] - nb[5])

        # ISRU normalization on the EUP (rsqrt), then the combination terms.
        inv = jax.lax.rsqrt(xk * xk + yk * yk + zk * zk + 1e-9)
        nx = xk * inv
        ny = yk * inv
        nz = zk * inv
        correl = uk * nx + vk * ny + wk * nz
        g = beta_ + gamma_ * correl      # (beta + gamma*correl) shared factor

        ax = ax + ak * xk
        ay = ay + ak * yk
        az = az + ak * zk
        bx = bx + g * nx
        by = by + g * ny
        bz = bz + g * nz

    # delta adds hoisted (12 * delta/12 = delta); write channels directly.
    out_ref[0, 0] = (ax + bx + dsum0) * dt
    out_ref[0, 1] = (ay + by + dsum1) * dt
    out_ref[0, 2] = (az + bz + dsum2) * dt


# ----------------------------------------------------------------------------
# Wrapper (glue: padding, parameter packing, pallas_call)
# ----------------------------------------------------------------------------
def cnn_branch_forward(h, params):
    """h: (B, 6, H, W) float32, NCHW.  Returns (B, 3, H, W) float32."""
    B, C, H, W = h.shape
    assert C == 6
    h = h.astype(jnp.float32)

    # padding for cnn_1 (replicate, pad=1)
    hp1 = jnp.pad(h, ((0, 0), (0, 0), (1, 1), (1, 1)), mode="edge")
    # custom padding for cnn_2 (copy first/last two rows, then first/last two cols)
    hp2 = jnp.concatenate([h[:, :, 0:2, :], h, h[:, :, -2:, :]], axis=2)
    hp2 = jnp.concatenate([hp2[:, :, :, 0:2], hp2, hp2[:, :, :, -2:]], axis=3)

    # Only the per-channel scales are needed (stencil taps baked into kernel).
    pscale = jnp.concatenate([params["cnnP1"], params["cnnP2"]]
                             ).astype(jnp.float32)                  # (12,)
    alpha = jnp.concatenate([params["alpha1"] * 1e6,
                             params["alpha2"] * 1e6]).astype(jnp.float32)  # (12,)
    scal = jnp.array([params["beta"] * 1e4,
                      params["gamma"] * 1e2,
                      params["delta0"] * 1.0,
                      params["delta1"] * 10.0,
                      params["delta2"] * 1.0,
                      params["dt"], 0.0, 0.0], dtype=jnp.float32)   # (8,)

    smem_spec = pl.BlockSpec(memory_space=pltpu.MemorySpace.SMEM)

    out = pl.pallas_call(
        cnn_branch_kernel,
        out_shape=jax.ShapeDtypeStruct((B, 3, H, W), jnp.float32),
        grid=(B,),
        in_specs=[
            smem_spec, smem_spec, smem_spec,
            pl.BlockSpec((1, 6, H + 2, W + 2), lambda b: (b, 0, 0, 0)),
            pl.BlockSpec((1, 6, H + 4, W + 4), lambda b: (b, 0, 0, 0)),
        ],
        out_specs=pl.BlockSpec((1, 3, H, W), lambda b: (b, 0, 0, 0)),
        compiler_params=pltpu.CompilerParams(
            dimension_semantics=("parallel",)),   # batch images independent
    )(pscale, alpha, scal, hp1, hp2)
    return out


# ----------------------------------------------------------------------------
# Pure numpy (float64) reference of the PyTorch forward, for validation
# ----------------------------------------------------------------------------
def ref_forward_np(h, k1, k2, P1, P2, a1, a2, beta, gamma, dl0, dl1, dl2, dt):
    h = h.astype(np.float64)
    B, _, H, W = h.shape

    def conv1(x):  # replicate pad=1, 3x3
        xp = np.pad(x, ((0, 0), (1, 1), (1, 1)), mode="edge")
        out = np.zeros((B, 8, H, W))
        for c in range(8):
            for i in range(3):
                for j in range(3):
                    out[:, c] += k1[c, 0, i, j] * xp[:, i:i + H, j:j + W]
        return out

    def conv2(x):  # custom pad 2, 3x3 dilation 2
        xp = np.concatenate([x[:, 0:2, :], x, x[:, -2:, :]], axis=1)
        xp = np.concatenate([xp[:, :, 0:2], xp, xp[:, :, -2:]], axis=2)
        out = np.zeros((B, 4, H, W))
        for c in range(4):
            for i in range(3):
                for j in range(3):
                    out[:, c] += k2[c, 0, i, j] * xp[:, 2 * i:2 * i + H,
                                                     2 * j:2 * j + W]
        return out

    def both(ch):
        x = h[:, ch]
        a = conv1(x) * P1[None, :, None, None]
        b = conv2(x) * P2[None, :, None, None]
        return np.concatenate([a, b], axis=1)  # (B,12,H,W)

    X, Y, Z = both(0), both(1), both(2)
    U, V, Wc = both(3), both(4), both(5)
    alpha = np.concatenate([a1 * 1e6, a2 * 1e6])[None, :, None, None]
    beta_, gamma_ = beta * 1e4, gamma * 1e2
    denom = np.sqrt(X ** 2 + Y ** 2 + Z ** 2 + 1e-9)
    nx, ny, nz = X / denom, Y / denom, Z / denom
    correl = U * nx + V * ny + Wc * nz
    outx = alpha * X + beta_ * nx + gamma_ * correl * nx + dl0 * 1.0 / 12
    outy = alpha * Y + beta_ * ny + gamma_ * correl * ny + dl1 * 10.0 / 12
    outz = alpha * Z + beta_ * nz + gamma_ * correl * nz + dl2 * 1.0 / 12
    outt = np.stack([outx.sum(1), outy.sum(1), outz.sum(1)], axis=1)
    return outt * dt


# ----------------------------------------------------------------------------
if __name__ == "__main__":
    key = jax.random.PRNGKey(0)
    # Lane-dense demo shape: W = 128 fills the vreg lane axis; H = 16 fills
    # sublanes.  Still small (2*6*16*128 elements).
    B, H, W = 2, 16, 128
    h = jax.random.normal(key, (B, 6, H, W), dtype=jnp.float32)

    # deterministic parameters, exactly as in CNNBranch.__init__
    params = {
        "cnnP1": jnp.ones((8,), jnp.float32),
        "cnnP2": jnp.ones((4,), jnp.float32),
        "alpha1": -jnp.ones((8,), jnp.float32),
        "alpha2": -jnp.ones((4,), jnp.float32),
        "beta": 1.0,
        "gamma": -1.0,
        "delta0": 1.0,
        "delta1": -1.0,
        "delta2": 1.0,
        "dt": 0.04 / 128,
    }

    out = cnn_branch_forward(h, params)
    out = jax.block_until_ready(out)
    assert out.shape == (B, 3, H, W), out.shape

    # validate against float64 numpy reference of the PyTorch forward
    ref = ref_forward_np(
        np.asarray(h), cnnKernel1, cnnKernel2,
        np.ones(8), np.ones(4), -np.ones(8), -np.ones(4),
        1.0, -1.0, 1.0, -1.0, 1.0, 0.04 / 128)
    np.testing.assert_allclose(np.asarray(out), ref,
                               rtol=1e-3, atol=1e-3 * np.abs(ref).max())
    print("KERNEL_OK")
</pallas_src>

<mosaic_0001>
module attributes {stable_mosaic.version = 11 : i64} {
  func.func @cnn_branch_kernel(%arg0: i32, %arg1: memref<12xf32, #tpu.memory_space<smem>>, %arg2: memref<12xf32, #tpu.memory_space<smem>>, %arg3: memref<8xf32, #tpu.memory_space<smem>>, %arg4: memref<1x6x18x130xf32, #tpu.memory_space<vmem>>, %arg5: memref<1x6x20x132xf32, #tpu.memory_space<vmem>>, %arg6: memref<1x3x16x128xf32, #tpu.memory_space<vmem>>) attributes {dimension_semantics = [#tpu.dimension_semantics<parallel>], iteration_bounds = array<i64: 2>, scalar_prefetch = 0 : i64, scratch_operands = 0 : i64, tpu.core_type = #tpu.core_type<tc>, window_params = [{transform_indices = @transform_0, window_bounds = array<i64: 12>}, {transform_indices = @transform_1, window_bounds = array<i64: 12>}, {transform_indices = @transform_2, window_bounds = array<i64: 8>}, {transform_indices = @transform_3, window_bounds = array<i64: 1, 6, 18, 130>}, {transform_indices = @transform_4, window_bounds = array<i64: 1, 6, 20, 132>}, {transform_indices = @transform_5, window_bounds = array<i64: 1, 3, 16, 128>}]} {
    %c0 = arith.constant 0 : index
    %0 = memref.load %arg3[%c0] : memref<8xf32, #tpu.memory_space<smem>>
    %c1 = arith.constant 1 : index
    %1 = memref.load %arg3[%c1] : memref<8xf32, #tpu.memory_space<smem>>
    %c2 = arith.constant 2 : index
    %2 = memref.load %arg3[%c2] : memref<8xf32, #tpu.memory_space<smem>>
    %c3 = arith.constant 3 : index
    %3 = memref.load %arg3[%c3] : memref<8xf32, #tpu.memory_space<smem>>
    %c4 = arith.constant 4 : index
    %4 = memref.load %arg3[%c4] : memref<8xf32, #tpu.memory_space<smem>>
    %c5 = arith.constant 5 : index
    %5 = memref.load %arg3[%c5] : memref<8xf32, #tpu.memory_space<smem>>
    %c0_0 = arith.constant 0 : index
    %c0_1 = arith.constant 0 : index
    %c1_2 = arith.constant 1 : index
    %c1_3 = arith.constant 1 : index
    %6 = vector.load %arg4[%c0_0, %c0_1, %c1_2, %c1_3] : memref<1x6x18x130xf32, #tpu.memory_space<vmem>>, vector<1x1x16x128xf32>
    %7 = vector.shape_cast %6 : vector<1x1x16x128xf32> to vector<16x128xf32>
    %c0_4 = arith.constant 0 : index
    %c1_5 = arith.constant 1 : index
    %c1_6 = arith.constant 1 : index
    %c1_7 = arith.constant 1 : index
    %8 = vector.load %arg4[%c0_4, %c1_5, %c1_6, %c1_7] : memref<1x6x18x130xf32, #tpu.memory_space<vmem>>, vector<1x1x16x128xf32>
    %9 = vector.shape_cast %8 : vector<1x1x16x128xf32> to vector<16x128xf32>
    %c0_8 = arith.constant 0 : index
    %c2_9 = arith.constant 2 : index
    %c1_10 = arith.constant 1 : index
    %c1_11 = arith.constant 1 : index
    %10 = vector.load %arg4[%c0_8, %c2_9, %c1_10, %c1_11] : memref<1x6x18x130xf32, #tpu.memory_space<vmem>>, vector<1x1x16x128xf32>
    %11 = vector.shape_cast %10 : vector<1x1x16x128xf32> to vector<16x128xf32>
    %c0_12 = arith.constant 0 : index
    %c3_13 = arith.constant 3 : index
    %c1_14 = arith.constant 1 : index
    %c1_15 = arith.constant 1 : index
    %12 = vector.load %arg4[%c0_12, %c3_13, %c1_14, %c1_15] : memref<1x6x18x130xf32, #tpu.memory_space<vmem>>, vector<1x1x16x128xf32>
    %13 = vector.shape_cast %12 : vector<1x1x16x128xf32> to vector<16x128xf32>
    %c0_16 = arith.constant 0 : index
    %c4_17 = arith.constant 4 : index
    %c1_18 = arith.constant 1 : index
    %c1_19 = arith.constant 1 : index
    %14 = vector.load %arg4[%c0_16, %c4_17, %c1_18, %c1_19] : memref<1x6x18x130xf32, #tpu.memory_space<vmem>>, vector<1x1x16x128xf32>
    %15 = vector.shape_cast %14 : vector<1x1x16x128xf32> to vector<16x128xf32>
    %c0_20 = arith.constant 0 : index
    %c5_21 = arith.constant 5 : index
    %c1_22 = arith.constant 1 : index
    %c1_23 = arith.constant 1 : index
    %16 = vector.load %arg4[%c0_20, %c5_21, %c1_22, %c1_23] : memref<1x6x18x130xf32, #tpu.memory_space<vmem>>, vector<1x1x16x128xf32>
    %17 = vector.shape_cast %16 : vector<1x1x16x128xf32> to vector<16x128xf32>
    %cst = arith.constant 0.000000e+00 : f32
    %18 = vector.broadcast %cst : f32 to vector<16x128xf32>
    %c0_24 = arith.constant 0 : index
    %19 = memref.load %arg1[%c0_24] : memref<12xf32, #tpu.memory_space<smem>>
    %c0_25 = arith.constant 0 : index
    %20 = memref.load %arg2[%c0_25] : memref<12xf32, #tpu.memory_space<smem>>
    %c0_26 = arith.constant 0 : index
    %c0_27 = arith.constant 0 : index
    %c0_28 = arith.constant 0 : index
    %c1_29 = arith.constant 1 : index
    %21 = vector.load %arg4[%c0_26, %c0_27, %c0_28, %c1_29] : memref<1x6x18x130xf32, #tpu.memory_space<vmem>>, vector<1x1x16x128xf32>
    %22 = vector.shape_cast %21 : vector<1x1x16x128xf32> to vector<16x128xf32>
    %c0_30 = arith.constant 0 : index
    %c1_31 = arith.constant 1 : index
    %c0_32 = arith.constant 0 : index
    %c1_33 = arith.constant 1 : index
    %23 = vector.load %arg4[%c0_30, %c1_31, %c0_32, %c1_33] : memref<1x6x18x130xf32, #tpu.memory_space<vmem>>, vector<1x1x16x128xf32>
    %24 = vector.shape_cast %23 : vector<1x1x16x128xf32> to vector<16x128xf32>
    %c0_34 = arith.constant 0 : index
    %c2_35 = arith.constant 2 : index
    %c0_36 = arith.constant 0 : index
    %c1_37 = arith.constant 1 : index
    %25 = vector.load %arg4[%c0_34, %c2_35, %c0_36, %c1_37] : memref<1x6x18x130xf32, #tpu.memory_space<vmem>>, vector<1x1x16x128xf32>
    %26 = vector.shape_cast %25 : vector<1x1x16x128xf32> to vector<16x128xf32>
    %c0_38 = arith.constant 0 : index
    %c3_39 = arith.constant 3 : index
    %c0_40 = arith.constant 0 : index
    %c1_41 = arith.constant 1 : index
    %27 = vector.load %arg4[%c0_38, %c3_39, %c0_40, %c1_41] : memref<1x6x18x130xf32, #tpu.memory_space<vmem>>, vector<1x1x16x128xf32>
    %28 = vector.shape_cast %27 : vector<1x1x16x128xf32> to vector<16x128xf32>
    %c0_42 = arith.constant 0 : index
    %c4_43 = arith.constant 4 : index
    %c0_44 = arith.constant 0 : index
    %c1_45 = arith.constant 1 : index
    %29 = vector.load %arg4[%c0_42, %c4_43, %c0_44, %c1_45] : memref<1x6x18x130xf32, #tpu.memory_space<vmem>>, vector<1x1x16x128xf32>
    %30 = vector.shape_cast %29 : vector<1x1x16x128xf32> to vector<16x128xf32>
    %c0_46 = arith.constant 0 : index
    %c5_47 = arith.constant 5 : index
    %c0_48 = arith.constant 0 : index
    %c1_49 = arith.constant 1 : index
    %31 = vector.load %arg4[%c0_46, %c5_47, %c0_48, %c1_49] : memref<1x6x18x130xf32, #tpu.memory_space<vmem>>, vector<1x1x16x128xf32>
    %32 = vector.shape_cast %31 : vector<1x1x16x128xf32> to vector<16x128xf32>
    %33 = arith.subf %7, %22 : vector<16x128xf32>
    %34 = vector.broadcast %19 : f32 to vector<16x128xf32>
    %35 = arith.mulf %34, %33 : vector<16x128xf32>
    %36 = arith.subf %9, %24 : vector<16x128xf32>
    %37 = vector.broadcast %19 : f32 to vector<16x128xf32>
    %38 = arith.mulf %37, %36 : vector<16x128xf32>
    %39 = arith.subf %11, %26 : vector<16x128xf32>
    %40 = vector.broadcast %19 : f32 to vector<16x128xf32>
    %41 = arith.mulf %40, %39 : vector<16x128xf32>
    %42 = arith.subf %13, %28 : vector<16x128xf32>
    %43 = vector.broadcast %19 : f32 to vector<16x128xf32>
    %44 = arith.mulf %43, %42 : vector<16x128xf32>
    %45 = arith.subf %15, %30 : vector<16x128xf32>
    %46 = vector.broadcast %19 : f32 to vector<16x128xf32>
    %47 = arith.mulf %46, %45 : vector<16x128xf32>
    %48 = arith.subf %17, %32 : vector<16x128xf32>
    %49 = vector.broadcast %19 : f32 to vector<16x128xf32>
    %50 = arith.mulf %49, %48 : vector<16x128xf32>
    %51 = arith.mulf %35, %35 : vector<16x128xf32>
    %52 = arith.mulf %38, %38 : vector<16x128xf32>
    %53 = arith.addf %51, %52 : vector<16x128xf32>
    %54 = arith.mulf %41, %41 : vector<16x128xf32>
    %55 = arith.addf %53, %54 : vector<16x128xf32>
    %cst_50 = arith.constant 9.99999971E-10 : f32
    %56 = vector.broadcast %cst_50 : f32 to vector<16x128xf32>
    %57 = arith.addf %55, %56 : vector<16x128xf32>
    %58 = math.rsqrt %57 : vector<16x128xf32>
    %59 = arith.mulf %35, %58 : vector<16x128xf32>
    %60 = arith.mulf %38, %58 : vector<16x128xf32>
    %61 = arith.mulf %41, %58 : vector<16x128xf32>
    %62 = arith.mulf %44, %59 : vector<16x128xf32>
    %63 = arith.mulf %47, %60 : vector<16x128xf32>
    %64 = arith.addf %62, %63 : vector<16x128xf32>
    %65 = arith.mulf %50, %61 : vector<16x128xf32>
    %66 = arith.addf %64, %65 : vector<16x128xf32>
    %67 = vector.broadcast %1 : f32 to vector<16x128xf32>
    %68 = arith.mulf %67, %66 : vector<16x128xf32>
    %69 = vector.broadcast %0 : f32 to vector<16x128xf32>
    %70 = arith.addf %69, %68 : vector<16x128xf32>
    %71 = vector.broadcast %20 : f32 to vector<16x128xf32>
    %72 = arith.mulf %71, %35 : vector<16x128xf32>
    %73 = arith.addf %18, %72 : vector<16x128xf32>
    %74 = vector.broadcast %20 : f32 to vector<16x128xf32>
    %75 = arith.mulf %74, %38 : vector<16x128xf32>
    %76 = arith.addf %18, %75 : vector<16x128xf32>
    %77 = vector.broadcast %20 : f32 to vector<16x128xf32>
    %78 = arith.mulf %77, %41 : vector<16x128xf32>
    %79 = arith.addf %18, %78 : vector<16x128xf32>
    %80 = arith.mulf %70, %59 : vector<16x128xf32>
    %81 = arith.addf %18, %80 : vector<16x128xf32>
    %82 = arith.mulf %70, %60 : vector<16x128xf32>
    %83 = arith.addf %18, %82 : vector<16x128xf32>
    %84 = arith.mulf %70, %61 : vector<16x128xf32>
    %85 = arith.addf %18, %84 : vector<16x128xf32>
    %c1_51 = arith.constant 1 : index
    %86 = memref.load %arg1[%c1_51] : memref<12xf32, #tpu.memory_space<smem>>
    %c1_52 = arith.constant 1 : index
    %87 = memref.load %arg2[%c1_52] : memref<12xf32, #tpu.memory_space<smem>>
    %c0_53 = arith.constant 0 : index
    %c0_54 = arith.constant 0 : index
    %c0_55 = arith.constant 0 : index
    %c0_56 = arith.constant 0 : index
    %88 = vector.load %arg4[%c0_53, %c0_54, %c0_55, %c0_56] : memref<1x6x18x130xf32, #tpu.memory_space<vmem>>, vector<1x1x16x128xf32>
    %89 = vector.shape_cast %88 : vector<1x1x16x128xf32> to vector<16x128xf32>
    %c0_57 = arith.constant 0 : index
    %c1_58 = arith.constant 1 : index
    %c0_59 = arith.constant 0 : index
    %c0_60 = arith.constant 0 : index
    %90 = vector.load %arg4[%c0_57, %c1_58, %c0_59, %c0_60] : memref<1x6x18x130xf32, #tpu.memory_space<vmem>>, vector<1x1x16x128xf32>
    %91 = vector.shape_cast %90 : vector<1x1x16x128xf32> to vector<16x128xf32>
    %c0_61 = arith.constant 0 : index
    %c2_62 = arith.constant 2 : index
    %c0_63 = arith.constant 0 : index
    %c0_64 = arith.constant 0 : index
    %92 = vector.load %arg4[%c0_61, %c2_62, %c0_63, %c0_64] : memref<1x6x18x130xf32, #tpu.memory_space<vmem>>, vector<1x1x16x128xf32>
    %93 = vector.shape_cast %92 : vector<1x1x16x128xf32> to vector<16x128xf32>
    %c0_65 = arith.constant 0 : index
    %c3_66 = arith.constant 3 : index
    %c0_67 = arith.constant 0 : index
    %c0_68 = arith.constant 0 : index
    %94 = vector.load %arg4[%c0_65, %c3_66, %c0_67, %c0_68] : memref<1x6x18x130xf32, #tpu.memory_space<vmem>>, vector<1x1x16x128xf32>
    %95 = vector.shape_cast %94 : vector<1x1x16x128xf32> to vector<16x128xf32>
    %c0_69 = arith.constant 0 : index
    %c4_70 = arith.constant 4 : index
    %c0_71 = arith.constant 0 : index
    %c0_72 = arith.constant 0 : index
    %96 = vector.load %arg4[%c0_69, %c4_70, %c0_71, %c0_72] : memref<1x6x18x130xf32, #tpu.memory_space<vmem>>, vector<1x1x16x128xf32>
    %97 = vector.shape_cast %96 : vector<1x1x16x128xf32> to vector<16x128xf32>
    %c0_73 = arith.constant 0 : index
    %c5_74 = arith.constant 5 : index
    %c0_75 = arith.constant 0 : index
    %c0_76 = arith.constant 0 : index
    %98 = vector.load %arg4[%c0_73, %c5_74, %c0_75, %c0_76] : memref<1x6x18x130xf32, #tpu.memory_space<vmem>>, vector<1x1x16x128xf32>
    %99 = vector.shape_cast %98 : vector<1x1x16x128xf32> to vector<16x128xf32>
    %100 = arith.subf %7, %89 : vector<16x128xf32>
    %101 = vector.broadcast %86 : f32 to vector<16x128xf32>
    %102 = arith.mulf %101, %100 : vector<16x128xf32>
    %103 = arith.subf %9, %91 : vector<16x128xf32>
    %104 = vector.broadcast %86 : f32 to vector<16x128xf32>
    %105 = arith.mulf %104, %103 : vector<16x128xf32>
    %106 = arith.subf %11, %93 : vector<16x128xf32>
    %107 = vector.broadcast %86 : f32 to vector<16x128xf32>
    %108 = arith.mulf %107, %106 : vector<16x128xf32>
    %109 = arith.subf %13, %95 : vector<16x128xf32>
    %110 = vector.broadcast %86 : f32 to vector<16x128xf32>
    %111 = arith.mulf %110, %109 : vector<16x128xf32>
    %112 = arith.subf %15, %97 : vector<16x128xf32>
    %113 = vector.broadcast %86 : f32 to vector<16x128xf32>
    %114 = arith.mulf %113, %112 : vector<16x128xf32>
    %115 = arith.subf %17, %99 : vector<16x128xf32>
    %116 = vector.broadcast %86 : f32 to vector<16x128xf32>
    %117 = arith.mulf %116, %115 : vector<16x128xf32>
    %118 = arith.mulf %102, %102 : vector<16x128xf32>
    %119 = arith.mulf %105, %105 : vector<16x128xf32>
    %120 = arith.addf %118, %119 : vector<16x128xf32>
    %121 = arith.mulf %108, %108 : vector<16x128xf32>
    %122 = arith.addf %120, %121 : vector<16x128xf32>
    %cst_77 = arith.constant 9.99999971E-10 : f32
    %123 = vector.broadcast %cst_77 : f32 to vector<16x128xf32>
    %124 = arith.addf %122, %123 : vector<16x128xf32>
    %125 = math.rsqrt %124 : vector<16x128xf32>
    %126 = arith.mulf %102, %125 : vector<16x128xf32>
    %127 = arith.mulf %105, %125 : vector<16x128xf32>
    %128 = arith.mulf %108, %125 : vector<16x128xf32>
    %129 = arith.mulf %111, %126 : vector<16x128xf32>
    %130 = arith.mulf %114, %127 : vector<16x128xf32>
    %131 = arith.addf %129, %130 : vector<16x128xf32>
    %132 = arith.mulf %117, %128 : vector<16x128xf32>
    %133 = arith.addf %131, %132 : vector<16x128xf32>
    %134 = vector.broadcast %1 : f32 to vector<16x128xf32>
    %135 = arith.mulf %134, %133 : vector<16x128xf32>
    %136 = vector.broadcast %0 : f32 to vector<16x128xf32>
    %137 = arith.addf %136, %135 : vector<16x128xf32>
    %138 = vector.broadcast %87 : f32 to vector<16x128xf32>
    %139 = arith.mulf %138, %102 : vector<16x128xf32>
    %140 = arith.addf %73, %139 : vector<16x128xf32>
    %141 = vector.broadcast %87 : f32 to vector<16x128xf32>
    %142 = arith.mulf %141, %105 : vector<16x128xf32>
    %143 = arith.addf %76, %142 : vector<16x128xf32>
    %144 = vector.broadcast %87 : f32 to vector<16x128xf32>
    %145 = arith.mulf %144, %108 : vector<16x128xf32>
    %146 = arith.addf %79, %145 : vector<16x128xf32>
    %147 = arith.mulf %137, %126 : vector<16x128xf32>
    %148 = arith.addf %81, %147 : vector<16x128xf32>
    %149 = arith.mulf %137, %127 : vector<16x128xf32>
    %150 = arith.addf %83, %149 : vector<16x128xf32>
    %151 = arith.mulf %137, %128 : vector<16x128xf32>
    %152 = arith.addf %85, %151 : vector<16x128xf32>
    %c2_78 = arith.constant 2 : index
    %153 = memref.load %arg1[%c2_78] : memref<12xf32, #tpu.memory_space<smem>>
    %c2_79 = arith.constant 2 : index
    %154 = memref.load %arg2[%c2_79] : memref<12xf32, #tpu.memory_space<smem>>
    %c0_80 = arith.constant 0 : index
    %c0_81 = arith.constant 0 : index
    %c1_82 = arith.constant 1 : index
    %c0_83 = arith.constant 0 : index
    %155 = vector.load %arg4[%c0_80, %c0_81, %c1_82, %c0_83] : memref<1x6x18x130xf32, #tpu.memory_space<vmem>>, vector<1x1x16x128xf32>
    %156 = vector.shape_cast %155 : vector<1x1x16x128xf32> to vector<16x128xf32>
    %c0_84 = arith.constant 0 : index
    %c1_85 = arith.constant 1 : index
    %c1_86 = arith.constant 1 : index
    %c0_87 = arith.constant 0 : index
    %157 = vector.load %arg4[%c0_84, %c1_85, %c1_86, %c0_87] : memref<1x6x18x130xf32, #tpu.memory_space<vmem>>, vector<1x1x16x128xf32>
    %158 = vector.shape_cast %157 : vector<1x1x16x128xf32> to vector<16x128xf32>
    %c0_88 = arith.constant 0 : index
    %c2_89 = arith.constant 2 : index
    %c1_90 = arith.constant 1 : index
    %c0_91 = arith.constant 0 : index
    %159 = vector.load %arg4[%c0_88, %c2_89, %c1_90, %c0_91] : memref<1x6x18x130xf32, #tpu.memory_space<vmem>>, vector<1x1x16x128xf32>
    %160 = vector.shape_cast %159 : vector<1x1x16x128xf32> to vector<16x128xf32>
    %c0_92 = arith.constant 0 : index
    %c3_93 = arith.constant 3 : index
    %c1_94 = arith.constant 1 : index
    %c0_95 = arith.constant 0 : index
    %161 = vector.load %arg4[%c0_92, %c3_93, %c1_94, %c0_95] : memref<1x6x18x130xf32, #tpu.memory_space<vmem>>, vector<1x1x16x128xf32>
    %162 = vector.shape_cast %161 : vector<1x1x16x128xf32> to vector<16x128xf32>
    %c0_96 = arith.constant 0 : index
    %c4_97 = arith.constant 4 : index
    %c1_98 = arith.constant 1 : index
    %c0_99 = arith.constant 0 : index
    %163 = vector.load %arg4[%c0_96, %c4_97, %c1_98, %c0_99] : memref<1x6x18x130xf32, #tpu.memory_space<vmem>>, vector<1x1x16x128xf32>
    %164 = vector.shape_cast %163 : vector<1x1x16x128xf32> to vector<16x128xf32>
    %c0_100 = arith.constant 0 : index
    %c5_101 = arith.constant 5 : index
    %c1_102 = arith.constant 1 : index
    %c0_103 = arith.constant 0 : index
    %165 = vector.load %arg4[%c0_100, %c5_101, %c1_102, %c0_103] : memref<1x6x18x130xf32, #tpu.memory_space<vmem>>, vector<1x1x16x128xf32>
    %166 = vector.shape_cast %165 : vector<1x1x16x128xf32> to vector<16x128xf32>
    %167 = arith.subf %7, %156 : vector<16x128xf32>
    %168 = vector.broadcast %153 : f32 to vector<16x128xf32>
    %169 = arith.mulf %168, %167 : vector<16x128xf32>
    %170 = arith.subf %9, %158 : vector<16x128xf32>
    %171 = vector.broadcast %153 : f32 to vector<16x128xf32>
    %172 = arith.mulf %171, %170 : vector<16x128xf32>
    %173 = arith.subf %11, %160 : vector<16x128xf32>
    %174 = vector.broadcast %153 : f32 to vector<16x128xf32>
    %175 = arith.mulf %174, %173 : vector<16x128xf32>
    %176 = arith.subf %13, %162 : vector<16x128xf32>
    %177 = vector.broadcast %153 : f32 to vector<16x128xf32>
    %178 = arith.mulf %177, %176 : vector<16x128xf32>
    %179 = arith.subf %15, %164 : vector<16x128xf32>
    %180 = vector.broadcast %153 : f32 to vector<16x128xf32>
    %181 = arith.mulf %180, %179 : vector<16x128xf32>
    %182 = arith.subf %17, %166 : vector<16x128xf32>
    %183 = vector.broadcast %153 : f32 to vector<16x128xf32>
    %184 = arith.mulf %183, %182 : vector<16x128xf32>
    %185 = arith.mulf %169, %169 : vector<16x128xf32>
    %186 = arith.mulf %172, %172 : vector<16x128xf32>
    %187 = arith.addf %185, %186 : vector<16x128xf32>
    %188 = arith.mulf %175, %175 : vector<16x128xf32>
    %189 = arith.addf %187, %188 : vector<16x128xf32>
    %cst_104 = arith.constant 9.99999971E-10 : f32
    %190 = vector.broadcast %cst_104 : f32 to vector<16x128xf32>
    %191 = arith.addf %189, %190 : vector<16x128xf32>
    %192 = math.rsqrt %191 : vector<16x128xf32>
    %193 = arith.mulf %169, %192 : vector<16x128xf32>
    %194 = arith.mulf %172, %192 : vector<16x128xf32>
    %195 = arith.mulf %175, %192 : vector<16x128xf32>
    %196 = arith.mulf %178, %193 : vector<16x128xf32>
    %197 = arith.mulf %181, %194 : vector<16x128xf32>
    %198 = arith.addf %196, %197 : vector<16x128xf32>
    %199 = arith.mulf %184, %195 : vector<16x128xf32>
    %200 = arith.addf %198, %199 : vector<16x128xf32>
    %201 = vector.broadcast %1 : f32 to vector<16x128xf32>
    %202 = arith.mulf %201, %200 : vector<16x128xf32>
    %203 = vector.broadcast %0 : f32 to vector<16x128xf32>
    %204 = arith.addf %203, %202 : vector<16x128xf32>
    %205 = vector.broadcast %154 : f32 to vector<16x128xf32>
    %206 = arith.mulf %205, %169 : vector<16x128xf32>
    %207 = arith.addf %140, %206 : vector<16x128xf32>
    %208 = vector.broadcast %154 : f32 to vector<16x128xf32>
    %209 = arith.mulf %208, %172 : vector<16x128xf32>
    %210 = arith.addf %143, %209 : vector<16x128xf32>
    %211 = vector.broadcast %154 : f32 to vector<16x128xf32>
    %212 = arith.mulf %211, %175 : vector<16x128xf32>
    %213 = arith.addf %146, %212 : vector<16x128xf32>
    %214 = arith.mulf %204, %193 : vector<16x128xf32>
    %215 = arith.addf %148, %214 : vector<16x128xf32>
    %216 = arith.mulf %204, %194 : vector<16x128xf32>
    %217 = arith.addf %150, %216 : vector<16x128xf32>
    %218 = arith.mulf %204, %195 : vector<16x128xf32>
    %219 = arith.addf %152, %218 : vector<16x128xf32>
    %c3_105 = arith.constant 3 : index
    %220 = memref.load %arg1[%c3_105] : memref<12xf32, #tpu.memory_space<smem>>
    %c3_106 = arith.constant 3 : index
    %221 = memref.load %arg2[%c3_106] : memref<12xf32, #tpu.memory_space<smem>>
    %c0_107 = arith.constant 0 : index
    %c0_108 = arith.constant 0 : index
    %c2_109 = arith.constant 2 : index
    %c0_110 = arith.constant 0 : index
    %222 = vector.load %arg4[%c0_107, %c0_108, %c2_109, %c0_110] : memref<1x6x18x130xf32, #tpu.memory_space<vmem>>, vector<1x1x16x128xf32>
    %223 = vector.shape_cast %222 : vector<1x1x16x128xf32> to vector<16x128xf32>
    %c0_111 = arith.constant 0 : index
    %c1_112 = arith.constant 1 : index
    %c2_113 = arith.constant 2 : index
    %c0_114 = arith.constant 0 : index
    %224 = vector.load %arg4[%c0_111, %c1_112, %c2_113, %c0_114] : memref<1x6x18x130xf32, #tpu.memory_space<vmem>>, vector<1x1x16x128xf32>
    %225 = vector.shape_cast %224 : vector<1x1x16x128xf32> to vector<16x128xf32>
    %c0_115 = arith.constant 0 : index
    %c2_116 = arith.constant 2 : index
    %c2_117 = arith.constant 2 : index
    %c0_118 = arith.constant 0 : index
    %226 = vector.load %arg4[%c0_115, %c2_116, %c2_117, %c0_118] : memref<1x6x18x130xf32, #tpu.memory_space<vmem>>, vector<1x1x16x128xf32>
    %227 = vector.shape_cast %226 : vector<1x1x16x128xf32> to vector<16x128xf32>
    %c0_119 = arith.constant 0 : index
    %c3_120 = arith.constant 3 : index
    %c2_121 = arith.constant 2 : index
    %c0_122 = arith.constant 0 : index
    %228 = vector.load %arg4[%c0_119, %c3_120, %c2_121, %c0_122] : memref<1x6x18x130xf32, #tpu.memory_space<vmem>>, vector<1x1x16x128xf32>
    %229 = vector.shape_cast %228 : vector<1x1x16x128xf32> to vector<16x128xf32>
    %c0_123 = arith.constant 0 : index
    %c4_124 = arith.constant 4 : index
    %c2_125 = arith.constant 2 : index
    %c0_126 = arith.constant 0 : index
    %230 = vector.load %arg4[%c0_123, %c4_124, %c2_125, %c0_126] : memref<1x6x18x130xf32, #tpu.memory_space<vmem>>, vector<1x1x16x128xf32>
    %231 = vector.shape_cast %230 : vector<1x1x16x128xf32> to vector<16x128xf32>
    %c0_127 = arith.constant 0 : index
    %c5_128 = arith.constant 5 : index
    %c2_129 = arith.constant 2 : index
    %c0_130 = arith.constant 0 : index
    %232 = vector.load %arg4[%c0_127, %c5_128, %c2_129, %c0_130] : memref<1x6x18x130xf32, #tpu.memory_space<vmem>>, vector<1x1x16x128xf32>
    %233 = vector.shape_cast %232 : vector<1x1x16x128xf32> to vector<16x128xf32>
    %234 = arith.subf %7, %223 : vector<16x128xf32>
    %235 = vector.broadcast %220 : f32 to vector<16x128xf32>
    %236 = arith.mulf %235, %234 : vector<16x128xf32>
    %237 = arith.subf %9, %225 : vector<16x128xf32>
    %238 = vector.broadcast %220 : f32 to vector<16x128xf32>
    %239 = arith.mulf %238, %237 : vector<16x128xf32>
    %240 = arith.subf %11, %227 : vector<16x128xf32>
    %241 = vector.broadcast %220 : f32 to vector<16x128xf32>
    %242 = arith.mulf %241, %240 : vector<16x128xf32>
    %243 = arith.subf %13, %229 : vector<16x128xf32>
    %244 = vector.broadcast %220 : f32 to vector<16x128xf32>
    %245 = arith.mulf %244, %243 : vector<16x128xf32>
    %246 = arith.subf %15, %231 : vector<16x128xf32>
    %247 = vector.broadcast %220 : f32 to vector<16x128xf32>
    %248 = arith.mulf %247, %246 : vector<16x128xf32>
    %249 = arith.subf %17, %233 : vector<16x128xf32>
    %250 = vector.broadcast %220 : f32 to vector<16x128xf32>
    %251 = arith.mulf %250, %249 : vector<16x128xf32>
    %252 = arith.mulf %236, %236 : vector<16x128xf32>
    %253 = arith.mulf %239, %239 : vector<16x128xf32>
    %254 = arith.addf %252, %253 : vector<16x128xf32>
    %255 = arith.mulf %242, %242 : vector<16x128xf32>
    %256 = arith.addf %254, %255 : vector<16x128xf32>
    %cst_131 = arith.constant 9.99999971E-10 : f32
    %257 = vector.broadcast %cst_131 : f32 to vector<16x128xf32>
    %258 = arith.addf %256, %257 : vector<16x128xf32>
    %259 = math.rsqrt %258 : vector<16x128xf32>
    %260 = arith.mulf %236, %259 : vector<16x128xf32>
    %261 = arith.mulf %239, %259 : vector<16x128xf32>
    %262 = arith.mulf %242, %259 : vector<16x128xf32>
    %263 = arith.mulf %245, %260 : vector<16x128xf32>
    %264 = arith.mulf %248, %261 : vector<16x128xf32>
    %265 = arith.addf %263, %264 : vector<16x128xf32>
    %266 = arith.mulf %251, %262 : vector<16x128xf32>
    %267 = arith.addf %265, %266 : vector<16x128xf32>
    %268 = vector.broadcast %1 : f32 to vector<16x128xf32>
    %269 = arith.mulf %268, %267 : vector<16x128xf32>
    %270 = vector.broadcast %0 : f32 to vector<16x128xf32>
    %271 = arith.addf %270, %269 : vector<16x128xf32>
    %272 = vector.broadcast %221 : f32 to vector<16x128xf32>
    %273 = arith.mulf %272, %236 : vector<16x128xf32>
    %274 = arith.addf %207, %273 : vector<16x128xf32>
    %275 = vector.broadcast %221 : f32 to vector<16x128xf32>
    %276 = arith.mulf %275, %239 : vector<16x128xf32>
    %277 = arith.addf %210, %276 : vector<16x128xf32>
    %278 = vector.broadcast %221 : f32 to vector<16x128xf32>
    %279 = arith.mulf %278, %242 : vector<16x128xf32>
    %280 = arith.addf %213, %279 : vector<16x128xf32>
    %281 = arith.mulf %271, %260 : vector<16x128xf32>
    %282 = arith.addf %215, %281 : vector<16x128xf32>
    %283 = arith.mulf %271, %261 : vector<16x128xf32>
    %284 = arith.addf %217, %283 : vector<16x128xf32>
    %285 = arith.mulf %271, %262 : vector<16x128xf32>
    %286 = arith.addf %219, %285 : vector<16x128xf32>
    %c4_132 = arith.constant 4 : index
    %287 = memref.load %arg1[%c4_132] : memref<12xf32, #tpu.memory_space<smem>>
    %c4_133 = arith.constant 4 : index
    %288 = memref.load %arg2[%c4_133] : memref<12xf32, #tpu.memory_space<smem>>
    %c0_134 = arith.constant 0 : index
    %c0_135 = arith.constant 0 : index
    %c2_136 = arith.constant 2 : index
    %c1_137 = arith.constant 1 : index
    %289 = vector.load %arg4[%c0_134, %c0_135, %c2_136, %c1_137] : memref<1x6x18x130xf32, #tpu.memory_space<vmem>>, vector<1x1x16x128xf32>
    %290 = vector.shape_cast %289 : vector<1x1x16x128xf32> to vector<16x128xf32>
    %c0_138 = arith.constant 0 : index
    %c1_139 = arith.constant 1 : index
    %c2_140 = arith.constant 2 : index
    %c1_141 = arith.constant 1 : index
    %291 = vector.load %arg4[%c0_138, %c1_139, %c2_140, %c1_141] : memref<1x6x18x130xf32, #tpu.memory_space<vmem>>, vector<1x1x16x128xf32>
    %292 = vector.shape_cast %291 : vector<1x1x16x128xf32> to vector<16x128xf32>
    %c0_142 = arith.constant 0 : index
    %c2_143 = arith.constant 2 : index
    %c2_144 = arith.constant 2 : index
    %c1_145 = arith.constant 1 : index
    %293 = vector.load %arg4[%c0_142, %c2_143, %c2_144, %c1_145] : memref<1x6x18x130xf32, #tpu.memory_space<vmem>>, vector<1x1x16x128xf32>
    %294 = vector.shape_cast %293 : vector<1x1x16x128xf32> to vector<16x128xf32>
    %c0_146 = arith.constant 0 : index
    %c3_147 = arith.constant 3 : index
    %c2_148 = arith.constant 2 : index
    %c1_149 = arith.constant 1 : index
    %295 = vector.load %arg4[%c0_146, %c3_147, %c2_148, %c1_149] : memref<1x6x18x130xf32, #tpu.memory_space<vmem>>, vector<1x1x16x128xf32>
    %296 = vector.shape_cast %295 : vector<1x1x16x128xf32> to vector<16x128xf32>
    %c0_150 = arith.constant 0 : index
    %c4_151 = arith.constant 4 : index
    %c2_152 = arith.constant 2 : index
    %c1_153 = arith.constant 1 : index
    %297 = vector.load %arg4[%c0_150, %c4_151, %c2_152, %c1_153] : memref<1x6x18x130xf32, #tpu.memory_space<vmem>>, vector<1x1x16x128xf32>
    %298 = vector.shape_cast %297 : vector<1x1x16x128xf32> to vector<16x128xf32>
    %c0_154 = arith.constant 0 : index
    %c5_155 = arith.constant 5 : index
    %c2_156 = arith.constant 2 : index
    %c1_157 = arith.constant 1 : index
    %299 = vector.load %arg4[%c0_154, %c5_155, %c2_156, %c1_157] : memref<1x6x18x130xf32, #tpu.memory_space<vmem>>, vector<1x1x16x128xf32>
    %300 = vector.shape_cast %299 : vector<1x1x16x128xf32> to vector<16x128xf32>
    %301 = arith.subf %7, %290 : vector<16x128xf32>
    %302 = vector.broadcast %287 : f32 to vector<16x128xf32>
    %303 = arith.mulf %302, %301 : vector<16x128xf32>
    %304 = arith.subf %9, %292 : vector<16x128xf32>
    %305 = vector.broadcast %287 : f32 to vector<16x128xf32>
    %306 = arith.mulf %305, %304 : vector<16x128xf32>
    %307 = arith.subf %11, %294 : vector<16x128xf32>
    %308 = vector.broadcast %287 : f32 to vector<16x128xf32>
    %309 = arith.mulf %308, %307 : vector<16x128xf32>
    %310 = arith.subf %13, %296 : vector<16x128xf32>
    %311 = vector.broadcast %287 : f32 to vector<16x128xf32>
    %312 = arith.mulf %311, %310 : vector<16x128xf32>
    %313 = arith.subf %15, %298 : vector<16x128xf32>
    %314 = vector.broadcast %287 : f32 to vector<16x128xf32>
    %315 = arith.mulf %314, %313 : vector<16x128xf32>
    %316 = arith.subf %17, %300 : vector<16x128xf32>
    %317 = vector.broadcast %287 : f32 to vector<16x128xf32>
    %318 = arith.mulf %317, %316 : vector<16x128xf32>
    %319 = arith.mulf %303, %303 : vector<16x128xf32>
    %320 = arith.mulf %306, %306 : vector<16x128xf32>
    %321 = arith.addf %319, %320 : vector<16x128xf32>
    %322 = arith.mulf %309, %309 : vector<16x128xf32>
    %323 = arith.addf %321, %322 : vector<16x128xf32>
    %cst_158 = arith.constant 9.99999971E-10 : f32
    %324 = vector.broadcast %cst_158 : f32 to vector<16x128xf32>
    %325 = arith.addf %323, %324 : vector<16x128xf32>
    %326 = math.rsqrt %325 : vector<16x128xf32>
    %327 = arith.mulf %303, %326 : vector<16x128xf32>
    %328 = arith.mulf %306, %326 : vector<16x128xf32>
    %329 = arith.mulf %309, %326 : vector<16x128xf32>
    %330 = arith.mulf %312, %327 : vector<16x128xf32>
    %331 = arith.mulf %315, %328 : vector<16x128xf32>
    %332 = arith.addf %330, %331 : vector<16x128xf32>
    %333 = arith.mulf %318, %329 : vector<16x128xf32>
    %334 = arith.addf %332, %333 : vector<16x128xf32>
    %335 = vector.broadcast %1 : f32 to vector<16x128xf32>
    %336 = arith.mulf %335, %334 : vector<16x128xf32>
    %337 = vector.broadcast %0 : f32 to vector<16x128xf32>
    %338 = arith.addf %337, %336 : vector<16x128xf32>
    %339 = vector.broadcast %288 : f32 to vector<16x128xf32>
    %340 = arith.mulf %339, %303 : vector<16x128xf32>
    %341 = arith.addf %274, %340 : vector<16x128xf32>
    %342 = vector.broadcast %288 : f32 to vector<16x128xf32>
    %343 = arith.mulf %342, %306 : vector<16x128xf32>
    %344 = arith.addf %277, %343 : vector<16x128xf32>
    %345 = vector.broadcast %288 : f32 to vector<16x128xf32>
    %346 = arith.mulf %345, %309 : vector<16x128xf32>
    %347 = arith.addf %280, %346 : vector<16x128xf32>
    %348 = arith.mulf %338, %327 : vector<16x128xf32>
    %349 = arith.addf %282, %348 : vector<16x128xf32>
    %350 = arith.mulf %338, %328 : vector<16x128xf32>
    %351 = arith.addf %284, %350 : vector<16x128xf32>
    %352 = arith.mulf %338, %329 : vector<16x128xf32>
    %353 = arith.addf %286, %352 : vector<16x128xf32>
    %c5_159 = arith.constant 5 : index
    %354 = memref.load %arg1[%c5_159] : memref<12xf32, #tpu.memory_space<smem>>
    %c5_160 = arith.constant 5 : index
    %355 = memref.load %arg2[%c5_160] : memref<12xf32, #tpu.memory_space<smem>>
    %c0_161 = arith.constant 0 : index
    %c0_162 = arith.constant 0 : index
    %c2_163 = arith.constant 2 : index
    %c2_164 = arith.constant 2 : index
    %356 = vector.load %arg4[%c0_161, %c0_162, %c2_163, %c2_164] : memref<1x6x18x130xf32, #tpu.memory_space<vmem>>, vector<1x1x16x128xf32>
    %357 = vector.shape_cast %356 : vector<1x1x16x128xf32> to vector<16x128xf32>
    %c0_165 = arith.constant 0 : index
    %c1_166 = arith.constant 1 : index
    %c2_167 = arith.constant 2 : index
    %c2_168 = arith.constant 2 : index
    %358 = vector.load %arg4[%c0_165, %c1_166, %c2_167, %c2_168] : memref<1x6x18x130xf32, #tpu.memory_space<vmem>>, vector<1x1x16x128xf32>
    %359 = vector.shape_cast %358 : vector<1x1x16x128xf32> to vector<16x128xf32>
    %c0_169 = arith.constant 0 : index
    %c2_170 = arith.constant 2 : index
    %c2_171 = arith.constant 2 : index
    %c2_172 = arith.constant 2 : index
    %360 = vector.load %arg4[%c0_169, %c2_170, %c2_171, %c2_172] : memref<1x6x18x130xf32, #tpu.memory_space<vmem>>, vector<1x1x16x128xf32>
    %361 = vector.shape_cast %360 : vector<1x1x16x128xf32> to vector<16x128xf32>
    %c0_173 = arith.constant 0 : index
    %c3_174 = arith.constant 3 : index
    %c2_175 = arith.constant 2 : index
    %c2_176 = arith.constant 2 : index
    %362 = vector.load %arg4[%c0_173, %c3_174, %c2_175, %c2_176] : memref<1x6x18x130xf32, #tpu.memory_space<vmem>>, vector<1x1x16x128xf32>
    %363 = vector.shape_cast %362 : vector<1x1x16x128xf32> to vector<16x128xf32>
    %c0_177 = arith.constant 0 : index
    %c4_178 = arith.constant 4 : index
    %c2_179 = arith.constant 2 : index
    %c2_180 = arith.constant 2 : index
    %364 = vector.load %arg4[%c0_177, %c4_178, %c2_179, %c2_180] : memref<1x6x18x130xf32, #tpu.memory_space<vmem>>, vector<1x1x16x128xf32>
    %365 = vector.shape_cast %364 : vector<1x1x16x128xf32> to vector<16x128xf32>
    %c0_181 = arith.constant 0 : index
    %c5_182 = arith.constant 5 : index
    %c2_183 = arith.constant 2 : index
    %c2_184 = arith.constant 2 : index
    %366 = vector.load %arg4[%c0_181, %c5_182, %c2_183, %c2_184] : memref<1x6x18x130xf32, #tpu.memory_space<vmem>>, vector<1x1x16x128xf32>
    %367 = vector.shape_cast %366 : vector<1x1x16x128xf32> to vector<16x128xf32>
    %368 = arith.subf %7, %357 : vector<16x128xf32>
    %369 = vector.broadcast %354 : f32 to vector<16x128xf32>
    %370 = arith.mulf %369, %368 : vector<16x128xf32>
    %371 = arith.subf %9, %359 : vector<16x128xf32>
    %372 = vector.broadcast %354 : f32 to vector<16x128xf32>
    %373 = arith.mulf %372, %371 : vector<16x128xf32>
    %374 = arith.subf %11, %361 : vector<16x128xf32>
    %375 = vector.broadcast %354 : f32 to vector<16x128xf32>
    %376 = arith.mulf %375, %374 : vector<16x128xf32>
    %377 = arith.subf %13, %363 : vector<16x128xf32>
    %378 = vector.broadcast %354 : f32 to vector<16x128xf32>
    %379 = arith.mulf %378, %377 : vector<16x128xf32>
    %380 = arith.subf %15, %365 : vector<16x128xf32>
    %381 = vector.broadcast %354 : f32 to vector<16x128xf32>
    %382 = arith.mulf %381, %380 : vector<16x128xf32>
    %383 = arith.subf %17, %367 : vector<16x128xf32>
    %384 = vector.broadcast %354 : f32 to vector<16x128xf32>
    %385 = arith.mulf %384, %383 : vector<16x128xf32>
    %386 = arith.mulf %370, %370 : vector<16x128xf32>
    %387 = arith.mulf %373, %373 : vector<16x128xf32>
    %388 = arith.addf %386, %387 : vector<16x128xf32>
    %389 = arith.mulf %376, %376 : vector<16x128xf32>
    %390 = arith.addf %388, %389 : vector<16x128xf32>
    %cst_185 = arith.constant 9.99999971E-10 : f32
    %391 = vector.broadcast %cst_185 : f32 to vector<16x128xf32>
    %392 = arith.addf %390, %391 : vector<16x128xf32>
    %393 = math.rsqrt %392 : vector<16x128xf32>
    %394 = arith.mulf %370, %393 : vector<16x128xf32>
    %395 = arith.mulf %373, %393 : vector<16x128xf32>
    %396 = arith.mulf %376, %393 : vector<16x128xf32>
    %397 = arith.mulf %379, %394 : vector<16x128xf32>
    %398 = arith.mulf %382, %395 : vector<16x128xf32>
    %399 = arith.addf %397, %398 : vector<16x128xf32>
    %400 = arith.mulf %385, %396 : vector<16x128xf32>
    %401 = arith.addf %399, %400 : vector<16x128xf32>
    %402 = vector.broadcast %1 : f32 to vector<16x128xf32>
    %403 = arith.mulf %402, %401 : vector<16x128xf32>
    %404 = vector.broadcast %0 : f32 to vector<16x128xf32>
    %405 = arith.addf %404, %403 : vector<16x128xf32>
    %406 = vector.broadcast %355 : f32 to vector<16x128xf32>
    %407 = arith.mulf %406, %370 : vector<16x128xf32>
    %408 = arith.addf %341, %407 : vector<16x128xf32>
    %409 = vector.broadcast %355 : f32 to vector<16x128xf32>
    %410 = arith.mulf %409, %373 : vector<16x128xf32>
    %411 = arith.addf %344, %410 : vector<16x128xf32>
    %412 = vector.broadcast %355 : f32 to vector<16x128xf32>
    %413 = arith.mulf %412, %376 : vector<16x128xf32>
    %414 = arith.addf %347, %413 : vector<16x128xf32>
    %415 = arith.mulf %405, %394 : vector<16x128xf32>
    %416 = arith.addf %349, %415 : vector<16x128xf32>
    %417 = arith.mulf %405, %395 : vector<16x128xf32>
    %418 = arith.addf %351, %417 : vector<16x128xf32>
    %419 = arith.mulf %405, %396 : vector<16x128xf32>
    %420 = arith.addf %353, %419 : vector<16x128xf32>
    %c6 = arith.constant 6 : index
    %421 = memref.load %arg1[%c6] : memref<12xf32, #tpu.memory_space<smem>>
    %c6_186 = arith.constant 6 : index
    %422 = memref.load %arg2[%c6_186] : memref<12xf32, #tpu.memory_space<smem>>
    %c0_187 = arith.constant 0 : index
    %c0_188 = arith.constant 0 : index
    %c1_189 = arith.constant 1 : index
    %c2_190 = arith.constant 2 : index
    %423 = vector.load %arg4[%c0_187, %c0_188, %c1_189, %c2_190] : memref<1x6x18x130xf32, #tpu.memory_space<vmem>>, vector<1x1x16x128xf32>
    %424 = vector.shape_cast %423 : vector<1x1x16x128xf32> to vector<16x128xf32>
    %c0_191 = arith.constant 0 : index
    %c1_192 = arith.constant 1 : index
    %c1_193 = arith.constant 1 : index
    %c2_194 = arith.constant 2 : index
    %425 = vector.load %arg4[%c0_191, %c1_192, %c1_193, %c2_194] : memref<1x6x18x130xf32, #tpu.memory_space<vmem>>, vector<1x1x16x128xf32>
    %426 = vector.shape_cast %425 : vector<1x1x16x128xf32> to vector<16x128xf32>
    %c0_195 = arith.constant 0 : index
    %c2_196 = arith.constant 2 : index
    %c1_197 = arith.constant 1 : index
    %c2_198 = arith.constant 2 : index
    %427 = vector.load %arg4[%c0_195, %c2_196, %c1_197, %c2_198] : memref<1x6x18x130xf32, #tpu.memory_space<vmem>>, vector<1x1x16x128xf32>
    %428 = vector.shape_cast %427 : vector<1x1x16x128xf32> to vector<16x128xf32>
    %c0_199 = arith.constant 0 : index
    %c3_200 = arith.constant 3 : index
    %c1_201 = arith.constant 1 : index
    %c2_202 = arith.constant 2 : index
    %429 = vector.load %arg4[%c0_199, %c3_200, %c1_201, %c2_202] : memref<1x6x18x130xf32, #tpu.memory_space<vmem>>, vector<1x1x16x128xf32>
    %430 = vector.shape_cast %429 : vector<1x1x16x128xf32> to vector<16x128xf32>
    %c0_203 = arith.constant 0 : index
    %c4_204 = arith.constant 4 : index
    %c1_205 = arith.constant 1 : index
    %c2_206 = arith.constant 2 : index
    %431 = vector.load %arg4[%c0_203, %c4_204, %c1_205, %c2_206] : memref<1x6x18x130xf32, #tpu.memory_space<vmem>>, vector<1x1x16x128xf32>
    %432 = vector.shape_cast %431 : vector<1x1x16x128xf32> to vector<16x128xf32>
    %c0_207 = arith.constant 0 : index
    %c5_208 = arith.constant 5 : index
    %c1_209 = arith.constant 1 : index
    %c2_210 = arith.constant 2 : index
    %433 = vector.load %arg4[%c0_207, %c5_208, %c1_209, %c2_210] : memref<1x6x18x130xf32, #tpu.memory_space<vmem>>, vector<1x1x16x128xf32>
    %434 = vector.shape_cast %433 : vector<1x1x16x128xf32> to vector<16x128xf32>
    %435 = arith.subf %7, %424 : vector<16x128xf32>
    %436 = vector.broadcast %421 : f32 to vector<16x128xf32>
    %437 = arith.mulf %436, %435 : vector<16x128xf32>
    %438 = arith.subf %9, %426 : vector<16x128xf32>
    %439 = vector.broadcast %421 : f32 to vector<16x128xf32>
    %440 = arith.mulf %439, %438 : vector<16x128xf32>
    %441 = arith.subf %11, %428 : vector<16x128xf32>
    %442 = vector.broadcast %421 : f32 to vector<16x128xf32>
    %443 = arith.mulf %442, %441 : vector<16x128xf32>
    %444 = arith.subf %13, %430 : vector<16x128xf32>
    %445 = vector.broadcast %421 : f32 to vector<16x128xf32>
    %446 = arith.mulf %445, %444 : vector<16x128xf32>
    %447 = arith.subf %15, %432 : vector<16x128xf32>
    %448 = vector.broadcast %421 : f32 to vector<16x128xf32>
    %449 = arith.mulf %448, %447 : vector<16x128xf32>
    %450 = arith.subf %17, %434 : vector<16x128xf32>
    %451 = vector.broadcast %421 : f32 to vector<16x128xf32>
    %452 = arith.mulf %451, %450 : vector<16x128xf32>
    %453 = arith.mulf %437, %437 : vector<16x128xf32>
    %454 = arith.mulf %440, %440 : vector<16x128xf32>
    %455 = arith.addf %453, %454 : vector<16x128xf32>
    %456 = arith.mulf %443, %443 : vector<16x128xf32>
    %457 = arith.addf %455, %456 : vector<16x128xf32>
    %cst_211 = arith.constant 9.99999971E-10 : f32
    %458 = vector.broadcast %cst_211 : f32 to vector<16x128xf32>
    %459 = arith.addf %457, %458 : vector<16x128xf32>
    %460 = math.rsqrt %459 : vector<16x128xf32>
    %461 = arith.mulf %437, %460 : vector<16x128xf32>
    %462 = arith.mulf %440, %460 : vector<16x128xf32>
    %463 = arith.mulf %443, %460 : vector<16x128xf32>
    %464 = arith.mulf %446, %461 : vector<16x128xf32>
    %465 = arith.mulf %449, %462 : vector<16x128xf32>
    %466 = arith.addf %464, %465 : vector<16x128xf32>
    %467 = arith.mulf %452, %463 : vector<16x128xf32>
    %468 = arith.addf %466, %467 : vector<16x128xf32>
    %469 = vector.broadcast %1 : f32 to vector<16x128xf32>
    %470 = arith.mulf %469, %468 : vector<16x128xf32>
    %471 = vector.broadcast %0 : f32 to vector<16x128xf32>
    %472 = arith.addf %471, %470 : vector<16x128xf32>
    %473 = vector.broadcast %422 : f32 to vector<16x128xf32>
    %474 = arith.mulf %473, %437 : vector<16x128xf32>
    %475 = arith.addf %408, %474 : vector<16x128xf32>
    %476 = vector.broadcast %422 : f32 to vector<16x128xf32>
    %477 = arith.mulf %476, %440 : vector<16x128xf32>
    %478 = arith.addf %411, %477 : vector<16x128xf32>
    %479 = vector.broadcast %422 : f32 to vector<16x128xf32>
    %480 = arith.mulf %479, %443 : vector<16x128xf32>
    %481 = arith.addf %414, %480 : vector<16x128xf32>
    %482 = arith.mulf %472, %461 : vector<16x128xf32>
    %483 = arith.addf %416, %482 : vector<16x128xf32>
    %484 = arith.mulf %472, %462 : vector<16x128xf32>
    %485 = arith.addf %418, %484 : vector<16x128xf32>
    %486 = arith.mulf %472, %463 : vector<16x128xf32>
    %487 = arith.addf %420, %486 : vector<16x128xf32>
    %c7 = arith.constant 7 : index
    %488 = memref.load %arg1[%c7] : memref<12xf32, #tpu.memory_space<smem>>
    %c7_212 = arith.constant 7 : index
    %489 = memref.load %arg2[%c7_212] : memref<12xf32, #tpu.memory_space<smem>>
    %c0_213 = arith.constant 0 : index
    %c0_214 = arith.constant 0 : index
    %c0_215 = arith.constant 0 : index
    %c2_216 = arith.constant 2 : index
    %490 = vector.load %arg4[%c0_213, %c0_214, %c0_215, %c2_216] : memref<1x6x18x130xf32, #tpu.memory_space<vmem>>, vector<1x1x16x128xf32>
    %491 = vector.shape_cast %490 : vector<1x1x16x128xf32> to vector<16x128xf32>
    %c0_217 = arith.constant 0 : index
    %c1_218 = arith.constant 1 : index
    %c0_219 = arith.constant 0 : index
    %c2_220 = arith.constant 2 : index
    %492 = vector.load %arg4[%c0_217, %c1_218, %c0_219, %c2_220] : memref<1x6x18x130xf32, #tpu.memory_space<vmem>>, vector<1x1x16x128xf32>
    %493 = vector.shape_cast %492 : vector<1x1x16x128xf32> to vector<16x128xf32>
    %c0_221 = arith.constant 0 : index
    %c2_222 = arith.constant 2 : index
    %c0_223 = arith.constant 0 : index
    %c2_224 = arith.constant 2 : index
    %494 = vector.load %arg4[%c0_221, %c2_222, %c0_223, %c2_224] : memref<1x6x18x130xf32, #tpu.memory_space<vmem>>, vector<1x1x16x128xf32>
    %495 = vector.shape_cast %494 : vector<1x1x16x128xf32> to vector<16x128xf32>
    %c0_225 = arith.constant 0 : index
    %c3_226 = arith.constant 3 : index
    %c0_227 = arith.constant 0 : index
    %c2_228 = arith.constant 2 : index
    %496 = vector.load %arg4[%c0_225, %c3_226, %c0_227, %c2_228] : memref<1x6x18x130xf32, #tpu.memory_space<vmem>>, vector<1x1x16x128xf32>
    %497 = vector.shape_cast %496 : vector<1x1x16x128xf32> to vector<16x128xf32>
    %c0_229 = arith.constant 0 : index
    %c4_230 = arith.constant 4 : index
    %c0_231 = arith.constant 0 : index
    %c2_232 = arith.constant 2 : index
    %498 = vector.load %arg4[%c0_229, %c4_230, %c0_231, %c2_232] : memref<1x6x18x130xf32, #tpu.memory_space<vmem>>, vector<1x1x16x128xf32>
    %499 = vector.shape_cast %498 : vector<1x1x16x128xf32> to vector<16x128xf32>
    %c0_233 = arith.constant 0 : index
    %c5_234 = arith.constant 5 : index
    %c0_235 = arith.constant 0 : index
    %c2_236 = arith.constant 2 : index
    %500 = vector.load %arg4[%c0_233, %c5_234, %c0_235, %c2_236] : memref<1x6x18x130xf32, #tpu.memory_space<vmem>>, vector<1x1x16x128xf32>
    %501 = vector.shape_cast %500 : vector<1x1x16x128xf32> to vector<16x128xf32>
    %502 = arith.subf %7, %491 : vector<16x128xf32>
    %503 = vector.broadcast %488 : f32 to vector<16x128xf32>
    %504 = arith.mulf %503, %502 : vector<16x128xf32>
    %505 = arith.subf %9, %493 : vector<16x128xf32>
    %506 = vector.broadcast %488 : f32 to vector<16x128xf32>
    %507 = arith.mulf %506, %505 : vector<16x128xf32>
    %508 = arith.subf %11, %495 : vector<16x128xf32>
    %509 = vector.broadcast %488 : f32 to vector<16x128xf32>
    %510 = arith.mulf %509, %508 : vector<16x128xf32>
    %511 = arith.subf %13, %497 : vector<16x128xf32>
    %512 = vector.broadcast %488 : f32 to vector<16x128xf32>
    %513 = arith.mulf %512, %511 : vector<16x128xf32>
    %514 = arith.subf %15, %499 : vector<16x128xf32>
    %515 = vector.broadcast %488 : f32 to vector<16x128xf32>
    %516 = arith.mulf %515, %514 : vector<16x128xf32>
    %517 = arith.subf %17, %501 : vector<16x128xf32>
    %518 = vector.broadcast %488 : f32 to vector<16x128xf32>
    %519 = arith.mulf %518, %517 : vector<16x128xf32>
    %520 = arith.mulf %504, %504 : vector<16x128xf32>
    %521 = arith.mulf %507, %507 : vector<16x128xf32>
    %522 = arith.addf %520, %521 : vector<16x128xf32>
    %523 = arith.mulf %510, %510 : vector<16x128xf32>
    %524 = arith.addf %522, %523 : vector<16x128xf32>
    %cst_237 = arith.constant 9.99999971E-10 : f32
    %525 = vector.broadcast %cst_237 : f32 to vector<16x128xf32>
    %526 = arith.addf %524, %525 : vector<16x128xf32>
    %527 = math.rsqrt %526 : vector<16x128xf32>
    %528 = arith.mulf %504, %527 : vector<16x128xf32>
    %529 = arith.mulf %507, %527 : vector<16x128xf32>
    %530 = arith.mulf %510, %527 : vector<16x128xf32>
    %531 = arith.mulf %513, %528 : vector<16x128xf32>
    %532 = arith.mulf %516, %529 : vector<16x128xf32>
    %533 = arith.addf %531, %532 : vector<16x128xf32>
    %534 = arith.mulf %519, %530 : vector<16x128xf32>
    %535 = arith.addf %533, %534 : vector<16x128xf32>
    %536 = vector.broadcast %1 : f32 to vector<16x128xf32>
    %537 = arith.mulf %536, %535 : vector<16x128xf32>
    %538 = vector.broadcast %0 : f32 to vector<16x128xf32>
    %539 = arith.addf %538, %537 : vector<16x128xf32>
    %540 = vector.broadcast %489 : f32 to vector<16x128xf32>
    %541 = arith.mulf %540, %504 : vector<16x128xf32>
    %542 = arith.addf %475, %541 : vector<16x128xf32>
    %543 = vector.broadcast %489 : f32 to vector<16x128xf32>
    %544 = arith.mulf %543, %507 : vector<16x128xf32>
    %545 = arith.addf %478, %544 : vector<16x128xf32>
    %546 = vector.broadcast %489 : f32 to vector<16x128xf32>
    %547 = arith.mulf %546, %510 : vector<16x128xf32>
    %548 = arith.addf %481, %547 : vector<16x128xf32>
    %549 = arith.mulf %539, %528 : vector<16x128xf32>
    %550 = arith.addf %483, %549 : vector<16x128xf32>
    %551 = arith.mulf %539, %529 : vector<16x128xf32>
    %552 = arith.addf %485, %551 : vector<16x128xf32>
    %553 = arith.mulf %539, %530 : vector<16x128xf32>
    %554 = arith.addf %487, %553 : vector<16x128xf32>
    %c8 = arith.constant 8 : index
    %555 = memref.load %arg1[%c8] : memref<12xf32, #tpu.memory_space<smem>>
    %c8_238 = arith.constant 8 : index
    %556 = memref.load %arg2[%c8_238] : memref<12xf32, #tpu.memory_space<smem>>
    %c0_239 = arith.constant 0 : index
    %c0_240 = arith.constant 0 : index
    %c0_241 = arith.constant 0 : index
    %c2_242 = arith.constant 2 : index
    %557 = vector.load %arg5[%c0_239, %c0_240, %c0_241, %c2_242] : memref<1x6x20x132xf32, #tpu.memory_space<vmem>>, vector<1x1x16x128xf32>
    %558 = vector.shape_cast %557 : vector<1x1x16x128xf32> to vector<16x128xf32>
    %c0_243 = arith.constant 0 : index
    %c1_244 = arith.constant 1 : index
    %c0_245 = arith.constant 0 : index
    %c2_246 = arith.constant 2 : index
    %559 = vector.load %arg5[%c0_243, %c1_244, %c0_245, %c2_246] : memref<1x6x20x132xf32, #tpu.memory_space<vmem>>, vector<1x1x16x128xf32>
    %560 = vector.shape_cast %559 : vector<1x1x16x128xf32> to vector<16x128xf32>
    %c0_247 = arith.constant 0 : index
    %c2_248 = arith.constant 2 : index
    %c0_249 = arith.constant 0 : index
    %c2_250 = arith.constant 2 : index
    %561 = vector.load %arg5[%c0_247, %c2_248, %c0_249, %c2_250] : memref<1x6x20x132xf32, #tpu.memory_space<vmem>>, vector<1x1x16x128xf32>
    %562 = vector.shape_cast %561 : vector<1x1x16x128xf32> to vector<16x128xf32>
    %c0_251 = arith.constant 0 : index
    %c3_252 = arith.constant 3 : index
    %c0_253 = arith.constant 0 : index
    %c2_254 = arith.constant 2 : index
    %563 = vector.load %arg5[%c0_251, %c3_252, %c0_253, %c2_254] : memref<1x6x20x132xf32, #tpu.memory_space<vmem>>, vector<1x1x16x128xf32>
    %564 = vector.shape_cast %563 : vector<1x1x16x128xf32> to vector<16x128xf32>
    %c0_255 = arith.constant 0 : index
    %c4_256 = arith.constant 4 : index
    %c0_257 = arith.constant 0 : index
    %c2_258 = arith.constant 2 : index
    %565 = vector.load %arg5[%c0_255, %c4_256, %c0_257, %c2_258] : memref<1x6x20x132xf32, #tpu.memory_space<vmem>>, vector<1x1x16x128xf32>
    %566 = vector.shape_cast %565 : vector<1x1x16x128xf32> to vector<16x128xf32>
    %c0_259 = arith.constant 0 : index
    %c5_260 = arith.constant 5 : index
    %c0_261 = arith.constant 0 : index
    %c2_262 = arith.constant 2 : index
    %567 = vector.load %arg5[%c0_259, %c5_260, %c0_261, %c2_262] : memref<1x6x20x132xf32, #tpu.memory_space<vmem>>, vector<1x1x16x128xf32>
    %568 = vector.shape_cast %567 : vector<1x1x16x128xf32> to vector<16x128xf32>
    %569 = arith.subf %7, %558 : vector<16x128xf32>
    %570 = vector.broadcast %555 : f32 to vector<16x128xf32>
    %571 = arith.mulf %570, %569 : vector<16x128xf32>
    %572 = arith.subf %9, %560 : vector<16x128xf32>
    %573 = vector.broadcast %555 : f32 to vector<16x128xf32>
    %574 = arith.mulf %573, %572 : vector<16x128xf32>
    %575 = arith.subf %11, %562 : vector<16x128xf32>
    %576 = vector.broadcast %555 : f32 to vector<16x128xf32>
    %577 = arith.mulf %576, %575 : vector<16x128xf32>
    %578 = arith.subf %13, %564 : vector<16x128xf32>
    %579 = vector.broadcast %555 : f32 to vector<16x128xf32>
    %580 = arith.mulf %579, %578 : vector<16x128xf32>
    %581 = arith.subf %15, %566 : vector<16x128xf32>
    %582 = vector.broadcast %555 : f32 to vector<16x128xf32>
    %583 = arith.mulf %582, %581 : vector<16x128xf32>
    %584 = arith.subf %17, %568 : vector<16x128xf32>
    %585 = vector.broadcast %555 : f32 to vector<16x128xf32>
    %586 = arith.mulf %585, %584 : vector<16x128xf32>
    %587 = arith.mulf %571, %571 : vector<16x128xf32>
    %588 = arith.mulf %574, %574 : vector<16x128xf32>
    %589 = arith.addf %587, %588 : vector<16x128xf32>
    %590 = arith.mulf %577, %577 : vector<16x128xf32>
    %591 = arith.addf %589, %590 : vector<16x128xf32>
    %cst_263 = arith.constant 9.99999971E-10 : f32
    %592 = vector.broadcast %cst_263 : f32 to vector<16x128xf32>
    %593 = arith.addf %591, %592 : vector<16x128xf32>
    %594 = math.rsqrt %593 : vector<16x128xf32>
    %595 = arith.mulf %571, %594 : vector<16x128xf32>
    %596 = arith.mulf %574, %594 : vector<16x128xf32>
    %597 = arith.mulf %577, %594 : vector<16x128xf32>
    %598 = arith.mulf %580, %595 : vector<16x128xf32>
    %599 = arith.mulf %583, %596 : vector<16x128xf32>
    %600 = arith.addf %598, %599 : vector<16x128xf32>
    %601 = arith.mulf %586, %597 : vector<16x128xf32>
    %602 = arith.addf %600, %601 : vector<16x128xf32>
    %603 = vector.broadcast %1 : f32 to vector<16x128xf32>
    %604 = arith.mulf %603, %602 : vector<16x128xf32>
    %605 = vector.broadcast %0 : f32 to vector<16x128xf32>
    %606 = arith.addf %605, %604 : vector<16x128xf32>
    %607 = vector.broadcast %556 : f32 to vector<16x128xf32>
    %608 = arith.mulf %607, %571 : vector<16x128xf32>
    %609 = arith.addf %542, %608 : vector<16x128xf32>
    %610 = vector.broadcast %556 : f32 to vector<16x128xf32>
    %611 = arith.mulf %610, %574 : vector<16x128xf32>
    %612 = arith.addf %545, %611 : vector<16x128xf32>
    %613 = vector.broadcast %556 : f32 to vector<16x128xf32>
    %614 = arith.mulf %613, %577 : vector<16x128xf32>
    %615 = arith.addf %548, %614 : vector<16x128xf32>
    %616 = arith.mulf %606, %595 : vector<16x128xf32>
    %617 = arith.addf %550, %616 : vector<16x128xf32>
    %618 = arith.mulf %606, %596 : vector<16x128xf32>
    %619 = arith.addf %552, %618 : vector<16x128xf32>
    %620 = arith.mulf %606, %597 : vector<16x128xf32>
    %621 = arith.addf %554, %620 : vector<16x128xf32>
    %c9 = arith.constant 9 : index
    %622 = memref.load %arg1[%c9] : memref<12xf32, #tpu.memory_space<smem>>
    %c9_264 = arith.constant 9 : index
    %623 = memref.load %arg2[%c9_264] : memref<12xf32, #tpu.memory_space<smem>>
    %c0_265 = arith.constant 0 : index
    %c0_266 = arith.constant 0 : index
    %c2_267 = arith.constant 2 : index
    %c0_268 = arith.constant 0 : index
    %624 = vector.load %arg5[%c0_265, %c0_266, %c2_267, %c0_268] : memref<1x6x20x132xf32, #tpu.memory_space<vmem>>, vector<1x1x16x128xf32>
    %625 = vector.shape_cast %624 : vector<1x1x16x128xf32> to vector<16x128xf32>
    %c0_269 = arith.constant 0 : index
    %c1_270 = arith.constant 1 : index
    %c2_271 = arith.constant 2 : index
    %c0_272 = arith.constant 0 : index
    %626 = vector.load %arg5[%c0_269, %c1_270, %c2_271, %c0_272] : memref<1x6x20x132xf32, #tpu.memory_space<vmem>>, vector<1x1x16x128xf32>
    %627 = vector.shape_cast %626 : vector<1x1x16x128xf32> to vector<16x128xf32>
    %c0_273 = arith.constant 0 : index
    %c2_274 = arith.constant 2 : index
    %c2_275 = arith.constant 2 : index
    %c0_276 = arith.constant 0 : index
    %628 = vector.load %arg5[%c0_273, %c2_274, %c2_275, %c0_276] : memref<1x6x20x132xf32, #tpu.memory_space<vmem>>, vector<1x1x16x128xf32>
    %629 = vector.shape_cast %628 : vector<1x1x16x128xf32> to vector<16x128xf32>
    %c0_277 = arith.constant 0 : index
    %c3_278 = arith.constant 3 : index
    %c2_279 = arith.constant 2 : index
    %c0_280 = arith.constant 0 : index
    %630 = vector.load %arg5[%c0_277, %c3_278, %c2_279, %c0_280] : memref<1x6x20x132xf32, #tpu.memory_space<vmem>>, vector<1x1x16x128xf32>
    %631 = vector.shape_cast %630 : vector<1x1x16x128xf32> to vector<16x128xf32>
    %c0_281 = arith.constant 0 : index
    %c4_282 = arith.constant 4 : index
    %c2_283 = arith.constant 2 : index
    %c0_284 = arith.constant 0 : index
    %632 = vector.load %arg5[%c0_281, %c4_282, %c2_283, %c0_284] : memref<1x6x20x132xf32, #tpu.memory_space<vmem>>, vector<1x1x16x128xf32>
    %633 = vector.shape_cast %632 : vector<1x1x16x128xf32> to vector<16x128xf32>
    %c0_285 = arith.constant 0 : index
    %c5_286 = arith.constant 5 : index
    %c2_287 = arith.constant 2 : index
    %c0_288 = arith.constant 0 : index
    %634 = vector.load %arg5[%c0_285, %c5_286, %c2_287, %c0_288] : memref<1x6x20x132xf32, #tpu.memory_space<vmem>>, vector<1x1x16x128xf32>
    %635 = vector.shape_cast %634 : vector<1x1x16x128xf32> to vector<16x128xf32>
    %636 = arith.subf %7, %625 : vector<16x128xf32>
    %637 = vector.broadcast %622 : f32 to vector<16x128xf32>
    %638 = arith.mulf %637, %636 : vector<16x128xf32>
    %639 = arith.subf %9, %627 : vector<16x128xf32>
    %640 = vector.broadcast %622 : f32 to vector<16x128xf32>
    %641 = arith.mulf %640, %639 : vector<16x128xf32>
    %642 = arith.subf %11, %629 : vector<16x128xf32>
    %643 = vector.broadcast %622 : f32 to vector<16x128xf32>
    %644 = arith.mulf %643, %642 : vector<16x128xf32>
    %645 = arith.subf %13, %631 : vector<16x128xf32>
    %646 = vector.broadcast %622 : f32 to vector<16x128xf32>
    %647 = arith.mulf %646, %645 : vector<16x128xf32>
    %648 = arith.subf %15, %633 : vector<16x128xf32>
    %649 = vector.broadcast %622 : f32 to vector<16x128xf32>
    %650 = arith.mulf %649, %648 : vector<16x128xf32>
    %651 = arith.subf %17, %635 : vector<16x128xf32>
    %652 = vector.broadcast %622 : f32 to vector<16x128xf32>
    %653 = arith.mulf %652, %651 : vector<16x128xf32>
    %654 = arith.mulf %638, %638 : vector<16x128xf32>
    %655 = arith.mulf %641, %641 : vector<16x128xf32>
    %656 = arith.addf %654, %655 : vector<16x128xf32>
    %657 = arith.mulf %644, %644 : vector<16x128xf32>
    %658 = arith.addf %656, %657 : vector<16x128xf32>
    %cst_289 = arith.constant 9.99999971E-10 : f32
    %659 = vector.broadcast %cst_289 : f32 to vector<16x128xf32>
    %660 = arith.addf %658, %659 : vector<16x128xf32>
    %661 = math.rsqrt %660 : vector<16x128xf32>
    %662 = arith.mulf %638, %661 : vector<16x128xf32>
    %663 = arith.mulf %641, %661 : vector<16x128xf32>
    %664 = arith.mulf %644, %661 : vector<16x128xf32>
    %665 = arith.mulf %647, %662 : vector<16x128xf32>
    %666 = arith.mulf %650, %663 : vector<16x128xf32>
    %667 = arith.addf %665, %666 : vector<16x128xf32>
    %668 = arith.mulf %653, %664 : vector<16x128xf32>
    %669 = arith.addf %667, %668 : vector<16x128xf32>
    %670 = vector.broadcast %1 : f32 to vector<16x128xf32>
    %671 = arith.mulf %670, %669 : vector<16x128xf32>
    %672 = vector.broadcast %0 : f32 to vector<16x128xf32>
    %673 = arith.addf %672, %671 : vector<16x128xf32>
    %674 = vector.broadcast %623 : f32 to vector<16x128xf32>
    %675 = arith.mulf %674, %638 : vector<16x128xf32>
    %676 = arith.addf %609, %675 : vector<16x128xf32>
    %677 = vector.broadcast %623 : f32 to vector<16x128xf32>
    %678 = arith.mulf %677, %641 : vector<16x128xf32>
    %679 = arith.addf %612, %678 : vector<16x128xf32>
    %680 = vector.broadcast %623 : f32 to vector<16x128xf32>
    %681 = arith.mulf %680, %644 : vector<16x128xf32>
    %682 = arith.addf %615, %681 : vector<16x128xf32>
    %683 = arith.mulf %673, %662 : vector<16x128xf32>
    %684 = arith.addf %617, %683 : vector<16x128xf32>
    %685 = arith.mulf %673, %663 : vector<16x128xf32>
    %686 = arith.addf %619, %685 : vector<16x128xf32>
    %687 = arith.mulf %673, %664 : vector<16x128xf32>
    %688 = arith.addf %621, %687 : vector<16x128xf32>
    %c10 = arith.constant 10 : index
    %689 = memref.load %arg1[%c10] : memref<12xf32, #tpu.memory_space<smem>>
    %c10_290 = arith.constant 10 : index
    %690 = memref.load %arg2[%c10_290] : memref<12xf32, #tpu.memory_space<smem>>
    %c0_291 = arith.constant 0 : index
    %c0_292 = arith.constant 0 : index
    %c4_293 = arith.constant 4 : index
    %c2_294 = arith.constant 2 : index
    %691 = vector.load %arg5[%c0_291, %c0_292, %c4_293, %c2_294] : memref<1x6x20x132xf32, #tpu.memory_space<vmem>>, vector<1x1x16x128xf32>
    %692 = vector.shape_cast %691 : vector<1x1x16x128xf32> to vector<16x128xf32>
    %c0_295 = arith.constant 0 : index
    %c1_296 = arith.constant 1 : index
    %c4_297 = arith.constant 4 : index
    %c2_298 = arith.constant 2 : index
    %693 = vector.load %arg5[%c0_295, %c1_296, %c4_297, %c2_298] : memref<1x6x20x132xf32, #tpu.memory_space<vmem>>, vector<1x1x16x128xf32>
    %694 = vector.shape_cast %693 : vector<1x1x16x128xf32> to vector<16x128xf32>
    %c0_299 = arith.constant 0 : index
    %c2_300 = arith.constant 2 : index
    %c4_301 = arith.constant 4 : index
    %c2_302 = arith.constant 2 : index
    %695 = vector.load %arg5[%c0_299, %c2_300, %c4_301, %c2_302] : memref<1x6x20x132xf32, #tpu.memory_space<vmem>>, vector<1x1x16x128xf32>
    %696 = vector.shape_cast %695 : vector<1x1x16x128xf32> to vector<16x128xf32>
    %c0_303 = arith.constant 0 : index
    %c3_304 = arith.constant 3 : index
    %c4_305 = arith.constant 4 : index
    %c2_306 = arith.constant 2 : index
    %697 = vector.load %arg5[%c0_303, %c3_304, %c4_305, %c2_306] : memref<1x6x20x132xf32, #tpu.memory_space<vmem>>, vector<1x1x16x128xf32>
    %698 = vector.shape_cast %697 : vector<1x1x16x128xf32> to vector<16x128xf32>
    %c0_307 = arith.constant 0 : index
    %c4_308 = arith.constant 4 : index
    %c4_309 = arith.constant 4 : index
    %c2_310 = arith.constant 2 : index
    %699 = vector.load %arg5[%c0_307, %c4_308, %c4_309, %c2_310] : memref<1x6x20x132xf32, #tpu.memory_space<vmem>>, vector<1x1x16x128xf32>
    %700 = vector.shape_cast %699 : vector<1x1x16x128xf32> to vector<16x128xf32>
    %c0_311 = arith.constant 0 : index
    %c5_312 = arith.constant 5 : index
    %c4_313 = arith.constant 4 : index
    %c2_314 = arith.constant 2 : index
    %701 = vector.load %arg5[%c0_311, %c5_312, %c4_313, %c2_314] : memref<1x6x20x132xf32, #tpu.memory_space<vmem>>, vector<1x1x16x128xf32>
    %702 = vector.shape_cast %701 : vector<1x1x16x128xf32> to vector<16x128xf32>
    %703 = arith.subf %7, %692 : vector<16x128xf32>
    %704 = vector.broadcast %689 : f32 to vector<16x128xf32>
    %705 = arith.mulf %704, %703 : vector<16x128xf32>
    %706 = arith.subf %9, %694 : vector<16x128xf32>
    %707 = vector.broadcast %689 : f32 to vector<16x128xf32>
    %708 = arith.mulf %707, %706 : vector<16x128xf32>
    %709 = arith.subf %11, %696 : vector<16x128xf32>
    %710 = vector.broadcast %689 : f32 to vector<16x128xf32>
    %711 = arith.mulf %710, %709 : vector<16x128xf32>
    %712 = arith.subf %13, %698 : vector<16x128xf32>
    %713 = vector.broadcast %689 : f32 to vector<16x128xf32>
    %714 = arith.mulf %713, %712 : vector<16x128xf32>
    %715 = arith.subf %15, %700 : vector<16x128xf32>
    %716 = vector.broadcast %689 : f32 to vector<16x128xf32>
    %717 = arith.mulf %716, %715 : vector<16x128xf32>
    %718 = arith.subf %17, %702 : vector<16x128xf32>
    %719 = vector.broadcast %689 : f32 to vector<16x128xf32>
    %720 = arith.mulf %719, %718 : vector<16x128xf32>
    %721 = arith.mulf %705, %705 : vector<16x128xf32>
    %722 = arith.mulf %708, %708 : vector<16x128xf32>
    %723 = arith.addf %721, %722 : vector<16x128xf32>
    %724 = arith.mulf %711, %711 : vector<16x128xf32>
    %725 = arith.addf %723, %724 : vector<16x128xf32>
    %cst_315 = arith.constant 9.99999971E-10 : f32
    %726 = vector.broadcast %cst_315 : f32 to vector<16x128xf32>
    %727 = arith.addf %725, %726 : vector<16x128xf32>
    %728 = math.rsqrt %727 : vector<16x128xf32>
    %729 = arith.mulf %705, %728 : vector<16x128xf32>
    %730 = arith.mulf %708, %728 : vector<16x128xf32>
    %731 = arith.mulf %711, %728 : vector<16x128xf32>
    %732 = arith.mulf %714, %729 : vector<16x128xf32>
    %733 = arith.mulf %717, %730 : vector<16x128xf32>
    %734 = arith.addf %732, %733 : vector<16x128xf32>
    %735 = arith.mulf %720, %731 : vector<16x128xf32>
    %736 = arith.addf %734, %735 : vector<16x128xf32>
    %737 = vector.broadcast %1 : f32 to vector<16x128xf32>
    %738 = arith.mulf %737, %736 : vector<16x128xf32>
    %739 = vector.broadcast %0 : f32 to vector<16x128xf32>
    %740 = arith.addf %739, %738 : vector<16x128xf32>
    %741 = vector.broadcast %690 : f32 to vector<16x128xf32>
    %742 = arith.mulf %741, %705 : vector<16x128xf32>
    %743 = arith.addf %676, %742 : vector<16x128xf32>
    %744 = vector.broadcast %690 : f32 to vector<16x128xf32>
    %745 = arith.mulf %744, %708 : vector<16x128xf32>
    %746 = arith.addf %679, %745 : vector<16x128xf32>
    %747 = vector.broadcast %690 : f32 to vector<16x128xf32>
    %748 = arith.mulf %747, %711 : vector<16x128xf32>
    %749 = arith.addf %682, %748 : vector<16x128xf32>
    %750 = arith.mulf %740, %729 : vector<16x128xf32>
    %751 = arith.addf %684, %750 : vector<16x128xf32>
    %752 = arith.mulf %740, %730 : vector<16x128xf32>
    %753 = arith.addf %686, %752 : vector<16x128xf32>
    %754 = arith.mulf %740, %731 : vector<16x128xf32>
    %755 = arith.addf %688, %754 : vector<16x128xf32>
    %c11 = arith.constant 11 : index
    %756 = memref.load %arg1[%c11] : memref<12xf32, #tpu.memory_space<smem>>
    %c11_316 = arith.constant 11 : index
    %757 = memref.load %arg2[%c11_316] : memref<12xf32, #tpu.memory_space<smem>>
    %c0_317 = arith.constant 0 : index
    %c0_318 = arith.constant 0 : index
    %c2_319 = arith.constant 2 : index
    %c4_320 = arith.constant 4 : index
    %758 = vector.load %arg5[%c0_317, %c0_318, %c2_319, %c4_320] : memref<1x6x20x132xf32, #tpu.memory_space<vmem>>, vector<1x1x16x128xf32>
    %759 = vector.shape_cast %758 : vector<1x1x16x128xf32> to vector<16x128xf32>
    %c0_321 = arith.constant 0 : index
    %c1_322 = arith.constant 1 : index
    %c2_323 = arith.constant 2 : index
    %c4_324 = arith.constant 4 : index
    %760 = vector.load %arg5[%c0_321, %c1_322, %c2_323, %c4_324] : memref<1x6x20x132xf32, #tpu.memory_space<vmem>>, vector<1x1x16x128xf32>
    %761 = vector.shape_cast %760 : vector<1x1x16x128xf32> to vector<16x128xf32>
    %c0_325 = arith.constant 0 : index
    %c2_326 = arith.constant 2 : index
    %c2_327 = arith.constant 2 : index
    %c4_328 = arith.constant 4 : index
    %762 = vector.load %arg5[%c0_325, %c2_326, %c2_327, %c4_328] : memref<1x6x20x132xf32, #tpu.memory_space<vmem>>, vector<1x1x16x128xf32>
    %763 = vector.shape_cast %762 : vector<1x1x16x128xf32> to vector<16x128xf32>
    %c0_329 = arith.constant 0 : index
    %c3_330 = arith.constant 3 : index
    %c2_331 = arith.constant 2 : index
    %c4_332 = arith.constant 4 : index
    %764 = vector.load %arg5[%c0_329, %c3_330, %c2_331, %c4_332] : memref<1x6x20x132xf32, #tpu.memory_space<vmem>>, vector<1x1x16x128xf32>
    %765 = vector.shape_cast %764 : vector<1x1x16x128xf32> to vector<16x128xf32>
    %c0_333 = arith.constant 0 : index
    %c4_334 = arith.constant 4 : index
    %c2_335 = arith.constant 2 : index
    %c4_336 = arith.constant 4 : index
    %766 = vector.load %arg5[%c0_333, %c4_334, %c2_335, %c4_336] : memref<1x6x20x132xf32, #tpu.memory_space<vmem>>, vector<1x1x16x128xf32>
    %767 = vector.shape_cast %766 : vector<1x1x16x128xf32> to vector<16x128xf32>
    %c0_337 = arith.constant 0 : index
    %c5_338 = arith.constant 5 : index
    %c2_339 = arith.constant 2 : index
    %c4_340 = arith.constant 4 : index
    %768 = vector.load %arg5[%c0_337, %c5_338, %c2_339, %c4_340] : memref<1x6x20x132xf32, #tpu.memory_space<vmem>>, vector<1x1x16x128xf32>
    %769 = vector.shape_cast %768 : vector<1x1x16x128xf32> to vector<16x128xf32>
    %770 = arith.subf %7, %759 : vector<16x128xf32>
    %771 = vector.broadcast %756 : f32 to vector<16x128xf32>
    %772 = arith.mulf %771, %770 : vector<16x128xf32>
    %773 = arith.subf %9, %761 : vector<16x128xf32>
    %774 = vector.broadcast %756 : f32 to vector<16x128xf32>
    %775 = arith.mulf %774, %773 : vector<16x128xf32>
    %776 = arith.subf %11, %763 : vector<16x128xf32>
    %777 = vector.broadcast %756 : f32 to vector<16x128xf32>
    %778 = arith.mulf %777, %776 : vector<16x128xf32>
    %779 = arith.subf %13, %765 : vector<16x128xf32>
    %780 = vector.broadcast %756 : f32 to vector<16x128xf32>
    %781 = arith.mulf %780, %779 : vector<16x128xf32>
    %782 = arith.subf %15, %767 : vector<16x128xf32>
    %783 = vector.broadcast %756 : f32 to vector<16x128xf32>
    %784 = arith.mulf %783, %782 : vector<16x128xf32>
    %785 = arith.subf %17, %769 : vector<16x128xf32>
    %786 = vector.broadcast %756 : f32 to vector<16x128xf32>
    %787 = arith.mulf %786, %785 : vector<16x128xf32>
    %788 = arith.mulf %772, %772 : vector<16x128xf32>
    %789 = arith.mulf %775, %775 : vector<16x128xf32>
    %790 = arith.addf %788, %789 : vector<16x128xf32>
    %791 = arith.mulf %778, %778 : vector<16x128xf32>
    %792 = arith.addf %790, %791 : vector<16x128xf32>
    %cst_341 = arith.constant 9.99999971E-10 : f32
    %793 = vector.broadcast %cst_341 : f32 to vector<16x128xf32>
    %794 = arith.addf %792, %793 : vector<16x128xf32>
    %795 = math.rsqrt %794 : vector<16x128xf32>
    %796 = arith.mulf %772, %795 : vector<16x128xf32>
    %797 = arith.mulf %775, %795 : vector<16x128xf32>
    %798 = arith.mulf %778, %795 : vector<16x128xf32>
    %799 = arith.mulf %781, %796 : vector<16x128xf32>
    %800 = arith.mulf %784, %797 : vector<16x128xf32>
    %801 = arith.addf %799, %800 : vector<16x128xf32>
    %802 = arith.mulf %787, %798 : vector<16x128xf32>
    %803 = arith.addf %801, %802 : vector<16x128xf32>
    %804 = vector.broadcast %1 : f32 to vector<16x128xf32>
    %805 = arith.mulf %804, %803 : vector<16x128xf32>
    %806 = vector.broadcast %0 : f32 to vector<16x128xf32>
    %807 = arith.addf %806, %805 : vector<16x128xf32>
    %808 = vector.broadcast %757 : f32 to vector<16x128xf32>
    %809 = arith.mulf %808, %772 : vector<16x128xf32>
    %810 = arith.addf %743, %809 : vector<16x128xf32>
    %811 = vector.broadcast %757 : f32 to vector<16x128xf32>
    %812 = arith.mulf %811, %775 : vector<16x128xf32>
    %813 = arith.addf %746, %812 : vector<16x128xf32>
    %814 = vector.broadcast %757 : f32 to vector<16x128xf32>
    %815 = arith.mulf %814, %778 : vector<16x128xf32>
    %816 = arith.addf %749, %815 : vector<16x128xf32>
    %817 = arith.mulf %807, %796 : vector<16x128xf32>
    %818 = arith.addf %751, %817 : vector<16x128xf32>
    %819 = arith.mulf %807, %797 : vector<16x128xf32>
    %820 = arith.addf %753, %819 : vector<16x128xf32>
    %821 = arith.mulf %807, %798 : vector<16x128xf32>
    %822 = arith.addf %755, %821 : vector<16x128xf32>
    %823 = arith.addf %810, %818 : vector<16x128xf32>
    %824 = vector.broadcast %2 : f32 to vector<16x128xf32>
    %825 = arith.addf %823, %824 : vector<16x128xf32>
    %826 = vector.broadcast %5 : f32 to vector<16x128xf32>
    %827 = arith.mulf %825, %826 : vector<16x128xf32>
    %c0_342 = arith.constant 0 : index
    %c0_343 = arith.constant 0 : index
    %c0_344 = arith.constant 0 : index
    %c0_345 = arith.constant 0 : index
    %828 = vector.load %arg6[%c0_342, %c0_343, %c0_344, %c0_345] : memref<1x3x16x128xf32, #tpu.memory_space<vmem>>, vector<1x1x16x128xf32>
    %829 = vector.shape_cast %828 : vector<1x1x16x128xf32> to vector<16x128xf32>
    %830 = vector.shape_cast %827 : vector<16x128xf32> to vector<1x1x16x128xf32>
    tpu.vector_store %arg6[%c0_342, %c0_343, %c0_344, %c0_345], %830 {strides = array<i32>} : memref<1x3x16x128xf32, #tpu.memory_space<vmem>>, vector<1x1x16x128xf32>,
    %831 = arith.addf %813, %820 : vector<16x128xf32>
    %832 = vector.broadcast %3 : f32 to vector<16x128xf32>
    %833 = arith.addf %831, %832 : vector<16x128xf32>
    %834 = vector.broadcast %5 : f32 to vector<16x128xf32>
    %835 = arith.mulf %833, %834 : vector<16x128xf32>
    %c0_346 = arith.constant 0 : index
    %c1_347 = arith.constant 1 : index
    %c0_348 = arith.constant 0 : index
    %c0_349 = arith.constant 0 : index
    %836 = vector.load %arg6[%c0_346, %c1_347, %c0_348, %c0_349] : memref<1x3x16x128xf32, #tpu.memory_space<vmem>>, vector<1x1x16x128xf32>
    %837 = vector.shape_cast %836 : vector<1x1x16x128xf32> to vector<16x128xf32>
    %838 = vector.shape_cast %835 : vector<16x128xf32> to vector<1x1x16x128xf32>
    tpu.vector_store %arg6[%c0_346, %c1_347, %c0_348, %c0_349], %838 {strides = array<i32>} : memref<1x3x16x128xf32, #tpu.memory_space<vmem>>, vector<1x1x16x128xf32>,
    %839 = arith.addf %816, %822 : vector<16x128xf32>
    %840 = vector.broadcast %4 : f32 to vector<16x128xf32>
    %841 = arith.addf %839, %840 : vector<16x128xf32>
    %842 = vector.broadcast %5 : f32 to vector<16x128xf32>
    %843 = arith.mulf %841, %842 : vector<16x128xf32>
    %c0_350 = arith.constant 0 : index
    %c2_351 = arith.constant 2 : index
    %c0_352 = arith.constant 0 : index
    %c0_353 = arith.constant 0 : index
    %844 = vector.load %arg6[%c0_350, %c2_351, %c0_352, %c0_353] : memref<1x3x16x128xf32, #tpu.memory_space<vmem>>, vector<1x1x16x128xf32>
    %845 = vector.shape_cast %844 : vector<1x1x16x128xf32> to vector<16x128xf32>
    %846 = vector.shape_cast %843 : vector<16x128xf32> to vector<1x1x16x128xf32>
    tpu.vector_store %arg6[%c0_350, %c2_351, %c0_352, %c0_353], %846 {strides = array<i32>} : memref<1x3x16x128xf32, #tpu.memory_space<vmem>>, vector<1x1x16x128xf32>,
    return
  }
  func.func @transform_0(%arg0: i32) -> i32 {
    %c0_i32 = arith.constant 0 : i32
    %c0_i32_0 = arith.constant 0 : i32
    return %c0_i32 : i32
  }
  func.func @transform_1(%arg0: i32) -> i32 {
    %c0_i32 = arith.constant 0 : i32
    %c0_i32_0 = arith.constant 0 : i32
    return %c0_i32 : i32
  }
  func.func @transform_2(%arg0: i32) -> i32 {
    %c0_i32 = arith.constant 0 : i32
    %c0_i32_0 = arith.constant 0 : i32
    return %c0_i32 : i32
  }
  func.func @transform_3(%arg0: i32) -> (i32, i32, i32, i32) {
    %c0_i32 = arith.constant 0 : i32
    %c0_i32_0 = arith.constant 0 : i32
    %c0_i32_1 = arith.constant 0 : i32
    %c0_i32_2 = arith.constant 0 : i32
    return %arg0, %c0_i32, %c0_i32_0, %c0_i32_1 : i32, i32, i32, i32
  }
  func.func @transform_4(%arg0: i32) -> (i32, i32, i32, i32) {
    %c0_i32 = arith.constant 0 : i32
    %c0_i32_0 = arith.constant 0 : i32
    %c0_i32_1 = arith.constant 0 : i32
    %c0_i32_2 = arith.constant 0 : i32
    return %arg0, %c0_i32, %c0_i32_0, %c0_i32_1 : i32, i32, i32, i32
  }
  func.func @transform_5(%arg0: i32) -> (i32, i32, i32, i32) {
    %c0_i32 = arith.constant 0 : i32
    %c0_i32_0 = arith.constant 0 : i32
    %c0_i32_1 = arith.constant 0 : i32
    %c0_i32_2 = arith.constant 0 : i32
    return %arg0, %c0_i32, %c0_i32_0, %c0_i32_1 : i32, i32, i32, i32
  }
}

</mosaic_0001>

<bundles_post_ra>
// kernel: tpu_custom_call.1
= control target key start
LH: loop header
LB: loop body
LE: loop exit
PB: predicated region body
PF: predicated region fallthrough
CT: control target
= control target key end

     0   :  { %10 = vsyncpa [#allocation4], 0  ;;  %s14666_s0 = inlined_call_operand.vmem [shape: f32[12], index: 0, kind: input, shape index: {}]   ;;  %s14667_s1 = inlined_call_operand.vmem [shape: f32[12], index: 1, kind: input, shape index: {}]   ;;  %s14668_s2 = inlined_call_operand.vmem [shape: f32[8], index: 2, kind: input, shape index: {}]   ;;  %s14669_s3 = inlined_call_operand.vmem [shape: f32[2,6,18,130], index: 3, kind: input, shape index: {}]   ;;  %s14670_s4 = inlined_call_operand.vmem [shape: f32[2,6,20,132], index: 4, kind: input, shape index: {}]   ;;  %s14671_s5 = inlined_call_operand.hbm [shape: f32[2,3,16,128], index: 5, kind: output, shape index: {}]  }
   0x1   :  { %11 = vsyncpa [#allocation6], 0 }
   0x2   :  { %12 = vsyncpa [#allocation3], 0 }
   0x3   :  { %14 = vsyncpa [#allocation3 + $0x1], 0  ;;  %s6193_s18 = smov 0   ;;  %s6195_s19 = smov 0  }
   0x4   :  { %s6197_s20 = smov 0   ;;  %s6199_s21 = smov 0  }
   0x5 LB: > { %s6214_s22 = sadd.s32 4294967295, %s6152_s21   ;;  %s5395_s23 = sadd.s32 4294967294, %s6152_s21   ;;  %s6152_s21 = sphi %s6199_s21, %s16816_s21   ;;  %s6148_s20 = sphi %s6197_s20, %s16815_s20   ;;  %s6144_s19 = sphi %s6195_s19, %s16814_s19   ;;  %s6140_s18 = sphi %s6193_s18, %s16813_s18  }
   0x6   : > { %s6218_s24 = sadd.s32 1, %s6152_s21   ;;  %s142_s25 = sadd.s32 1, %s6148_s20 }
   0x7   : > { %s139_s26 = ssub.s32 %s6152_s21, %s6218_s24  ;;  %p152_p0 = scmp.ne.s32.totalorder %s6148_s20, %s6144_s19 }
   0x8   : > { %p140_p1 = scmp.eq.s32.totalorder %s139_s26, 0  ;;  %p153_p2 = scmp.eq.s32.totalorder %s6214_s22, 1 }
   0x9   : > { %p158_p3 = scmp.ne.s32.totalorder %s6144_s19, %s6140_s18  ;;  %p159_p4 = scmp.eq.s32.totalorder %s5395_s23, 1 }
   0xa   : > { %s6229_s27 = scalar_select %p140_p1, %s6148_s20, %s142_s25  }
   0xb   : > { %p6231_p5 = por %p153_p2, %p152_p0  ;;  %p6235_p6 = por %p159_p4, %p158_p3 }
   0xc   : > { %p5396_p7 = scmp.ge.s32.totalorder %s6152_s21, 1  ;;  %p166_p8 = scmp.lt.s32.totalorder %s6152_s21, 3 }
   0xd   : > { %s15166_s28 = scalar_select %p6231_p5, 1, 0 }
   0xe   : > { %s15167_s29 = scalar_select %p6235_p6, 1, 0 }
   0xf   : > { %p14672_p9 = scmp.eq.s32.totalorder %s6214_s22, 0  ;;  %p6242_p10 = pnand %p5396_p7, %p166_p8 }
  0x10   : > { %s190_s8 = sshll.u32 %s14667_s1, 4  ;;  %s179_s11 = sshll.u32 %s14666_s0, 4  ;;  %s191_s8 = int_to_ptr.vmem [resolvable:$true] %s190_s8  ;;  %s180_s11 = int_to_ptr.vmem [resolvable:$true] %s179_s11 }
  0x11   : > { %s15168_s30 = scalar_select %p6242_p10, 1, 0 }
  0x12   : > { %p5650_p11 = pneg %p6242_p10  ;;  %s201_s15 = sshll.u32 %s14668_s2, 4  ;;  %s6263_s15 = int_to_ptr.vmem [resolvable:$true] %s201_s15 }
  0x13   : > { %s6039_s16 = scalar_lea.vmem %s191_s8, 16  ;;  %p6047_p3 = scmp.lt.s32.totalorder %s191_s8, %s191_s8 }
  0x14   : > { %p6256_p12 = pnand %p14672_p9, %p5650_p11  ;;  %p6040_p13 = scmp.ne.s32.totalorder %s191_s8, %s6039_s16 }
  0x15   : > { %p6048_p4 = scmp.lt.s32.totalorder %s6039_s16, %s6039_s16 }
  0x16   : > { %p6041_p0 = pneg %p6256_p12 }
  0x17   : > { %p6049_p7 = por %p6048_p4, %p6047_p3 }
  0x18   : > { %p6042_p1 = pnand %p6041_p0, %p6040_p13 }
  0x1a   : > { %p6043_p2 = pneg %p6042_p1 }
  0x1c   : > { %p6050_p8 = pnand %p6049_p7, %p6043_p2 }
  0x1e   : > { %6053 = shalt.err (!%p6050_p8)
}
  0x1f   : > { %s6154_s17 = smov [#allocation5]   ;;  %s6054_s23 = scalar_lea.vmem %s180_s11, 16 }
  0x20   : > { %5656 = dma.vmem_to_smem (!%p6256_p12), %s191_s8, 16, %s6154_s17, [#allocation6]  }
  0x21   : > { %p6055_p11 = scmp.ne.s32.totalorder %s180_s11, %s6054_s23  ;;  %p6062_p5 = scmp.lt.s32.totalorder %s180_s11, %s180_s11 }
  0x22   : > { %p6063_p10 = scmp.lt.s32.totalorder %s6054_s23, %s6054_s23 }
  0x23   : > { %p6057_p9 = pnand %p6055_p11, %p6041_p0 }
  0x24   : > { %p6064_p13 = por %p6063_p10, %p6062_p5 }
  0x25   : > { %p6058_p6 = pneg %p6057_p9 }
  0x27   : > { %p6065_p1 = pnand %p6064_p13, %p6058_p6 }
  0x29   : > { %6068 = shalt.err (!%p6065_p1)
}
  0x2a   : > { %s6155_s25 = smov [#allocation2]   ;;  %s6069_s26 = scalar_lea.vmem %s6263_s15, 16 }
  0x2b   : > { %5653 = dma.vmem_to_smem (!%p6256_p12), %s180_s11, 16, %s6155_s25, [#allocation4]  }
  0x2c   : > { %p6070_p2 = scmp.ne.s32.totalorder %s6263_s15, %s6069_s26  ;;  %p6077_p9 = scmp.lt.s32.totalorder %s6263_s15, %s6263_s15 }
  0x2d   : > { %p6078_p7 = scmp.lt.s32.totalorder %s6069_s26, %s6069_s26 }
  0x2e   : > { %p6072_p3 = pnand %p6070_p2, %p6041_p0 }
  0x2f   : > { %p6079_p5 = por %p6078_p7, %p6077_p9 }
  0x30   : > { %p6073_p4 = pneg %p6072_p3 }
  0x32   : > { %p6080_p6 = pnand %p6079_p5, %p6073_p4 }
  0x34   : > { %6083 = shalt.err (!%p6080_p6)
}
  0x35   : > { %s6156_s6 = smov [#allocation7]   ;;  %p15170_p10 = scmp.ne.s32.totalorder %s15168_s30, 0 }
  0x36   : > { %5659 = dma.vmem_to_smem (!%p6256_p12), %s6263_s15, 16, %s6156_s6, [#allocation6]  }
  0x37   : > { %230 = sbr.rel (%p15170_p10) target bundleno = 1181 (0x49d), region = 40 }
  0x3c   : > { %p15171_p8 = scmp.eq.s32.totalorder %s6214_s22, 0 }
  0x3e   : > { %6127 = dma.done.wait (%p15171_p8), [#allocation4], 16   ;;  %p15172_p0 = pmov %p15171_p8 }
  0x40   : > { %6129 = vsyncadd (%p15172_p0), [#allocation4], 4294967280  ;;  %p15173_p11 = pmov %p15172_p0 }
  0x41   : > { %p15174_p13 = pmov %p15172_p0 }
  0x42   : > { %6131 = dma.done.wait (%p15173_p11), [#allocation6], 32  }
  0x43   : > { %6133 = vsyncadd (%p15174_p13), [#allocation6], 4294967264 }
  0x44   : > { %244 = sfence }
  0x45   : > { %p272_p1 = scmp.lt.s32.totalorder %s6214_s22, 1  ;;  %vm359_vm0 = vcmask 1040384   ;;  %s6157_s11 = smov 1   ;;  %vm1404_vm1 = vcmask 1046528   ;;  %vm2167_vm2 = vcmask 1039360   ;;  %vm4185_vm3 = vcmask 1044480  }
  0x46   : > { %s6372_s12 = sld [smem:[#allocation2 + $0x4]]  ;;  %s6158_s6 = smov 127   ;;  %vm4702_vm4 = vcmask 1022976  }
  0x47   : > { %s6299_s7 = scalar_select %p272_p1, %s6214_s22, 1 }
  0x48   : > { %s6374_s13 = sld [smem:[#allocation5 + $0x4]]  ;;  %p16811_p2 = scmp.ne.s32.totalorder %s15166_s28, 0 }
  0x49   : > { %s5634_s30 = smul.u32 288, %s6299_s7  ;;  %s6379_s14 = sld [smem:[#allocation2 + $0x1]] }
  0x4a   : > { %s6382_s15 = sld [smem:[#allocation5 + $0x1]] }
  0x4b   : > { %s6307_s10 = scalar_lea.vmem %s14669_s3, %s5634_s30  ;;  %s6774_s16 = sld [smem:[#allocation7 + $0x1]] }
  0x4c   : > { %v6310_v0 = vld [vmem:[%s6307_s10 + $0x10] sm:$0xff]  ;;  %v704_v1 = vld [vmem:[%s6307_s10] sm:$0xff]  ;;  %v6388_v36 = vld [vmem:[%s6307_s10 + $0x18] sm:$0xff]  ;;  %v6425_v56 = vstv %s6372_s12  ;;  %s6833_s17 = sld [smem:[#allocation7]] }
  0x4d   : > { %15175 = vst [vmem:[#allocation12_spill] sm:$0xff] %v6310_v0  ;;  %v5464_v2 = vld [vmem:[%s6307_s10 + $0x30] sm:$0xff]  ;;  %v719_v3 = vrot.slane %v6310_v0, 7  ;;  %v718_v4 = vrot.slane %v704_v1, 7  ;;  %v6316_v5 = vld [vmem:[%s6307_s10 + $0x40] sm:$0xff]  ;;  %v6385_v35 = vrot.slane %v6310_v0, 1 }
  0x4e   : > { %15176 = vst [vmem:[#allocation13_spill] sm:$0xff] %v6316_v5  ;;  %v745_v6 = vrot.slane %v5464_v2, 7  ;;  %v746_v8 = vrot.slane %v6316_v5, 7  ;;  %v5466_v9 = vld [vmem:[%s6307_s10 + $0x60] sm:$0xff]  ;;  %v6324_v10 = vld [vmem:[%s6307_s10 + $0x70] sm:$0xff]  ;;  %15178 = vst [vmem:[#allocation15_spill] sm:$0xff] %v6388_v36  ;;  %v6428_v57 = vstv %s6374_s13 }
  0x4f   : > { %725 = vrot.lane.b32.xlu1 %v719_v3, %s6157_s11  ;;  %721 = vrot.lane.b32.xlu0 %v718_v4, %s6157_s11  ;;  %v720_v7 = vsel %vm359_vm0, %v718_v4, %v719_v3  ;;  %15177 = vst [vmem:[#allocation14_spill] sm:$0xff] %v6324_v10  ;;  %v771_v12 = vrot.slane %v5466_v9, 7  ;;  %v772_v13 = vrot.slane %v6324_v10, 7  ;;  %v5468_v15 = vld [vmem:[%s6307_s10 + $0x90] sm:$0xff]  ;;  %v6335_v16 = vld [vmem:[%s6307_s10 + $0xa0] sm:$0xff]  ;;  %v6396_v40 = vrot.slane %v6316_v5, 1 }
  0x50   : > { %v747_v11 = vsel %vm359_vm0, %v745_v6, %v746_v8  ;;  %v797_v17 = vrot.slane %v5468_v15, 7  ;;  %v798_v18 = vrot.slane %v6335_v16, 7  ;;  %v5470_v19 = vld [vmem:[%s6307_s10 + $0xc0] sm:$0xff]  ;;  %v6342_v20 = vld [vmem:[%s6307_s10 + $0xd0] sm:$0xff]  ;;  %v1750_v39 = vld [vmem:[%s6307_s10 + $0x8] sm:$0xfc]  ;;  %v6445_v3 = vstv %s6379_s14 }
  0x51   : > { %v773_v14 = vsel %vm359_vm0, %v771_v12, %v772_v13  ;;  %v823_v22 = vrot.slane %v5470_v19, 7  ;;  %v824_v23 = vrot.slane %v6342_v20, 7  ;;  %v5472_v25 = vld [vmem:[%s6307_s10 + $0xf0] sm:$0xff]  ;;  %v6353_v26 = vld [vmem:[%s6307_s10 + $0x100] sm:$0xff]  ;;  %v6399_v41 = vrot.slane %v6324_v10, 1  ;;  %v6420_v52 = vld [vmem:[%s6307_s10 + $0x48] sm:$0xff] }
  0x52   : > { %v799_v21 = vsel %vm359_vm0, %v797_v17, %v798_v18  ;;  %v849_v27 = vrot.slane %v5472_v25, 7  ;;  %v850_v28 = vrot.slane %v6353_v26, 7  ;;  %v1050_v30 = vld [vmem:[%s6307_s10] sm:$0xfe]  ;;  %v5476_v31 = vld [vmem:[%s6307_s10 + $0x30] sm:$0xfe]  ;;  %v6448_v4 = vstv %s6382_s15 }
  0x53   : > { %748 = vrot.lane.b32.xlu1 %v745_v6, %s6157_s11  ;;  %723 = vrot.lane.b32.xlu0 %v720_v7, %s6157_s11  ;;  %v825_v24 = vsel %vm359_vm0, %v823_v22, %v824_v23  ;;  %v1052_v32 = vld [vmem:[%s6307_s10 + $0x20] sm:$0x1]  ;;  %v5478_v33 = vld [vmem:[%s6307_s10 + $0x50] sm:$0x1]  ;;  %v6407_v44 = vrot.slane %v6335_v16, 1  ;;  %v6410_v45 = vrot.slane %v6342_v20, 1 }
  0x54   : > { %v851_v29 = vsel %vm359_vm0, %v849_v27, %v850_v28  ;;  %v5479_v34 = vld [vmem:[%s6307_s10 + $0x60] sm:$0xfe]  ;;  %v5482_v37 = vld [vmem:[%s6307_s10 + $0x90] sm:$0xfe]  ;;  %v5481_v42 = vld [vmem:[%s6307_s10 + $0x80] sm:$0x1] }
  0x55   : > { %v6392_v38 = vld [vmem:[%s6307_s10 + $0x20] sm:$0x3]  ;;  %v1390_v43 = vld [vmem:[%s6307_s10] sm:$0xfc]  ;;  %v5493_v46 = vld [vmem:[%s6307_s10 + $0x30] sm:$0xfc] }
  0x56   : > { %v1749_v47 = vld [vmem:[%s6307_s10] sm:$0xfc]  ;;  %v14677_v48 = vrot.slane %v6392_v38, 1  ;;  %v6416_v49 = vld [vmem:[%s6307_s10 + $0x50] sm:$0x3]  ;;  %v1782_v50 = vrot.slane %v1750_v39, 1 }
  0x57   : > { %752 = vrot.lane.b32.xlu1 %v746_v8, %s6157_s11  ;;  %750 = vrot.lane.b32.xlu0 %v747_v11, %s6157_s11  ;;  %v1783_v51 = vrot.slane %v6388_v36, 1  ;;  %15179 = vst [vmem:[#allocation16_spill] sm:$0xff] %v6420_v52  ;;  %v5484_v53 = vld [vmem:[%s6307_s10 + $0xb0] sm:$0x1]  ;;  %v1405_v55 = vrot.slane %v1390_v43, 1  ;;  %15180 = vst [vmem:[#allocation17_spill] sm:$0xff] %v6428_v57 }
  0x58   : > { %v1752_v58 = vld [vmem:[%s6307_s10 + $0x28] sm:$0x3]  ;;  %v5506_v59 = vld [vmem:[%s6307_s10 + $0x38] sm:$0xfc]  ;;  %v1434_v60 = vrot.slane %v5493_v46, 1  ;;  %v1779_v63 = vrot.slane %v1749_v47, 1  ;;  %v6456_v8 = vsel %vm1404_vm1, %v6385_v35, %v14677_v48 }
  0x59   : > { %v6435_v61 = vld [vmem:[%s6307_s10 + $0x80] sm:$0x3]  ;;  %v6438_v62 = vld [vmem:[%s6307_s10 + $0x60] sm:$0xfc]  ;;  %v14676_v1 = vrot.slane %v6416_v49, 1  ;;  %15181 = vst [vmem:[#allocation18_spill] sm:$0xff] %v6445_v3  ;;  %v6459_v9 = vsel %vm1404_vm1, %v1782_v50, %v1783_v51 }
  0x5a   : > { %v6442_v2 = vld [vmem:[%s6307_s10 + $0x8] sm:$0xfe]  ;;  %15182 = vst [vmem:[#allocation19_spill] sm:$0xff] %v6448_v4  ;;  %v1818_v6 = vrot.slane %v6420_v52, 1  ;;  %v6461_v11 = vrot.slane %v1752_v58, 1  ;;  %v6487_v25 = vsel %vm1404_vm1, %v1779_v63, %v6385_v35  ;;  %s6851_s23 = sld [smem:[#allocation2 + $0x2]] }
  0x5b   : > { %776 = vrot.lane.b32.xlu1 %v773_v14, %s6157_s11  ;;  %774 = vrot.lane.b32.xlu0 %v771_v12, %s6157_s11  ;;  %v5510_v7 = vld [vmem:[%s6307_s10 + $0x68] sm:$0xfc]  ;;  %v1751_v12 = vld [vmem:[%s6307_s10 + $0x20] sm:$0x3]  ;;  %s6886_s25 = sld [smem:[#allocation5 + $0x2]] }
  0x5c   : > { %15183 = vst [vmem:[#allocation20_spill] sm:$0xff] %v6461_v11  ;;  %v5505_v14 = vld [vmem:[%s6307_s10 + $0x30] sm:$0xfc]  ;;  %v5485_v15 = vld [vmem:[%s6307_s10 + $0xc0] sm:$0xfe]  ;;  %s7100_s26 = sld [smem:[#allocation2]] }
  0x5d   : > { %v5512_v39 = vld [vmem:[%s6307_s10 + $0x88] sm:$0x3]  ;;  %v6515_v46 = vld [vmem:[%s6307_s10 + $0x38] sm:$0xfe]  ;;  %v6529_v58 = vld [vmem:[%s6307_s10 + $0x20] sm:$0x1] }
  0x5e   : > { %15187 = vst [vmem:[#allocation24_spill] sm:$0xff] %v6515_v46  ;;  %15190 = vst [vmem:[#allocation27_spill] sm:$0xff] %v6529_v58  ;;  %v5487_v63 = vld [vmem:[%s6307_s10 + $0xe0] sm:$0x1]  ;;  %s7147_s8 = sld [smem:[#allocation5]] }
  0x5f   : > { %800 = vrot.lane.b32.xlu1 %v797_v17, %s6157_s11  ;;  %778 = vrot.lane.b32.xlu0 %v772_v13, %s6157_s11  ;;  %v1817_v13 = vrot.slane %v5506_v59, 1  ;;  %v6468_v17 = vsel %vm1404_vm1, %v1405_v55, %v6385_v35  ;;  %s7207_s9 = sld [smem:[#allocation2 + $0x3]] }
  0x60   : > { %s7215_s12 = sld [smem:[#allocation5 + $0x3]] }
  0x61   : > { %v6518_v47 = vsel %vm1404_vm1, %v1817_v13, %v1818_v6  ;;  %v6546_v13 = vld [vmem:[%s6307_s10 + $0x68] sm:$0xfe]  ;;  %s7673_s13 = sld [smem:[#allocation2 + $0x5]] }
  0x62   : > { %15188 = vst [vmem:[#allocation25_spill] sm:$0xff] %v6518_v47  ;;  %v1831_v59 = vsub.f32 %v6515_v46, %v6518_v47  ;;  %15191 = vst [vmem:[#allocation28_spill] sm:$0xff] %v6546_v13  ;;  %s7765_s14 = sld [smem:[#allocation5 + $0x5]] }
  0x63   : > { %804 = vrot.lane.b32.xlu1 %v798_v18, %s6157_s11  ;;  %802 = vrot.lane.b32.xlu0 %v799_v21, %s6157_s11  ;;  %v14675_v18 = vrot.slane %v6435_v61, 1  ;;  %v1796_v21 = vsub.f32 %v6442_v2, %v6459_v9  ;;  %s9899_s15 = sld [smem:[#allocation2 + $0x6]] }
  0x64   : > { %s11096_s7 = sld [smem:[#allocation2 + $0x7]] }
  0x65   : > { %v6524_v55 = vmul.f32 %v6425_v56, %v1796_v21  ;;  %v6551_v21 = vrot.slane %v5512_v39, 1 }
  0x67   : > { %828 = vrot.lane.b32.xlu1 %v825_v24, %s6157_s11  ;;  %826 = vrot.lane.b32.xlu0 %v823_v22, %s6157_s11  ;;  %v5508_v22 = vld [vmem:[%s6307_s10 + $0x58] sm:$0x3]  ;;  %v6483_v24 = vsel %vm1404_vm1, %v1434_v60, %v6396_v40  ;;  %15193 = vst [vmem:[#allocation30_spill] sm:$0xff] %v6551_v21 }
  0x68   : > { %v6520_v50 = vrot.slane %v5508_v22, 1  ;;  %v1979_v22 = vmul.f32 %v6524_v55, %v6524_v55 }
  0x6a   : > { %15189 = vst [vmem:[#allocation26_spill] sm:$0xff] %v6520_v50 }
  0x6b   : > { %852 = vrot.lane.b32.xlu1 %v849_v27, %s6157_s11  ;;  %830 = vrot.lane.b32.xlu0 %v824_v23, %s6157_s11  ;;  %v6476_v23 = vld [vmem:[%s6307_s10 + $0x78] sm:$0xff]  ;;  %v6490_v27 = vld [vmem:[%s6307_s10] sm:$0xfe] }
  0x6c   : > { %15184 = vst [vmem:[#allocation21_spill] sm:$0xff] %v6476_v23 }
  0x6f   : > { %856 = vrot.lane.b32.xlu1 %v850_v28, %s6157_s11  ;;  %854 = vrot.lane.b32.xlu0 %v851_v29, %s6157_s11  ;;  %v1851_v28 = vrot.slane %v5510_v7, 1  ;;  %v1852_v29 = vrot.slane %v6476_v23, 1  ;;  %v6541_v7 = vsel %vm1404_vm1, %v6399_v41, %v14675_v18  ;;  %v6562_v18 = vld [vmem:[%s6307_s10 + $0x30] sm:$0xfe] }
  0x70   : > { %15194 = vst [vmem:[#allocation31_spill] sm:$0xff] %v6562_v18 }
  0x73   : > { %1073 = vrot.lane.b32.xlu1 %v6310_v0, %s6157_s11  ;;  %1071 = vrot.lane.b32.xlu0 %v1050_v30, %s6157_s11  ;;  %v5509_v30 = vld [vmem:[%s6307_s10 + $0x60] sm:$0xfc] }
  0x74   : > { %v1848_v60 = vrot.slane %v5509_v30, 1 }
  0x77   : > { %1096 = vrot.lane.b32.xlu1 %v5476_v31, %s6157_s11  ;;  %1075 = vrot.lane.b32.xlu0 %v1052_v32, %s6157_s11  ;;  %v6498_v31 = vsel %vm1404_vm1, %v6396_v40, %v14676_v1  ;;  %v1795_v32 = vsub.f32 %v6490_v27, %v6487_v25 }
  0x79   : > { %v6559_v30 = vmul.f32 %v6425_v56, %v1795_v32  ;;  %v6580_v32 = vsel %vm1404_vm1, %v1818_v6, %v6520_v50  ;;  %v6598_v6 = vsel %vm1404_vm1, %v1848_v60, %v6399_v41 }
  0x7a   : > { %15197 = vst [vmem:[#allocation34_spill] sm:$0xff] %v6580_v32  ;;  %15199 = vst [vmem:[#allocation36_spill] sm:$0xff] %v6598_v6 }
  0x7b   : > { %1100 = vrot.lane.b32.xlu1 %v5478_v33, %s6157_s11  ;;  %1098 = vrot.lane.b32.xlu0 %v6316_v5, %s6157_s11  ;;  %v6503_v33 = vld [vmem:[%s6307_s10 + $0x28] sm:$0x1] }
  0x7c   : > { %15185 = vst [vmem:[#allocation22_spill] sm:$0xff] %v6503_v33  ;;  %v1800_v43 = vsub.f32 %v6503_v33, %v6461_v11 }
  0x7e   : > { %v6574_v1 = vmul.f32 %v6425_v56, %v1800_v43  ;;  %v1833_v43 = vsub.f32 %v6420_v52, %v6580_v32  ;;  %v6611_v52 = vsel %vm1404_vm1, %v1852_v29, %v6551_v21 }
  0x7f   : > { %1122 = vrot.lane.b32.xlu1 %v6324_v10, %s6157_s11  ;;  %1120 = vrot.lane.b32.xlu0 %v5479_v34, %s6157_s11  ;;  %v6505_v34 = vrot.slane %v1751_v12, 1  ;;  %15201 = vst [vmem:[#allocation38_spill] sm:$0xff] %v6611_v52 }
  0x81   : > { %15186 = vst [vmem:[#allocation23_spill] sm:$0xff] %v6505_v34  ;;  %v1799_v12 = vsub.f32 %v6529_v58, %v6505_v34  ;;  %v6644_v58 = vmul.f32 %v1833_v43, %v6425_v56  ;;  %v6661_v43 = vld [vmem:[%s6307_s10 + $0xb0] sm:$0x3] }
  0x83   : > { %1144 = vrot.lane.b32.xlu1 %v5482_v37, %s6157_s11  ;;  %1124 = vrot.lane.b32.xlu0 %v5481_v42, %s6157_s11  ;;  %v1814_v37 = vrot.slane %v5505_v14, 1  ;;  %v6510_v42 = vsel %vm1404_vm1, %v1783_v51, %v6461_v11  ;;  %v6549_v14 = vsel %vm1404_vm1, %v1851_v28, %v1852_v29  ;;  %v6569_v28 = vld [vmem:[%s6307_s10 + $0x58] sm:$0x1] }
  0x84   : > { %v1798_v51 = vsub.f32 %v6388_v36, %v6510_v42  ;;  %15192 = vst [vmem:[#allocation29_spill] sm:$0xff] %v6549_v14  ;;  %15196 = vst [vmem:[#allocation33_spill] sm:$0xff] %v6569_v28  ;;  %v1865_v39 = vsub.f32 %v6546_v13, %v6549_v14  ;;  %v1835_v48 = vsub.f32 %v6569_v28, %v6520_v50  ;;  %v6594_v13 = vld [vmem:[%s6307_s10 + $0x60] sm:$0xfe] }
  0x85   : > { %v6566_v54 = vsel %vm1404_vm1, %v1814_v37, %v6396_v40  ;;  %v5507_v37 = vld [vmem:[%s6307_s10 + $0x50] sm:$0x3]  ;;  %v6589_v14 = vmul.f32 %v1831_v59, %v6425_v56  ;;  %15198 = vst [vmem:[#allocation35_spill] sm:$0xff] %v6594_v13  ;;  %v6605_v59 = vmul.f32 %v6425_v56, %v1799_v12  ;;  %v1864_v50 = vsub.f32 %v6594_v13, %v6598_v6  ;;  %v5511_v28 = vld [vmem:[%s6307_s10 + $0x80] sm:$0x3] }
  0x86   : > { %15195 = vst [vmem:[#allocation32_spill] sm:$0xff] %v6566_v54  ;;  %v1830_v19 = vsub.f32 %v6562_v18, %v6566_v54  ;;  %v6586_v4 = vmul.f32 %v6425_v56, %v1798_v51  ;;  %v5490_v51 = vld [vmem:[%s6307_s10 + $0x110] sm:$0x1]  ;;  %v6615_v3 = vrot.slane %v5507_v37, 1  ;;  %v1867_v12 = vsub.f32 %v6476_v23, %v6611_v52 }
  0x87   : > { %1148 = vrot.lane.b32.xlu1 %v5484_v53, %s6157_s11  ;;  %1146 = vrot.lane.b32.xlu0 %v6335_v16, %s6157_s11  ;;  %v5488_v53 = vld [vmem:[%s6307_s10 + $0xf0] sm:$0xfe]  ;;  %15200 = vst [vmem:[#allocation37_spill] sm:$0xff] %v6605_v59  ;;  %v1985_v60 = vmul.f32 %v6589_v14, %v6589_v14  ;;  %v1978_v6 = vmul.f32 %v6559_v30, %v6559_v30  ;;  %v6632_v13 = vld [vmem:[%s6307_s10 + $0x50] sm:$0x1]  ;;  %v6658_v32 = vrot.slane %v5511_v28, 1 }
  0x88   : > { %15202 = vst [vmem:[#allocation39_spill] sm:$0xff] %v6615_v3  ;;  %v6629_v29 = vmul.f32 %v1830_v19, %v6425_v56  ;;  %15204 = vst [vmem:[#allocation41_spill] sm:$0xff] %v6632_v13  ;;  %v6635_v37 = vmul.f32 %v1835_v48, %v6425_v56  ;;  %v1981_v52 = vmul.f32 %v6586_v4, %v6586_v4 }
  0x89   : > { %v1983_v23 = vmul.f32 %v6574_v1, %v6574_v1  ;;  %v1834_v19 = vsub.f32 %v6632_v13, %v6615_v3  ;;  %15205 = vst [vmem:[#allocation42_spill] sm:$0xff] %v6658_v32  ;;  %v1991_v46 = vadd.f32 %v1985_v60, %v1979_v22  ;;  %v6666_v13 = vld [vmem:[%s6307_s10 + $0x80] sm:$0x1]  ;;  %v6671_v54 = vmul.f32 %v1867_v12, %v6425_v56 }
  0x8a   : > { %v1984_v48 = vmul.f32 %v6629_v29, %v6629_v29  ;;  %15206 = vst [vmem:[#allocation43_spill] sm:$0xff] %v6666_v13  ;;  %v6681_v22 = vsel %vm1404_vm1, %v6396_v40, %v6615_v3  ;;  %v1868_v60 = vsub.f32 %v6666_v13, %v6658_v32  ;;  %v5499_v13 = vld [vmem:[%s6307_s10 + $0xc0] sm:$0xfc]  ;;  %v15211_v40 = vrot.slane %v6392_v38, 1 }
  0x8b   : > { %1170 = vrot.lane.b32.xlu1 %v6342_v20, %s6157_s11  ;;  %1168 = vrot.lane.b32.xlu0 %v5485_v15, %s6157_s11  ;;  %v6554_v15 = vld [vmem:[%s6307_s10 + $0x90] sm:$0xfc]  ;;  %15207 = vst [vmem:[#allocation44_spill] sm:$0xff] %v6681_v22  ;;  %v1832_v47 = vsub.f32 %v6316_v5, %v6681_v22  ;;  %v6710_v5 = vld [vmem:[%s6307_s10 + $0x110] sm:$0x3] }
  0x8c   : > { %v1990_v3 = vadd.f32 %v1984_v48, %v1978_v6  ;;  %v5501_v22 = vld [vmem:[%s6307_s10 + $0xf0] sm:$0xfc] }
  0x8f   : > { %1192 = vrot.lane.b32.xlu1 %v5488_v53, %s6157_s11  ;;  %1172 = vrot.lane.b32.xlu0 %v5487_v63, %s6157_s11  ;;  %v6618_v53 = vld [vmem:[%s6307_s10 + $0x88] sm:$0x1]  ;;  %v6621_v63 = vmul.f32 %v1865_v39, %v6425_v56 }
  0x90   : > { %15203 = vst [vmem:[#allocation40_spill] sm:$0xff] %v6618_v53  ;;  %v1869_v39 = vsub.f32 %v6618_v53, %v6551_v21  ;;  %v1989_v21 = vmul.f32 %v6635_v37, %v6635_v37  ;;  %v6656_v53 = vmul.f32 %v1864_v50, %v6425_v56  ;;  %v6676_v50 = vsel %vm1404_vm1, %v6385_v35, %v6505_v34 }
  0x91   : > { %v1997_v18 = vmul.f32 %v6621_v63, %v6621_v63  ;;  %v1797_v12 = vsub.f32 %v6310_v0, %v6676_v50  ;;  %v1982_v35 = vmul.f32 %v6605_v59, %v6605_v59  ;;  %v6695_v34 = vmul.f32 %v1834_v19, %v6425_v56 }
  0x92   : > { %v6684_v28 = vmul.f32 %v1869_v39, %v6425_v56  ;;  %v6703_v39 = vld [vmem:[%s6307_s10 + $0xe0] sm:$0x3]  ;;  %v1995_v0 = vadd.f32 %v1989_v21, %v1983_v23  ;;  %v1996_v11 = vmul.f32 %v6656_v53, %v6656_v53 }
  0x93   : > { %1196 = vrot.lane.b32.xlu1 %v5490_v51, %s6157_s11  ;;  %1194 = vrot.lane.b32.xlu0 %v6353_v26, %s6157_s11  ;;  %v1987_v51 = vmul.f32 %v6644_v58, %v6644_v58  ;;  %15208 = vst [vmem:[#allocation45_spill] sm:$0xff] %v6695_v34  ;;  %v2003_v33 = vadd.f32 %v1997_v18, %v1991_v46  ;;  %v1518_v46 = vrot.slane %v5499_v13, 1  ;;  %v1546_v18 = vrot.slane %v5501_v22, 1 }
  0x94   : > { %v1988_v6 = vmul.f32 %v6695_v34, %v6695_v34  ;;  %v2001_v23 = vmul.f32 %v6684_v28, %v6684_v28  ;;  %v6730_v48 = vmul.f32 %v6425_v56, %v1797_v12  ;;  %v14712_v13 = vrot.slane %v6710_v5, 1 }
  0x95   : > { %v1993_v19 = vadd.f32 %v1987_v51, %v1981_v52  ;;  %v6726_v52 = vmul.f32 %v1868_v60, %v6425_v56  ;;  %v6733_v51 = vmul.f32 %v1832_v47, %v6425_v56  ;;  %v15212_v60 = vrot.slane %v6438_v62, 1 }
  0x96   : > { %v2002_v12 = vadd.f32 %v1996_v11, %v1990_v3  ;;  %v1980_v47 = vmul.f32 %v6730_v48, %v6730_v48  ;;  %v1994_v36 = vadd.f32 %v1988_v6, %v1982_v35  ;;  %v2007_v38 = vadd.f32 %v2001_v23, %v1995_v0 }
  0x97   : > { %1412 = vrot.lane.b32.xlu1 %v6456_v8, %s6157_s11  ;;  %1410 = vrot.lane.b32.xlu0 %v6468_v17, %s6157_s11  ;;  %v1999_v8 = vmul.f32 %v6671_v54, %v6671_v54  ;;  %v6717_v17 = vsel %vm1404_vm1, %v6399_v41, %v6658_v32  ;;  %15210 = vst [vmem:[#allocation47_spill] sm:$0xff] %v6726_v52  ;;  %v15213_v62 = vrot.slane %v6554_v15, 1  ;;  %v15214_v11 = vrot.slane %v6661_v43, 1 }
  0x98   : > { %15209 = vst [vmem:[#allocation46_spill] sm:$0xff] %v6717_v17  ;;  %v1866_v21 = vsub.f32 %v6324_v10, %v6717_v17  ;;  %v1464_v32 = vsel %vm1404_vm1, %v15212_v60, %v6399_v41  ;;  %v1986_v17 = vmul.f32 %v6733_v51, %v6733_v51  ;;  %v2000_v41 = vmul.f32 %v6726_v52, %v6726_v52  ;;  %v5513_v60 = vld [vmem:[%s6307_s10 + $0x90] sm:$0xfc] }
  0x99   : > { %v2005_v10 = vadd.f32 %v1999_v8, %v1993_v19  ;;  %v1492_v3 = vsel %vm1404_vm1, %v15213_v62, %v6407_v44  ;;  %v15215_v0 = vrot.slane %v6703_v39, 1  ;;  %v6772_v35 = vsel %vm1404_vm1, %v1518_v46, %v6410_v45  ;;  %v5514_v46 = vld [vmem:[%s6307_s10 + $0x98] sm:$0xfc] }
  0x9a   : > { %v15216_v15 = vrot.slane %v6416_v49, 1  ;;  %v15217_v19 = vrot.slane %v6353_v26, 1  ;;  %v2008_v49 = vadd.f32 1e-09, %v2002_v12  ;;  %v1992_v62 = vadd.f32 %v1986_v17, %v1980_v47  ;;  %v6826_v17 = vld [vmem:[%s6307_s10 + $0xa8] sm:$0xff] }
  0x9b   : > { %1439 = vrot.lane.b32.xlu1 %v6483_v24, %s6157_s11  ;;  %1414 = vrot.lane.b32.xlu0 %v15211_v40, %s6157_s11  ;;  %v2009_v24 = vadd.f32 1e-09, %v2003_v33  ;;  %v6750_v40 = vmul.f32 %v1866_v21, %v6425_v56  ;;  %v6762_v33 = vsel %vm1404_vm1, %v6407_v44, %v15214_v11  ;;  %v6768_v22 = vsel %vm1404_vm1, %v6410_v45, %v15215_v0  ;;  %v5515_v47 = vld [vmem:[%s6307_s10 + $0xb0] sm:$0x3] }
  0x9c   : > { %v6784_v8 = vsel %vm1404_vm1, %v1546_v18, %v15217_v19  ;;  %v15218_v6 = vmov %v15217_v19  ;;  %v6795_v21 = vmul.f32 %v6428_v57, %v6524_v55  ;;  %v6803_v18 = vmul.f32 %v6428_v57, %v6574_v1  ;;  %15226 = vst [vmem:[#allocation55_spill] sm:$0xff] %v6826_v17 }
  0x9d   : > { %v6791_v23 = vsel %vm1404_vm1, %v15218_v6, %v14712_v13  ;;  %5711 = vrsqrt.f32 %v2009_v24  ;;  %v2011_v26 = vadd.f32 1e-09, %v2005_v10  ;;  %v2013_v11 = vadd.f32 1e-09, %v2007_v38 }
  0x9e   : > { %15219 = vst [vmem:[#allocation48_spill] sm:$0xff] %v6795_v21  ;;  %15221 = vst [vmem:[#allocation50_spill] sm:$0xff] %v6803_v18  ;;  %v1998_v0 = vmul.f32 %v6750_v40, %v6750_v40  ;;  %v2006_v12 = vadd.f32 %v2000_v41, %v1994_v36  ;;  %v6815_v19 = vmul.f32 %v6428_v57, %v6730_v48  ;;  %v5516_v36 = vld [vmem:[%s6307_s10 + $0xb8] sm:$0x3]  ;;  %5713 = vrsqrt.f32 %v2008_v49  ;;  %v5518_v49 = vld [vmem:[%s6307_s10 + $0xc8] sm:$0xfc] }
  0x9f   : > { %1443 = vrot.lane.b32.xlu1 %v15216_v15, %s6157_s11  ;;  %1441 = vrot.lane.b32.xlu0 %v6498_v31, %s6157_s11  ;;  %v6799_v31 = vmul.f32 %v6428_v57, %v6559_v30  ;;  %v6811_v15 = vmul.f32 %v6428_v57, %v6586_v4  ;;  %v6819_v24 = vmul.f32 %v6428_v57, %v6589_v14  ;;  %v1885_v38 = vrot.slane %v5514_v46, 1 }
  0xa0   : > { %15223 = vst [vmem:[#allocation52_spill] sm:$0xff] %v6815_v19  ;;  %v6823_v10 = vmul.f32 %v6428_v57, %v6629_v29  ;;  %v1886_v41 = vrot.slane %v6826_v17, 1  ;;  %v1882_v6 = vrot.slane %v5513_v60, 1  ;;  %v6838_v13 = vmul.f32 %v6428_v57, %v6644_v58  ;;  %v6854_v60 = vld [vmem:[%s6307_s10 + $0x90] sm:$0xfe] }
  0xa1   : > { %15220 = vst [vmem:[#allocation49_spill] sm:$0xff] %v6799_v31  ;;  %15222 = vst [vmem:[#allocation51_spill] sm:$0xff] %v6811_v15  ;;  %5715 = vrsqrt.f32 %v2011_v26  ;;  %v2004_v46 = vadd.f32 %v1998_v0, %v1992_v62  ;;  %v6865_v26 = vmul.f32 %v6428_v57, %v6656_v53  ;;  %v6868_v62 = vld [vmem:[%s6307_s10 + $0xd8] sm:$0xff]  ;;  %v6873_v0 = vrot.slane %v5515_v47, 1  ;;  %v6916_v31 = vld [vmem:[%s6307_s10 + $0xc8] sm:$0xfe] }
  0xa2   : > { %15224 = vst [vmem:[#allocation53_spill] sm:$0xff] %v6819_v24  ;;  %15225 = vst [vmem:[#allocation54_spill] sm:$0xff] %v6823_v10  ;;  %5717 = vrsqrt.f32 %v2013_v11  ;;  %v2012_v10 = vadd.f32 1e-09, %v2006_v12  ;;  %v6849_v24 = vrot.slane %v5516_v36, 1  ;;  %v6871_v11 = vstv %s6774_s16  ;;  %s9916_s16 = sld [smem:[#allocation5 + $0x6]] }
  0xa3   : > { %1469 = vrot.lane.b32.xlu1 %v6541_v7, %s6157_s11  ;;  %1467 = vrot.lane.b32.xlu0 %v1464_v32, %s6157_s11  ;;  %15227 = vst [vmem:[#allocation56_spill] sm:$0xff] %v6838_v13  ;;  %v6842_v7 = vmul.f32 %v6428_v57, %v6635_v37  ;;  %v6846_v32 = vmul.f32 %v6428_v57, %v6733_v51  ;;  %15231 = vst [vmem:[#allocation60_spill] sm:$0xff] %v6854_v60  ;;  %v6857_v13 = vld [vmem:[%s6307_s10 + $0x98] sm:$0xfe]  ;;  %v15238_v12 = vrot.slane %v6435_v61, 1 }
  0xa4   : > { %15230 = vst [vmem:[#allocation59_spill] sm:$0xff] %v6849_v24  ;;  %15232 = vst [vmem:[#allocation61_spill] sm:$0xff] %v6857_v13  ;;  %v6880_v36 = vsel %vm1404_vm1, %v1885_v38, %v1886_v41  ;;  %v1920_v47 = vrot.slane %v6868_v62, 1  ;;  %v6895_v61 = vmul.f32 %v6428_v57, %v6671_v54  ;;  %v6899_v38 = vmul.f32 %v6428_v57, %v6684_v28 }
  0xa5   : > { %15228 = vst [vmem:[#allocation57_spill] sm:$0xff] %v6842_v7  ;;  %15229 = vst [vmem:[#allocation58_spill] sm:$0xff] %v6846_v32  ;;  %v6861_v7 = vmul.f32 %v6428_v57, %v6621_v63  ;;  %v5517_v32 = vld [vmem:[%s6307_s10 + $0xc0] sm:$0xfc]  ;;  %v2010_v18 = vadd.f32 1e-09, %v2004_v46  ;;  %5719 = vrsqrt.f32 %v2012_v10  ;;  %v6910_v19 = vsel %vm1404_vm1, %v1886_v41, %v6849_v24 }
  0xa6   : > { %15234 = vst [vmem:[#allocation63_spill] sm:$0xff] %v6865_v26  ;;  %15235 = vst [vmem:[#allocation64_spill] sm:$0xff] %v6868_v62  ;;  %v6884_v26 = vsel %vm1404_vm1, %v1882_v6, %v6407_v44  ;;  %v1899_v6 = vsub.f32 %v6857_v13, %v6880_v36  ;;  %v1901_v21 = vsub.f32 %v6826_v17, %v6910_v19  ;;  %v1916_v46 = vrot.slane %v5517_v32, 1  ;;  %v5519_v10 = vld [vmem:[%s6307_s10 + $0xe0] sm:$0x3] }
  0xa7   : > { %15233 = vst [vmem:[#allocation62_spill] sm:$0xff] %v6861_v7  ;;  %15236 = vst [vmem:[#allocation65_spill] sm:$0xff] %v6871_v11  ;;  %1495 = vrot.lane.b32.xlu1 %v1492_v3, %s6157_s11  ;;  %1471 = vrot.lane.b32.xlu0 %v15238_v12, %s6157_s11  ;;  %v1919_v7 = vrot.slane %v5518_v49, 1  ;;  %v6891_v3 = vld [vmem:[%s6307_s10 + $0xb8] sm:$0x1]  ;;  %v1898_v49 = vsub.f32 %v6854_v60, %v6884_v26  ;;  %v6923_v15 = vsel %vm1404_vm1, %v6407_v44, %v6873_v0 }
  0xa8   : > { %15237 = vst [vmem:[#allocation66_spill] sm:$0xff] %v6873_v0  ;;  %15239 = vst [vmem:[#allocation67_spill] sm:$0xff] %v6880_v36  ;;  %v6906_v12 = vld [vmem:[%s6307_s10 + $0xb0] sm:$0x1]  ;;  %v15248_v41 = vrot.slane %v6661_v43, 1  ;;  %v1900_v17 = vsub.f32 %v6335_v16, %v6923_v15  ;;  %v6944_v43 = vmul.f32 %v6428_v57, %v6750_v40  ;;  %5721 = vrsqrt.f32 %v2010_v18 }
  0xa9   : > { %15240 = vst [vmem:[#allocation68_spill] sm:$0xff] %v6884_v26  ;;  %15241 = vst [vmem:[#allocation69_spill] sm:$0xff] %v6891_v3  ;;  %v1902_v44 = vsub.f32 %v6906_v12, %v6873_v0  ;;  %v6939_v32 = vsel %vm1404_vm1, %v1919_v7, %v1920_v47  ;;  %v1904_v7 = vmul.f32 %v1898_v49, %v6425_v56  ;;  %v6957_v0 = vrot.slane %v5519_v10, 1  ;;  %v5522_v18 = vld [vmem:[%s6307_s10 + $0xf8] sm:$0xfc] }
  0xaa   : > { %15242 = vst [vmem:[#allocation70_spill] sm:$0xff] %v6895_v61  ;;  %15243 = vst [vmem:[#allocation71_spill] sm:$0xff] %v6899_v38  ;;  %v1903_v61 = vsub.f32 %v6891_v3, %v6849_v24  ;;  %v5520_v38 = vld [vmem:[%s6307_s10 + $0xe8] sm:$0x3]  ;;  %v6932_v3 = vstv %s6833_s17  ;;  %v6951_v16 = vpop.eup %5711  ;;  %v6984_v49 = vstv %s6886_s25  ;;  %v7061_v26 = vld [vmem:[%s6307_s10 + $0xe0] sm:$0x1]  ;;  %s10439_s25 = scalar_lea.vmem %s14670_s4, %s5634_s30 }
  0xab   : > { %15244 = vst [vmem:[#allocation72_spill] sm:$0xff] %v6906_v12  ;;  %15245 = vst [vmem:[#allocation73_spill] sm:$0xff] %v6910_v19  ;;  %1499 = vrot.lane.b32.xlu1 %v15248_v41, %s6157_s11  ;;  %1497 = vrot.lane.b32.xlu0 %v6762_v33, %s6157_s11  ;;  %v332_v24 = vld [vmem:[%s6307_s10 + $0x8] sm:$0xff]  ;;  %v1905_v41 = vmul.f32 %v1899_v6, %v6425_v56  ;;  %v1933_v33 = vsub.f32 %v6916_v31, %v6939_v32  ;;  %v6949_v13 = vrot.slane %v5520_v38, 1  ;;  %v6989_v10 = vpop.eup %5713  ;;  %s11137_s30 = sld [smem:[#allocation5 + $0x7]] }
  0xac   : > { %15246 = vst [vmem:[#allocation74_spill] sm:$0xff] %v6916_v31  ;;  %15247 = vst [vmem:[#allocation75_spill] sm:$0xff] %v6923_v15  ;;  %v6955_v12 = vstv %s6851_s23  ;;  %v1907_v6 = vmul.f32 %v1901_v21, %v6425_v56  ;;  %v6964_v57 = vmul.f32 %v1903_v61, %v6425_v56  ;;  %v6968_v38 = vsel %vm1404_vm1, %v1916_v46, %v6410_v45  ;;  %v5521_v46 = vld [vmem:[%s6307_s10 + $0xf0] sm:$0xfc]  ;;  %s14347_s17 = sld [smem:[#allocation7 + $0x2]] }
  0xad   : > { %15249 = vst [vmem:[#allocation76_spill] sm:$0xff] %v6932_v3  ;;  %15250 = vst [vmem:[#allocation77_spill] sm:$0xff] %v6939_v32  ;;  %v6971_v31 = vrot.slane %v332_v24, 7  ;;  %v6978_v21 = vmul.f32 %v1900_v17, %v6425_v56  ;;  %v6981_v61 = vmul.f32 %v1902_v44, %v6425_v56  ;;  %v7001_v17 = vmul.f32 %v6951_v16, %v6589_v14  ;;  %v7011_v32 = vld [vmem:[%s6307_s10 + $0xe8] sm:$0x1]  ;;  %s14363_s23 = sld [smem:[#allocation7 + $0x5]] }
  0xae   : > { %15251 = vst [vmem:[#allocation78_spill] sm:$0xff] %v6944_v43  ;;  %15252 = vst [vmem:[#allocation79_spill] sm:$0xff] %v6949_v13  ;;  %v6960_v43 = vld [vmem:[%s6307_s10 + $0xc0] sm:$0xfe]  ;;  %v7005_v44 = vsel %vm1404_vm1, %v1920_v47, %v6949_v13  ;;  %v1953_v14 = vrot.slane %v5522_v18, 1  ;;  %v1937_v15 = vsub.f32 %v7011_v32, %v6949_v13  ;;  %v1950_v19 = vrot.slane %v5521_v46, 1 }
  0xaf   : > { %15253 = vst [vmem:[#allocation80_spill] sm:$0xff] %v6955_v12  ;;  %15254 = vst [vmem:[#allocation81_spill] sm:$0xff] %v6957_v0  ;;  %1525 = vrot.lane.b32.xlu1 %v6768_v22, %s6157_s11  ;;  %1523 = vrot.lane.b32.xlu0 %v6772_v35, %s6157_s11  ;;  %v1932_v24 = vsub.f32 %v6960_v43, %v6968_v38  ;;  %v6993_v22 = vmul.f32 %v6951_v16, %v6524_v55  ;;  %v6996_v12 = vld [vmem:[%s6307_s10 + $0x108] sm:$0xff] }
  0xb0   : > { %15255 = vst [vmem:[#allocation82_spill] sm:$0xff] %v6960_v43  ;;  %15256 = vst [vmem:[#allocation83_spill] sm:$0xff] %v6968_v38  ;;  %v1939_v35 = vmul.f32 %v1933_v33, %v6425_v56  ;;  %v7008_v38 = vpop.eup %5715  ;;  %v7014_v43 = vld [vmem:[%s6307_s10 + $0x100] sm:$0xff]  ;;  %v1935_v55 = vsub.f32 %v6868_v62, %v7005_v44  ;;  %v7021_v33 = vsel %vm1404_vm1, %v6410_v45, %v6957_v0  ;;  %v1954_v60 = vrot.slane %v6996_v12, 1 }
  0xb1   : > { %15257 = vst [vmem:[#allocation84_spill] sm:$0xff] %v6971_v31  ;;  %15258 = vst [vmem:[#allocation85_spill] sm:$0xff] %v6984_v49  ;;  %v331_v49 = vld [vmem:[%s6307_s10] sm:$0xff]  ;;  %v7024_v47 = vpop.eup %5717  ;;  %v15264_v45 = vrot.slane %v6703_v39, 1  ;;  %v7038_v18 = vmul.f32 %v6989_v10, %v6559_v30  ;;  %v1938_v13 = vmul.f32 %v1932_v24, %v6425_v56  ;;  %v1934_v46 = vsub.f32 %v6342_v20, %v7021_v33  ;;  %v334_v24 = vld [vmem:[%s6307_s10 + $0x18] sm:$0xff] }
  0xb2   : > { %15259 = vst [vmem:[#allocation86_spill] sm:$0xff] %v6996_v12  ;;  %15260 = vst [vmem:[#allocation87_spill] sm:$0xff] %v7005_v44  ;;  %v7043_v44 = vrot.slane %v331_v49, 7  ;;  %v2039_v62 = vmul.f32 %v6993_v22, %v1905_v41  ;;  %v2045_v39 = vmul.f32 %v7001_v17, %v1939_v35  ;;  %v7053_v30 = vmul.f32 %v6989_v10, %v6629_v29  ;;  %v7075_v29 = vpop.eup %5719  ;;  %v7078_v35 = vld [vmem:[%s6307_s10 + $0xf0] sm:$0xfe] }
  0xb3   : > { %15261 = vst [vmem:[#allocation88_spill] sm:$0xff] %v7011_v32  ;;  %15262 = vst [vmem:[#allocation89_spill] sm:$0xff] %v7014_v43  ;;  %1551 = vrot.lane.b32.xlu1 %v6784_v8, %s6157_s11  ;;  %1527 = vrot.lane.b32.xlu0 %v15264_v45, %s6157_s11  ;;  %v7048_v8 = vmul.f32 %v7008_v38, %v6586_v4  ;;  %v5524_v45 = vld [vmem:[%s6307_s10 + $0x118] sm:$0x3]  ;;  %v7065_v20 = vmul.f32 %v7024_v47, %v6574_v1  ;;  %v15270_v36 = vrot.slane %v7014_v43, 1 }
  0xb4   : > { %15263 = vst [vmem:[#allocation90_spill] sm:$0xff] %v7021_v33  ;;  %15265 = vst [vmem:[#allocation91_spill] sm:$0xff] %v7043_v44  ;;  %v7058_v32 = vld [vmem:[%s6307_s10 + $0xf8] sm:$0xfe]  ;;  %v1941_v41 = vmul.f32 %v1935_v55, %v6425_v56  ;;  %v7070_v4 = vmul.f32 %v7008_v38, %v6644_v58  ;;  %v7073_v49 = vsel %vm1404_vm1, %v1953_v14, %v1954_v60  ;;  %v15272_v14 = vrot.slane %v6710_v5, 1 }
  0xb5   : > { %15266 = vst [vmem:[#allocation92_spill] sm:$0xff] %v7058_v32  ;;  %15267 = vst [vmem:[#allocation93_spill] sm:$0xff] %v7061_v26  ;;  %v1943_v33 = vmul.f32 %v1937_v15, %v6425_v56  ;;  %v1936_v1 = vsub.f32 %v7061_v26, %v6957_v0  ;;  %v1967_v55 = vsub.f32 %v7058_v32, %v7073_v49  ;;  %v7098_v26 = vrot.slane %v5524_v45, 1 }
  0xb6   : > { %15268 = vst [vmem:[#allocation94_spill] sm:$0xff] %v7073_v49  ;;  %15269 = vst [vmem:[#allocation95_spill] sm:$0xff] %v7078_v35  ;;  %v7088_v58 = vsel %vm1404_vm1, %v1950_v19, %v15270_v36  ;;  %v2038_v15 = vmul.f32 %v7038_v18, %v1904_v7  ;;  %v7102_v49 = vrot.slane %v334_v24, 7  ;;  %v2041_v19 = vmul.f32 %v7048_v8, %v1907_v6  ;;  %v5523_v7 = vld [vmem:[%s6307_s10 + $0x110] sm:$0x3] }
  0xb7   : > { %15271 = vst [vmem:[#allocation96_spill] sm:$0xff] %v7088_v58  ;;  %1555 = vrot.lane.b32.xlu1 %v15272_v14, %s6157_s11  ;;  %1553 = vrot.lane.b32.xlu0 %v6791_v23, %s6157_s11  ;;  %v1966_v0 = vsub.f32 %v7078_v35, %v7088_v58  ;;  %15273 = vst [vmem:[#allocation97_spill] sm:$0xff] %v7098_v26  ;;  %v2051_v36 = vadd.f32 %v2045_v39, %v2039_v62  ;;  %v5722_v62 = vpop.eup %5721  ;;  %v15324_v58 = vld [vmem:[#allocation36_spill] sm:$0xff] }
  0xb8   : > { %15274 = vst [vmem:[#allocation98_spill] sm:$0xff] %v7102_v49  ;;  %v2044_v5 = vmul.f32 %v7053_v30, %v1938_v13  ;;  %v7108_v23 = vmul.f32 %v7024_v47, %v6635_v37  ;;  %v2043_v14 = vmul.f32 %v7065_v20, %v6964_v57  ;;  %v7115_v45 = vmul.f32 %v7075_v29, %v6605_v59 }
  0xb9   : > { %v2047_v24 = vmul.f32 %v7070_v4, %v1941_v41  ;;  %v1940_v6 = vmul.f32 %v1934_v46, %v6425_v56  ;;  %v1942_v39 = vmul.f32 %v1936_v1, %v6425_v56  ;;  %v7122_v13 = vmul.f32 %v7075_v29, %v6695_v34  ;;  %v7134_v46 = vld [vmem:[%s6307_s10 + $0x118] sm:$0x1] }
  0xba   : > { %15275 = vst [vmem:[#allocation99_spill] sm:$0xff] %v7115_v45  ;;  %v1973_v37 = vmul.f32 %v1967_v55, %v6425_v56  ;;  %v7127_v57 = vmul.f32 %v6951_v16, %v6621_v63  ;;  %15277 = vst [vmem:[#allocation101_spill] sm:$0xff] %v7134_v46  ;;  %v1972_v41 = vmul.f32 %v1966_v0, %v6425_v56  ;;  %v7145_v63 = vrot.slane %v5523_v7, 1 }
  0xbb   : > { %15276 = vst [vmem:[#allocation100_spill] sm:$0xff] %v7122_v13  ;;  %2157 = vrot.lane.b32.xlu1 %v6459_v9, %s6158_s6  ;;  %2155 = vrot.lane.b32.xlu0 %v6487_v25, %s6158_s6  ;;  %v7139_v1 = vmul.f32 %v6989_v10, %v6656_v53  ;;  %v7143_v55 = vsel %vm1404_vm1, %v1954_v60, %v7098_v26 }
  0xbc   : > { %15278 = vst [vmem:[#allocation102_spill] sm:$0xff] %v7143_v55  ;;  %15279 = vst [vmem:[#allocation103_spill] sm:$0xff] %v7145_v63  ;;  %v2050_v9 = vadd.f32 %v2044_v5, %v2038_v15  ;;  %v2049_v16 = vmul.f32 %v7108_v23, %v1943_v33  ;;  %v1969_v25 = vsub.f32 %v6996_v12, %v7143_v55  ;;  %v15329_v12 = vld [vmem:[#allocation43_spill] sm:$0xff] }
  0xbd   : > { %v1971_v0 = vsub.f32 %v7134_v46, %v7098_v26  ;;  %v7155_v53 = vmul.f32 %v5722_v62, %v6730_v48  ;;  %v2042_v60 = vmul.f32 %v7115_v45, %v6981_v61  ;;  %v2053_v10 = vadd.f32 %v2047_v24, %v2041_v19  ;;  %v15289_v26 = vld [vmem:[#allocation20_spill] sm:$0xff] }
  0xbe   : > { %v7160_v7 = vmul.f32 %v5722_v62, %v6733_v51  ;;  %v2048_v15 = vmul.f32 %v7122_v13, %v1942_v39  ;;  %v2057_v33 = vmul.f32 %v7127_v57, %v1973_v37  ;;  %v372_v5 = vsub.f32 %v6490_v27, %v7043_v44  ;;  %v15330_v46 = vld [vmem:[#allocation40_spill] sm:$0xff] }
  0xbf   : > { %v7169_v48 = vsel %vm359_vm0, %v6971_v31, %v7102_v49  ;;  %2161 = vrot.lane.b32.xlu1 %v6510_v42, %s6158_s6  ;;  %2159 = vrot.lane.b32.xlu0 %v6676_v50, %s6158_s6  ;;  %v2056_v51 = vmul.f32 %v7139_v1, %v1972_v41  ;;  %v7178_v61 = vmul.f32 %v7008_v38, %v6671_v54  ;;  %v15281_v19 = vrot.slane %v7014_v43, 1 }
  0xc0   : > { %15280 = vst [vmem:[#allocation104_spill] sm:$0xff] %v7169_v48  ;;  %v7187_v39 = vstv %s7100_s26  ;;  %v1975_v37 = vmul.f32 %v1969_v25, %v6425_v56  ;;  %v1977_v42 = vmul.f32 %v1971_v0, %v6425_v56  ;;  %v7193_v50 = vmul.f32 %v7024_v47, %v6684_v28  ;;  %v15285_v28 = vld [vmem:[#allocation15_spill] sm:$0xff]  ;;  %v15286_v0 = vld [vmem:[#allocation22_spill] sm:$0xff]  ;;  %s11879_s26 = sld [smem:[#allocation5 + $0x8]] }
  0xc1   : > { %v7184_v24 = vsel %vm1404_vm1, %v15281_v19, %v7145_v63  ;;  %15283 = vst [vmem:[#allocation106_spill] sm:$0xff] %v7187_v39  ;;  %v7197_v38 = vpop.permute.xlu1 %725  ;;  %v7199_v41 = vpop.permute.xlu0 %721  ;;  %v7202_v19 = vld [vmem:[%s6307_s10 + $0x110] sm:$0x1]  ;;  %v2040_v13 = vmul.f32 %v7155_v53, %v6978_v21  ;;  %v2046_v25 = vmul.f32 %v7160_v7, %v1940_v6  ;;  %v375_v47 = vsub.f32 %v15285_v28, %v7169_v48  ;;  %v15290_v48 = vld [vmem:[#allocation23_spill] sm:$0xff] }
  0xc2   : > { %15282 = vst [vmem:[#allocation105_spill] sm:$0xff] %v7184_v24  ;;  %v1968_v54 = vsub.f32 %v7014_v43, %v7184_v24  ;;  %15284 = vst [vmem:[#allocation107_spill] sm:$0xff] %v7202_v19  ;;  %v377_v45 = vsub.f32 %v15286_v0, %v7102_v49  ;;  %v2055_v34 = vadd.f32 %v2049_v16, %v2043_v14 }
  0xc3   : > { %v2063_v59 = vadd.f32 %v2057_v33, %v2051_v36  ;;  %v1970_v44 = vsub.f32 %v7202_v19, %v7145_v63  ;;  %v15287_v21 = vsub.f32 %v6442_v2, %v6971_v31  ;;  %2165 = vrot.lane.b32.xlu1 %v15289_v26, %s6158_s6  ;;  %2163 = vrot.lane.b32.xlu0 %v15290_v48, %s6158_s6  ;;  %v7228_v36 = vstv %s7147_s8  ;;  %s6159_s8 = smov 125  }
  0xc4   : > { %v2054_v49 = vadd.f32 %v2048_v15, %v2042_v60  ;;  %v2062_v14 = vadd.f32 %v2056_v51, %v2050_v9  ;;  %15291 = vst [vmem:[#allocation22_spill] sm:$0xff] %v7228_v36  ;;  %v7231_v16 = vmul.f32 %v7187_v39, %v372_v5  ;;  %v2059_v33 = vmul.f32 %v7178_v61, %v1975_v37 }
  0xc5   : > { %v7221_v6 = vmul.f32 %v7187_v39, %v15287_v21  ;;  %v2061_v31 = vmul.f32 %v7193_v50, %v1977_v42  ;;  %v1974_v21 = vmul.f32 %v1968_v54, %v6425_v56  ;;  %v7237_v63 = vmul.f32 %v5722_v62, %v6750_v40  ;;  %v749_v26 = vpop.permute.xlu1 %748  ;;  %v7239_v24 = vpop.permute.xlu0 %723 }
  0xc6   : > { %15292 = vst [vmem:[#allocation20_spill] sm:$0xff] %v7231_v16  ;;  %v2052_v48 = vadd.f32 %v2046_v25, %v2040_v13  ;;  %v7246_v60 = vmul.f32 %v7187_v39, %v375_v47  ;;  %v7249_v15 = vmul.f32 %v7187_v39, %v377_v45  ;;  %v2069_v5 = vmul.f32 %v2063_v59, %v6871_v11  ;;  %v15297_v13 = vld [vmem:[#allocation25_spill] sm:$0xff]  ;;  %v15322_v39 = vld [vmem:[#allocation28_spill] sm:$0xff] }
  0xc7   : > { %15288 = vst [vmem:[#allocation15_spill] sm:$0xff] %v7221_v6  ;;  %v7243_v9 = vmul.f32 %v7221_v6, %v7221_v6  ;;  %v1976_v51 = vmul.f32 %v1970_v44, %v6425_v56  ;;  %v7255_v40 = vmul.f32 %v7075_v29, %v6726_v52  ;;  %v7259_v62 = vmul.f32 %v7228_v36, %v7221_v6  ;;  %v15300_v44 = vld [vmem:[#allocation32_spill] sm:$0xff] }
  0xc8   : > { %15294 = vst [vmem:[#allocation108_spill] sm:$0xff] %v7246_v60  ;;  %15295 = vst [vmem:[#allocation109_spill] sm:$0xff] %v7249_v15  ;;  %2192 = vrot.lane.b32.xlu1 %v15297_v13, %s6158_s6  ;;  %v2068_v37 = vmul.f32 %v2062_v14, %v6871_v11  ;;  %v7266_v45 = vmul.f32 %v7231_v16, %v7231_v16  ;;  %v7270_v56 = vmul.f32 %v7228_v36, %v7231_v16 }
  0xc9   : > { %15293 = vst [vmem:[#allocation23_spill] sm:$0xff] %v7243_v9  ;;  %15296 = vst [vmem:[#allocation110_spill] sm:$0xff] %v7255_v40  ;;  %v7274_v59 = vmul.f32 %v7246_v60, %v7246_v60  ;;  %2190 = vrot.lane.b32.xlu0 %v15300_v44, %s6158_s6  ;;  %v2065_v29 = vadd.f32 %v2059_v33, %v2053_v10  ;;  %v2067_v42 = vadd.f32 %v2061_v31, %v2055_v34  ;;  %v753_v14 = vpop.permute.xlu1 %752  ;;  %v751_v13 = vpop.permute.xlu0 %750  ;;  %v15304_v31 = vld [vmem:[#allocation31_spill] sm:$0xff]  ;;  %v15306_v44 = vld [vmem:[#allocation24_spill] sm:$0xff] }
  0xca   : > { %15298 = vst [vmem:[#allocation25_spill] sm:$0xff] %v7266_v45  ;;  %v2058_v54 = vmul.f32 %v7237_v63, %v1974_v21  ;;  %v7281_v25 = vmul.f32 %v7249_v15, %v7249_v15  ;;  %v730_v47 = vsub.f32 %v6490_v27, %v7199_v41  ;;  %v7286_v52 = vstv %s7207_s9  ;;  %v15309_v9 = vld [vmem:[#allocation34_spill] sm:$0xff]  ;;  %s12565_s9 = sld [smem:[#allocation2 + $0x9]] }
  0xcb   : > { %15299 = vst [vmem:[#allocation111_spill] sm:$0xff] %v7274_v59  ;;  %15302 = vst [vmem:[#allocation112_spill] sm:$0xff] %v7286_v52  ;;  %v7290_v16 = vmul.f32 %v7228_v36, %v7246_v60  ;;  %v7294_v34 = vmul.f32 %v7228_v36, %v7249_v15  ;;  %v757_v10 = vsub.f32 %v15304_v31, %v749_v26  ;;  %v7302_v27 = vstv %s7215_s12  ;;  %v15308_v60 = vld [vmem:[#allocation13_spill] sm:$0xff]  ;;  %s12616_s12 = sld [smem:[#allocation5 + $0x9]] }
  0xcc   : > { %15301 = vst [vmem:[#allocation32_spill] sm:$0xff] %v7281_v25  ;;  %v7298_v33 = vadd.f32 %v2069_v5, %v6932_v3  ;;  %v2060_v21 = vmul.f32 %v7255_v40, %v1976_v51  ;;  %15305 = vst [vmem:[#allocation31_spill] sm:$0xff] %v7302_v27  ;;  %v758_v6 = vsub.f32 %v15306_v44, %v749_v26  ;;  %v15307_v25 = vld [vmem:[#allocation12_spill] sm:$0xff]  ;;  %2196 = vrot.lane.b32.xlu1 %v15309_v9, %s6158_s6  ;;  %v15310_v5 = vld [vmem:[#allocation27_spill] sm:$0xff] }
  0xcd   : > { %15303 = vst [vmem:[#allocation113_spill] sm:$0xff] %v7290_v16  ;;  %v732_v59 = vsub.f32 %v15307_v25, %v7239_v24  ;;  %v759_v45 = vsub.f32 %v15308_v60, %v751_v13  ;;  %v7311_v15 = vadd.f32 %v2068_v37, %v6932_v3  ;;  %v734_v31 = vsub.f32 %v15310_v5, %v7197_v38  ;;  %v15311_v51 = vld [vmem:[#allocation44_spill] sm:$0xff]  ;;  %v15312_v37 = vld [vmem:[#allocation18_spill] sm:$0xff]  ;;  %v15323_v52 = vld [vmem:[#allocation29_spill] sm:$0xff] }
  0xce   : > { %2194 = vrot.lane.b32.xlu0 %v15311_v51, %s6158_s6  ;;  %v7318_v40 = vmul.f32 %v2065_v29, %v6871_v11  ;;  %v7321_v26 = vmul.f32 %v2067_v42, %v6871_v11  ;;  %v7323_v25 = vadd.f32 %v2058_v54, %v2052_v48  ;;  %v735_v9 = vsub.f32 %v15286_v0, %v7197_v38  ;;  %v777_v51 = vpop.permute.xlu1 %776  ;;  %v775_v29 = vpop.permute.xlu0 %774  ;;  %v15313_v42 = vld [vmem:[#allocation16_spill] sm:$0xff] }
  0xcf   : > { %v731_v60 = vsub.f32 %v6442_v2, %v7199_v41  ;;  %v7330_v44 = vmul.f32 %v15312_v37, %v730_v47  ;;  %v733_v5 = vsub.f32 %v15285_v28, %v7239_v24  ;;  %v7335_v36 = vmul.f32 %v757_v10, %v15312_v37  ;;  %v15315_v28 = vld [vmem:[#allocation14_spill] sm:$0xff]  ;;  %v15318_v10 = vld [vmem:[#allocation33_spill] sm:$0xff] }
  0xd0   : > { %v760_v48 = vsub.f32 %v15313_v42, %v751_v13  ;;  %v7340_v54 = vmul.f32 %v7298_v33, %v6993_v22  ;;  %v7342_v38 = vadd.f32 %v2060_v21, %v2054_v49  ;;  %v7345_v2 = vmul.f32 %v758_v6, %v15312_v37  ;;  %v15316_v47 = vld [vmem:[#allocation26_spill] sm:$0xff]  ;;  %v15317_v22 = vld [vmem:[#allocation41_spill] sm:$0xff] }
  0xd1   : > { %v7348_v41 = vmul.f32 %v15312_v37, %v732_v59  ;;  %v7351_v24 = vmul.f32 %v759_v45, %v15312_v37  ;;  %v785_v0 = vsub.f32 %v15315_v28, %v777_v51  ;;  %2200 = vrot.lane.b32.xlu1 %v15316_v47, %s6158_s6  ;;  %v7357_v13 = vmul.f32 %v15312_v37, %v734_v31  ;;  %v15319_v6 = vld [vmem:[#allocation21_spill] sm:$0xff]  ;;  %v15320_v59 = vld [vmem:[#allocation39_spill] sm:$0xff] }
  0xd2   : > { %15314 = vst [vmem:[#allocation24_spill] sm:$0xff] %v7340_v54  ;;  %v761_v49 = vsub.f32 %v15317_v22, %v753_v14  ;;  %v762_v21 = vsub.f32 %v15318_v10, %v753_v14  ;;  %v786_v42 = vsub.f32 %v15319_v6, %v777_v51  ;;  %2198 = vrot.lane.b32.xlu0 %v15320_v59, %s6158_s6  ;;  %v7375_v22 = vpop.permute.xlu1 %800  ;;  %v779_v14 = vpop.permute.xlu0 %778  ;;  %v15321_v59 = vld [vmem:[#allocation35_spill] sm:$0xff] }
  0xd3   : > { %v7365_v45 = vmul.f32 %v15312_v37, %v735_v9  ;;  %v7368_v28 = vmul.f32 %v15312_v37, %v731_v60  ;;  %v873_v47 = vmul.f32 %v7330_v44, %v7330_v44  ;;  %v7373_v31 = vmul.f32 %v15312_v37, %v733_v5 }
  0xd4   : > { %v879_v51 = vmul.f32 %v7335_v36, %v7335_v36  ;;  %v7380_v10 = vmul.f32 %v760_v48, %v15312_v37  ;;  %v881_v9 = vmul.f32 %v7351_v24, %v7351_v24  ;;  %v7385_v60 = vmul.f32 %v785_v0, %v15312_v37 }
  0xd5   : > { %v880_v6 = vmul.f32 %v7345_v2, %v7345_v2  ;;  %v875_v5 = vmul.f32 %v7348_v41, %v7348_v41  ;;  %v783_v54 = vsub.f32 %v15321_v59, %v775_v29  ;;  %v784_v27 = vsub.f32 %v15322_v39, %v775_v29  ;;  %2225 = vrot.lane.b32.xlu1 %v15323_v52, %s6158_s6 }
  0xd6   : > { %v7396_v48 = vmul.f32 %v761_v49, %v15312_v37  ;;  %v7399_v16 = vmul.f32 %v762_v21, %v15312_v37  ;;  %v7402_v0 = vmul.f32 %v786_v42, %v15312_v37  ;;  %v893_v55 = vmul.f32 %v7385_v60, %v7385_v60  ;;  %2223 = vrot.lane.b32.xlu0 %v15324_v58, %s6158_s6  ;;  %v7418_v21 = vpop.permute.xlu1 %804  ;;  %v7420_v42 = vpop.permute.xlu0 %802 }
  0xd7   : > { %v874_v39 = vmul.f32 %v7368_v28, %v7368_v28  ;;  %v876_v52 = vmul.f32 %v7373_v31, %v7373_v31  ;;  %v7413_v29 = vmul.f32 %v783_v54, %v15312_v37  ;;  %v7416_v49 = vmul.f32 %v784_v27, %v15312_v37  ;;  %15327 = vst [vmem:[#allocation34_spill] sm:$0xff] %v7418_v21  ;;  %v15331_v21 = vld [vmem:[#allocation38_spill] sm:$0xff] }
  0xd8   : > { %15328 = vst [vmem:[#allocation27_spill] sm:$0xff] %v7420_v42  ;;  %v882_v59 = vmul.f32 %v7380_v10, %v7380_v10  ;;  %v887_v58 = vadd.f32 %v881_v9, %v875_v5  ;;  %v787_v43 = vsub.f32 %v15329_v12, %v779_v14  ;;  %v788_v19 = vsub.f32 %v15330_v46, %v779_v14 }
  0xd9   : > { %15325 = vst [vmem:[#allocation12_spill] sm:$0xff] %v7413_v29  ;;  %15326 = vst [vmem:[#allocation13_spill] sm:$0xff] %v7416_v49  ;;  %v885_v32 = vadd.f32 %v879_v51, %v873_v47  ;;  %v886_v35 = vadd.f32 %v880_v6, %v874_v39  ;;  %v891_v54 = vmul.f32 %v7413_v29, %v7413_v29  ;;  %2229 = vrot.lane.b32.xlu1 %v15331_v21, %s6158_s6  ;;  %v15332_v47 = vld [vmem:[#allocation46_spill] sm:$0xff] }
  0xda   : > { %v892_v27 = vmul.f32 %v7416_v49, %v7416_v49  ;;  %v883_v42 = vmul.f32 %v7396_v48, %v7396_v48  ;;  %v884_v9 = vmul.f32 %v7399_v16, %v7399_v16  ;;  %v894_v12 = vmul.f32 %v7402_v0, %v7402_v0  ;;  %2227 = vrot.lane.b32.xlu0 %v15332_v47, %s6158_s6  ;;  %v7446_v39 = vpop.permute.xlu1 %828  ;;  %v7448_v21 = vpop.permute.xlu0 %826 }
  0xdb   : > { %v899_v46 = vadd.f32 %v893_v55, %v887_v58  ;;  %v897_v14 = vadd.f32 %v891_v54, %v885_v32  ;;  %v7441_v6 = vmul.f32 %v787_v43, %v15312_v37  ;;  %v7444_v5 = vmul.f32 %v788_v19, %v15312_v37  ;;  %15333 = vst [vmem:[#allocation44_spill] sm:$0xff] %v7446_v39  ;;  %v15334_v54 = vld [vmem:[#allocation30_spill] sm:$0xff] }
  0xdc   : > { %v898_v51 = vadd.f32 %v892_v27, %v886_v35  ;;  %v877_v49 = vmul.f32 %v7357_v13, %v7357_v13  ;;  %v888_v29 = vadd.f32 %v882_v59, %v876_v52  ;;  %v2077_v55 = vadd.f32 %v7318_v40, %v6932_v3  ;;  %v15335_v40 = vld [vmem:[#allocation42_spill] sm:$0xff] }
  0xdd   : > { %v2070_v32 = vmul.f32 %v7323_v25, %v6871_v11  ;;  %v878_v43 = vmul.f32 %v7365_v45, %v7365_v45  ;;  %v903_v35 = vadd.f32 1e-09, %v897_v14  ;;  %v895_v58 = vmul.f32 %v7441_v6, %v7441_v6  ;;  %2233 = vrot.lane.b32.xlu1 %v15334_v54, %s6158_s6 }
  0xde   : > { %v904_v19 = vadd.f32 1e-09, %v898_v51  ;;  %v889_v27 = vadd.f32 %v883_v42, %v877_v49  ;;  %v900_v47 = vadd.f32 %v894_v12, %v888_v29  ;;  %v896_v52 = vmul.f32 %v7444_v5, %v7444_v5  ;;  %2231 = vrot.lane.b32.xlu0 %v15335_v40, %s6158_s6  ;;  %v7468_v51 = vpop.permute.xlu1 %852  ;;  %v7470_v39 = vpop.permute.xlu0 %830 }
  0xdf   : > { %v2079_v25 = vadd.f32 %v7321_v26, %v6932_v3  ;;  %v890_v59 = vadd.f32 %v884_v9, %v878_v43  ;;  %v905_v14 = vadd.f32 1e-09, %v899_v46  ;;  %5723 = vrsqrt.f32 %v903_v35  ;;  %v15340_v46 = vld [vmem:[#allocation67_spill] sm:$0xff] }
  0xe0   : > { %v7474_v49 = vmul.f32 %v7298_v33, %v7001_v17  ;;  %v901_v29 = vadd.f32 %v895_v58, %v889_v27  ;;  %v7478_v42 = vmul.f32 %v7298_v33, %v7127_v57  ;;  %v7482_v12 = vmul.f32 %v7311_v15, %v7038_v18  ;;  %v15341_v33 = vld [vmem:[#allocation68_spill] sm:$0xff] }
  0xe1   : > { %v7486_v26 = vmul.f32 %v7311_v15, %v7053_v30  ;;  %5725 = vrsqrt.f32 %v904_v19  ;;  %v902_v9 = vadd.f32 %v896_v52, %v890_v59  ;;  %2258 = vrot.lane.b32.xlu1 %v15340_v46, %s6158_s6  ;;  %v2072_v17 = vmul.f32 %v7342_v38, %v6871_v11  ;;  %v15345_v19 = vld [vmem:[#allocation19_spill] sm:$0xff]  ;;  %v15349_v52 = vld [vmem:[#allocation73_spill] sm:$0xff] }
  0xe2   : > { %15336 = vst [vmem:[#allocation18_spill] sm:$0xff] %v7474_v49  ;;  %15337 = vst [vmem:[#allocation16_spill] sm:$0xff] %v7478_v42  ;;  %v2076_v43 = vadd.f32 %v2070_v32, %v6932_v3  ;;  %v906_v57 = vadd.f32 1e-09, %v900_v47  ;;  %2256 = vrot.lane.b32.xlu0 %v15341_v33, %s6158_s6  ;;  %v7497_v18 = vmul.f32 %v7311_v15, %v7139_v1  ;;  %5727 = vrsqrt.f32 %v905_v14  ;;  %v7511_v54 = vpop.permute.xlu1 %856  ;;  %v7513_v1 = vpop.permute.xlu0 %854  ;;  %v15366_v33 = vld [vmem:[#allocation59_spill] sm:$0xff] }
  0xe3   : > { %15338 = vst [vmem:[#allocation14_spill] sm:$0xff] %v7482_v12  ;;  %15339 = vst [vmem:[#allocation26_spill] sm:$0xff] %v7486_v26  ;;  %v7500_v30 = vmul.f32 %v2077_v55, %v7048_v8  ;;  %v7503_v35 = vmul.f32 %v2079_v25, %v7065_v20  ;;  %v981_v58 = vmul.f32 %v15345_v19, %v7365_v45  ;;  %v907_v15 = vadd.f32 1e-09, %v901_v29  ;;  %v15383_v26 = vld [vmem:[#allocation82_spill] sm:$0xff] }
  0xe4   : > { %15342 = vst [vmem:[#allocation41_spill] sm:$0xff] %v7497_v18  ;;  %v976_v38 = vmul.f32 %v15345_v19, %v7330_v44  ;;  %v977_v32 = vmul.f32 %v15345_v19, %v7368_v28  ;;  %v7516_v8 = vmul.f32 %v2077_v55, %v7070_v4  ;;  %v7519_v20 = vmul.f32 %v2079_v25, %v7108_v23  ;;  %v15354_v23 = vld [vmem:[#allocation75_spill] sm:$0xff] }
  0xe5   : > { %15343 = vst [vmem:[#allocation33_spill] sm:$0xff] %v7500_v30  ;;  %15344 = vst [vmem:[#allocation21_spill] sm:$0xff] %v7503_v35  ;;  %v7522_v27 = vmul.f32 %v2077_v55, %v7178_v61  ;;  %v908_v47 = vadd.f32 1e-09, %v902_v9  ;;  %2262 = vrot.lane.b32.xlu1 %v15349_v52, %s6158_s6  ;;  %v7527_v40 = vmul.f32 %v2079_v25, %v7193_v50  ;;  %5729 = vrsqrt.f32 %v906_v57  ;;  %v15373_v52 = vld [vmem:[#allocation12_spill] sm:$0xff]  ;;  %v15382_v30 = vld [vmem:[#allocation55_spill] sm:$0xff] }
  0xe6   : > { %15346 = vst [vmem:[#allocation39_spill] sm:$0xff] %v7516_v8  ;;  %15347 = vst [vmem:[#allocation35_spill] sm:$0xff] %v7519_v20  ;;  %v7530_v59 = vadd.f32 %v2072_v17, %v6932_v3  ;;  %v7533_v14 = vmul.f32 %v2076_v43, %v7155_v53  ;;  %v7537_v4 = vmul.f32 %v15345_v19, %v7357_v13  ;;  %2260 = vrot.lane.b32.xlu0 %v15354_v23, %s6158_s6  ;;  %v7551_v53 = vpop.permute.xlu1 %1073  ;;  %v7553_v25 = vpop.permute.xlu0 %1071 }
  0xe7   : > { %15348 = vst [vmem:[#allocation28_spill] sm:$0xff] %v7522_v27  ;;  %15350 = vst [vmem:[#allocation29_spill] sm:$0xff] %v7527_v40  ;;  %v7542_v61 = vmul.f32 %v2076_v43, %v7160_v7  ;;  %v7545_v50 = vmul.f32 %v2076_v43, %v7237_v63  ;;  %v7549_v55 = vmul.f32 %v15345_v19, %v7335_v36  ;;  %5731 = vrsqrt.f32 %v907_v15  ;;  %v15365_v43 = vld [vmem:[#allocation61_spill] sm:$0xff]  ;;  %v15371_v15 = vld [vmem:[#allocation66_spill] sm:$0xff] }
  0xe8   : > { %15351 = vst [vmem:[#allocation36_spill] sm:$0xff] %v7530_v59  ;;  %15352 = vst [vmem:[#allocation43_spill] sm:$0xff] %v7533_v14  ;;  %v7556_v29 = vadd.f32 %v977_v32, %v7259_v62  ;;  %v7559_v9 = vadd.f32 %v976_v38, %v7270_v56  ;;  %v7562_v7 = vadd.f32 %v981_v58, %v7294_v34  ;;  %v15364_v56 = vld [vmem:[#allocation60_spill] sm:$0xff]  ;;  %5733 = vrsqrt.f32 %v908_v47  ;;  %v15381_v27 = vld [vmem:[#allocation27_spill] sm:$0xff] }
  0xe9   : > { %15353 = vst [vmem:[#allocation40_spill] sm:$0xff] %v7537_v4  ;;  %15355 = vst [vmem:[#allocation38_spill] sm:$0xff] %v7542_v61  ;;  %v7566_v63 = vmul.f32 %v15345_v19, %v7345_v2  ;;  %v7570_v46 = vmul.f32 %v15345_v19, %v7348_v41  ;;  %v7574_v17 = vmul.f32 %v15345_v19, %v7373_v31  ;;  %2266 = vrot.lane.b32.xlu1 %v15366_v33, %s6158_s6  ;;  %v15377_v33 = vld [vmem:[#allocation34_spill] sm:$0xff]  ;;  %v15378_v59 = vld [vmem:[#allocation72_spill] sm:$0xff] }
  0xea   : > { %15356 = vst [vmem:[#allocation46_spill] sm:$0xff] %v7545_v50  ;;  %15357 = vst [vmem:[#allocation30_spill] sm:$0xff] %v7549_v55  ;;  %v7578_v62 = vmul.f32 %v15345_v19, %v7396_v48  ;;  %v809_v34 = vsub.f32 %v15364_v56, %v7375_v22  ;;  %v810_v57 = vsub.f32 %v15365_v43, %v7375_v22  ;;  %2264 = vrot.lane.b32.xlu0 %v15371_v15, %s6158_s6  ;;  %v15375_v56 = vld [vmem:[#allocation13_spill] sm:$0xff]  ;;  %v7618_v20 = vpop.permute.xlu1 %1096  ;;  %v7620_v35 = vpop.permute.xlu0 %1075  ;;  %v7625_v14 = vld [vmem:[%s6307_s10 + $0xa0] sm:$0xff] }
  0xeb   : > { %15358 = vst [vmem:[#allocation42_spill] sm:$0xff] %v7556_v29  ;;  %15359 = vst [vmem:[#allocation67_spill] sm:$0xff] %v7559_v9  ;;  %v7588_v58 = vmul.f32 %v15345_v19, %v7399_v16  ;;  %v7592_v38 = vmul.f32 %v15345_v19, %v7351_v24  ;;  %v7596_v32 = vmul.f32 %v15345_v19, %v7380_v10  ;;  %v15379_v50 = vld [vmem:[#allocation69_spill] sm:$0xff] }
  0xec   : > { %15360 = vst [vmem:[#allocation68_spill] sm:$0xff] %v7562_v7  ;;  %15361 = vst [vmem:[#allocation19_spill] sm:$0xff] %v7566_v63  ;;  %v7600_v22 = vmul.f32 %v15345_v19, %v7385_v60  ;;  %v7606_v47 = vmul.f32 %v15345_v19, %v7402_v0  ;;  %v7610_v23 = vmul.f32 %v15345_v19, %v15373_v52  ;;  %v5724_v15 = vpop.eup %5723  ;;  %v15387_v9 = vld [vmem:[#allocation77_spill] sm:$0xff] }
  0xed   : > { %15362 = vst [vmem:[#allocation73_spill] sm:$0xff] %v7570_v46  ;;  %15363 = vst [vmem:[#allocation75_spill] sm:$0xff] %v7578_v62  ;;  %v7614_v43 = vmul.f32 %v15345_v19, %v15375_v56  ;;  %v813_v40 = vsub.f32 %v15378_v59, %v15377_v33  ;;  %v814_v61 = vsub.f32 %v15379_v50, %v15377_v33  ;;  %v7640_v50 = vld [vmem:[%s6307_s10 + $0xd0] sm:$0xff]  ;;  %v15386_v33 = vld [vmem:[#allocation44_spill] sm:$0xff]  ;;  %2291 = vrot.lane.b32.xlu1 %v15387_v9, %s6158_s6 }
  0xee   : > { %15367 = vst [vmem:[#allocation60_spill] sm:$0xff] %v7588_v58  ;;  %15368 = vst [vmem:[#allocation61_spill] sm:$0xff] %v7592_v38  ;;  %v811_v8 = vsub.f32 %v7625_v14, %v15381_v27  ;;  %v812_v18 = vsub.f32 %v15382_v30, %v15381_v27  ;;  %v835_v12 = vsub.f32 %v15383_v26, %v7448_v21  ;;  %v5726_v30 = vpop.eup %5725  ;;  %v15388_v26 = vld [vmem:[#allocation64_spill] sm:$0xff]  ;;  %v15396_v62 = vld [vmem:[#allocation90_spill] sm:$0xff] }
  0xef   : > { %15369 = vst [vmem:[#allocation59_spill] sm:$0xff] %v7596_v32  ;;  %15370 = vst [vmem:[#allocation114_spill] sm:$0xff] %v7600_v22  ;;  %v815_v59 = vmul.f32 %v809_v34, %v15312_v37  ;;  %v816_v42 = vmul.f32 %v810_v57, %v15312_v37  ;;  %v7637_v49 = vmul.f32 %v15345_v19, %v7441_v6  ;;  %v15389_v57 = vld [vmem:[#allocation74_spill] sm:$0xff]  ;;  %v15390_v22 = vld [vmem:[#allocation83_spill] sm:$0xff] }
  0xf0   : > { %15372 = vst [vmem:[#allocation66_spill] sm:$0xff] %v7606_v47  ;;  %15374 = vst [vmem:[#allocation12_spill] sm:$0xff] %v7610_v23  ;;  %v837_v7 = vsub.f32 %v7640_v50, %v15386_v33  ;;  %v7647_v27 = vmul.f32 %v5724_v15, %v7330_v44  ;;  %v838_v34 = vsub.f32 %v15388_v26, %v15386_v33  ;;  %2289 = vrot.lane.b32.xlu0 %v15390_v22, %s6158_s6  ;;  %v15392_v44 = vld [vmem:[#allocation95_spill] sm:$0xff]  ;;  %v15393_v33 = vld [vmem:[#allocation92_spill] sm:$0xff]  ;;  %v5728_v22 = vpop.eup %5727 }
  0xf1   : > { %15376 = vst [vmem:[#allocation13_spill] sm:$0xff] %v7614_v43  ;;  %15380 = vst [vmem:[#allocation34_spill] sm:$0xff] %v7625_v14  ;;  %v836_v29 = vsub.f32 %v15389_v57, %v7448_v21  ;;  %v7660_v47 = vmul.f32 %v15345_v19, %v7444_v5  ;;  %v7663_v9 = vmul.f32 %v813_v40, %v15312_v37  ;;  %v7669_v21 = vpop.permute.xlu1 %1100  ;;  %v15394_v43 = vld [vmem:[#allocation93_spill] sm:$0xff]  ;;  %v15411_v14 = vld [vmem:[#allocation102_spill] sm:$0xff] }
  0xf2   : > { %15384 = vst [vmem:[#allocation72_spill] sm:$0xff] %v7637_v49  ;;  %15385 = vst [vmem:[#allocation69_spill] sm:$0xff] %v7640_v50  ;;  %v7654_v49 = vmul.f32 %v5724_v15, %v7335_v36  ;;  %v861_v23 = vsub.f32 %v15392_v44, %v7468_v51  ;;  %v862_v26 = vsub.f32 %v15393_v33, %v7468_v51  ;;  %v7671_v36 = vpop.permute.xlu0 %1098 }
  0xf3   : > { %15391 = vst [vmem:[#allocation27_spill] sm:$0xff] %v7660_v47  ;;  %v7676_v57 = vmul.f32 %v814_v61, %v15312_v37  ;;  %v817_v19 = vmul.f32 %v811_v8, %v15312_v37  ;;  %v818_v40 = vmul.f32 %v812_v18, %v15312_v37  ;;  %v841_v47 = vmul.f32 %v835_v12, %v15312_v37  ;;  %v15395_v61 = vld [vmem:[#allocation87_spill] sm:$0xff] }
  0xf4   : > { %v7682_v44 = vmul.f32 %v5726_v30, %v7368_v28  ;;  %v843_v51 = vmul.f32 %v837_v7, %v15312_v37  ;;  %v7686_v33 = vmul.f32 %v5726_v30, %v7345_v2  ;;  %v839_v38 = vsub.f32 %v15394_v43, %v7470_v39  ;;  %2295 = vrot.lane.b32.xlu1 %v15395_v61, %s6158_s6  ;;  %v5730_v7 = vpop.eup %5729  ;;  %v15397_v61 = vld [vmem:[#allocation88_spill] sm:$0xff] }
  0xf5   : > { %v933_v8 = vmul.f32 %v7647_v27, %v815_v59  ;;  %v844_v18 = vmul.f32 %v838_v34, %v15312_v37  ;;  %v842_v12 = vmul.f32 %v836_v29, %v15312_v37  ;;  %v939_v28 = vmul.f32 %v7654_v49, %v841_v47  ;;  %2293 = vrot.lane.b32.xlu0 %v15396_v62, %s6158_s6  ;;  %v7705_v32 = vpop.permute.xlu1 %1122 }
  0xf6   : > { %v7699_v2 = vmul.f32 %v5728_v22, %v7348_v41  ;;  %v867_v43 = vmul.f32 %v861_v23, %v15312_v37  ;;  %v868_v58 = vmul.f32 %v862_v26, %v15312_v37  ;;  %v840_v59 = vsub.f32 %v15397_v61, %v7470_v39  ;;  %v7707_v34 = vpop.permute.xlu0 %1120  ;;  %v15398_v41 = vld [vmem:[#allocation107_spill] sm:$0xff]  ;;  %v15399_v23 = vld [vmem:[#allocation101_spill] sm:$0xff]  ;;  %v5732_v26 = vpop.eup %5731 }
  0xf7   : > { %v7710_v29 = vmul.f32 %v5728_v22, %v7351_v24  ;;  %v7713_v62 = vmul.f32 %v5724_v15, %v15373_v52  ;;  %v865_v47 = vsub.f32 %v15398_v41, %v7511_v54  ;;  %v866_v55 = vsub.f32 %v15399_v23, %v7511_v54  ;;  %v15400_v24 = vld [vmem:[#allocation89_spill] sm:$0xff]  ;;  %v15401_v52 = vld [vmem:[#allocation79_spill] sm:$0xff]  ;;  %v5734_v15 = vpop.eup %5733 }
  0xf8   : > { %v934_v63 = vmul.f32 %v7682_v44, %v816_v42  ;;  %v940_v39 = vmul.f32 %v7686_v33, %v842_v12  ;;  %v845_v61 = vmul.f32 %v839_v38, %v15312_v37  ;;  %v863_v4 = vsub.f32 %v15400_v24, %v7513_v1  ;;  %2299 = vrot.lane.b32.xlu1 %v15401_v52, %s6158_s6  ;;  %v15402_v42 = vld [vmem:[#allocation86_spill] sm:$0xff]  ;;  %v15403_v12 = vld [vmem:[#allocation81_spill] sm:$0xff] }
  0xf9   : > { %v7727_v46 = vmul.f32 %v5730_v7, %v7373_v31  ;;  %v7730_v54 = vmul.f32 %v5730_v7, %v7380_v10  ;;  %v945_v23 = vadd.f32 %v939_v28, %v933_v8  ;;  %v864_v41 = vsub.f32 %v15402_v42, %v7513_v1  ;;  %2297 = vrot.lane.b32.xlu0 %v15403_v12, %s6158_s6  ;;  %v7741_v50 = vpop.permute.xlu1 %1144 }
  0xfa   : > { %v935_v38 = vmul.f32 %v7699_v2, %v817_v19  ;;  %v7738_v24 = vmul.f32 %v5726_v30, %v15375_v56  ;;  %v846_v52 = vmul.f32 %v840_v59, %v15312_v37  ;;  %v7743_v31 = vpop.permute.xlu0 %1124  ;;  %v7746_v10 = vstv %s7673_s13  ;;  %s13132_s13 = sld [smem:[#allocation2 + $0xa]] }
  0xfb   : > { %15404 = vst [vmem:[#allocation55_spill] sm:$0xff] %v7746_v10  ;;  %v7749_v8 = vmul.f32 %v5732_v26, %v7357_v13  ;;  %v941_v1 = vmul.f32 %v7710_v29, %v843_v51  ;;  %v951_v28 = vmul.f32 %v7713_v62, %v867_v43  ;;  %v7754_v19 = vmul.f32 %v5732_v26, %v7396_v48  ;;  %v15405_v13 = vld [vmem:[#allocation94_spill] sm:$0xff] }
  0xfc   : > { %v7757_v56 = vmul.f32 %v5734_v15, %v7365_v45  ;;  %v946_v30 = vadd.f32 %v940_v39, %v934_v63  ;;  %v7760_v59 = vmul.f32 %v5734_v15, %v7399_v16  ;;  %v871_v42 = vmul.f32 %v865_v47, %v15312_v37  ;;  %2324 = vrot.lane.b32.xlu1 %v15405_v13, %s6158_s6  ;;  %v15406_v45 = vld [vmem:[#allocation96_spill] sm:$0xff]  ;;  %v7777_v47 = vld [vmem:[%s6307_s10 + $0x10] sm:$0xff]  ;;  %v7782_v13 = vld [vmem:[%s6307_s10 + $0x18] sm:$0xff] }
  0xfd   : > { %v936_v51 = vmul.f32 %v7727_v46, %v818_v40  ;;  %v942_v48 = vmul.f32 %v7730_v54, %v844_v18  ;;  %v957_v43 = vadd.f32 %v951_v28, %v945_v23  ;;  %v7770_v12 = vmul.f32 %v5728_v22, %v7385_v60  ;;  %2322 = vrot.lane.b32.xlu0 %v15406_v45, %s6158_s6  ;;  %v7786_v18 = vpop.permute.xlu1 %1148 }
  0xfe   : > { %v952_v16 = vmul.f32 %v7738_v24, %v868_v58  ;;  %v869_v63 = vmul.f32 %v863_v4, %v15312_v37  ;;  %15407 = vst [vmem:[#allocation82_spill] sm:$0xff] %v7777_v47  ;;  %v1082_v39 = vsub.f32 %v7777_v47, %v7551_v53  ;;  %15408 = vst [vmem:[#allocation44_spill] sm:$0xff] %v7782_v13  ;;  %v7788_v60 = vpop.permute.xlu0 %1146 }
  0xff   : > { %v1083_v40 = vsub.f32 %v7782_v13, %v7551_v53  ;;  %15409 = vst [vmem:[#allocation77_spill] sm:$0xff] %v7786_v18  ;;  %15410 = vst [vmem:[#allocation64_spill] sm:$0xff] %v7788_v60  ;;  %v937_v22 = vmul.f32 %v7749_v8, %v7663_v9  ;;  %v947_v58 = vadd.f32 %v941_v1, %v935_v38 }
 0x100   : > { %v943_v4 = vmul.f32 %v7754_v19, %v845_v61  ;;  %v7794_v23 = vmul.f32 %v5730_v7, %v7402_v0  ;;  %v938_v28 = vmul.f32 %v7757_v56, %v7676_v57  ;;  %v958_v45 = vadd.f32 %v952_v16, %v946_v30  ;;  %2328 = vrot.lane.b32.xlu1 %v15411_v14, %s6158_s6  ;;  %v15412_v7 = vld [vmem:[#allocation105_spill] sm:$0xff]  ;;  %v15413_v61 = vld [vmem:[#allocation80_spill] sm:$0xff] }
 0x101   : > { %v944_v53 = vmul.f32 %v7760_v59, %v846_v52  ;;  %v870_v10 = vmul.f32 %v864_v41, %v15312_v37  ;;  %v948_v60 = vadd.f32 %v942_v48, %v936_v51  ;;  %v963_v9 = vmul.f32 %v957_v43, %v6871_v11  ;;  %2326 = vrot.lane.b32.xlu0 %v15412_v7, %s6158_s6  ;;  %v7817_v52 = vld [vmem:[%s6307_s10] sm:$0xfe]  ;;  %v7831_v48 = vld [vmem:[%s6307_s10 + $0x30] sm:$0xfe]  ;;  %v15420_v16 = vld [vmem:[#allocation97_spill] sm:$0xff] }
 0x102   : > { %v7804_v38 = vmul.f32 %v5732_v26, %v7441_v6  ;;  %v953_v0 = vmul.f32 %v7770_v12, %v869_v63  ;;  %v872_v57 = vmul.f32 %v866_v55, %v15312_v37  ;;  %v7811_v41 = vmul.f32 %v5734_v15, %v7444_v5  ;;  %15415 = vst [vmem:[#allocation83_spill] sm:$0xff] %v7817_v52  ;;  %v7821_v26 = vpop.permute.xlu1 %1170  ;;  %v7823_v1 = vpop.permute.xlu0 %1168 }
 0x103   : > { %v7814_v14 = vmul.f32 %v15413_v61, %v1082_v39  ;;  %v1080_v6 = vsub.f32 %v7817_v52, %v7553_v25  ;;  %15416 = vst [vmem:[#allocation95_spill] sm:$0xff] %v7821_v26  ;;  %15417 = vst [vmem:[#allocation92_spill] sm:$0xff] %v7823_v1  ;;  %v949_v30 = vadd.f32 %v943_v4, %v937_v22  ;;  %v7838_v63 = vstv %s7765_s14  ;;  %v15423_v4 = vld [vmem:[#allocation103_spill] sm:$0xff]  ;;  %v8002_v26 = vld [vmem:[%s6307_s10 + $0x80] sm:$0x1]  ;;  %s13189_s14 = sld [smem:[#allocation5 + $0xa]] }
 0x104   : > { %v954_v37 = vmul.f32 %v7794_v23, %v870_v10  ;;  %v959_v55 = vadd.f32 %v953_v0, %v947_v58  ;;  %v7827_v5 = vmul.f32 %v15413_v61, %v1083_v40  ;;  %v964_v15 = vmul.f32 %v958_v45, %v6871_v11  ;;  %15419 = vst [vmem:[#allocation87_spill] sm:$0xff] %v7831_v48  ;;  %v7843_v40 = vld [vmem:[%s6307_s10 + $0x8] sm:$0xfe] }
 0x105   : > { %15414 = vst [vmem:[#allocation74_spill] sm:$0xff] %v7814_v14  ;;  %v950_v51 = vadd.f32 %v944_v53, %v938_v28  ;;  %v1105_v43 = vsub.f32 %v7831_v48, %v7618_v20  ;;  %2332 = vrot.lane.b32.xlu1 %v15420_v16, %s6158_s6  ;;  %15421 = vst [vmem:[#allocation90_spill] sm:$0xff] %v7838_v63  ;;  %v969_v10 = vadd.f32 %v963_v9, %v6932_v3  ;;  %v7855_v53 = vld [vmem:[%s6307_s10 + $0x38] sm:$0xfe]  ;;  %v7952_v63 = vld [vmem:[%s6307_s10 + $0x70] sm:$0xff] }
 0x106   : > { %15418 = vst [vmem:[#allocation93_spill] sm:$0xff] %v7827_v5  ;;  %v955_v39 = vmul.f32 %v7804_v38, %v871_v42  ;;  %v960_v22 = vadd.f32 %v954_v37, %v948_v60  ;;  %15422 = vst [vmem:[#allocation88_spill] sm:$0xff] %v7843_v40  ;;  %v1081_v58 = vsub.f32 %v7843_v40, %v7553_v25  ;;  %2330 = vrot.lane.b32.xlu0 %v15423_v4, %s6158_s6  ;;  %v7859_v60 = vpop.permute.xlu1 %1192  ;;  %v7861_v9 = vpop.permute.xlu0 %1172  ;;  %v15427_v25 = vld [vmem:[#allocation113_spill] sm:$0xff] }
 0x107   : > { %v956_v28 = vmul.f32 %v7811_v41, %v872_v57  ;;  %v7852_v45 = vmul.f32 %v7814_v14, %v7814_v14  ;;  %15424 = vst [vmem:[#allocation101_spill] sm:$0xff] %v7855_v53  ;;  %v1106_v42 = vsub.f32 %v7855_v53, %v7618_v20  ;;  %15425 = vst [vmem:[#allocation89_spill] sm:$0xff] %v7859_v60 }
 0x108   : > { %15426 = vst [vmem:[#allocation79_spill] sm:$0xff] %v7861_v9  ;;  %v7865_v0 = vadd.f32 %v7574_v17, %v15427_v25  ;;  %v961_v7 = vadd.f32 %v955_v39, %v949_v30  ;;  %v7868_v57 = vmul.f32 %v959_v55, %v6871_v11  ;;  %v7872_v37 = vmul.f32 %v7827_v5, %v7827_v5  ;;  %v15429_v17 = vld [vmem:[#allocation85_spill] sm:$0xff] }
 0x109   : > { %v7875_v20 = vmul.f32 %v15413_v61, %v1080_v6  ;;  %v7878_v16 = vadd.f32 %v964_v15, %v6932_v3  ;;  %v7880_v4 = vadd.f32 %v956_v28, %v950_v51  ;;  %v7884_v25 = vmul.f32 %v15429_v17, %v7814_v14  ;;  %2538 = vrot.lane.b32.xlu1 %v7843_v40, %s6158_s6  ;;  %v7902_v51 = vld [vmem:[%s6307_s10 + $0x40] sm:$0xff]  ;;  %v7918_v28 = vld [vmem:[%s6307_s10 + $0x48] sm:$0xff] }
 0x10a   : > { %15428 = vst [vmem:[#allocation86_spill] sm:$0xff] %v7865_v0  ;;  %v7887_v30 = vmul.f32 %v1105_v43, %v15413_v61  ;;  %v7892_v55 = vmul.f32 %v969_v10, %v7647_v27  ;;  %v7895_v6 = vmul.f32 %v960_v22, %v6871_v11  ;;  %v7899_v15 = vmul.f32 %v15429_v17, %v7827_v5  ;;  %v7981_v9 = vld [vmem:[%s6307_s10 + $0x28] sm:$0x1] }
 0x10b   : > { %15430 = vst [vmem:[#allocation81_spill] sm:$0xff] %v7884_v25  ;;  %v1107_v43 = vsub.f32 %v7902_v51, %v7671_v36  ;;  %2536 = vrot.lane.b32.xlu0 %v7817_v52, %s6158_s6  ;;  %v7909_v27 = vmul.f32 %v969_v10, %v7654_v49  ;;  %v7912_v39 = vmul.f32 %v969_v10, %v7713_v62  ;;  %v7922_v25 = vpop.permute.xlu1 %1196  ;;  %15439 = vst [vmem:[#allocation85_spill] sm:$0xff] %v7952_v63  ;;  %v7962_v52 = vld [vmem:[%s6307_s10 + $0x78] sm:$0xff] }
 0x10c   : > { %15431 = vst [vmem:[#allocation94_spill] sm:$0xff] %v7892_v55  ;;  %15432 = vst [vmem:[#allocation96_spill] sm:$0xff] %v7899_v15  ;;  %v7915_v22 = vmul.f32 %v1106_v42, %v15413_v61  ;;  %v1108_v55 = vsub.f32 %v7918_v28, %v7671_v36  ;;  %v7924_v15 = vpop.permute.xlu0 %1194  ;;  %v7927_v49 = vmul.f32 %v961_v7, %v6871_v11  ;;  %v7935_v42 = vld [vmem:[%s6307_s10 + $0x20] sm:$0x1] }
 0x10d   : > { %15433 = vst [vmem:[#allocation102_spill] sm:$0xff] %v7909_v27  ;;  %15434 = vst [vmem:[#allocation105_spill] sm:$0xff] %v7912_v39  ;;  %v7930_v62 = vmul.f32 %v15413_v61, %v1081_v58  ;;  %v1213_v10 = vmul.f32 %v7875_v20, %v7875_v20  ;;  %v1084_v36 = vsub.f32 %v7935_v42, %v7620_v35  ;;  %v7942_v27 = vld [vmem:[%s6307_s10 + $0x50] sm:$0x1]  ;;  %v7947_v58 = vld [vmem:[%s6307_s10 + $0x58] sm:$0x1]  ;;  %2542 = vrot.lane.b32.xlu1 %v7782_v13, %s6158_s6 }
 0x10e   : > { %15435 = vst [vmem:[#allocation80_spill] sm:$0xff] %v7922_v25  ;;  %15436 = vst [vmem:[#allocation97_spill] sm:$0xff] %v7924_v15  ;;  %v1219_v39 = vmul.f32 %v7887_v30, %v7887_v30  ;;  %v1109_v7 = vsub.f32 %v7942_v27, %v7669_v21  ;;  %v1110_v0 = vsub.f32 %v7947_v58, %v7669_v21  ;;  %v7967_v15 = vld [vmem:[%s6307_s10 + $0x60] sm:$0xfe]  ;;  %v7972_v25 = vld [vmem:[%s6307_s10 + $0x68] sm:$0xfe] }
 0x10f   : > { %15437 = vst [vmem:[#allocation103_spill] sm:$0xff] %v7935_v42  ;;  %15438 = vst [vmem:[#allocation113_spill] sm:$0xff] %v7947_v58  ;;  %v1131_v40 = vsub.f32 %v7952_v63, %v7705_v32  ;;  %v7959_v5 = vmul.f32 %v1107_v43, %v15413_v61  ;;  %v1132_v14 = vsub.f32 %v7962_v52, %v7705_v32  ;;  %2540 = vrot.lane.b32.xlu0 %v7777_v47, %s6158_s6  ;;  %v7991_v63 = vpop.permute.xlu1 %1412 }
 0x110   : > { %15440 = vst [vmem:[#allocation115_spill] sm:$0xff] %v7962_v52  ;;  %15441 = vst [vmem:[#allocation116_spill] sm:$0xff] %v7967_v15  ;;  %v1129_v21 = vsub.f32 %v7967_v15, %v7707_v34  ;;  %v1130_v13 = vsub.f32 %v7972_v25, %v7707_v34  ;;  %v1220_v43 = vmul.f32 %v7915_v22, %v7915_v22  ;;  %v7993_v34 = vpop.permute.xlu0 %1410 }
 0x111   : > { %15442 = vst [vmem:[#allocation117_spill] sm:$0xff] %v7972_v25  ;;  %15443 = vst [vmem:[#allocation118_spill] sm:$0xff] %v7981_v9  ;;  %v1085_v32 = vsub.f32 %v7981_v9, %v7620_v35  ;;  %v7986_v60 = vmul.f32 %v1108_v55, %v15413_v61  ;;  %v7989_v1 = vmul.f32 %v1131_v40, %v15413_v61  ;;  %v8007_v55 = vld [vmem:[%s6307_s10 + $0x88] sm:$0x1]  ;;  %2546 = vrot.lane.b32.xlu1 %v7981_v9, %s6158_s6 }
 0x112   : > { %15444 = vst [vmem:[#allocation119_spill] sm:$0xff] %v7991_v63  ;;  %15445 = vst [vmem:[#allocation120_spill] sm:$0xff] %v7993_v34  ;;  %v7996_v47 = vmul.f32 %v1129_v21, %v15413_v61  ;;  %v7999_v52 = vmul.f32 %v1130_v13, %v15413_v61  ;;  %v1133_v35 = vsub.f32 %v8002_v26, %v7743_v31 }
 0x113   : > { %15448 = vst [vmem:[#allocation123_spill] sm:$0xff] %v8002_v26  ;;  %15449 = vst [vmem:[#allocation124_spill] sm:$0xff] %v8007_v55  ;;  %v1134_v40 = vsub.f32 %v8007_v55, %v7743_v31  ;;  %v1214_v63 = vmul.f32 %v7930_v62, %v7930_v62  ;;  %v1225_v34 = vadd.f32 %v1219_v39, %v1213_v10  ;;  %2544 = vrot.lane.b32.xlu0 %v7935_v42, %s6158_s6  ;;  %v8040_v9 = vpop.permute.xlu1 %1439 }
 0x114   : > { %15446 = vst [vmem:[#allocation121_spill] sm:$0xff] %v7996_v47  ;;  %15447 = vst [vmem:[#allocation122_spill] sm:$0xff] %v7999_v52  ;;  %v8014_v21 = vmul.f32 %v1109_v7, %v15413_v61  ;;  %v8017_v13 = vmul.f32 %v1110_v0, %v15413_v61  ;;  %v1221_v26 = vmul.f32 %v7959_v5, %v7959_v5  ;;  %v8042_v55 = vpop.permute.xlu0 %1414 }
 0x115   : > { %v8024_v18 = vmul.f32 %v1132_v14, %v15413_v61  ;;  %v1231_v31 = vmul.f32 %v7996_v47, %v7996_v47  ;;  %v1232_v39 = vmul.f32 %v7999_v52, %v7999_v52  ;;  %v1226_v0 = vadd.f32 %v1220_v43, %v1214_v63  ;;  %15450 = vst [vmem:[#allocation125_spill] sm:$0xff] %v8042_v55 }
 0x116   : > { %v8033_v10 = vmul.f32 %v15413_v61, %v1084_v36  ;;  %v8036_v7 = vmul.f32 %v15413_v61, %v1085_v32  ;;  %v1222_v14 = vmul.f32 %v7986_v60, %v7986_v60  ;;  %v1233_v52 = vmul.f32 %v7989_v1, %v7989_v1  ;;  %2576 = vrot.lane.b32.xlu1 %v7855_v53, %s6158_s6 }
 0x117   : > { %v1237_v47 = vadd.f32 %v1231_v31, %v1225_v34  ;;  %v8047_v42 = vmul.f32 %v1133_v35, %v15413_v61  ;;  %v8050_v63 = vmul.f32 %v1134_v40, %v15413_v61  ;;  %v8054_v36 = vmul.f32 %v7878_v16, %v7682_v44  ;;  %2574 = vrot.lane.b32.xlu0 %v7831_v48, %s6158_s6 }
 0x118   : > { %v968_v43 = vmul.f32 %v7880_v4, %v6871_v11  ;;  %v1223_v32 = vmul.f32 %v8014_v21, %v8014_v21  ;;  %v1238_v55 = vadd.f32 %v1232_v39, %v1226_v0  ;;  %v1224_v34 = vmul.f32 %v8017_v13, %v8017_v13 }
 0x119   : > { %15451 = vst [vmem:[#allocation126_spill] sm:$0xff] %v8054_v36  ;;  %v1227_v35 = vadd.f32 %v1221_v26, %v7852_v45  ;;  %v1234_v40 = vmul.f32 %v8024_v18, %v8024_v18  ;;  %v1243_v44 = vadd.f32 1e-09, %v1237_v47  ;;  %v973_v4 = vadd.f32 %v7927_v49, %v6932_v3  ;;  %v8077_v26 = vpop.permute.xlu1 %1443  ;;  %v8079_v45 = vpop.permute.xlu0 %1441 }
 0x11a   : > { %v971_v31 = vadd.f32 %v7868_v57, %v6932_v3  ;;  %v1217_v39 = vmul.f32 %v8033_v10, %v8033_v10  ;;  %v1235_v0 = vmul.f32 %v8047_v42, %v8047_v42  ;;  %15452 = vst [vmem:[#allocation127_spill] sm:$0xff] %v8077_v26  ;;  %15453 = vst [vmem:[#allocation128_spill] sm:$0xff] %v8079_v45  ;;  %v1244_v48 = vadd.f32 1e-09, %v1238_v55 }
 0x11b   : > { %v1218_v47 = vmul.f32 %v8036_v7, %v8036_v7  ;;  %v1228_v36 = vadd.f32 %v1222_v14, %v7872_v37  ;;  %v1239_v11 = vadd.f32 %v1233_v52, %v1227_v35  ;;  %v1236_v49 = vmul.f32 %v8050_v63, %v8050_v63  ;;  %2580 = vrot.lane.b32.xlu1 %v7918_v28, %s6158_s6 }
 0x11c   : > { %v974_v57 = vadd.f32 %v968_v43, %v6932_v3  ;;  %v1229_v53 = vadd.f32 %v1223_v32, %v1217_v39  ;;  %5735 = vrsqrt.f32 %v1243_v44  ;;  %v8091_v26 = vmul.f32 %v7878_v16, %v7686_v33  ;;  %2578 = vrot.lane.b32.xlu0 %v7902_v51, %s6158_s6  ;;  %v8182_v39 = vld [vmem:[%s6307_s10 + $0x90] sm:$0xfe] }
 0x11d   : > { %v972_v45 = vadd.f32 %v7895_v6, %v6932_v3  ;;  %v1230_v37 = vadd.f32 %v1224_v34, %v1218_v47  ;;  %v1240_v52 = vadd.f32 %v1234_v40, %v1228_v36  ;;  %v8099_v14 = vmul.f32 %v7878_v16, %v7738_v24  ;;  %v8107_v32 = vpop.permute.xlu1 %1469  ;;  %v8115_v40 = vpop.permute.xlu0 %1467  ;;  %15479 = vst [vmem:[#allocation154_spill] sm:$0xff] %v8182_v39 }
 0x11e   : > { %15454 = vst [vmem:[#allocation129_spill] sm:$0xff] %v8091_v26  ;;  %v8102_v55 = vmul.f32 %v973_v4, %v7749_v8  ;;  %v8105_v43 = vmul.f32 %v973_v4, %v7754_v19  ;;  %v1241_v33 = vadd.f32 %v1235_v0, %v1229_v53  ;;  %15458 = vst [vmem:[#allocation133_spill] sm:$0xff] %v8107_v32  ;;  %v1245_v34 = vadd.f32 1e-09, %v1239_v11 }
 0x11f   : > { %15455 = vst [vmem:[#allocation130_spill] sm:$0xff] %v8099_v14  ;;  %v8110_v6 = vmul.f32 %v973_v4, %v7804_v38  ;;  %v8113_v36 = vmul.f32 %v971_v31, %v7699_v2  ;;  %v1242_v35 = vadd.f32 %v1236_v49, %v1230_v37  ;;  %15461 = vst [vmem:[#allocation136_spill] sm:$0xff] %v8115_v40  ;;  %5737 = vrsqrt.f32 %v1244_v48  ;;  %v8328_v40 = vld [vmem:[%s6307_s10 + $0x100] sm:$0xff] }
 0x120   : > { %15456 = vst [vmem:[#allocation131_spill] sm:$0xff] %v8102_v55  ;;  %15457 = vst [vmem:[#allocation132_spill] sm:$0xff] %v8105_v43  ;;  %v8118_v24 = vmul.f32 %v974_v57, %v7757_v56  ;;  %v8121_v8 = vmul.f32 %v974_v57, %v7760_v59  ;;  %v8124_v19 = vmul.f32 %v974_v57, %v7811_v41  ;;  %2584 = vrot.lane.b32.xlu1 %v7947_v58, %s6158_s6  ;;  %v8228_v55 = vld [vmem:[%s6307_s10 + $0xa8] sm:$0xff] }
 0x121   : > { %15459 = vst [vmem:[#allocation134_spill] sm:$0xff] %v8110_v6  ;;  %15460 = vst [vmem:[#allocation135_spill] sm:$0xff] %v8113_v36  ;;  %v8129_v2 = vmul.f32 %v972_v45, %v7727_v46  ;;  %v8132_v11 = vmul.f32 %v971_v31, %v7710_v29  ;;  %v8135_v38 = vmul.f32 %v972_v45, %v7730_v54  ;;  %v1246_v56 = vadd.f32 1e-09, %v1240_v52  ;;  %v8157_v53 = vpop.permute.xlu1 %1495  ;;  %v8191_v49 = vpop.permute.xlu0 %1471  ;;  %v8204_v52 = vld [vmem:[%s6307_s10 + $0xb0] sm:$0x1] }
 0x122   : > { %15462 = vst [vmem:[#allocation137_spill] sm:$0xff] %v8118_v24  ;;  %15463 = vst [vmem:[#allocation138_spill] sm:$0xff] %v8121_v8  ;;  %2582 = vrot.lane.b32.xlu0 %v7942_v27, %s6158_s6  ;;  %v8140_v59 = vmul.f32 %v971_v31, %v7770_v12  ;;  %v8143_v41 = vmul.f32 %v972_v45, %v7794_v23  ;;  %v8147_v46 = vmul.f32 %v15429_v17, %v7875_v20  ;;  %v8187_v45 = vld [vmem:[%s6307_s10 + $0x98] sm:$0xfe]  ;;  %v15489_v36 = vld [vmem:[#allocation121_spill] sm:$0xff] }
 0x123   : > { %15464 = vst [vmem:[#allocation139_spill] sm:$0xff] %v8124_v19  ;;  %15465 = vst [vmem:[#allocation140_spill] sm:$0xff] %v8129_v2  ;;  %v1247_v29 = vadd.f32 1e-09, %v1241_v33  ;;  %v8151_v54 = vmul.f32 %v15429_v17, %v7930_v62  ;;  %v8155_v48 = vmul.f32 %v15429_v17, %v7887_v30  ;;  %5739 = vrsqrt.f32 %v1245_v34  ;;  %v15484_v33 = vld [vmem:[#allocation77_spill] sm:$0xff]  ;;  %v15491_v19 = vld [vmem:[#allocation95_spill] sm:$0xff] }
 0x124   : > { %15466 = vst [vmem:[#allocation141_spill] sm:$0xff] %v8132_v11  ;;  %15467 = vst [vmem:[#allocation142_spill] sm:$0xff] %v8135_v38  ;;  %v1248_v12 = vadd.f32 1e-09, %v1242_v35  ;;  %v8161_v23 = vmul.f32 %v15429_v17, %v7915_v22  ;;  %v8165_v16 = vmul.f32 %v15429_v17, %v8033_v10  ;;  %v8169_v44 = vmul.f32 %v15429_v17, %v8036_v7  ;;  %v8213_v35 = vld [vmem:[%s6307_s10 + $0xb8] sm:$0x1] }
 0x125   : > { %15468 = vst [vmem:[#allocation143_spill] sm:$0xff] %v8140_v59  ;;  %15469 = vst [vmem:[#allocation144_spill] sm:$0xff] %v8143_v41  ;;  %v8173_v4 = vmul.f32 %v15429_v17, %v8014_v21  ;;  %2613 = vrot.lane.b32.xlu1 %v7972_v25, %s6158_s6  ;;  %v8179_v31 = vmul.f32 %v15429_v17, %v8017_v13  ;;  %5741 = vrsqrt.f32 %v1246_v56  ;;  %v15486_v59 = vld [vmem:[#allocation64_spill] sm:$0xff]  ;;  %v15487_v11 = vld [vmem:[#allocation34_spill] sm:$0xff] }
 0x126   : > { %15470 = vst [vmem:[#allocation145_spill] sm:$0xff] %v8147_v46  ;;  %15471 = vst [vmem:[#allocation146_spill] sm:$0xff] %v8151_v54  ;;  %v1153_v0 = vsub.f32 %v8182_v39, %v7741_v50  ;;  %v1154_v47 = vsub.f32 %v8187_v45, %v7741_v50  ;;  %2611 = vrot.lane.b32.xlu0 %v7967_v15, %s6158_s6  ;;  %v8197_v57 = vmul.f32 %v15429_v17, %v7959_v5  ;;  %v15493_v8 = vld [vmem:[#allocation115_spill] sm:$0xff]  ;;  %v15494_v24 = vld [vmem:[#allocation122_spill] sm:$0xff]  ;;  %v8285_v54 = vpop.permute.xlu0 %1497 }
 0x127   : > { %15472 = vst [vmem:[#allocation147_spill] sm:$0xff] %v8155_v48  ;;  %15473 = vst [vmem:[#allocation148_spill] sm:$0xff] %v8157_v53  ;;  %v8201_v37 = vmul.f32 %v15429_v17, %v7986_v60  ;;  %5743 = vrsqrt.f32 %v1247_v29  ;;  %v1157_v34 = vsub.f32 %v8204_v52, %v15484_v33  ;;  %v8210_v50 = vmul.f32 %v15429_v17, %v7989_v1  ;;  %v8265_v48 = vld [vmem:[%s6307_s10 + $0xc0] sm:$0xfe] }
 0x128   : > { %15474 = vst [vmem:[#allocation149_spill] sm:$0xff] %v8161_v23  ;;  %15475 = vst [vmem:[#allocation150_spill] sm:$0xff] %v8165_v16  ;;  %5745 = vrsqrt.f32 %v1248_v12  ;;  %v1158_v56 = vsub.f32 %v8213_v35, %v15484_v33  ;;  %v1155_v6 = vsub.f32 %v15487_v11, %v15486_v59  ;;  %v8221_v29 = vmul.f32 %v15429_v17, %v8024_v18  ;;  %v15492_v33 = vld [vmem:[#allocation69_spill] sm:$0xff]  ;;  %v15511_v53 = vld [vmem:[#allocation80_spill] sm:$0xff] }
 0x129   : > { %15476 = vst [vmem:[#allocation151_spill] sm:$0xff] %v8169_v44  ;;  %15477 = vst [vmem:[#allocation152_spill] sm:$0xff] %v8173_v4  ;;  %v8225_v43 = vmul.f32 %v15429_v17, %v15489_v36  ;;  %v1156_v12 = vsub.f32 %v8228_v55, %v15486_v59  ;;  %v1179_v41 = vsub.f32 %v15492_v33, %v15491_v19  ;;  %2617 = vrot.lane.b32.xlu1 %v15493_v8, %s6158_s6  ;;  %v5736_v38 = vpop.eup %5735  ;;  %v15498_v4 = vld [vmem:[#allocation85_spill] sm:$0xff] }
 0x12a   : > { %15478 = vst [vmem:[#allocation153_spill] sm:$0xff] %v8179_v31  ;;  %15480 = vst [vmem:[#allocation155_spill] sm:$0xff] %v8187_v45  ;;  %v8238_v2 = vmul.f32 %v15429_v17, %v15494_v24  ;;  %v1159_v14 = vmul.f32 %v1153_v0, %v15413_v61  ;;  %v8242_v26 = vmul.f32 %v1154_v47, %v15413_v61  ;;  %2615 = vrot.lane.b32.xlu0 %v15498_v4, %s6158_s6  ;;  %v8260_v0 = vld [vmem:[%s6307_s10 + $0xd8] sm:$0xff]  ;;  %v15502_v44 = vld [vmem:[#allocation89_spill] sm:$0xff] }
 0x12b   : > { %15481 = vst [vmem:[#allocation156_spill] sm:$0xff] %v8191_v49  ;;  %15482 = vst [vmem:[#allocation157_spill] sm:$0xff] %v8197_v57  ;;  %v8246_v59 = vmul.f32 %v15429_v17, %v8047_v42  ;;  %v8254_v31 = vmul.f32 %v15429_v17, %v8050_v63  ;;  %v1180_v47 = vsub.f32 %v8260_v0, %v15491_v19  ;;  %v8281_v19 = vld [vmem:[%s6307_s10 + $0xf0] sm:$0xfe]  ;;  %v15513_v49 = vld [vmem:[#allocation123_spill] sm:$0xff] }
 0x12c   : > { %15483 = vst [vmem:[#allocation158_spill] sm:$0xff] %v8201_v37  ;;  %15485 = vst [vmem:[#allocation77_spill] sm:$0xff] %v8210_v50  ;;  %v8270_v16 = vmul.f32 %v1158_v56, %v15413_v61  ;;  %v8273_v17 = vmul.f32 %v1155_v6, %v15413_v61  ;;  %v1201_v46 = vsub.f32 %v8281_v19, %v15502_v44  ;;  %v5738_v57 = vpop.eup %5737  ;;  %v8302_v37 = vld [vmem:[%s6307_s10 + $0xf8] sm:$0xfe]  ;;  %v8335_v8 = vld [vmem:[%s6307_s10 + $0x108] sm:$0xff] }
 0x12d   : > { %15488 = vst [vmem:[#allocation64_spill] sm:$0xff] %v8221_v29  ;;  %15490 = vst [vmem:[#allocation34_spill] sm:$0xff] %v8225_v43  ;;  %v8248_v43 = vpop.permute.xlu1 %1499  ;;  %v8288_v50 = vmul.f32 %v5736_v38, %v7875_v20  ;;  %v8291_v6 = vmul.f32 %v1156_v12, %v15413_v61  ;;  %v8294_v56 = vmul.f32 %v1179_v41, %v15413_v61  ;;  %v15506_v29 = vld [vmem:[#allocation124_spill] sm:$0xff]  ;;  %v15509_v12 = vld [vmem:[#allocation79_spill] sm:$0xff] }
 0x12e   : > { %15495 = vst [vmem:[#allocation121_spill] sm:$0xff] %v8238_v2  ;;  %15496 = vst [vmem:[#allocation95_spill] sm:$0xff] %v8246_v59  ;;  %v8257_v2 = vmul.f32 %v1157_v34, %v15413_v61  ;;  %v15500_v59 = vld [vmem:[#allocation92_spill] sm:$0xff]  ;;  %v8276_v34 = vld [vmem:[%s6307_s10 + $0xc8] sm:$0xfe]  ;;  %2621 = vrot.lane.b32.xlu1 %v15506_v29, %s6158_s6  ;;  %v1202_v20 = vsub.f32 %v8302_v37, %v15502_v44  ;;  %2619 = vrot.lane.b32.xlu0 %v15513_v49, %s6158_s6 }
 0x12f   : > { %15497 = vst [vmem:[#allocation122_spill] sm:$0xff] %v8248_v43  ;;  %15499 = vst [vmem:[#allocation159_spill] sm:$0xff] %v8254_v31  ;;  %v1177_v23 = vsub.f32 %v8265_v48, %v15500_v59  ;;  %v1178_v31 = vsub.f32 %v8276_v34, %v15500_v59  ;;  %v8297_v59 = vmul.f32 %v5736_v38, %v7887_v30  ;;  %v8312_v43 = vld [vmem:[%s6307_s10 + $0xe8] sm:$0x1]  ;;  %v15519_v49 = vld [vmem:[#allocation82_spill] sm:$0xff] }
 0x130   : > { %15501 = vst [vmem:[#allocation92_spill] sm:$0xff] %v8281_v19  ;;  %15503 = vst [vmem:[#allocation89_spill] sm:$0xff] %v8285_v54  ;;  %v8307_v54 = vld [vmem:[%s6307_s10 + $0xe0] sm:$0x1]  ;;  %v1182_v30 = vsub.f32 %v8312_v43, %v15509_v12  ;;  %v15512_v19 = vld [vmem:[#allocation107_spill] sm:$0xff]  ;;  %v1186_v25 = vmul.f32 %v1180_v47, %v15413_v61 }
 0x131   : > { %15504 = vst [vmem:[#allocation160_spill] sm:$0xff] %v8288_v50  ;;  %15505 = vst [vmem:[#allocation161_spill] sm:$0xff] %v8297_v59  ;;  %v1181_v41 = vsub.f32 %v8307_v54, %v15509_v12  ;;  %v1205_v29 = vsub.f32 %v15512_v19, %v15511_v53  ;;  %v1183_v44 = vmul.f32 %v1177_v23, %v15413_v61  ;;  %v15518_v23 = vld [vmem:[#allocation119_spill] sm:$0xff]  ;;  %v8341_v33 = vpop.permute.xlu1 %1525  ;;  %v15526_v4 = vld [vmem:[#allocation120_spill] sm:$0xff] }
 0x132   : > { %15507 = vst [vmem:[#allocation162_spill] sm:$0xff] %v8302_v37  ;;  %15508 = vst [vmem:[#allocation163_spill] sm:$0xff] %v8307_v54  ;;  %v8323_v37 = vld [vmem:[%s6307_s10 + $0x118] sm:$0x1]  ;;  %v15516_v54 = vld [vmem:[#allocation97_spill] sm:$0xff]  ;;  %v1207_v19 = vmul.f32 %v1201_v46, %v15413_v61  ;;  %v1421_v58 = vsub.f32 %v15519_v49, %v15518_v23  ;;  %2650 = vrot.lane.b32.xlu1 %v8187_v45, %s6158_s6  ;;  %2648 = vrot.lane.b32.xlu0 %v8182_v39, %s6158_s6 }
 0x133   : > { %15510 = vst [vmem:[#allocation79_spill] sm:$0xff] %v8312_v43  ;;  %15514 = vst [vmem:[#allocation80_spill] sm:$0xff] %v8323_v37  ;;  %v1206_v15 = vsub.f32 %v8323_v37, %v15511_v53  ;;  %v1203_v12 = vsub.f32 %v8328_v40, %v15516_v54  ;;  %v1184_v43 = vmul.f32 %v1178_v31, %v15413_v61  ;;  %v5740_v53 = vpop.eup %5739 }
 0x134   : > { %15515 = vst [vmem:[#allocation107_spill] sm:$0xff] %v8328_v40  ;;  %15517 = vst [vmem:[#allocation97_spill] sm:$0xff] %v8335_v8  ;;  %v1204_v47 = vsub.f32 %v8335_v8, %v15516_v54  ;;  %v8344_v37 = vmul.f32 %v5738_v57, %v7930_v62  ;;  %v1273_v40 = vmul.f32 %v8288_v50, %v1159_v14  ;;  %v8359_v62 = vpop.permute.xlu0 %1523  ;;  %v15525_v50 = vld [vmem:[#allocation112_spill] sm:$0xff] }
 0x135   : > { %15520 = vst [vmem:[#allocation119_spill] sm:$0xff] %v8341_v33  ;;  %v8348_v31 = vmul.f32 %v5738_v57, %v7915_v22  ;;  %v1279_v46 = vmul.f32 %v8297_v59, %v1183_v44  ;;  %v1208_v54 = vmul.f32 %v1202_v20, %v15413_v61  ;;  %v1187_v49 = vmul.f32 %v1181_v41, %v15413_v61  ;;  %v5742_v22 = vpop.eup %5741  ;;  %v15523_v41 = vld [vmem:[#allocation44_spill] sm:$0xff] }
 0x136   : > { %15521 = vst [vmem:[#allocation82_spill] sm:$0xff] %v8344_v37  ;;  %v1188_v33 = vmul.f32 %v1182_v30, %v15413_v61  ;;  %v8357_v8 = vmul.f32 %v1205_v29, %v15413_v61  ;;  %15522 = vst [vmem:[#allocation164_spill] sm:$0xff] %v8359_v62  ;;  %v8364_v14 = vmul.f32 %v5736_v38, %v15489_v36  ;;  %v5744_v45 = vpop.eup %5743  ;;  %v15524_v29 = vld [vmem:[#allocation74_spill] sm:$0xff]  ;;  %v15527_v36 = vld [vmem:[#allocation83_spill] sm:$0xff]  ;;  %2654 = vrot.lane.b32.xlu1 %v8228_v55, %s6158_s6 }
 0x137   : > { %v8367_v44 = vmul.f32 %v1206_v15, %v15413_v61  ;;  %v1209_v20 = vmul.f32 %v1203_v12, %v15413_v61  ;;  %v1422_v30 = vsub.f32 %v15523_v41, %v15518_v23  ;;  %v8373_v59 = vmul.f32 %v5740_v53, %v15524_v29  ;;  %v5746_v32 = vpop.eup %5745  ;;  %v15529_v29 = vld [vmem:[#allocation88_spill] sm:$0xff]  ;;  %2652 = vrot.lane.b32.xlu0 %v15487_v11, %s6158_s6 }
 0x138   : > { %v1210_v62 = vmul.f32 %v1204_v47, %v15413_v61  ;;  %v8377_v39 = vmul.f32 %v15525_v50, %v1421_v58  ;;  %v1419_v38 = vsub.f32 %v15527_v36, %v15526_v4  ;;  %v1274_v15 = vmul.f32 %v8344_v37, %v8242_v26  ;;  %v15528_v61 = vld [vmem:[#allocation93_spill] sm:$0xff]  ;;  %v15530_v26 = vld [vmem:[#allocation87_spill] sm:$0xff]  ;;  %v8425_v11 = vpop.permute.xlu0 %1527 }
 0x139   : > { %v8384_v12 = vmul.f32 %v5740_v53, %v7959_v5  ;;  %v1280_v23 = vmul.f32 %v8348_v31, %v1184_v43  ;;  %v1285_v41 = vadd.f32 %v1279_v46, %v1273_v40  ;;  %v8390_v47 = vmul.f32 %v5742_v22, %v15528_v61  ;;  %v8399_v5 = vpop.permute.xlu1 %1551  ;;  %15532 = vst [vmem:[#allocation74_spill] sm:$0xff] %v8425_v11 }
 0x13a   : > { %v8393_v58 = vmul.f32 %v5742_v22, %v7986_v60  ;;  %v1420_v36 = vsub.f32 %v15529_v29, %v15526_v4  ;;  %v1448_v37 = vsub.f32 %v15530_v26, %v8040_v9  ;;  %15531 = vst [vmem:[#allocation44_spill] sm:$0xff] %v8399_v5  ;;  %v8404_v43 = vmul.f32 %v5744_v45, %v8033_v10 }
 0x13b   : > { %v8407_v40 = vmul.f32 %v5738_v57, %v15494_v24  ;;  %v1291_v60 = vmul.f32 %v8364_v14, %v1207_v19  ;;  %v8411_v46 = vmul.f32 %v5744_v45, %v8014_v21  ;;  %v8414_v4 = vmul.f32 %v5746_v32, %v8036_v7  ;;  %2658 = vrot.lane.b32.xlu1 %v8213_v35, %s6158_s6 }
 0x13c   : > { %v8417_v61 = vmul.f32 %v5746_v32, %v8017_v13  ;;  %v8420_v26 = vmul.f32 %v15525_v50, %v1422_v30  ;;  %v8423_v10 = vmul.f32 %v15525_v50, %v1419_v38  ;;  %v1275_v24 = vmul.f32 %v8373_v59, %v8273_v17  ;;  %v15533_v38 = vld [vmem:[#allocation101_spill] sm:$0xff]  ;;  %2656 = vrot.lane.b32.xlu0 %v8204_v52, %s6158_s6 }
 0x13d   : > { %v1281_v21 = vmul.f32 %v8384_v12, %v8294_v56  ;;  %v1286_v57 = vadd.f32 %v1280_v23, %v1274_v15  ;;  %v1297_v7 = vadd.f32 %v1291_v60, %v1285_v41  ;;  %v1276_v13 = vmul.f32 %v8390_v47, %v8291_v6  ;;  %v15535_v23 = vld [vmem:[#allocation103_spill] sm:$0xff]  ;;  %v8458_v60 = vpop.permute.xlu1 %1555 }
 0x13e   : > { %v1282_v19 = vmul.f32 %v8393_v58, %v1186_v25  ;;  %v8437_v30 = vmul.f32 %v5740_v53, %v7989_v1  ;;  %v1449_v29 = vsub.f32 %v15533_v38, %v8040_v9  ;;  %v1277_v17 = vmul.f32 %v8404_v43, %v8257_v2  ;;  %v15534_v53 = vld [vmem:[#allocation125_spill] sm:$0xff]  ;;  %15536 = vst [vmem:[#allocation112_spill] sm:$0xff] %v8458_v60 }
 0x13f   : > { %v1292_v56 = vmul.f32 %v8407_v40, %v1208_v54  ;;  %v1283_v15 = vmul.f32 %v8411_v46, %v1187_v49  ;;  %v8448_v6 = vmul.f32 %v5744_v45, %v8047_v42  ;;  %v1278_v1 = vmul.f32 %v8414_v4, %v8270_v16  ;;  %v15537_v38 = vld [vmem:[#allocation65_spill] sm:$0xff]  ;;  %2687 = vrot.lane.b32.xlu1 %v8276_v34, %s6158_s6 }
 0x140   : > { %v1284_v25 = vmul.f32 %v8417_v61, %v1188_v33  ;;  %v8454_v9 = vmul.f32 %v5742_v22, %v8024_v18  ;;  %v1423_v41 = vsub.f32 %v15535_v23, %v15534_v53  ;;  %v1287_v2 = vadd.f32 %v1281_v21, %v1275_v24  ;;  %v8476_v22 = vpop.permute.xlu0 %1553  ;;  %2685 = vrot.lane.b32.xlu0 %v8265_v48, %s6158_s6 }
 0x141   : > { %v1298_v54 = vadd.f32 %v1292_v56, %v1286_v57  ;;  %v1303_v49 = vmul.f32 %v1297_v7, %v15537_v38  ;;  %v8462_v42 = vmul.f32 %v5746_v32, %v8050_v63  ;;  %v1574_v16 = vmul.f32 %v8377_v39, %v8377_v39  ;;  %15538 = vst [vmem:[#allocation120_spill] sm:$0xff] %v8476_v22 }
 0x142   : > { %v1575_v18 = vmul.f32 %v8420_v26, %v8420_v26  ;;  %v8471_v45 = vmul.f32 %v15525_v50, %v1420_v36  ;;  %v8474_v33 = vmul.f32 %v1448_v37, %v15525_v50  ;;  %v1288_v63 = vadd.f32 %v1282_v19, %v1276_v13  ;;  %v15539_v37 = vld [vmem:[#allocation128_spill] sm:$0xff]  ;;  %v15541_v19 = vld [vmem:[#allocation133_spill] sm:$0xff] }
 0x143   : > { %v1289_v32 = vadd.f32 %v1283_v15, %v1277_v17  ;;  %v1295_v24 = vmul.f32 %v8448_v6, %v8357_v8  ;;  %v1293_v21 = vmul.f32 %v8437_v30, %v1209_v20  ;;  %v1290_v57 = vadd.f32 %v1284_v25, %v1278_v1  ;;  %2691 = vrot.lane.b32.xlu1 %v8260_v0, %s6158_s6  ;;  %v15540_v20 = vld [vmem:[#allocation127_spill] sm:$0xff]  ;;  %v15542_v17 = vld [vmem:[#allocation85_spill] sm:$0xff]  ;;  %v8506_v1 = vpop.permute.xlu1 %2157 }
 0x144   : > { %v1294_v7 = vmul.f32 %v8454_v9, %v1210_v62  ;;  %v8485_v36 = vmul.f32 %v1449_v29, %v15525_v50  ;;  %v1450_v56 = vsub.f32 %v7902_v51, %v15539_v37  ;;  %v1304_v23 = vmul.f32 %v1298_v54, %v15537_v38  ;;  %15543 = vst [vmem:[#allocation93_spill] sm:$0xff] %v8506_v1  ;;  %v15545_v54 = vld [vmem:[#allocation113_spill] sm:$0xff] }
 0x145   : > { %v8491_v22 = vadd.f32 %v1303_v49, %v6932_v3  ;;  %v1296_v13 = vmul.f32 %v8462_v42, %v8367_v44  ;;  %v1299_v8 = vadd.f32 %v1293_v21, %v1287_v2  ;;  %v1452_v62 = vsub.f32 %v7942_v27, %v15540_v20  ;;  %v15544_v44 = vld [vmem:[#allocation69_spill] sm:$0xff] }
 0x146   : > { %v1451_v29 = vsub.f32 %v7918_v28, %v15539_v37  ;;  %v8502_v51 = vmul.f32 %v1450_v56, %v15525_v50  ;;  %v1478_v15 = vsub.f32 %v15542_v17, %v15541_v19  ;;  %2689 = vrot.lane.b32.xlu0 %v15544_v44, %s6158_s6  ;;  %v1301_v25 = vadd.f32 %v1295_v24, %v1289_v32  ;;  %v8523_v17 = vpop.permute.xlu0 %2155 }
 0x147   : > { %v8510_v2 = vadd.f32 %v1294_v7, %v1288_v63  ;;  %v1572_v27 = vmul.f32 %v8423_v10, %v8423_v10  ;;  %v1453_v28 = vsub.f32 %v15545_v54, %v15540_v20  ;;  %v1302_v49 = vadd.f32 %v1296_v13, %v1290_v57  ;;  %15547 = vst [vmem:[#allocation101_spill] sm:$0xff] %v8523_v17  ;;  %v15548_v63 = vld [vmem:[#allocation118_spill] sm:$0xff]  ;;  %v15549_v7 = vld [vmem:[#allocation115_spill] sm:$0xff]  ;;  %v15555_v17 = vld [vmem:[#allocation116_spill] sm:$0xff] }
 0x148   : > { %v1578_v21 = vmul.f32 %v8474_v33, %v8474_v33  ;;  %v1579_v37 = vmul.f32 %v8485_v36, %v8485_v36  ;;  %v8521_v56 = vmul.f32 %v1451_v29, %v15525_v50  ;;  %v1424_v32 = vsub.f32 %v15548_v63, %v15534_v53  ;;  %v15551_v20 = vld [vmem:[#allocation79_spill] sm:$0xff] }
 0x149   : > { %v1580_v24 = vmul.f32 %v8502_v51, %v8502_v51  ;;  %v1479_v57 = vsub.f32 %v15549_v7, %v15541_v19  ;;  %v8532_v13 = vmul.f32 %v1478_v15, %v15525_v50  ;;  %2695 = vrot.lane.b32.xlu1 %v15551_v20, %s6158_s6  ;;  %v1573_v29 = vmul.f32 %v8471_v45, %v8471_v45  ;;  %v15552_v19 = vld [vmem:[#allocation163_spill] sm:$0xff] }
 0x14a   : > { %15546 = vst [vmem:[#allocation87_spill] sm:$0xff] %v8521_v56  ;;  %v8539_v44 = vmul.f32 %v15525_v50, %v1423_v41  ;;  %v8542_v53 = vmul.f32 %v1452_v62, %v15525_v50  ;;  %v1581_v54 = vmul.f32 %v8521_v56, %v8521_v56  ;;  %2693 = vrot.lane.b32.xlu0 %v15552_v19, %s6158_s6  ;;  %v15554_v41 = vld [vmem:[#allocation136_spill] sm:$0xff]  ;;  %v15556_v56 = vld [vmem:[#allocation117_spill] sm:$0xff]  ;;  %v8561_v19 = vpop.permute.xlu1 %2161 }
 0x14b   : > { %15550 = vst [vmem:[#allocation125_spill] sm:$0xff] %v8532_v13  ;;  %v8549_v15 = vmul.f32 %v1453_v28, %v15525_v50  ;;  %v8552_v7 = vmul.f32 %v1479_v57, %v15525_v50  ;;  %v1592_v63 = vmul.f32 %v8532_v13, %v8532_v13  ;;  %v1476_v1 = vsub.f32 %v15555_v17, %v15554_v41  ;;  %v15559_v17 = vld [vmem:[#allocation162_spill] sm:$0xff] }
 0x14c   : > { %v1305_v62 = vmul.f32 %v1299_v8, %v15537_v38  ;;  %v1584_v60 = vadd.f32 %v1578_v21, %v1572_v27  ;;  %v1585_v20 = vadd.f32 %v1579_v37, %v1573_v29  ;;  %v1477_v11 = vsub.f32 %v15556_v56, %v15554_v41  ;;  %15557 = vst [vmem:[#allocation128_spill] sm:$0xff] %v8561_v19  ;;  %v15561_v37 = vld [vmem:[#allocation156_spill] sm:$0xff] }
 0x14d   : > { %15553 = vst [vmem:[#allocation103_spill] sm:$0xff] %v8552_v7  ;;  %v8564_v28 = vmul.f32 %v15525_v50, %v1424_v32  ;;  %v1586_v57 = vadd.f32 %v1580_v24, %v1574_v16  ;;  %v1593_v5 = vmul.f32 %v8552_v7, %v8552_v7  ;;  %v8569_v13 = vmul.f32 %v1476_v1, %v15525_v50  ;;  %v15562_v32 = vld [vmem:[#allocation123_spill] sm:$0xff]  ;;  %v8580_v16 = vpop.permute.xlu0 %2159  ;;  %v15564_v24 = vld [vmem:[#allocation92_spill] sm:$0xff] }
 0x14e   : > { %2724 = vrot.lane.b32.xlu1 %v15559_v17, %s6158_s6  ;;  %v1582_v8 = vmul.f32 %v8542_v53, %v8542_v53  ;;  %v1587_v27 = vadd.f32 %v1581_v54, %v1575_v18  ;;  %v8576_v21 = vmul.f32 %v1477_v11, %v15525_v50  ;;  %v1480_v29 = vsub.f32 %v15562_v32, %v15561_v37  ;;  %v15565_v32 = vld [vmem:[#allocation124_spill] sm:$0xff] }
 0x14f   : > { %15558 = vst [vmem:[#allocation127_spill] sm:$0xff] %v8569_v13  ;;  %15563 = vst [vmem:[#allocation85_spill] sm:$0xff] %v8580_v16  ;;  %2722 = vrot.lane.b32.xlu0 %v15564_v24, %s6158_s6  ;;  %v1576_v1 = vmul.f32 %v8539_v44, %v8539_v44  ;;  %v1583_v41 = vmul.f32 %v8549_v15, %v8549_v15  ;;  %v1598_v56 = vadd.f32 %v1592_v63, %v1586_v57 }
 0x150   : > { %15560 = vst [vmem:[#allocation133_spill] sm:$0xff] %v8576_v21  ;;  %v1590_v18 = vmul.f32 %v8569_v13, %v8569_v13  ;;  %v1599_v11 = vadd.f32 %v1593_v5, %v1587_v27  ;;  %v1591_v54 = vmul.f32 %v8576_v21, %v8576_v21  ;;  %v1481_v16 = vsub.f32 %v15565_v32, %v15561_v37  ;;  %v15567_v13 = vld [vmem:[#allocation97_spill] sm:$0xff] }
 0x151   : > { %v8595_v19 = vmul.f32 %v1480_v29, %v15525_v50  ;;  %v1310_v7 = vadd.f32 %v1304_v23, %v6932_v3  ;;  %v1307_v17 = vmul.f32 %v1301_v25, %v15537_v38  ;;  %v1577_v63 = vmul.f32 %v8564_v28, %v8564_v28  ;;  %v8608_v29 = vpop.permute.xlu1 %2165  ;;  %v15569_v23 = vld [vmem:[#allocation107_spill] sm:$0xff] }
 0x152   : > { %v1596_v57 = vadd.f32 %v1590_v18, %v1584_v60  ;;  %2728 = vrot.lane.b32.xlu1 %v15567_v13, %s6158_s6  ;;  %v1588_v5 = vadd.f32 %v1582_v8, %v1576_v1  ;;  %v1597_v27 = vadd.f32 %v1591_v54, %v1585_v20  ;;  %v8604_v21 = vmul.f32 %v1481_v16, %v15525_v50  ;;  %v8615_v1 = vpop.permute.xlu0 %2163 }
 0x153   : > { %15566 = vst [vmem:[#allocation69_spill] sm:$0xff] %v8595_v19  ;;  %v1594_v37 = vmul.f32 %v8595_v19, %v8595_v19  ;;  %15568 = vst [vmem:[#allocation113_spill] sm:$0xff] %v8608_v29  ;;  %2726 = vrot.lane.b32.xlu0 %v15569_v23, %s6158_s6  ;;  %v1308_v25 = vmul.f32 %v1302_v49, %v15537_v38  ;;  %v1589_v32 = vadd.f32 %v1583_v41, %v1577_v63  ;;  %v15571_v29 = vld [vmem:[#allocation31_spill] sm:$0xff] }
 0x154   : > { %v1604_v60 = vadd.f32 1e-09, %v1598_v56  ;;  %v1602_v18 = vadd.f32 1e-09, %v1596_v57  ;;  %v1605_v13 = vadd.f32 1e-09, %v1599_v11  ;;  %v1595_v20 = vmul.f32 %v8604_v21, %v8604_v21 }
 0x155   : > { %v1603_v8 = vadd.f32 1e-09, %v1597_v27  ;;  %v1600_v16 = vadd.f32 %v1594_v37, %v1588_v5  ;;  %15570 = vst [vmem:[#allocation115_spill] sm:$0xff] %v8615_v1  ;;  %v1306_v54 = vmul.f32 %v8510_v2, %v15537_v38  ;;  %v8621_v19 = vmul.f32 %v15571_v29, %v8377_v39  ;;  %v15574_v56 = vld [vmem:[#allocation80_spill] sm:$0xff]  ;;  %v8631_v57 = vld [vmem:[%s6307_s10 + $0x110] sm:$0x1] }
 0x156   : > { %v8625_v49 = vmul.f32 %v15571_v29, %v8420_v26  ;;  %5747 = vrsqrt.f32 %v1602_v18  ;;  %2732 = vrot.lane.b32.xlu1 %v15574_v56, %s6158_s6  ;;  %v1311_v41 = vadd.f32 %v1305_v62, %v6932_v3  ;;  %v1601_v11 = vadd.f32 %v1595_v20, %v1589_v32  ;;  %v15575_v2 = vld [vmem:[#allocation160_spill] sm:$0xff]  ;;  %v15577_v18 = vld [vmem:[#allocation82_spill] sm:$0xff]  ;;  %v15579_v62 = vld [vmem:[#allocation161_spill] sm:$0xff]  ;;  %v8652_v20 = vpop.permute.xlu1 %2192 }
 0x157   : > { %15572 = vst [vmem:[#allocation136_spill] sm:$0xff] %v8621_v19  ;;  %5749 = vrsqrt.f32 %v1603_v8  ;;  %v1606_v63 = vadd.f32 1e-09, %v1600_v16  ;;  %2730 = vrot.lane.b32.xlu0 %v8631_v57, %s6158_s6  ;;  %v8637_v5 = vmul.f32 %v8491_v22, %v15575_v2  ;;  %v1313_v27 = vadd.f32 %v1307_v17, %v6932_v3  ;;  %v15584_v2 = vld [vmem:[#allocation84_spill] sm:$0xff]  ;;  %v15638_v1 = vld [vmem:[#allocation83_spill] sm:$0xff] }
 0x158   : > { %15573 = vst [vmem:[#allocation116_spill] sm:$0xff] %v8625_v49  ;;  %v1314_v37 = vadd.f32 %v1308_v25, %v6932_v3  ;;  %5751 = vrsqrt.f32 %v1604_v60  ;;  %v8642_v19 = vmul.f32 %v1310_v7, %v15577_v18  ;;  %v8646_v32 = vmul.f32 %v8491_v22, %v15579_v62  ;;  %v15600_v62 = vld [vmem:[#allocation154_spill] sm:$0xff] }
 0x159   : > { %15576 = vst [vmem:[#allocation156_spill] sm:$0xff] %v8637_v5  ;;  %v8650_v8 = vmul.f32 %v8491_v22, %v8364_v14  ;;  %5753 = vrsqrt.f32 %v1605_v13  ;;  %v8655_v16 = vmul.f32 %v1310_v7, %v8348_v31  ;;  %v8658_v17 = vmul.f32 %v1310_v7, %v8407_v40  ;;  %v8673_v31 = vpop.permute.xlu0 %2190  ;;  %v15588_v40 = vld [vmem:[#allocation91_spill] sm:$0xff] }
 0x15a   : > { %15578 = vst [vmem:[#allocation123_spill] sm:$0xff] %v8642_v19  ;;  %15580 = vst [vmem:[#allocation92_spill] sm:$0xff] %v8646_v32  ;;  %v1312_v25 = vadd.f32 %v1306_v54, %v6932_v3  ;;  %v1607_v60 = vadd.f32 1e-09, %v1601_v11  ;;  %2934 = vrot.lane.b32.xlu1 %v15584_v2, %s6158_s6  ;;  %v8664_v18 = vmul.f32 %v1311_v41, %v8373_v59  ;;  %5755 = vrsqrt.f32 %v1606_v63  ;;  %v15599_v63 = vld [vmem:[#allocation148_spill] sm:$0xff]  ;;  %v15607_v2 = vld [vmem:[#allocation122_spill] sm:$0xff] }
 0x15b   : > { %15581 = vst [vmem:[#allocation124_spill] sm:$0xff] %v8650_v8  ;;  %15582 = vst [vmem:[#allocation107_spill] sm:$0xff] %v8655_v16  ;;  %v8667_v14 = vmul.f32 %v1311_v41, %v8384_v12  ;;  %v8671_v22 = vmul.f32 %v15571_v29, %v8423_v10  ;;  %2932 = vrot.lane.b32.xlu0 %v15588_v40, %s6158_s6  ;;  %v8678_v13 = vmul.f32 %v1313_v27, %v8404_v43  ;;  %v15617_v8 = vld [vmem:[#allocation164_spill] sm:$0xff] }
 0x15c   : > { %15583 = vst [vmem:[#allocation31_spill] sm:$0xff] %v8658_v17  ;;  %15585 = vst [vmem:[#allocation80_spill] sm:$0xff] %v8664_v18  ;;  %v8681_v7 = vmul.f32 %v1314_v37, %v8414_v4  ;;  %v8684_v59 = vmul.f32 %v1311_v41, %v8437_v30  ;;  %v8688_v12 = vmul.f32 %v15571_v29, %v8471_v45  ;;  %5757 = vrsqrt.f32 %v1607_v60  ;;  %v15618_v17 = vld [vmem:[#allocation44_spill] sm:$0xff] }
 0x15d   : > { %15586 = vst [vmem:[#allocation160_spill] sm:$0xff] %v8667_v14  ;;  %15587 = vst [vmem:[#allocation82_spill] sm:$0xff] %v8671_v22  ;;  %v8691_v54 = vmul.f32 %v1313_v27, %v8411_v46  ;;  %v8694_v11 = vmul.f32 %v1314_v37, %v8417_v61  ;;  %v8697_v43 = vmul.f32 %v1313_v27, %v8448_v6  ;;  %v15601_v61 = vld [vmem:[#allocation104_spill] sm:$0xff]  ;;  %v15619_v14 = vld [vmem:[#allocation162_spill] sm:$0xff] }
 0x15e   : > { %15589 = vst [vmem:[#allocation161_spill] sm:$0xff] %v8678_v13  ;;  %15590 = vst [vmem:[#allocation84_spill] sm:$0xff] %v8681_v7  ;;  %v8700_v4 = vmul.f32 %v1314_v37, %v8462_v42  ;;  %v8703_v30 = vmul.f32 %v1312_v25, %v8390_v47  ;;  %v8706_v41 = vmul.f32 %v1312_v25, %v8393_v58  ;;  %2938 = vrot.lane.b32.xlu1 %v15601_v61, %s6158_s6  ;;  %v15605_v58 = vld [vmem:[#allocation155_spill] sm:$0xff]  ;;  %v8725_v37 = vpop.permute.xlu1 %2196  ;;  %v15609_v61 = vld [vmem:[#allocation89_spill] sm:$0xff] }
 0x15f   : > { %15591 = vst [vmem:[#allocation165_spill] sm:$0xff] %v8684_v59  ;;  %15592 = vst [vmem:[#allocation166_spill] sm:$0xff] %v8688_v12  ;;  %v1504_v46 = vsub.f32 %v15600_v62, %v15599_v63  ;;  %v8713_v6 = vmul.f32 %v1312_v25, %v8454_v9  ;;  %v8717_v42 = vmul.f32 %v15571_v29, %v8474_v33  ;;  %v8736_v62 = vld [vmem:[%s6307_s10 + $0xa0] sm:$0xff]  ;;  %v15612_v13 = vld [vmem:[#allocation119_spill] sm:$0xff] }
 0x160   : > { %15593 = vst [vmem:[#allocation167_spill] sm:$0xff] %v8691_v54  ;;  %15594 = vst [vmem:[#allocation168_spill] sm:$0xff] %v8694_v11  ;;  %v8721_v47 = vmul.f32 %v15571_v29, %v8485_v36  ;;  %v1505_v27 = vsub.f32 %v15605_v58, %v15599_v63  ;;  %v8729_v60 = vmul.f32 %v15571_v29, %v8539_v44  ;;  %v8747_v54 = vld [vmem:[%s6307_s10 + $0xd0] sm:$0xff]  ;;  %v15629_v12 = vld [vmem:[#allocation133_spill] sm:$0xff] }
 0x161   : > { %15595 = vst [vmem:[#allocation169_spill] sm:$0xff] %v8697_v43  ;;  %15596 = vst [vmem:[#allocation170_spill] sm:$0xff] %v8700_v4  ;;  %v1508_v9 = vsub.f32 %v8204_v52, %v15607_v2  ;;  %v1509_v25 = vsub.f32 %v8213_v35, %v15607_v2  ;;  %v1506_v43 = vsub.f32 %v8736_v62, %v15609_v61  ;;  %v8753_v2 = vpop.permute.xlu0 %2194  ;;  %v15616_v7 = vld [vmem:[#allocation98_spill] sm:$0xff] }
 0x162   : > { %15597 = vst [vmem:[#allocation171_spill] sm:$0xff] %v8703_v30  ;;  %15598 = vst [vmem:[#allocation172_spill] sm:$0xff] %v8706_v41  ;;  %v8742_v63 = vmul.f32 %v15571_v29, %v8564_v28  ;;  %v1507_v58 = vsub.f32 %v8228_v55, %v15609_v61  ;;  %v1534_v52 = vsub.f32 %v8747_v54, %v15612_v13  ;;  %2942 = vrot.lane.b32.xlu1 %v15616_v7, %s6158_s6 }
 0x163   : > { %15602 = vst [vmem:[#allocation148_spill] sm:$0xff] %v8713_v6  ;;  %15603 = vst [vmem:[#allocation154_spill] sm:$0xff] %v8717_v42  ;;  %v1535_v35 = vsub.f32 %v8260_v0, %v15612_v13  ;;  %v8757_v4 = vmul.f32 %v15571_v29, %v8542_v53  ;;  %v8761_v11 = vmul.f32 %v15571_v29, %v8549_v15  ;;  %v5748_v0 = vpop.eup %5747  ;;  %v15625_v42 = vld [vmem:[#allocation112_spill] sm:$0xff] }
 0x164   : > { %15604 = vst [vmem:[#allocation104_spill] sm:$0xff] %v8721_v47  ;;  %15606 = vst [vmem:[#allocation155_spill] sm:$0xff] %v8729_v60  ;;  %v8765_v55 = vmul.f32 %v15571_v29, %v8502_v51  ;;  %v1510_v61 = vmul.f32 %v1504_v46, %v15525_v50  ;;  %v1511_v13 = vmul.f32 %v1505_v27, %v15525_v50  ;;  %v5750_v19 = vpop.eup %5749 }
 0x165   : > { %15608 = vst [vmem:[#allocation122_spill] sm:$0xff] %v8736_v62  ;;  %15610 = vst [vmem:[#allocation89_spill] sm:$0xff] %v8742_v63  ;;  %v1532_v32 = vsub.f32 %v8265_v48, %v15617_v8  ;;  %v1533_v5 = vsub.f32 %v8276_v34, %v15617_v8  ;;  %v1560_v16 = vsub.f32 %v15564_v24, %v15618_v17  ;;  %v5752_v18 = vpop.eup %5751  ;;  %v15620_v8 = vld [vmem:[#allocation74_spill] sm:$0xff]  ;;  %v15621_v24 = vld [vmem:[#allocation163_spill] sm:$0xff] }
 0x166   : > { %15611 = vst [vmem:[#allocation173_spill] sm:$0xff] %v8747_v54  ;;  %15613 = vst [vmem:[#allocation119_spill] sm:$0xff] %v8757_v4  ;;  %v1514_v59 = vmul.f32 %v1508_v9, %v15525_v50  ;;  %v8779_v46 = vmul.f32 %v1509_v25, %v15525_v50  ;;  %v1512_v7 = vmul.f32 %v1506_v43, %v15525_v50  ;;  %v8789_v9 = vpop.permute.xlu1 %2200  ;;  %v5754_v25 = vpop.eup %5753 }
 0x167   : > { %15614 = vst [vmem:[#allocation174_spill] sm:$0xff] %v8761_v11  ;;  %15615 = vst [vmem:[#allocation175_spill] sm:$0xff] %v8765_v55  ;;  %v1561_v27 = vsub.f32 %v15619_v14, %v15618_v17  ;;  %v1513_v48 = vmul.f32 %v1507_v58, %v15525_v50  ;;  %v1540_v6 = vmul.f32 %v1534_v52, %v15525_v50  ;;  %v5756_v11 = vpop.eup %5755  ;;  %v15630_v55 = vld [vmem:[#allocation97_spill] sm:$0xff] }
 0x168   : > { %v1541_v34 = vmul.f32 %v1535_v35, %v15525_v50  ;;  %v1536_v41 = vsub.f32 %v15621_v24, %v15620_v8  ;;  %15622 = vst [vmem:[#allocation98_spill] sm:$0xff] %v8789_v9  ;;  %v8792_v30 = vmul.f32 %v5748_v0, %v8423_v10  ;;  %v8795_v43 = vmul.f32 %v5750_v19, %v8471_v45  ;;  %v15623_v24 = vld [vmem:[#allocation79_spill] sm:$0xff]  ;;  %v8808_v10 = vpop.permute.xlu0 %2198  ;;  %v15633_v9 = vld [vmem:[#allocation93_spill] sm:$0xff] }
 0x169   : > { %v8798_v17 = vmul.f32 %v5748_v0, %v8474_v33  ;;  %v8801_v14 = vmul.f32 %v5750_v19, %v8485_v36  ;;  %v1538_v58 = vmul.f32 %v1532_v32, %v15525_v50  ;;  %v1539_v52 = vmul.f32 %v1533_v5, %v15525_v50  ;;  %15624 = vst [vmem:[#allocation164_spill] sm:$0xff] %v8808_v10 }
 0x16a   : > { %v1566_v35 = vmul.f32 %v1560_v16, %v15525_v50  ;;  %v1537_v4 = vsub.f32 %v15623_v24, %v15620_v8  ;;  %v8811_v45 = vmul.f32 %v5752_v18, %v8377_v39  ;;  %v8814_v33 = vmul.f32 %v5752_v18, %v8502_v51  ;;  %v15626_v16 = vld [vmem:[#allocation87_spill] sm:$0xff] }
 0x16b   : > { %v1567_v36 = vmul.f32 %v1561_v27, %v15525_v50  ;;  %v1564_v32 = vsub.f32 %v8631_v57, %v15625_v42  ;;  %v8820_v5 = vmul.f32 %v5754_v25, %v8420_v26  ;;  %v8823_v47 = vmul.f32 %v5754_v25, %v15626_v16  ;;  %v5758_v57 = vpop.eup %5757 }
 0x16c   : > { %v1542_v8 = vmul.f32 %v1536_v41, %v15525_v50  ;;  %v1565_v39 = vsub.f32 %v15574_v56, %v15625_v42  ;;  %v1632_v24 = vmul.f32 %v8792_v30, %v1510_v61  ;;  %v1633_v51 = vmul.f32 %v8795_v43, %v1511_v13  ;;  %v15627_v41 = vld [vmem:[#allocation120_spill] sm:$0xff]  ;;  %v8841_v42 = vpop.permute.xlu1 %2225  ;;  %v8858_v49 = vpop.permute.xlu0 %2223 }
 0x16d   : > { %v1638_v27 = vmul.f32 %v8798_v17, %v1538_v58  ;;  %v1639_v60 = vmul.f32 %v8801_v14, %v1539_v52  ;;  %v8833_v26 = vmul.f32 %v5756_v11, %v8539_v44  ;;  %v1543_v63 = vmul.f32 %v1537_v4, %v15525_v50  ;;  %v15628_v58 = vld [vmem:[#allocation127_spill] sm:$0xff] }
 0x16e   : > { %v8837_v22 = vmul.f32 %v5756_v11, %v8542_v53  ;;  %v1562_v56 = vsub.f32 %v15569_v23, %v15627_v41  ;;  %v1634_v61 = vmul.f32 %v8811_v45, %v1512_v7  ;;  %v1640_v13 = vmul.f32 %v8814_v33, %v1540_v6  ;;  %v15631_v23 = vld [vmem:[#allocation125_spill] sm:$0xff] }
 0x16f   : > { %v8846_v52 = vmul.f32 %v5748_v0, %v15628_v58  ;;  %v8849_v44 = vmul.f32 %v5750_v19, %v15629_v12  ;;  %v1635_v4 = vmul.f32 %v8820_v5, %v1513_v48  ;;  %v1641_v53 = vmul.f32 %v8823_v47, %v1541_v34 }
 0x170   : > { %v1563_v54 = vsub.f32 %v15630_v55, %v15627_v41  ;;  %v8856_v62 = vmul.f32 %v5752_v18, %v15631_v23  ;;  %v8861_v6 = vmul.f32 %v5758_v57, %v8564_v28  ;;  %v1644_v0 = vadd.f32 %v1638_v27, %v1632_v24  ;;  %v15632_v55 = vld [vmem:[#allocation103_spill] sm:$0xff]  ;;  %v15634_v24 = vld [vmem:[#allocation101_spill] sm:$0xff] }
 0x171   : > { %v1645_v7 = vadd.f32 %v1639_v60, %v1633_v51  ;;  %v8864_v19 = vmul.f32 %v5758_v57, %v8549_v15  ;;  %v1636_v48 = vmul.f32 %v8833_v26, %v1514_v59  ;;  %v1642_v34 = vmul.f32 %v8837_v22, %v1542_v8  ;;  %v15635_v51 = vld [vmem:[#allocation69_spill] sm:$0xff] }
 0x172   : > { %v1568_v40 = vmul.f32 %v1562_v56, %v15525_v50  ;;  %v8870_v41 = vmul.f32 %v5754_v25, %v15632_v55  ;;  %v1646_v18 = vadd.f32 %v1640_v13, %v1634_v61  ;;  %v1650_v10 = vmul.f32 %v8846_v52, %v1566_v35  ;;  %v8882_v25 = vpop.permute.xlu1 %2229 }
 0x173   : > { %v1651_v28 = vmul.f32 %v8849_v44, %v1567_v36  ;;  %v2168_v60 = vsel %vm2167_vm2, %v15634_v24, %v15633_v9  ;;  %v1647_v15 = vadd.f32 %v1641_v53, %v1635_v4  ;;  %v8878_v27 = vmul.f32 %v5756_v11, %v15635_v51  ;;  %15636 = vst [vmem:[#allocation44_spill] sm:$0xff] %v8882_v25  ;;  %v15637_v53 = vld [vmem:[#allocation88_spill] sm:$0xff] }
 0x174   : > { %v1569_v59 = vmul.f32 %v1563_v54, %v15525_v50  ;;  %v1652_v8 = vmul.f32 %v8856_v62, %v1568_v40  ;;  %v1637_v35 = vmul.f32 %v8861_v6, %v8779_v46  ;;  %v1656_v56 = vadd.f32 %v1650_v10, %v1644_v0  ;;  %v8891_v54 = vpop.permute.xlu0 %2227  ;;  %v5893_v10 = vld [vmem:[%s6307_s10 + $0x18] sm:$0xff]  ;;  %v15639_v0 = vld [vmem:[#allocation128_spill] sm:$0xff] }
 0x175   : > { %v1657_v36 = vadd.f32 %v1651_v28, %v1645_v7  ;;  %v1643_v61 = vmul.f32 %v8864_v19, %v1543_v63  ;;  %v1648_v13 = vadd.f32 %v1642_v34, %v1636_v48  ;;  %v1570_v4 = vmul.f32 %v1564_v32, %v15525_v50 }
 0x176   : > { %v1653_v11 = vmul.f32 %v8870_v41, %v1569_v59  ;;  %v2178_v24 = vsub.f32 %v15637_v53, %v15633_v9  ;;  %v8894_v40 = vmul.f32 %v5758_v57, %v8604_v21  ;;  %v1658_v25 = vadd.f32 %v1652_v8, %v1646_v18 }
 0x177   : > { %v2177_v46 = vsub.f32 %v15638_v1, %v2168_v60  ;;  %v2180_v7 = vsub.f32 %v5893_v10, %v15639_v0  ;;  %v8901_v63 = vmul.f32 %v15571_v29, %v15626_v16  ;;  %v8905_v32 = vmul.f32 %v15571_v29, %v15631_v23  ;;  %v15644_v60 = vld [vmem:[#allocation55_spill] sm:$0xff] }
 0x178   : > { %v1654_v9 = vmul.f32 %v8878_v27, %v1570_v4  ;;  %v1659_v48 = vadd.f32 %v1653_v11, %v1647_v15  ;;  %v1662_v57 = vmul.f32 %v1656_v56, %v15537_v38  ;;  %v1663_v34 = vmul.f32 %v1657_v36, %v15537_v38  ;;  %v8922_v15 = vpop.permute.xlu1 %2233  ;;  %v8945_v36 = vpop.permute.xlu0 %2231 }
 0x179   : > { %15640 = vst [vmem:[#allocation162_spill] sm:$0xff] %v8901_v63  ;;  %15641 = vst [vmem:[#allocation74_spill] sm:$0xff] %v8905_v32  ;;  %v1649_v18 = vadd.f32 %v1643_v61, %v1637_v35  ;;  %v1571_v1 = vmul.f32 %v1565_v39, %v15525_v50  ;;  %v8913_v28 = vmul.f32 %v15571_v29, %v15632_v55 }
 0x17a   : > { %v8917_v16 = vmul.f32 %v15571_v29, %v15628_v58  ;;  %v1660_v23 = vadd.f32 %v1654_v9, %v1648_v13  ;;  %v8920_v59 = vmul.f32 %v15644_v60, %v2178_v24  ;;  %v1664_v35 = vmul.f32 %v1658_v25, %v15537_v38  ;;  %v15651_v24 = vld [vmem:[#allocation113_spill] sm:$0xff] }
 0x17b   : > { %15642 = vst [vmem:[#allocation163_spill] sm:$0xff] %v8913_v28  ;;  %v1655_v8 = vmul.f32 %v8894_v40, %v1571_v1  ;;  %v8927_v50 = vmul.f32 %v15644_v60, %v2177_v46  ;;  %v8930_v39 = vmul.f32 %v15644_v60, %v2180_v7  ;;  %v8934_v58 = vmul.f32 %v15571_v29, %v15629_v12  ;;  %v15648_v12 = vld [vmem:[#allocation85_spill] sm:$0xff]  ;;  %v15652_v46 = vld [vmem:[#allocation118_spill] sm:$0xff] }
 0x17c   : > { %15643 = vst [vmem:[#allocation79_spill] sm:$0xff] %v8917_v16  ;;  %v8938_v55 = vmul.f32 %v15571_v29, %v15635_v51  ;;  %v8942_v56 = vmul.f32 %v15571_v29, %v8604_v21  ;;  %v1665_v25 = vmul.f32 %v1659_v48, %v15537_v38  ;;  %v1668_v61 = vadd.f32 %v1662_v57, %v6932_v3  ;;  %v15649_v29 = vld [vmem:[#allocation90_spill] sm:$0xff] }
 0x17d   : > { %15645 = vst [vmem:[#allocation112_spill] sm:$0xff] %v8934_v58  ;;  %v1669_v13 = vadd.f32 %v1663_v34, %v6932_v3  ;;  %v1661_v4 = vadd.f32 %v1655_v8, %v1649_v18  ;;  %v8952_v11 = vsel %vm2167_vm2, %v15648_v12, %v15639_v0  ;;  %v1666_v51 = vmul.f32 %v1660_v23, %v15537_v38  ;;  %v8984_v18 = vld [vmem:[%s6307_s10 + $0x38] sm:$0xfe]  ;;  %v8991_v8 = vpop.permute.xlu1 %2258  ;;  %v9175_v16 = vld [vmem:[%s6307_s10 + $0x50] sm:$0x1] }
 0x17e   : > { %15646 = vst [vmem:[#allocation87_spill] sm:$0xff] %v8938_v55  ;;  %15647 = vst [vmem:[#allocation120_spill] sm:$0xff] %v8942_v56  ;;  %v8957_v21 = vmul.f32 %v8920_v59, %v8920_v59  ;;  %v8961_v53 = vmul.f32 %v15649_v29, %v8920_v59  ;;  %v2182_v10 = vsub.f32 %v15652_v46, %v15651_v24  ;;  %v9198_v58 = vld [vmem:[%s6307_s10 + $0x80] sm:$0x1] }
 0x17f   : > { %v1670_v7 = vadd.f32 %v1664_v35, %v6932_v3  ;;  %v8968_v9 = vmul.f32 %v8927_v50, %v8927_v50  ;;  %v8972_v0 = vmul.f32 %v15649_v29, %v8927_v50  ;;  %v8976_v48 = vmul.f32 %v8930_v39, %v8930_v39 }
 0x180   : > { %15650 = vst [vmem:[#allocation127_spill] sm:$0xff] %v8961_v53  ;;  %v1671_v57 = vadd.f32 %v1665_v25, %v6932_v3  ;;  %v8981_v34 = vmul.f32 %v15649_v29, %v8930_v39  ;;  %v2212_v1 = vsub.f32 %v8984_v18, %v8652_v20  ;;  %v2202_v23 = vsel %vm2167_vm2, %v8673_v31, %v8652_v20  ;;  %v15660_v31 = vld [vmem:[#allocation117_spill] sm:$0xff] }
 0x181   : > { %15653 = vst [vmem:[#allocation133_spill] sm:$0xff] %v8972_v0  ;;  %v8994_v35 = vmul.f32 %v1668_v61, %v8792_v30  ;;  %v8997_v25 = vmul.f32 %v1669_v13, %v8795_v43  ;;  %v9000_v12 = vmul.f32 %v1668_v61, %v8798_v17  ;;  %v1667_v46 = vmul.f32 %v1661_v4, %v15537_v38  ;;  %v9012_v43 = vpop.permute.xlu0 %2256  ;;  %v5445_v53 = vld [vmem:[%s6307_s10 + $0x48] sm:$0xff] }
 0x182   : > { %15654 = vst [vmem:[#allocation97_spill] sm:$0xff] %v8981_v34  ;;  %v9004_v55 = vmul.f32 %v1669_v13, %v8801_v14  ;;  %v9007_v56 = vmul.f32 %v1668_v61, %v8846_v52  ;;  %v1672_v20 = vadd.f32 %v1666_v51, %v6932_v3  ;;  %v2245_v30 = vsub.f32 %v15660_v31, %v8841_v42 }
 0x183   : > { %15655 = vst [vmem:[#allocation125_spill] sm:$0xff] %v8994_v35  ;;  %15656 = vst [vmem:[#allocation103_spill] sm:$0xff] %v8997_v25  ;;  %v9015_v17 = vmul.f32 %v1669_v13, %v8849_v44  ;;  %v9018_v4 = vmul.f32 %v1670_v7, %v8811_v45  ;;  %v2235_v52 = vsel %vm2167_vm2, %v8858_v49, %v8841_v42 }
 0x184   : > { %15657 = vst [vmem:[#allocation93_spill] sm:$0xff] %v9000_v12  ;;  %15658 = vst [vmem:[#allocation101_spill] sm:$0xff] %v9004_v55  ;;  %v9021_v12 = vld [vmem:[%s6307_s10 + $0x30] sm:$0xfe]  ;;  %v9028_v61 = vmul.f32 %v1671_v57, %v8820_v5  ;;  %v9031_v51 = vmul.f32 %v1670_v7, %v8814_v33  ;;  %v9034_v44 = vmul.f32 %v1671_v57, %v8823_v47  ;;  %v9049_v5 = vld [vmem:[%s6307_s10 + $0x60] sm:$0xfe] }
 0x185   : > { %15659 = vst [vmem:[#allocation69_spill] sm:$0xff] %v9007_v56  ;;  %15661 = vst [vmem:[#allocation88_spill] sm:$0xff] %v9015_v17  ;;  %v2211_v14 = vsub.f32 %v9021_v12, %v2202_v23  ;;  %v9037_v45 = vmul.f32 %v2212_v1, %v15644_v60  ;;  %v1673_v13 = vadd.f32 %v1667_v46, %v6932_v3  ;;  %v9041_v23 = vld [vmem:[%s6307_s10 + $0x48] sm:$0xff]  ;;  %v9064_v56 = vpop.permute.xlu1 %2262  ;;  %v9117_v17 = vld [vmem:[%s6307_s10 + $0x58] sm:$0x1] }
 0x186   : > { %15662 = vst [vmem:[#allocation83_spill] sm:$0xff] %v9018_v4  ;;  %15663 = vst [vmem:[#allocation128_spill] sm:$0xff] %v9028_v61  ;;  %v2214_v49 = vsub.f32 %v9041_v23, %v8725_v37  ;;  %v2203_v33 = vsel %vm2167_vm2, %v8753_v2, %v8725_v37  ;;  %v2244_v47 = vsub.f32 %v9049_v5, %v2235_v52  ;;  %v15671_v2 = vld [vmem:[#allocation115_spill] sm:$0xff] }
 0x187   : > { %15664 = vst [vmem:[#allocation55_spill] sm:$0xff] %v9031_v51  ;;  %15665 = vst [vmem:[#allocation85_spill] sm:$0xff] %v9034_v44  ;;  %v9053_v42 = vmul.f32 %v1672_v20, %v8833_v26  ;;  %v9056_v1 = vmul.f32 %v1672_v20, %v8837_v22  ;;  %v9059_v46 = vmul.f32 %v1672_v20, %v8878_v27  ;;  %v9076_v22 = vld [vmem:[%s6307_s10 + $0x78] sm:$0xff]  ;;  %v15672_v27 = vld [vmem:[#allocation44_spill] sm:$0xff] }
 0x188   : > { %v9062_v31 = vmul.f32 %v2245_v30, %v15644_v60  ;;  %v9067_v37 = vmul.f32 %v1670_v7, %v8856_v62  ;;  %v2170_v26 = vsel %vm2167_vm2, %v15671_v2, %v15651_v24  ;;  %v9073_v52 = vmul.f32 %v2211_v14, %v15644_v60  ;;  %v9086_v7 = vld [vmem:[%s6307_s10 + $0x40] sm:$0xff]  ;;  %v333_v2 = vld [vmem:[%s6307_s10 + $0x10] sm:$0xff] }
 0x189   : > { %15666 = vst [vmem:[#allocation90_spill] sm:$0xff] %v9053_v42  ;;  %15667 = vst [vmem:[#allocation113_spill] sm:$0xff] %v9056_v1  ;;  %v2247_v20 = vsub.f32 %v9076_v22, %v15672_v27  ;;  %v9081_v30 = vmul.f32 %v1671_v57, %v8870_v41  ;;  %v2362_v62 = vmul.f32 %v9037_v45, %v9037_v45  ;;  %v9096_v1 = vld [vmem:[%s6307_s10 + $0x10] sm:$0xff]  ;;  %v9132_v25 = vrot.slane %v333_v2, 7  ;;  %v15680_v51 = vld [vmem:[#allocation164_spill] sm:$0xff]  ;;  %v9146_v44 = vpop.permute.xlu1 %2266 }
 0x18a   : > { %15668 = vst [vmem:[#allocation118_spill] sm:$0xff] %v9059_v46  ;;  %15669 = vst [vmem:[#allocation117_spill] sm:$0xff] %v9062_v31  ;;  %v2213_v24 = vsub.f32 %v9086_v7, %v2203_v33  ;;  %v2236_v14 = vsel %vm2167_vm2, %v8891_v54, %v15672_v27  ;;  %v9093_v46 = vpop.permute.xlu0 %2260  ;;  %v2179_v41 = vsub.f32 %v9096_v1, %v8952_v11  ;;  %v9113_v27 = vld [vmem:[%s6307_s10 + $0x20] sm:$0x1]  ;;  %v15678_v11 = vld [vmem:[#allocation98_spill] sm:$0xff] }
 0x18b   : > { %15670 = vst [vmem:[#allocation176_spill] sm:$0xff] %v9067_v37  ;;  %15673 = vst [vmem:[#allocation115_spill] sm:$0xff] %v9081_v30  ;;  %v9101_v57 = vmul.f32 %v15644_v60, %v2182_v10  ;;  %v9104_v42 = vmul.f32 %v2214_v49, %v15644_v60  ;;  %v9107_v33 = vmul.f32 %v2244_v47, %v15644_v60  ;;  %v9142_v30 = vld [vmem:[%s6307_s10 + $0x88] sm:$0x1] }
 0x18c   : > { %15674 = vst [vmem:[#allocation44_spill] sm:$0xff] %v9096_v1  ;;  %v9110_v54 = vmul.f32 %v1673_v13, %v8861_v6  ;;  %15677 = vst [vmem:[#allocation179_spill] sm:$0xff] %v9113_v27  ;;  %v2181_v35 = vsub.f32 %v9113_v27, %v2170_v26  ;;  %v2216_v10 = vsub.f32 %v9117_v17, %v15678_v11  ;;  %v9129_v6 = vld [vmem:[%s6307_s10 + $0x70] sm:$0xff] }
 0x18d   : > { %15675 = vst [vmem:[#allocation177_spill] sm:$0xff] %v9107_v33  ;;  %v2374_v49 = vmul.f32 %v9062_v31, %v9062_v31  ;;  %v2361_v55 = vmul.f32 %v9073_v52, %v9073_v52  ;;  %v9126_v47 = vmul.f32 %v2247_v20, %v15644_v60  ;;  %v2368_v26 = vadd.f32 %v2362_v62, %v8957_v21 }
 0x18e   : > { %15676 = vst [vmem:[#allocation178_spill] sm:$0xff] %v9110_v54  ;;  %v2246_v54 = vsub.f32 %v9129_v6, %v2236_v14  ;;  %v9136_v37 = vmul.f32 %v2213_v24, %v15644_v60  ;;  %v2204_v4 = vsel %vm2167_vm2, %v15680_v51, %v15678_v11  ;;  %v2249_v20 = vsub.f32 %v9142_v30, %v8922_v15  ;;  %v15682_v24 = vld [vmem:[#allocation91_spill] sm:$0xff] }
 0x18f   : > { %15679 = vst [vmem:[#allocation98_spill] sm:$0xff] %v9126_v47  ;;  %v9149_v14 = vmul.f32 %v1673_v13, %v8864_v19  ;;  %v2364_v21 = vmul.f32 %v9104_v42, %v9104_v42  ;;  %v2373_v62 = vmul.f32 %v9107_v33, %v9107_v33  ;;  %v9158_v51 = vsel %vm359_vm0, %v15682_v24, %v9132_v25 }
 0x190   : > { %v9161_v2 = vmul.f32 %v15644_v60, %v2179_v41  ;;  %v9164_v11 = vmul.f32 %v2216_v10, %v15644_v60  ;;  %v2380_v61 = vadd.f32 %v2374_v49, %v2368_v26  ;;  %v2237_v19 = vsel %vm2167_vm2, %v8945_v36, %v8922_v15  ;;  %2936 = vrot.lane.b32.xlu0 %v9158_v51, %s6158_s6 }
 0x191   : > { %15681 = vst [vmem:[#allocation164_spill] sm:$0xff] %v9149_v14  ;;  %v9171_v14 = vpop.permute.xlu0 %2264  ;;  %v2367_v24 = vadd.f32 %v2361_v55, %v8968_v9  ;;  %v2215_v41 = vsub.f32 %v9175_v16, %v2204_v4  ;;  %v2376_v10 = vmul.f32 %v9126_v47, %v9126_v47  ;;  %v9181_v49 = vmul.f32 %v2246_v54, %v15644_v60 }
 0x192   : > { %v9184_v15 = vmul.f32 %v1673_v13, %v8894_v40  ;;  %v9187_v36 = vmul.f32 %v15644_v60, %v2181_v35  ;;  %v2363_v55 = vmul.f32 %v9136_v37, %v9136_v37  ;;  %v9192_v9 = vmul.f32 %v2249_v20, %v15644_v60 }
 0x193   : > { %15683 = vst [vmem:[#allocation91_spill] sm:$0xff] %v9181_v49  ;;  %v2360_v4 = vmul.f32 %v9101_v57, %v9101_v57  ;;  %v2370_v26 = vadd.f32 %v2364_v21, %v8976_v48  ;;  %v2379_v54 = vadd.f32 %v2373_v62, %v2367_v24  ;;  %v2248_v40 = vsub.f32 %v9198_v58, %v2237_v19  ;;  %v5443_v48 = vld [vmem:[%s6307_s10 + $0x38] sm:$0xff]  ;;  %v5442_v21 = vld [vmem:[%s6307_s10 + $0x30] sm:$0xff]  ;;  %v9213_v62 = vpop.permute.xlu1 %2291 }
 0x194   : > { %15684 = vst [vmem:[#allocation180_spill] sm:$0xff] %v9184_v15  ;;  %15685 = vst [vmem:[#allocation181_spill] sm:$0xff] %v9192_v9  ;;  %v2357_v35 = vmul.f32 %v9161_v2, %v9161_v2  ;;  %v9205_v13 = vmul.f32 %v15649_v29, %v9101_v57  ;;  %v2366_v20 = vmul.f32 %v9164_v11, %v9164_v11  ;;  %v2386_v15 = vadd.f32 1e-09, %v2380_v61 }
 0x195   : > { %2940 = vrot.lane.b32.xlu0 %v9132_v25, %s6158_s6  ;;  %v9217_v19 = vmul.f32 %v15649_v29, %v9161_v2  ;;  %v9220_v24 = vmul.f32 %v2215_v41, %v15644_v60  ;;  %v2375_v0 = vmul.f32 %v9181_v49, %v9181_v49  ;;  %v2359_v61 = vmul.f32 %v9187_v36, %v9187_v36  ;;  %v9234_v3 = vpop.permute.xlu0 %2289 }
 0x196   : > { %15686 = vst [vmem:[#allocation182_spill] sm:$0xff] %v9205_v13  ;;  %v2382_v13 = vadd.f32 %v2376_v10, %v2370_v26  ;;  %v9229_v34 = vmul.f32 %v15649_v29, %v9187_v36  ;;  %v2369_v32 = vadd.f32 %v2363_v55, %v2357_v35  ;;  %v2378_v28 = vmul.f32 %v9192_v9, %v9192_v9 }
 0x197   : > { %15687 = vst [vmem:[#allocation183_spill] sm:$0xff] %v9217_v19  ;;  %15688 = vst [vmem:[#allocation184_spill] sm:$0xff] %v9220_v24  ;;  %v5444_v19 = vld [vmem:[%s6307_s10 + $0x40] sm:$0xff]  ;;  %v2385_v41 = vadd.f32 1e-09, %v2379_v54  ;;  %v9237_v10 = vmul.f32 %v2248_v40, %v15644_v60  ;;  %v9239_v26 = vrot.slane %v5443_v48, 7  ;;  %v9245_v63 = vmul.f32 %v15649_v29, %v9037_v45 }
 0x198   : > { %15689 = vst [vmem:[#allocation185_spill] sm:$0xff] %v9229_v34  ;;  %15690 = vst [vmem:[#allocation186_spill] sm:$0xff] %v9234_v3  ;;  %v9241_v38 = vrot.slane %v5442_v21, 7  ;;  %v2372_v34 = vadd.f32 %v2366_v20, %v2360_v4  ;;  %5759 = vrsqrt.f32 %v2386_v15  ;;  %v9247_v55 = vrot.slane %v5445_v53, 7 }
 0x199   : > { %15691 = vst [vmem:[#allocation187_spill] sm:$0xff] %v9237_v10  ;;  %15692 = vst [vmem:[#allocation188_spill] sm:$0xff] %v9245_v63  ;;  %v2365_v35 = vmul.f32 %v9220_v24, %v9220_v24  ;;  %v2388_v3 = vadd.f32 1e-09, %v2382_v13  ;;  %v2381_v54 = vadd.f32 %v2375_v0, %v2369_v32  ;;  %2968 = vrot.lane.b32.xlu1 %v9239_v26, %s6158_s6  ;;  %v391_v40 = vrot.slane %v5444_v19, 7  ;;  %v9267_v0 = vpop.permute.xlu1 %2295 }
 0x19a   : > { %2966 = vrot.lane.b32.xlu0 %v9241_v38, %s6158_s6  ;;  %v9257_v48 = vmul.f32 %v15649_v29, %v9073_v52  ;;  %v9261_v53 = vmul.f32 %v15649_v29, %v9104_v42  ;;  %v9265_v15 = vmul.f32 %v15649_v29, %v9136_v37  ;;  %v2384_v32 = vadd.f32 %v2378_v28, %v2372_v34 }
 0x19b   : > { %v9271_v4 = vmul.f32 %v15649_v29, %v9164_v11  ;;  %5761 = vrsqrt.f32 %v2385_v41  ;;  %v2377_v13 = vmul.f32 %v9237_v10, %v9237_v10  ;;  %v374_v20 = vsub.f32 %v9096_v1, %v9158_v51  ;;  %v9292_v41 = vpop.permute.xlu0 %2293  ;;  %v15711_v1 = vld [vmem:[#allocation22_spill] sm:$0xff] }
 0x19c   : > { %15693 = vst [vmem:[#allocation189_spill] sm:$0xff] %v9257_v48  ;;  %15694 = vst [vmem:[#allocation190_spill] sm:$0xff] %v9261_v53  ;;  %v9279_v21 = vmul.f32 %v15649_v29, %v9220_v24  ;;  %v9283_v28 = vmul.f32 %v15649_v29, %v9062_v31  ;;  %v376_v34 = vsub.f32 %v9113_v27, %v9132_v25  ;;  %5763 = vrsqrt.f32 %v2388_v3  ;;  %v15701_v53 = vld [vmem:[#allocation96_spill] sm:$0xff]  ;;  %v15735_v31 = vld [vmem:[#allocation25_spill] sm:$0xff] }
 0x19d   : > { %15695 = vst [vmem:[#allocation191_spill] sm:$0xff] %v9265_v15  ;;  %15696 = vst [vmem:[#allocation192_spill] sm:$0xff] %v9271_v4  ;;  %v9290_v19 = vsel %vm359_vm0, %v9239_v26, %v9247_v55  ;;  %v2371_v4 = vadd.f32 %v2365_v35, %v2359_v61  ;;  %v2387_v51 = vadd.f32 1e-09, %v2381_v54  ;;  %v9300_v25 = vmul.f32 %v15649_v29, %v9107_v33  ;;  %v15700_v15 = vld [vmem:[#allocation86_spill] sm:$0xff] }
 0x19e   : > { %15697 = vst [vmem:[#allocation193_spill] sm:$0xff] %v9279_v21  ;;  %15698 = vst [vmem:[#allocation194_spill] sm:$0xff] %v9283_v28  ;;  %2972 = vrot.lane.b32.xlu1 %v9290_v19, %s6158_s6  ;;  %v392_v21 = vsel %vm359_vm0, %v9241_v38, %v391_v40  ;;  %v2390_v28 = vadd.f32 1e-09, %v2384_v32  ;;  %v1325_v48 = vadd.f32 %v15701_v53, %v15700_v15  ;;  %v15703_v54 = vld [vmem:[#allocation106_spill] sm:$0xff]  ;;  %v15707_v15 = vld [vmem:[#allocation116_spill] sm:$0xff] }
 0x19f   : > { %15699 = vst [vmem:[#allocation195_spill] sm:$0xff] %v9300_v25  ;;  %v2268_v3 = vsel %vm2167_vm2, %v9012_v43, %v8991_v8  ;;  %2970 = vrot.lane.b32.xlu0 %v392_v21, %s6158_s6  ;;  %v9310_v61 = vmul.f32 %v15649_v29, %v9126_v47  ;;  %v2383_v35 = vadd.f32 %v2377_v13, %v2371_v4  ;;  %v9330_v4 = vpop.permute.xlu1 %2299  ;;  %5765 = vrsqrt.f32 %v2387_v51  ;;  %v9333_v13 = vld [vmem:[%s6307_s10 + $0x98] sm:$0xfe] }
 0x1a0   : > { %v9313_v63 = vmul.f32 %v15703_v54, %v374_v20  ;;  %v405_v32 = vsub.f32 %v9175_v16, %v391_v40  ;;  %v9318_v53 = vmul.f32 %v15649_v29, %v9181_v49  ;;  %v9322_v43 = vmul.f32 %v15649_v29, %v9192_v9  ;;  %v9338_v20 = vld [vmem:[%s6307_s10 + $0x90] sm:$0xfe]  ;;  %v9410_v9 = vld [vmem:[%s6307_s10 + $0xb0] sm:$0x1] }
 0x1a1   : > { %15702 = vst [vmem:[#allocation86_spill] sm:$0xff] %v9310_v61  ;;  %v9325_v25 = vadd.f32 %v15707_v15, %v1325_v48  ;;  %v9328_v27 = vmul.f32 %v15703_v54, %v376_v34  ;;  %v2278_v16 = vsub.f32 %v9333_v13, %v8991_v8  ;;  %v9342_v61 = vld [vmem:[%s6307_s10 + $0xa8] sm:$0xff]  ;;  %5767 = vrsqrt.f32 %v2390_v28  ;;  %15720 = vst [vmem:[#allocation202_spill] sm:$0xff] %v9410_v9 }
 0x1a2   : > { %15704 = vst [vmem:[#allocation96_spill] sm:$0xff] %v9313_v63  ;;  %15705 = vst [vmem:[#allocation106_spill] sm:$0xff] %v9318_v53  ;;  %v2277_v53 = vsub.f32 %v9338_v20, %v2268_v3  ;;  %v2280_v48 = vsub.f32 %v9342_v61, %v9064_v56  ;;  %2976 = vrot.lane.b32.xlu1 %v9247_v55, %s6158_s6  ;;  %v2269_v34 = vsel %vm2167_vm2, %v9093_v46, %v9064_v56  ;;  %v9355_v3 = vpop.permute.xlu0 %2297 }
 0x1a3   : > { %15706 = vst [vmem:[#allocation196_spill] sm:$0xff] %v9322_v43  ;;  %15708 = vst [vmem:[#allocation116_spill] sm:$0xff] %v9325_v25  ;;  %v402_v8 = vsub.f32 %v8984_v18, %v9239_v26  ;;  %v403_v51 = vsub.f32 %v9086_v7, %v392_v21  ;;  %2974 = vrot.lane.b32.xlu0 %v391_v40, %s6158_s6  ;;  %v2389_v15 = vadd.f32 1e-09, %v2383_v35  ;;  %v15715_v40 = vld [vmem:[#allocation122_spill] sm:$0xff] }
 0x1a4   : > { %15709 = vst [vmem:[#allocation197_spill] sm:$0xff] %v9328_v27  ;;  %15710 = vst [vmem:[#allocation198_spill] sm:$0xff] %v9342_v61  ;;  %v529_v43 = vmul.f32 %v9328_v27, %v9328_v27  ;;  %v632_v28 = vmul.f32 %v15711_v1, %v9313_v63  ;;  %v9362_v25 = vmul.f32 %v405_v32, %v15703_v54 }
 0x1a5   : > { %v9366_v56 = vmul.f32 %v15649_v29, %v9237_v10  ;;  %v527_v18 = vmul.f32 %v9313_v63, %v9313_v63  ;;  %v634_v46 = vmul.f32 %v15711_v1, %v9328_v27  ;;  %v9373_v7 = vmul.f32 %v403_v51, %v15703_v54  ;;  %v9375_v26 = vpop.eup %5759 }
 0x1a6   : > { %15712 = vst [vmem:[#allocation22_spill] sm:$0xff] %v9362_v25  ;;  %v2279_v21 = vsub.f32 %v15715_v40, %v2269_v34  ;;  %v401_v35 = vsub.f32 %v9021_v12, %v9241_v38  ;;  %v2270_v29 = vsel %vm2167_vm2, %v9171_v14, %v9146_v44  ;;  %v535_v32 = vmul.f32 %v9362_v25, %v9362_v25  ;;  %v9392_v12 = vpop.permute.xlu1 %2324  ;;  %v15717_v34 = vld [vmem:[#allocation73_spill] sm:$0xff] }
 0x1a7   : > { %15713 = vst [vmem:[#allocation199_spill] sm:$0xff] %v9366_v56  ;;  %15714 = vst [vmem:[#allocation200_spill] sm:$0xff] %v9373_v7  ;;  %v2284_v56 = vmul.f32 %v2278_v16, %v15644_v60  ;;  %v2283_v51 = vmul.f32 %v2277_v53, %v15644_v60  ;;  %v9388_v10 = vmul.f32 %v402_v8, %v15703_v54  ;;  %5769 = vrsqrt.f32 %v2389_v15  ;;  %v9405_v8 = vld [vmem:[%s6307_s10 + $0xb8] sm:$0x1] }
 0x1a8   : > { %v533_v38 = vmul.f32 %v9373_v7, %v9373_v7  ;;  %v984_v14 = vadd.f32 %v15717_v34, %v632_v28  ;;  %v2286_v40 = vmul.f32 %v2280_v48, %v15644_v60  ;;  %v9396_v27 = vadd.f32 %v535_v32, %v529_v43  ;;  %v9398_v16 = vpop.eup %5761  ;;  %15719 = vst [vmem:[#allocation201_spill] sm:$0xff] %v9405_v8  ;;  %v5447_v48 = vld [vmem:[%s6307_s10 + $0x68] sm:$0xff]  ;;  %v5446_v43 = vld [vmem:[%s6307_s10 + $0x60] sm:$0xff]  ;;  %v9417_v32 = vpop.permute.xlu0 %2322 }
 0x1a9   : > { %15716 = vst [vmem:[#allocation122_spill] sm:$0xff] %v9388_v10  ;;  %v9402_v53 = vmul.f32 %v9375_v26, %v8920_v59  ;;  %v2282_v63 = vsub.f32 %v9405_v8, %v9146_v44  ;;  %v2281_v15 = vsub.f32 %v9410_v9, %v2270_v29  ;;  %v15721_v34 = vld [vmem:[#allocation40_spill] sm:$0xff]  ;;  %v15723_v59 = vld [vmem:[#allocation81_spill] sm:$0xff]  ;;  %v9424_v47 = vmul.f32 %v2279_v21, %v15644_v60  ;;  %v9429_v8 = vpop.eup %5763 }
 0x1aa   : > { %v9413_v28 = vadd.f32 %v533_v38, %v527_v18  ;;  %v9420_v49 = vadd.f32 %v15721_v34, %v634_v46  ;;  %v1324_v61 = vadd.f32 %v15723_v59, %v984_v14  ;;  %v9427_v44 = vmul.f32 %v401_v35, %v15703_v54  ;;  %v15726_v59 = vld [vmem:[#allocation136_spill] sm:$0xff] }
 0x1ab   : > { %15718 = vst [vmem:[#allocation73_spill] sm:$0xff] %v9402_v53  ;;  %v532_v18 = vmul.f32 %v9388_v10, %v9388_v10  ;;  %v643_v29 = vmul.f32 %v15711_v1, %v9388_v10  ;;  %v404_v46 = vsub.f32 %v9041_v23, %v9290_v19  ;;  %v406_v38 = vsub.f32 %v9117_v17, %v9247_v55 }
 0x1ac   : > { %15722 = vst [vmem:[#allocation40_spill] sm:$0xff] %v9420_v49  ;;  %15724 = vst [vmem:[#allocation81_spill] sm:$0xff] %v9427_v44  ;;  %v9441_v21 = vmul.f32 %v9398_v16, %v8927_v50  ;;  %v531_v35 = vmul.f32 %v9427_v44, %v9427_v44  ;;  %v418_v14 = vrot.slane %v5447_v48, 7  ;;  %v417_v34 = vrot.slane %v5446_v43, 7  ;;  %v9457_v50 = vpop.permute.xlu1 %2328  ;;  %v5449_v48 = vld [vmem:[%s6307_s10 + $0x78] sm:$0xff]  ;;  %v9473_v43 = vpop.eup %5765 }
 0x1ad   : > { %v9446_v49 = vadd.f32 %v15726_v59, %v1324_v61  ;;  %v9449_v10 = vmul.f32 %v9402_v53, %v2284_v56  ;;  %v9452_v23 = vmul.f32 %v2282_v63, %v15644_v60  ;;  %v9455_v17 = vmul.f32 %v2281_v15, %v15644_v60  ;;  %v9466_v61 = vld [vmem:[%s6307_s10 + $0x68] sm:$0xfe]  ;;  %v5448_v15 = vld [vmem:[%s6307_s10 + $0x70] sm:$0xff]  ;;  %v15730_v59 = vld [vmem:[#allocation19_spill] sm:$0xff] }
 0x1ae   : > { %15725 = vst [vmem:[#allocation203_spill] sm:$0xff] %v9441_v21  ;;  %v9461_v55 = vmul.f32 %v9429_v8, %v8930_v39  ;;  %v642_v19 = vmul.f32 %v15711_v1, %v9427_v44  ;;  %15729 = vst [vmem:[#allocation205_spill] sm:$0xff] %v9466_v61  ;;  %v430_v56 = vsub.f32 %v9466_v61, %v418_v14  ;;  %3001 = vrot.lane.b32.xlu1 %v418_v14, %s6158_s6  ;;  %v15732_v39 = vld [vmem:[#allocation23_spill] sm:$0xff]  ;;  %v9486_v61 = vpop.permute.xlu0 %2326 }
 0x1af   : > { %15727 = vst [vmem:[#allocation136_spill] sm:$0xff] %v9446_v49  ;;  %v429_v63 = vsub.f32 %v9049_v5, %v417_v34  ;;  %v9476_v49 = vadd.f32 %v15730_v59, %v643_v29  ;;  %v538_v53 = vadd.f32 %v532_v18, %v15732_v39  ;;  %v9480_v9 = vmul.f32 %v404_v46, %v15703_v54  ;;  %v9488_v5 = vpop.eup %5767 }
 0x1b0   : > { %15728 = vst [vmem:[#allocation204_spill] sm:$0xff] %v9461_v55  ;;  %v9483_v44 = vmul.f32 %v406_v38, %v15703_v54  ;;  %2999 = vrot.lane.b32.xlu0 %v417_v34, %s6158_s6  ;;  %v9491_v33 = vmul.f32 %v9441_v21, %v2283_v51  ;;  %v537_v29 = vadd.f32 %v531_v35, %v15735_v31  ;;  %v421_v39 = vrot.slane %v5449_v48, 7  ;;  %v15739_v51 = vld [vmem:[#allocation30_spill] sm:$0xff] }
 0x1b1   : > { %15731 = vst [vmem:[#allocation19_spill] sm:$0xff] %v9476_v49  ;;  %15733 = vst [vmem:[#allocation23_spill] sm:$0xff] %v9480_v9  ;;  %v9495_v59 = vmul.f32 %v430_v56, %v15703_v54  ;;  %v9498_v18 = vmul.f32 %v429_v63, %v15703_v54  ;;  %v534_v46 = vmul.f32 %v9480_v9, %v9480_v9  ;;  %v419_v49 = vrot.slane %v5448_v15, 7 }
 0x1b2   : > { %15734 = vst [vmem:[#allocation206_spill] sm:$0xff] %v9483_v44  ;;  %v536_v38 = vmul.f32 %v9483_v44, %v9483_v44  ;;  %v9505_v24 = vmul.f32 %v9461_v55, %v2286_v40  ;;  %v9508_v21 = vadd.f32 %v15739_v51, %v642_v19  ;;  %v9516_v56 = vmul.f32 %v9473_v43, %v9161_v2  ;;  %v9523_v19 = vpop.permute.xlu1 %2332 }
 0x1b3   : > { %15736 = vst [vmem:[#allocation25_spill] sm:$0xff] %v9495_v59  ;;  %15737 = vst [vmem:[#allocation207_spill] sm:$0xff] %v9498_v18  ;;  %v544_v31 = vmul.f32 %v9495_v59, %v9495_v59  ;;  %v543_v35 = vmul.f32 %v9498_v18, %v9498_v18  ;;  %v645_v63 = vmul.f32 %v15711_v1, %v9480_v9  ;;  %v15742_v9 = vld [vmem:[#allocation111_spill] sm:$0xff] }
 0x1b4   : > { %15738 = vst [vmem:[#allocation208_spill] sm:$0xff] %v9505_v24  ;;  %15740 = vst [vmem:[#allocation30_spill] sm:$0xff] %v9508_v21  ;;  %v647_v40 = vmul.f32 %v15711_v1, %v9483_v44  ;;  %v422_v48 = vsel %vm359_vm0, %v418_v14, %v421_v39  ;;  %v9527_v15 = vmul.f32 %v9488_v5, %v9101_v57  ;;  %v9531_v2 = vpop.eup %5769  ;;  %v15743_v44 = vld [vmem:[#allocation32_spill] sm:$0xff]  ;;  %v9537_v24 = vpop.permute.xlu0 %2330 }
 0x1b5   : > { %15741 = vst [vmem:[#allocation209_spill] sm:$0xff] %v9523_v19  ;;  %v550_v51 = vadd.f32 %v544_v31, %v538_v53  ;;  %v549_v21 = vadd.f32 %v543_v35, %v537_v29  ;;  %v432_v55 = vsub.f32 %v9076_v22, %v422_v48  ;;  %3005 = vrot.lane.b32.xlu1 %v422_v48, %s6158_s6 }
 0x1b6   : > { %v540_v18 = vadd.f32 %v534_v46, %v15742_v9  ;;  %v542_v59 = vadd.f32 %v536_v38, %v15743_v44  ;;  %v434_v14 = vsub.f32 %v9142_v30, %v421_v39  ;;  %v420_v19 = vsel %vm359_vm0, %v417_v34, %v419_v49  ;;  %v15744_v44 = vld [vmem:[#allocation59_spill] sm:$0xff]  ;;  %v9554_v38 = vld [vmem:[%s6307_s10 + $0xc8] sm:$0xfe] }
 0x1b7   : > { %v556_v57 = vadd.f32 1e-09, %v550_v51  ;;  %v555_v53 = vadd.f32 1e-09, %v549_v21  ;;  %v9540_v29 = vmul.f32 %v432_v55, %v15703_v54  ;;  %v431_v22 = vsub.f32 %v9129_v6, %v420_v19  ;;  %3003 = vrot.lane.b32.xlu0 %v420_v19, %s6158_s6  ;;  %v15749_v19 = vld [vmem:[#allocation186_spill] sm:$0xff] }
 0x1b8   : > { %v9546_v9 = vmul.f32 %v9516_v56, %v9424_v47  ;;  %v997_v46 = vadd.f32 %v15744_v44, %v645_v63  ;;  %v9550_v30 = vmul.f32 %v434_v14, %v15703_v54  ;;  %v433_v34 = vsub.f32 %v9198_v58, %v419_v49  ;;  %v15746_v47 = vld [vmem:[#allocation60_spill] sm:$0xff]  ;;  %v9572_v63 = vpop.permute.xlu1 %2538  ;;  %v15750_v14 = vld [vmem:[#allocation158_spill] sm:$0xff]  ;;  %v9589_v44 = vpop.permute.xlu0 %2536 }
 0x1b9   : > { %v2311_v21 = vsub.f32 %v9554_v38, %v9213_v62  ;;  %5771 = vrsqrt.f32 %v556_v57  ;;  %v546_v6 = vmul.f32 %v9540_v29, %v9540_v29  ;;  %v9561_v55 = vmul.f32 %v431_v22, %v15703_v54  ;;  %3009 = vrot.lane.b32.xlu1 %v421_v39, %s6158_s6  ;;  %15751 = vst [vmem:[#allocation60_spill] sm:$0xff] %v9589_v44 }
 0x1ba   : > { %v9565_v31 = vadd.f32 %v15746_v47, %v647_v40  ;;  %5773 = vrsqrt.f32 %v555_v53  ;;  %v548_v58 = vmul.f32 %v9550_v30, %v9550_v30  ;;  %v9570_v35 = vmul.f32 %v433_v34, %v15703_v54 }
 0x1bb   : > { %15745 = vst [vmem:[#allocation111_spill] sm:$0xff] %v9561_v55  ;;  %v9576_v48 = vmul.f32 %v9531_v2, %v9187_v36  ;;  %v2301_v39 = vsel %vm2167_vm2, %v15749_v19, %v9213_v62  ;;  %v552_v40 = vadd.f32 %v546_v6, %v540_v18  ;;  %v545_v51 = vmul.f32 %v9561_v55, %v9561_v55 }
 0x1bc   : > { %15747 = vst [vmem:[#allocation32_spill] sm:$0xff] %v9565_v31  ;;  %3007 = vrot.lane.b32.xlu0 %v419_v49, %s6158_s6  ;;  %v1337_v57 = vadd.f32 %v15750_v14, %v997_v46  ;;  %v646_v53 = vmul.f32 %v15711_v1, %v9362_v25  ;;  %v554_v22 = vadd.f32 %v548_v58, %v542_v59  ;;  %v9596_v46 = vld [vmem:[%s6307_s10 + $0xc0] sm:$0xfe]  ;;  %v5451_v14 = vld [vmem:[%s6307_s10 + $0x98] sm:$0xff]  ;;  %v5450_v25 = vld [vmem:[%s6307_s10 + $0x90] sm:$0xff] }
 0x1bd   : > { %15748 = vst [vmem:[#allocation59_spill] sm:$0xff] %v9576_v48  ;;  %v547_v36 = vmul.f32 %v9570_v35, %v9570_v35  ;;  %v644_v62 = vmul.f32 %v15711_v1, %v9373_v7  ;;  %v2317_v18 = vmul.f32 %v2311_v21, %v15644_v60  ;;  %v558_v34 = vadd.f32 1e-09, %v552_v40 }
 0x1be   : > { %v551_v49 = vadd.f32 %v545_v51, %v9413_v28  ;;  %v2310_v6 = vsub.f32 %v9596_v46, %v2301_v39  ;;  %v2302_v59 = vsel %vm2167_vm2, %v9292_v41, %v9267_v0  ;;  %v560_v47 = vadd.f32 1e-09, %v554_v22  ;;  %v9612_v28 = vld [vmem:[%s6307_s10 + $0xd8] sm:$0xff]  ;;  %v9624_v22 = vpop.permute.xlu1 %2542 }
 0x1bf   : > { %v553_v58 = vadd.f32 %v547_v36, %v9396_v27  ;;  %v9605_v19 = vmul.f32 %v9527_v15, %v9452_v23  ;;  %v9609_v21 = vmul.f32 %v9375_v26, %v9037_v45  ;;  %15752 = vst [vmem:[#allocation186_spill] sm:$0xff] %v9612_v28  ;;  %v2313_v39 = vsub.f32 %v9612_v28, %v9267_v0  ;;  %v15753_v27 = vld [vmem:[#allocation162_spill] sm:$0xff]  ;;  %v15756_v45 = vld [vmem:[#allocation75_spill] sm:$0xff]  ;;  %v15758_v0 = vld [vmem:[#allocation173_spill] sm:$0xff] }
 0x1c0   : > { %v557_v40 = vadd.f32 1e-09, %v551_v49  ;;  %v9618_v41 = vmul.f32 %v9576_v48, %v9455_v17  ;;  %v9621_v51 = vadd.f32 %v15753_v27, %v1337_v57  ;;  %5775 = vrsqrt.f32 %v558_v34  ;;  %15755 = vst [vmem:[#allocation162_spill] sm:$0xff] %v9624_v22  ;;  %v15759_v17 = vld [vmem:[#allocation61_spill] sm:$0xff] }
 0x1c1   : > { %v559_v23 = vadd.f32 1e-09, %v553_v58  ;;  %v9627_v36 = vadd.f32 %v15756_v45, %v646_v53  ;;  %v2422_v31 = vmul.f32 %v9609_v21, %v2317_v18  ;;  %v2312_v49 = vsub.f32 %v15758_v0, %v2302_v59  ;;  %v9642_v53 = vpop.permute.xlu0 %2540  ;;  %v15765_v0 = vld [vmem:[#allocation175_spill] sm:$0xff] }
 0x1c2   : > { %15754 = vst [vmem:[#allocation158_spill] sm:$0xff] %v9621_v51  ;;  %5777 = vrsqrt.f32 %v560_v47  ;;  %v996_v48 = vadd.f32 %v15759_v17, %v644_v62  ;;  %v2316_v57 = vmul.f32 %v2310_v6, %v15644_v60  ;;  %v9636_v34 = vmul.f32 %v9398_v16, %v9073_v52  ;;  %15760 = vst [vmem:[#allocation173_spill] sm:$0xff] %v9642_v53  ;;  %v15761_v6 = vld [vmem:[#allocation157_spill] sm:$0xff] }
 0x1c3   : > { %15757 = vst [vmem:[#allocation75_spill] sm:$0xff] %v9627_v36  ;;  %v9640_v58 = vmul.f32 %v9429_v8, %v9104_v42  ;;  %v2319_v18 = vmul.f32 %v2313_v39, %v15644_v60  ;;  %v9647_v59 = vmul.f32 %v9473_v43, %v9136_v37  ;;  %5779 = vrsqrt.f32 %v557_v40  ;;  %v9653_v52 = vld [vmem:[%s6307_s10 + $0xe8] sm:$0x1] }
 0x1c4   : > { %v9649_v62 = vrot.slane %v5451_v14, 7  ;;  %v1336_v47 = vadd.f32 %v15761_v6, %v996_v48  ;;  %15762 = vst [vmem:[#allocation61_spill] sm:$0xff] %v9653_v52  ;;  %v2315_v42 = vsub.f32 %v9653_v52, %v9330_v4  ;;  %5781 = vrsqrt.f32 %v559_v23  ;;  %v9685_v23 = vpop.permute.xlu1 %2546 }
 0x1c5   : > { %v9657_v27 = vrot.slane %v5450_v25, 7  ;;  %v9660_v39 = vadd.f32 %v2422_v31, %v9449_v10  ;;  %v2318_v37 = vmul.f32 %v2312_v49, %v15644_v60  ;;  %v2334_v40 = vsel %vm2167_vm2, %v9417_v32, %v9392_v12  ;;  %v9677_v31 = vld [vmem:[%s6307_s10 + $0xf8] sm:$0xfe]  ;;  %15764 = vst [vmem:[#allocation210_spill] sm:$0xff] %v9685_v23 }
 0x1c6   : > { %v458_v48 = vsub.f32 %v9333_v13, %v9649_v62  ;;  %3034 = vrot.lane.b32.xlu1 %v9649_v62, %s6158_s6  ;;  %v9670_v14 = vpop.eup %5771  ;;  %v2421_v25 = vmul.f32 %v9636_v34, %v2316_v57  ;;  %v2303_v10 = vsel %vm2167_vm2, %v9355_v3, %v9330_v4  ;;  %15763 = vst [vmem:[#allocation157_spill] sm:$0xff] %v9677_v31  ;;  %v9700_v57 = vld [vmem:[%s6307_s10 + $0xf0] sm:$0xfe] }
 0x1c7   : > { %v2344_v32 = vsub.f32 %v9677_v31, %v9392_v12  ;;  %v457_v13 = vsub.f32 %v9338_v20, %v9657_v27  ;;  %3032 = vrot.lane.b32.xlu0 %v9657_v27, %s6158_s6  ;;  %v9687_v45 = vpop.eup %5773  ;;  %v9690_v49 = vadd.f32 %v15765_v0, %v1336_v47  ;;  %v2424_v4 = vmul.f32 %v9640_v58, %v2319_v18  ;;  %v15767_v12 = vld [vmem:[#allocation15_spill] sm:$0xff]  ;;  %v9707_v0 = vpop.permute.xlu0 %2544  ;;  %v15776_v31 = vld [vmem:[#allocation184_spill] sm:$0xff] }
 0x1c8   : > { %v464_v3 = vmul.f32 %v458_v48, %v15703_v54  ;;  %v9696_v17 = vmul.f32 %v9670_v14, %v15767_v12  ;;  %v2321_v20 = vmul.f32 %v2315_v42, %v15644_v60  ;;  %15769 = vst [vmem:[#allocation211_spill] sm:$0xff] %v9700_v57  ;;  %v2343_v6 = vsub.f32 %v9700_v57, %v2334_v40  ;;  %v9711_v12 = vld [vmem:[%s6307_s10 + $0xe0] sm:$0x1]  ;;  %v9729_v57 = vld [vmem:[%s6307_s10 + $0x108] sm:$0xff] }
 0x1c9   : > { %15766 = vst [vmem:[#allocation175_spill] sm:$0xff] %v9690_v49  ;;  %v2335_v47 = vsel %vm2167_vm2, %v9486_v61, %v9457_v50  ;;  %v463_v18 = vmul.f32 %v457_v13, %v15703_v54  ;;  %15770 = vst [vmem:[#allocation212_spill] sm:$0xff] %v9707_v0  ;;  %v2423_v48 = vmul.f32 %v9647_v59, %v2318_v37  ;;  %v15772_v40 = vld [vmem:[#allocation20_spill] sm:$0xff]  ;;  %v5453_v61 = vld [vmem:[%s6307_s10 + $0xa8] sm:$0xff] }
 0x1ca   : > { %15768 = vst [vmem:[#allocation15_spill] sm:$0xff] %v9696_v17  ;;  %15771 = vst [vmem:[#allocation213_spill] sm:$0xff] %v9711_v12  ;;  %v2314_v36 = vsub.f32 %v9711_v12, %v2303_v10  ;;  %v9715_v42 = vmul.f32 %v9696_v17, %v464_v3  ;;  %v9719_v49 = vmul.f32 %v9687_v45, %v15772_v40  ;;  %v15775_v3 = vld [vmem:[#allocation208_spill] sm:$0xff] }
 0x1cb   : > { %v2427_v51 = vadd.f32 %v2421_v25, %v9491_v33  ;;  %v9725_v13 = vmul.f32 %v9488_v5, %v9164_v11  ;;  %v2350_v37 = vmul.f32 %v2344_v32, %v15644_v60  ;;  %15774 = vst [vmem:[#allocation214_spill] sm:$0xff] %v9729_v57  ;;  %v2346_v10 = vsub.f32 %v9729_v57, %v9457_v50  ;;  %v9739_v0 = vld [vmem:[%s6307_s10 + $0x100] sm:$0xff]  ;;  %v15779_v25 = vld [vmem:[#allocation117_spill] sm:$0xff]  ;;  %v9751_v50 = vld [vmem:[%s6307_s10 + $0x118] sm:$0x1]  ;;  %v9755_v57 = vpop.permute.xlu1 %2576 }
 0x1cc   : > { %15773 = vst [vmem:[#allocation20_spill] sm:$0xff] %v9719_v49  ;;  %v2430_v17 = vadd.f32 %v2424_v4, %v15775_v3  ;;  %v9736_v40 = vmul.f32 %v9531_v2, %v15776_v31  ;;  %15778 = vst [vmem:[#allocation184_spill] sm:$0xff] %v9739_v0  ;;  %v2345_v33 = vsub.f32 %v9739_v0, %v2335_v47  ;;  %v15781_v4 = vld [vmem:[#allocation209_spill] sm:$0xff]  ;;  %v449_v31 = vrot.slane %v5453_v61, 7 }
 0x1cd   : > { %v9743_v11 = vmul.f32 %v9719_v49, %v463_v18  ;;  %v9747_v32 = vmul.f32 %v9375_v26, %v15779_v25  ;;  %v2349_v23 = vmul.f32 %v2343_v6, %v15644_v60  ;;  %15780 = vst [vmem:[#allocation117_spill] sm:$0xff] %v9751_v50  ;;  %v2348_v3 = vsub.f32 %v9751_v50, %v15781_v4  ;;  %v9757_v53 = vpop.eup %5775  ;;  %v15784_v18 = vld [vmem:[#allocation25_spill] sm:$0xff]  ;;  %v15785_v49 = vld [vmem:[#allocation207_spill] sm:$0xff] }
 0x1ce   : > { %15777 = vst [vmem:[#allocation208_spill] sm:$0xff] %v9736_v40  ;;  %15782 = vst [vmem:[#allocation209_spill] sm:$0xff] %v9755_v57  ;;  %v2429_v47 = vadd.f32 %v2423_v48, %v9546_v9  ;;  %v655_v0 = vmul.f32 %v15711_v1, %v15784_v18  ;;  %v2426_v26 = vmul.f32 %v9725_v13, %v2321_v20  ;;  %v15786_v57 = vld [vmem:[#allocation177_spill] sm:$0xff]  ;;  %v9774_v48 = vpop.permute.xlu0 %2574  ;;  %v15788_v18 = vld [vmem:[#allocation98_spill] sm:$0xff] }
 0x1cf   : > { %15783 = vst [vmem:[#allocation215_spill] sm:$0xff] %v9757_v53  ;;  %v2320_v25 = vmul.f32 %v2314_v36, %v15644_v60  ;;  %v9764_v6 = vpop.eup %5777  ;;  %v654_v50 = vmul.f32 %v15711_v1, %v15785_v49  ;;  %v2434_v61 = vmul.f32 %v9747_v32, %v2350_v37  ;;  %v9771_v22 = vmul.f32 %v9398_v16, %v15786_v57  ;;  %v15789_v49 = vld [vmem:[#allocation201_spill] sm:$0xff] }
 0x1d0   : > { %v2352_v9 = vmul.f32 %v2346_v10, %v15644_v60  ;;  %15787 = vst [vmem:[#allocation177_spill] sm:$0xff] %v9774_v48  ;;  %v9778_v20 = vmul.f32 %v9429_v8, %v15788_v18  ;;  %v2351_v36 = vmul.f32 %v2345_v33, %v15644_v60  ;;  %v450_v7 = vsel %vm359_vm0, %v9649_v62, %v449_v31  ;;  %v9784_v37 = vpop.eup %5779  ;;  %v15790_v10 = vld [vmem:[#allocation198_spill] sm:$0xff]  ;;  %v15791_v48 = vld [vmem:[#allocation108_spill] sm:$0xff]  ;;  %v15793_v18 = vld [vmem:[#allocation91_spill] sm:$0xff] }
 0x1d1   : > { %v462_v12 = vsub.f32 %v15789_v49, %v449_v31  ;;  %v2433_v16 = vmul.f32 %v9771_v22, %v2349_v23  ;;  %v2354_v57 = vmul.f32 %v2348_v3, %v15644_v60  ;;  %v460_v28 = vsub.f32 %v15790_v10, %v450_v7  ;;  %3038 = vrot.lane.b32.xlu1 %v450_v7, %s6158_s6  ;;  %v5452_v8 = vld [vmem:[%s6307_s10 + $0xa0] sm:$0xff]  ;;  %v9795_v33 = vpop.eup %5781  ;;  %v15794_v3 = vld [vmem:[#allocation109_spill] sm:$0xff] }
 0x1d2   : > { %v9791_v52 = vmul.f32 %v9757_v53, %v15791_v48  ;;  %v2432_v62 = vadd.f32 %v2426_v26, %v9605_v19  ;;  %v2425_v49 = vmul.f32 %v9736_v40, %v2320_v25  ;;  %v9801_v23 = vmul.f32 %v9473_v43, %v15793_v18  ;;  %v15796_v7 = vld [vmem:[#allocation181_spill] sm:$0xff]  ;;  %v9814_v26 = vpop.permute.xlu1 %2580 }
 0x1d3   : > { %v9805_v10 = vmul.f32 %v9764_v6, %v15794_v3  ;;  %v2440_v48 = vadd.f32 %v2434_v61, %v9660_v39  ;;  %v2436_v44 = vmul.f32 %v9778_v20, %v2352_v9  ;;  %v9811_v53 = vmul.f32 %v9488_v5, %v15796_v7  ;;  %15797 = vst [vmem:[#allocation198_spill] sm:$0xff] %v9814_v26  ;;  %v15798_v3 = vld [vmem:[#allocation96_spill] sm:$0xff]  ;;  %v15800_v9 = vld [vmem:[#allocation197_spill] sm:$0xff] }
 0x1d4   : > { %15792 = vst [vmem:[#allocation98_spill] sm:$0xff] %v9791_v52  ;;  %v466_v19 = vmul.f32 %v460_v28, %v15703_v54  ;;  %v2435_v25 = vmul.f32 %v9801_v23, %v2351_v36  ;;  %v468_v43 = vmul.f32 %v462_v12, %v15703_v54  ;;  %v447_v18 = vrot.slane %v5452_v8, 7  ;;  %v9831_v36 = vpop.permute.xlu0 %2578  ;;  %v15808_v26 = vld [vmem:[#allocation12_spill] sm:$0xff] }
 0x1d5   : > { %15795 = vst [vmem:[#allocation201_spill] sm:$0xff] %v9805_v10  ;;  %v9820_v40 = vmul.f32 %v9784_v37, %v15798_v3  ;;  %v2439_v39 = vadd.f32 %v2433_v16, %v2427_v51  ;;  %v2438_v61 = vmul.f32 %v9811_v53, %v2354_v57  ;;  %v9828_v28 = vmul.f32 %v9795_v33, %v15800_v9  ;;  %v15803_v57 = vld [vmem:[#allocation202_spill] sm:$0xff]  ;;  %v9847_v3 = vld [vmem:[%s6307_s10 + $0xa0] sm:$0xff] }
 0x1d6   : > { %v9824_v5 = vmul.f32 %v9791_v52, %v466_v19  ;;  %3042 = vrot.lane.b32.xlu1 %v449_v31, %s6158_s6  ;;  %15802 = vst [vmem:[#allocation109_spill] sm:$0xff] %v9831_v36  ;;  %v2336_v12 = vsel %vm2167_vm2, %v9537_v24, %v15781_v4  ;;  %v9837_v51 = vmul.f32 %v9805_v10, %v468_v43  ;;  %15804 = vst [vmem:[#allocation181_spill] sm:$0xff] %v9847_v3  ;;  %v15805_v43 = vld [vmem:[#allocation65_spill] sm:$0xff] }
 0x1d7   : > { %15799 = vst [vmem:[#allocation108_spill] sm:$0xff] %v9820_v40  ;;  %15801 = vst [vmem:[#allocation91_spill] sm:$0xff] %v9828_v28  ;;  %v448_v16 = vsel %vm359_vm0, %v9657_v27, %v447_v18  ;;  %v461_v8 = vsub.f32 %v15803_v57, %v447_v18  ;;  %v657_v7 = vmul.f32 %v15711_v1, %v9540_v29  ;;  %v15806_v10 = vld [vmem:[#allocation13_spill] sm:$0xff] }
 0x1d8   : > { %v656_v31 = vmul.f32 %v15711_v1, %v9561_v55  ;;  %v2442_v19 = vadd.f32 %v2436_v44, %v2430_v17  ;;  %v459_v24 = vsub.f32 %v9847_v3, %v448_v16  ;;  %3036 = vrot.lane.b32.xlu0 %v448_v16, %s6158_s6  ;;  %v659_v4 = vmul.f32 %v15711_v1, %v9550_v30  ;;  %v9859_v44 = vld [vmem:[%s6307_s10 + $0x110] sm:$0x1]  ;;  %v9863_v16 = vpop.permute.xlu1 %2584 }
 0x1d9   : > { %v2446_v27 = vmul.f32 %v2440_v48, %v15805_v43  ;;  %v2441_v9 = vadd.f32 %v2435_v25, %v2429_v47  ;;  %v467_v57 = vmul.f32 %v461_v8, %v15703_v54  ;;  %v9856_v52 = vadd.f32 %v15806_v10, %v655_v0  ;;  %v15811_v25 = vld [vmem:[#allocation114_spill] sm:$0xff] }
 0x1da   : > { %v2444_v36 = vadd.f32 %v2438_v61, %v2432_v62  ;;  %v2347_v17 = vsub.f32 %v9859_v44, %v2336_v12  ;;  %v465_v3 = vmul.f32 %v459_v24, %v15703_v54  ;;  %v9866_v55 = vadd.f32 %v15808_v26, %v654_v50  ;;  %v15810_v62 = vld [vmem:[#allocation66_spill] sm:$0xff]  ;;  %v5455_v50 = vld [vmem:[%s6307_s10 + $0xc8] sm:$0xff]  ;;  %v9882_v26 = vpop.permute.xlu0 %2582 }
 0x1db   : > { %15807 = vst [vmem:[#allocation96_spill] sm:$0xff] %v9856_v52  ;;  %v658_v47 = vmul.f32 %v15711_v1, %v9570_v35  ;;  %v2445_v48 = vmul.f32 %v2439_v39, %v15805_v43  ;;  %v9872_v0 = vmul.f32 %v9828_v28, %v467_v57  ;;  %v1009_v10 = vadd.f32 %v15810_v62, %v657_v7  ;;  %v15812_v39 = vld [vmem:[#allocation27_spill] sm:$0xff]  ;;  %v15814_v57 = vld [vmem:[#allocation76_spill] sm:$0xff] }
 0x1dc   : > { %15809 = vst [vmem:[#allocation197_spill] sm:$0xff] %v9866_v55  ;;  %v1008_v61 = vadd.f32 %v15811_v25, %v656_v31  ;;  %v2448_v12 = vmul.f32 %v2442_v19, %v15805_v43  ;;  %v9878_v8 = vmul.f32 %v9820_v40, %v465_v3  ;;  %3040 = vrot.lane.b32.xlu0 %v447_v18, %s6158_s6  ;;  %v15815_v31 = vld [vmem:[#allocation64_spill] sm:$0xff]  ;;  %v15816_v19 = vld [vmem:[#allocation77_spill] sm:$0xff] }
 0x1dd   : > { %v2431_v1 = vadd.f32 %v2425_v49, %v9618_v41  ;;  %v9886_v24 = vadd.f32 %v15812_v39, %v659_v4  ;;  %v2452_v55 = vadd.f32 %v2446_v27, %v15814_v57  ;;  %v2447_v7 = vmul.f32 %v2441_v9, %v15805_v43  ;;  %v5454_v52 = vld [vmem:[%s6307_s10 + $0xc0] sm:$0xff]  ;;  %v15819_v4 = vld [vmem:[#allocation122_spill] sm:$0xff]  ;;  %v15820_v9 = vld [vmem:[#allocation163_spill] sm:$0xff] }
 0x1de   : > { %v1349_v62 = vadd.f32 %v15815_v31, %v1009_v10  ;;  %v1348_v25 = vadd.f32 %v15816_v19, %v1008_v61  ;;  %v2450_v3 = vmul.f32 %v2444_v36, %v15805_v43  ;;  %v2353_v18 = vmul.f32 %v2347_v17, %v15644_v60  ;;  %v15817_v40 = vld [vmem:[#allocation72_spill] sm:$0xff]  ;;  %v15822_v61 = vld [vmem:[#allocation74_spill] sm:$0xff]  ;;  %v15824_v17 = vld [vmem:[#allocation187_spill] sm:$0xff] }
 0x1df   : > { %15813 = vst [vmem:[#allocation202_spill] sm:$0xff] %v9886_v24  ;;  %v9896_v28 = vadd.f32 %v15817_v40, %v658_v47  ;;  %v2451_v41 = vadd.f32 %v2445_v48, %v15814_v57  ;;  %v474_v49 = vrot.slane %v5455_v50, 7  ;;  %v9903_v27 = vmul.f32 %v9670_v14, %v15819_v4  ;;  %v9918_v47 = vpop.permute.xlu1 %2613  ;;  %v15825_v48 = vld [vmem:[#allocation73_spill] sm:$0xff] }
 0x1e0   : > { %v9906_v10 = vadd.f32 %v15820_v9, %v1349_v62  ;;  %v9909_v36 = vadd.f32 %v15822_v61, %v1348_v25  ;;  %v2454_v60 = vadd.f32 %v2448_v12, %v15814_v57  ;;  %v9914_v40 = vmul.f32 %v9531_v2, %v15824_v17  ;;  %v15828_v25 = vld [vmem:[#allocation81_spill] sm:$0xff]  ;;  %v9935_v9 = vpop.permute.xlu0 %2611  ;;  %v15834_v17 = vld [vmem:[#allocation204_spill] sm:$0xff] }
 0x1e1   : > { %15818 = vst [vmem:[#allocation13_spill] sm:$0xff] %v9896_v28  ;;  %v9921_v50 = vmul.f32 %v2452_v55, %v15825_v48  ;;  %v2453_v39 = vadd.f32 %v2447_v7, %v15814_v57  ;;  %v486_v31 = vsub.f32 %v9554_v38, %v474_v49  ;;  %3067 = vrot.lane.b32.xlu1 %v474_v49, %s6158_s6  ;;  %v473_v62 = vrot.slane %v5454_v52, 7  ;;  %v15830_v38 = vld [vmem:[#allocation203_spill] sm:$0xff] }
 0x1e2   : > { %15821 = vst [vmem:[#allocation12_spill] sm:$0xff] %v9906_v10  ;;  %15823 = vst [vmem:[#allocation66_spill] sm:$0xff] %v9909_v36  ;;  %v9927_v12 = vmul.f32 %v2452_v55, %v9609_v21  ;;  %v2456_v2 = vadd.f32 %v2450_v3, %v15814_v57  ;;  %v2437_v19 = vmul.f32 %v9914_v40, %v2353_v18  ;;  %v15868_v36 = vld [vmem:[#allocation48_spill] sm:$0xff] }
 0x1e3   : > { %15826 = vst [vmem:[#allocation114_spill] sm:$0xff] %v9921_v50  ;;  %v9933_v4 = vmul.f32 %v9687_v45, %v15828_v25  ;;  %v9938_v7 = vmul.f32 %v2452_v55, %v9747_v32  ;;  %v9941_v61 = vmul.f32 %v2451_v41, %v15830_v38  ;;  %v492_v21 = vmul.f32 %v486_v31, %v15703_v54  ;;  %v9976_v25 = vpop.permute.xlu1 %2617 }
 0x1e4   : > { %15827 = vst [vmem:[#allocation27_spill] sm:$0xff] %v9927_v12  ;;  %v485_v52 = vsub.f32 %v9596_v46, %v473_v62  ;;  %3065 = vrot.lane.b32.xlu0 %v473_v62, %s6158_s6  ;;  %v9947_v3 = vmul.f32 %v2451_v41, %v9636_v34  ;;  %v9950_v18 = vmul.f32 %v2451_v41, %v9771_v22 }
 0x1e5   : > { %15829 = vst [vmem:[#allocation64_spill] sm:$0xff] %v9938_v7  ;;  %15831 = vst [vmem:[#allocation77_spill] sm:$0xff] %v9941_v61  ;;  %v9953_v48 = vmul.f32 %v2454_v60, %v15834_v17  ;;  %v9956_v55 = vmul.f32 %v2454_v60, %v9640_v58  ;;  %v9959_v32 = vmul.f32 %v2454_v60, %v9778_v20  ;;  %v5457_v60 = vld [vmem:[%s6307_s10 + $0xd8] sm:$0xff]  ;;  %v5925_v17 = vld [vmem:[%s6307_s10 + $0x8] sm:$0xfe] }
 0x1e6   : > { %15832 = vst [vmem:[#allocation72_spill] sm:$0xff] %v9947_v3  ;;  %15833 = vst [vmem:[#allocation122_spill] sm:$0xff] %v9950_v18  ;;  %v9962_v46 = vmul.f32 %v2453_v39, %v9516_v56  ;;  %v592_v34 = vmul.f32 %v9903_v27, %v492_v21  ;;  %v491_v22 = vmul.f32 %v485_v52, %v15703_v54  ;;  %v15857_v18 = vld [vmem:[#allocation186_spill] sm:$0xff] }
 0x1e7   : > { %15835 = vst [vmem:[#allocation163_spill] sm:$0xff] %v9953_v48  ;;  %15836 = vst [vmem:[#allocation74_spill] sm:$0xff] %v9956_v55  ;;  %v9967_v41 = vmul.f32 %v2453_v39, %v9647_v59  ;;  %v9970_v31 = vmul.f32 %v2453_v39, %v9801_v23  ;;  %v9973_v58 = vmul.f32 %v2456_v2, %v9527_v15  ;;  %v5456_v23 = vld [vmem:[%s6307_s10 + $0xd0] sm:$0xff]  ;;  %v9990_v39 = vstv %s9899_s15  ;;  %v15855_v55 = vld [vmem:[#allocation61_spill] sm:$0xff]  ;;  %s13461_s15 = sld [smem:[#allocation2 + $0xb]] }
 0x1e8   : > { %15837 = vst [vmem:[#allocation187_spill] sm:$0xff] %v9959_v32  ;;  %15838 = vst [vmem:[#allocation73_spill] sm:$0xff] %v9962_v46  ;;  %v2443_v20 = vadd.f32 %v2437_v19, %v2431_v1  ;;  %v9979_v56 = vmul.f32 %v2456_v2, %v9725_v13  ;;  %v9982_v38 = vmul.f32 %v2456_v2, %v9811_v53  ;;  %v9993_v15 = vstv %s9916_s16  ;;  %v15844_v1 = vld [vmem:[#allocation42_spill] sm:$0xff]  ;;  %v15846_v53 = vld [vmem:[#allocation67_spill] sm:$0xff]  ;;  %s13479_s16 = sld [smem:[#allocation5 + $0xb]] }
 0x1e9   : > { %15839 = vst [vmem:[#allocation81_spill] sm:$0xff] %v9967_v41  ;;  %15840 = vst [vmem:[#allocation203_spill] sm:$0xff] %v9970_v31  ;;  %v9985_v21 = vadd.f32 %v592_v34, %v9715_v42  ;;  %v591_v59 = vmul.f32 %v9933_v4, %v491_v22  ;;  %v15845_v19 = vld [vmem:[#allocation146_spill] sm:$0xff]  ;;  %v2558_v13 = vsub.f32 %v5925_v17, %v9572_v63  ;;  %v15847_v2 = vld [vmem:[#allocation145_spill] sm:$0xff]  ;;  %v477_v34 = vrot.slane %v5457_v60, 7 }
 0x1ea   : > { %15841 = vst [vmem:[#allocation204_spill] sm:$0xff] %v9973_v58  ;;  %15842 = vst [vmem:[#allocation216_spill] sm:$0xff] %v9979_v56  ;;  %v1323_v52 = vadd.f32 %v15845_v19, %v15844_v1  ;;  %v9999_v56 = vpop.permute.xlu0 %2615  ;;  %v15848_v22 = vld [vmem:[#allocation23_spill] sm:$0xff]  ;;  %v2449_v41 = vmul.f32 %v2443_v20, %v15805_v43  ;;  %v15850_v1 = vld [vmem:[#allocation60_spill] sm:$0xff] }
 0x1eb   : > { %15843 = vst [vmem:[#allocation217_spill] sm:$0xff] %v9982_v38  ;;  %v1322_v38 = vadd.f32 %v15847_v2, %v15846_v53  ;;  %v10004_v42 = vadd.f32 %v591_v59, %v9743_v11  ;;  %v15849_v58 = vld [vmem:[#allocation215_spill] sm:$0xff]  ;;  %v2548_v19 = vsel %vm2167_vm2, %v15850_v1, %v9572_v63  ;;  %v15851_v17 = vld [vmem:[#allocation206_spill] sm:$0xff]  ;;  %v475_v53 = vrot.slane %v5456_v23, 7  ;;  %v15853_v60 = vld [vmem:[#allocation116_spill] sm:$0xff] }
 0x1ec   : > { %v10008_v31 = vmul.f32 %v15849_v58, %v15848_v22  ;;  %v10016_v46 = vmul.f32 %v9764_v6, %v15851_v17  ;;  %v15852_v11 = vld [vmem:[#allocation166_spill] sm:$0xff]  ;;  %v15854_v2 = vld [vmem:[#allocation51_spill] sm:$0xff]  ;;  %v478_v22 = vsel %vm359_vm0, %v474_v49, %v477_v34  ;;  %v490_v48 = vsub.f32 %v15855_v55, %v477_v34  ;;  %v15858_v17 = vld [vmem:[#allocation213_spill] sm:$0xff] }
 0x1ed   : > { %v1682_v59 = vadd.f32 %v15852_v11, %v1323_v52  ;;  %v2090_v32 = vadd.f32 %v15854_v2, %v15853_v60  ;;  %v10024_v20 = vmul.f32 %v9990_v39, %v2558_v13  ;;  %v488_v63 = vsub.f32 %v15857_v18, %v478_v22  ;;  %3071 = vrot.lane.b32.xlu1 %v478_v22, %s6158_s6  ;;  %v10030_v52 = vpop.permute.xlu1 %2621  ;;  %v5926_v11 = vld [vmem:[%s6307_s10] sm:$0xfe]  ;;  %v10035_v2 = vld [vmem:[%s6307_s10 + $0xd0] sm:$0xff]  ;;  %v15863_v22 = vld [vmem:[#allocation173_spill] sm:$0xff] }
 0x1ee   : > { %v476_v1 = vsel %vm359_vm0, %v473_v62, %v475_v53  ;;  %v489_v23 = vsub.f32 %v15858_v17, %v475_v53  ;;  %15859 = vst [vmem:[#allocation146_spill] sm:$0xff] %v10030_v52  ;;  %v2557_v60 = vsub.f32 %v5926_v11, %v2548_v19  ;;  %v496_v49 = vmul.f32 %v490_v48, %v15703_v54  ;;  %v15861_v13 = vld [vmem:[#allocation200_spill] sm:$0xff]  ;;  %v15862_v62 = vld [vmem:[#allocation162_spill] sm:$0xff]  ;;  %v10052_v61 = vpop.permute.xlu0 %2619  ;;  %v5930_v52 = vld [vmem:[%s6307_s10 + $0x38] sm:$0xfe] }
 0x1ef   : > { %15856 = vst [vmem:[#allocation42_spill] sm:$0xff] %v10024_v20  ;;  %15860 = vst [vmem:[#allocation67_spill] sm:$0xff] %v10035_v2  ;;  %v487_v55 = vsub.f32 %v10035_v2, %v476_v1  ;;  %v10040_v18 = vmul.f32 %v9784_v37, %v15861_v13  ;;  %3069 = vrot.lane.b32.xlu0 %v476_v1, %s6158_s6  ;;  %v2549_v17 = vsel %vm2167_vm2, %v15863_v22, %v15862_v62  ;;  %v15864_v11 = vld [vmem:[#allocation22_spill] sm:$0xff]  ;;  %v5928_v13 = vld [vmem:[%s6307_s10 + $0x18] sm:$0xff] }
 0x1f0   : > { %v494_v3 = vmul.f32 %v488_v63, %v15703_v54  ;;  %v495_v19 = vmul.f32 %v489_v23, %v15703_v54  ;;  %v10050_v48 = vmul.f32 %v9795_v33, %v15864_v11  ;;  %15865 = vst [vmem:[#allocation145_spill] sm:$0xff] %v10052_v61  ;;  %v2455_v7 = vadd.f32 %v2449_v41, %v15814_v57  ;;  %v15866_v22 = vld [vmem:[#allocation82_spill] sm:$0xff]  ;;  %v15867_v63 = vld [vmem:[#allocation97_spill] sm:$0xff]  ;;  %v15869_v41 = vld [vmem:[#allocation44_spill] sm:$0xff] }
 0x1f1   : > { %v2560_v12 = vsub.f32 %v5928_v13, %v15862_v62  ;;  %v596_v1 = vmul.f32 %v10016_v46, %v496_v49  ;;  %v493_v50 = vmul.f32 %v487_v55, %v15703_v54  ;;  %v1681_v2 = vadd.f32 %v15866_v22, %v1322_v38  ;;  %3075 = vrot.lane.b32.xlu1 %v477_v34, %s6158_s6  ;;  %v15872_v34 = vld [vmem:[#allocation59_spill] sm:$0xff]  ;;  %v15879_v13 = vld [vmem:[#allocation49_spill] sm:$0xff] }
 0x1f2   : > { %v2467_v28 = vadd.f32 %v15867_v63, %v2090_v32  ;;  %v594_v23 = vmul.f32 %v10008_v31, %v494_v3  ;;  %v595_v11 = vmul.f32 %v10050_v48, %v495_v19  ;;  %v2088_v24 = vadd.f32 %v15868_v36, %v1682_v59  ;;  %v5459_v22 = vld [vmem:[%s6307_s10 + $0xf8] sm:$0xff]  ;;  %v10106_v63 = vpop.permute.xlu0 %2648 }
 0x1f3   : > { %v2559_v10 = vsub.f32 %v15869_v41, %v2549_v17  ;;  %v10067_v62 = vadd.f32 %v596_v1, %v9837_v51  ;;  %v593_v49 = vmul.f32 %v10040_v18, %v493_v50  ;;  %3073 = vrot.lane.b32.xlu0 %v475_v53, %s6158_s6  ;;  %v2859_v32 = vmul.f32 %v9993_v15, %v10024_v20  ;;  %v10082_v51 = vpop.permute.xlu1 %2650  ;;  %v15878_v17 = vld [vmem:[#allocation127_spill] sm:$0xff] }
 0x1f4   : > { %v10074_v3 = vmul.f32 %v9990_v39, %v2557_v60  ;;  %v10077_v38 = vadd.f32 %v594_v23, %v9824_v5  ;;  %v10080_v36 = vadd.f32 %v595_v11, %v9872_v0  ;;  %15871 = vst [vmem:[#allocation215_spill] sm:$0xff] %v10082_v51  ;;  %v10085_v50 = vmul.f32 %v2455_v7, %v15872_v34  ;;  %v15875_v5 = vld [vmem:[#allocation208_spill] sm:$0xff] }
 0x1f5   : > { %v10089_v53 = vmul.f32 %v10024_v20, %v10024_v20  ;;  %v10092_v59 = vmul.f32 %v9990_v39, %v2560_v12  ;;  %v10095_v60 = vadd.f32 %v593_v49, %v9878_v8  ;;  %v10098_v55 = vmul.f32 %v2455_v7, %v15875_v5  ;;  %15880 = vst [vmem:[#allocation51_spill] sm:$0xff] %v10106_v63  ;;  %v15881_v23 = vld [vmem:[#allocation136_spill] sm:$0xff]  ;;  %v5929_v8 = vld [vmem:[%s6307_s10 + $0x28] sm:$0x1]  ;;  %v15884_v49 = vld [vmem:[#allocation210_spill] sm:$0xff] }
 0x1f6   : > { %15870 = vst [vmem:[#allocation23_spill] sm:$0xff] %v10074_v3  ;;  %15873 = vst [vmem:[#allocation60_spill] sm:$0xff] %v10085_v50  ;;  %v10101_v0 = vmul.f32 %v2455_v7, %v9914_v40  ;;  %v2465_v19 = vadd.f32 %v15878_v17, %v2088_v24  ;;  %v2087_v1 = vadd.f32 %v15879_v13, %v1681_v2  ;;  %v15882_v11 = vld [vmem:[#allocation52_spill] sm:$0xff]  ;;  %v5458_v7 = vld [vmem:[%s6307_s10 + $0xf0] sm:$0xff] }
 0x1f7   : > { %15874 = vst [vmem:[#allocation206_spill] sm:$0xff] %v10092_v59  ;;  %15876 = vst [vmem:[#allocation166_spill] sm:$0xff] %v10098_v55  ;;  %v2089_v12 = vadd.f32 %v15882_v11, %v15881_v23  ;;  %v10111_v41 = vmul.f32 %v9990_v39, %v2559_v10  ;;  %v2562_v34 = vsub.f32 %v5929_v8, %v15884_v49  ;;  %v15885_v5 = vld [vmem:[#allocation212_spill] sm:$0xff]  ;;  %v15887_v2 = vld [vmem:[#allocation133_spill] sm:$0xff]  ;;  %v10138_v61 = vrot.slane %v5458_v7, 7 }
 0x1f8   : > { %15877 = vst [vmem:[#allocation116_spill] sm:$0xff] %v10101_v0  ;;  %v2550_v40 = vsel %vm2167_vm2, %v15885_v5, %v15884_v49  ;;  %v10119_v24 = vadd.f32 %v2859_v32, %v2465_v19  ;;  %v2464_v17 = vadd.f32 %v15887_v2, %v2087_v1  ;;  %v2858_v13 = vmul.f32 %v9993_v15, %v10074_v3  ;;  %v15888_v0 = vld [vmem:[#allocation68_spill] sm:$0xff]  ;;  %v15889_v23 = vld [vmem:[#allocation151_spill] sm:$0xff]  ;;  %v15891_v8 = vld [vmem:[#allocation150_spill] sm:$0xff] }
 0x1f9   : > { %15883 = vst [vmem:[#allocation61_spill] sm:$0xff] %v10111_v41  ;;  %v1327_v11 = vadd.f32 %v15889_v23, %v15888_v0  ;;  %v2861_v10 = vmul.f32 %v9993_v15, %v10092_v59  ;;  %v15890_v55 = vld [vmem:[#allocation40_spill] sm:$0xff]  ;;  %v15892_v63 = vld [vmem:[#allocation37_spill] sm:$0xff]  ;;  %v502_v5 = vrot.slane %v5459_v22, 7  ;;  %v10140_v0 = vpop.permute.xlu1 %2654  ;;  %v2860_v23 = vmul.f32 %v9993_v15, %v10111_v41  ;;  %3098 = vrot.lane.b32.xlu0 %v10138_v61, %s6158_s6 }
 0x1fa   : > { %15886 = vst [vmem:[#allocation186_spill] sm:$0xff] %v10119_v24  ;;  %v1326_v50 = vadd.f32 %v15891_v8, %v15890_v55  ;;  %v15893_v20 = vld [vmem:[#allocation17_spill] sm:$0xff]  ;;  %v15895_v24 = vld [vmem:[#allocation179_spill] sm:$0xff]  ;;  %15897 = vst [vmem:[#allocation213_spill] sm:$0xff] %v10140_v0  ;;  %v10145_v55 = vmul.f32 %v9990_v39, %v2562_v34 }
 0x1fb   : > { %v2085_v49 = vmul.f32 %v15893_v20, %v15892_v63  ;;  %v15894_v32 = vld [vmem:[#allocation89_spill] sm:$0xff]  ;;  %v2561_v1 = vsub.f32 %v15895_v24, %v2550_v40  ;;  %v15899_v63 = vld [vmem:[#allocation155_spill] sm:$0xff]  ;;  %3100 = vrot.lane.b32.xlu1 %v502_v5, %s6158_s6 }
 0x1fc   : > { %v1686_v19 = vadd.f32 %v15894_v32, %v1327_v11  ;;  %v15896_v2 = vld [vmem:[#allocation25_spill] sm:$0xff]  ;;  %15898 = vst [vmem:[#allocation200_spill] sm:$0xff] %v10145_v55  ;;  %v1685_v22 = vadd.f32 %v15899_v63, %v1326_v50  ;;  %v15901_v40 = vld [vmem:[#allocation183_spill] sm:$0xff]  ;;  %v10165_v63 = vadd.f32 %v2858_v13, %v2464_v17 }
 0x1fd   : > { %v10136_v51 = vmul.f32 %v9670_v14, %v15896_v2  ;;  %v15900_v8 = vld [vmem:[#allocation157_spill] sm:$0xff]  ;;  %v10152_v14 = vmul.f32 %v10074_v3, %v10074_v3  ;;  %v2466_v7 = vadd.f32 %v15901_v40, %v2089_v12  ;;  %v15902_v24 = vld [vmem:[#allocation211_spill] sm:$0xff]  ;;  %v10163_v2 = vpop.permute.xlu0 %2652  ;;  %v10171_v3 = vadd.f32 %v2861_v10, %v2467_v28  ;;  %v15907_v40 = vld [vmem:[#allocation50_spill] sm:$0xff] }
 0x1fe   : > { %v514_v11 = vsub.f32 %v15900_v8, %v502_v5  ;;  %v513_v32 = vsub.f32 %v15902_v24, %v10138_v61  ;;  %v15903_v34 = vld [vmem:[#allocation207_spill] sm:$0xff]  ;;  %15904 = vst [vmem:[#allocation162_spill] sm:$0xff] %v10163_v2  ;;  %15905 = vst [vmem:[#allocation173_spill] sm:$0xff] %v10165_v63  ;;  %v10169_v8 = vmul.f32 %v10092_v59, %v10092_v59  ;;  %v5461_v13 = vld [vmem:[%s6307_s10 + $0x108] sm:$0xff]  ;;  %v10197_v2 = vpop.permute.xlu1 %2658 }
 0x1ff   : > { %v10161_v50 = vmul.f32 %v9687_v45, %v15903_v34  ;;  %15906 = vst [vmem:[#allocation22_spill] sm:$0xff] %v10171_v3  ;;  %v10175_v12 = vmul.f32 %v10111_v41, %v10111_v41  ;;  %v2092_v24 = vadd.f32 %v15907_v40, %v1686_v19  ;;  %v10179_v45 = vmul.f32 %v9990_v39, %v2561_v1  ;;  %v15910_v3 = vld [vmem:[#allocation19_spill] sm:$0xff]  ;;  %v15911_v41 = vld [vmem:[#allocation149_spill] sm:$0xff]  ;;  %v15912_v19 = vld [vmem:[#allocation182_spill] sm:$0xff] }
 0x200   : > { %v520_v34 = vmul.f32 %v514_v11, %v15703_v54  ;;  %v519_v17 = vmul.f32 %v513_v32, %v15703_v54  ;;  %v10184_v63 = vadd.f32 %v2860_v23, %v2466_v7  ;;  %v10188_v28 = vmul.f32 %v10145_v55, %v10145_v55  ;;  %15913 = vst [vmem:[#allocation48_spill] sm:$0xff] %v10197_v2  ;;  %v15914_v23 = vld [vmem:[#allocation185_spill] sm:$0xff] }
 0x201   : > { %15908 = vst [vmem:[#allocation82_spill] sm:$0xff] %v10179_v45  ;;  %v2091_v10 = vadd.f32 %v2085_v49, %v1685_v22  ;;  %v1335_v59 = vadd.f32 %v15911_v41, %v15910_v3  ;;  %v2469_v40 = vadd.f32 %v15912_v19, %v2092_v24  ;;  %v2863_v1 = vmul.f32 %v9993_v15, %v10145_v55  ;;  %v15916_v49 = vld [vmem:[#allocation209_spill] sm:$0xff] }
 0x202   : > { %15909 = vst [vmem:[#allocation97_spill] sm:$0xff] %v10184_v63  ;;  %v604_v11 = vmul.f32 %v10136_v51, %v520_v34  ;;  %v603_v32 = vmul.f32 %v10161_v50, %v519_v17  ;;  %v15915_v63 = vld [vmem:[#allocation104_spill] sm:$0xff]  ;;  %v2596_v22 = vsub.f32 %v5930_v52, %v15916_v49  ;;  %v505_v3 = vrot.slane %v5461_v13, 7  ;;  %v15921_v52 = vld [vmem:[#allocation177_spill] sm:$0xff] }
 0x203   : > { %v2468_v7 = vadd.f32 %v15914_v23, %v2091_v10  ;;  %v1694_v0 = vadd.f32 %v15915_v63, %v1335_v59  ;;  %v10205_v41 = vmul.f32 %v10179_v45, %v10179_v45  ;;  %v2862_v24 = vmul.f32 %v9993_v15, %v10179_v45  ;;  %v10211_v10 = vpop.permute.xlu0 %2656  ;;  %v15919_v59 = vld [vmem:[#allocation30_spill] sm:$0xff]  ;;  %v15920_v63 = vld [vmem:[#allocation147_spill] sm:$0xff]  ;;  %v15922_v55 = vld [vmem:[#allocation117_spill] sm:$0xff] }
 0x204   : > { %v610_v34 = vadd.f32 %v604_v11, %v9985_v21  ;;  %v609_v17 = vadd.f32 %v603_v32, %v10004_v42  ;;  %15918 = vst [vmem:[#allocation59_spill] sm:$0xff] %v10211_v10  ;;  %v1334_v19 = vadd.f32 %v15920_v63, %v15919_v59  ;;  %v2586_v13 = vsel %vm2167_vm2, %v15921_v52, %v15916_v49  ;;  %v15924_v11 = vld [vmem:[#allocation214_spill] sm:$0xff]  ;;  %v5460_v45 = vld [vmem:[%s6307_s10 + $0x100] sm:$0xff]  ;;  %v15925_v59 = vld [vmem:[#allocation53_spill] sm:$0xff] }
 0x205   : > { %15917 = vst [vmem:[#allocation44_spill] sm:$0xff] %v10205_v41  ;;  %v506_v23 = vsel %vm359_vm0, %v502_v5, %v505_v3  ;;  %v518_v2 = vsub.f32 %v15922_v55, %v505_v3  ;;  %v10220_v41 = vadd.f32 %v2863_v1, %v2469_v40  ;;  %v2100_v63 = vadd.f32 %v15925_v59, %v1694_v0  ;;  %v15927_v49 = vld [vmem:[#allocation154_spill] sm:$0xff]  ;;  %v10243_v0 = vpop.permute.xlu1 %2687 }
 0x206   : > { %v617_v21 = vmul.f32 %v15805_v43, %v610_v34  ;;  %v616_v42 = vmul.f32 %v15805_v43, %v609_v17  ;;  %v516_v32 = vsub.f32 %v15924_v11, %v506_v23  ;;  %3104 = vrot.lane.b32.xlu1 %v506_v23, %s6158_s6  ;;  %v10229_v10 = vmul.f32 %v2596_v22, %v9990_v39  ;;  %v5931_v40 = vld [vmem:[%s6307_s10 + $0x30] sm:$0xfe]  ;;  %v15928_v11 = vld [vmem:[#allocation111_spill] sm:$0xff] }
 0x207   : > { %15923 = vst [vmem:[#allocation208_spill] sm:$0xff] %v10220_v41  ;;  %v1693_v5 = vadd.f32 %v15927_v49, %v1334_v19  ;;  %v10234_v55 = vmul.f32 %v15849_v58, %v9540_v29  ;;  %v2595_v1 = vsub.f32 %v5931_v40, %v2586_v13  ;;  %v10241_v52 = vmul.f32 %v9764_v6, %v9550_v30  ;;  %v15929_v58 = vld [vmem:[#allocation15_spill] sm:$0xff]  ;;  %v15930_v6 = vld [vmem:[#allocation20_spill] sm:$0xff]  ;;  %v15933_v40 = vld [vmem:[#allocation54_spill] sm:$0xff] }
 0x208   : > { %15926 = vst [vmem:[#allocation127_spill] sm:$0xff] %v10229_v10  ;;  %v624_v34 = vadd.f32 %v15814_v57, %v617_v21  ;;  %v623_v17 = vadd.f32 %v15814_v57, %v616_v42  ;;  %v522_v22 = vmul.f32 %v516_v32, %v15703_v54  ;;  %v524_v19 = vmul.f32 %v518_v2, %v15703_v54  ;;  %v10264_v2 = vpop.permute.xlu0 %2685 }
 0x209   : > { %v503_v23 = vrot.slane %v5460_v45, 7  ;;  %v10249_v29 = vmul.f32 %v9784_v37, %v15928_v11  ;;  %v10266_v45 = vadd.f32 %v2862_v24, %v2468_v7  ;;  %v2762_v37 = vmul.f32 %v10229_v10, %v10229_v10  ;;  %v15934_v7 = vld [vmem:[#allocation158_spill] sm:$0xff]  ;;  %v15935_v24 = vld [vmem:[#allocation56_spill] sm:$0xff] }
 0x20a   : > { %v10252_v13 = vmul.f32 %v624_v34, %v15929_v58  ;;  %v10255_v21 = vmul.f32 %v624_v34, %v9903_v27  ;;  %v10258_v30 = vmul.f32 %v624_v34, %v10136_v51  ;;  %v10261_v42 = vmul.f32 %v623_v17, %v15930_v6  ;;  %3108 = vrot.lane.b32.xlu1 %v505_v3, %s6158_s6  ;;  %v15932_v51 = vld [vmem:[#allocation188_spill] sm:$0xff]  ;;  %v15936_v58 = vld [vmem:[#allocation198_spill] sm:$0xff]  ;;  %v15937_v6 = vld [vmem:[#allocation109_spill] sm:$0xff] }
 0x20b   : > { %15931 = vst [vmem:[#allocation49_spill] sm:$0xff] %v10266_v45  ;;  %v10271_v32 = vmul.f32 %v623_v17, %v9933_v4  ;;  %v10274_v27 = vmul.f32 %v623_v17, %v10161_v50  ;;  %v2477_v59 = vadd.f32 %v15932_v51, %v2100_v63  ;;  %v2871_v49 = vmul.f32 %v9993_v15, %v10229_v10  ;;  %v5932_v17 = vld [vmem:[%s6307_s10 + $0x48] sm:$0xff]  ;;  %v5933_v10 = vld [vmem:[%s6307_s10 + $0x40] sm:$0xff] }
 0x20c   : > { %v2099_v3 = vadd.f32 %v15933_v40, %v1693_v5  ;;  %v10281_v34 = vmul.f32 %v2595_v1, %v9990_v39  ;;  %v2102_v11 = vadd.f32 %v15935_v24, %v15934_v7  ;;  %v2587_v4 = vsel %vm2167_vm2, %v15937_v6, %v15936_v58  ;;  %v10297_v7 = vpop.permute.xlu1 %2691  ;;  %v15938_v6 = vld [vmem:[#allocation184_spill] sm:$0xff] }
 0x20d   : > { %v606_v50 = vmul.f32 %v10234_v55, %v522_v22  ;;  %v608_v63 = vmul.f32 %v10241_v52, %v524_v19  ;;  %v2598_v51 = vsub.f32 %v5932_v17, %v15936_v58  ;;  %v504_v5 = vsel %vm359_vm0, %v10138_v61, %v503_v23  ;;  %v15939_v58 = vld [vmem:[#allocation189_spill] sm:$0xff]  ;;  %v15940_v17 = vld [vmem:[#allocation175_spill] sm:$0xff] }
 0x20e   : > { %v517_v1 = vsub.f32 %v9859_v44, %v503_v23  ;;  %v583_v40 = vmul.f32 %v9795_v33, %v9570_v35  ;;  %v10300_v24 = vadd.f32 %v2762_v37, %v10089_v53  ;;  %v515_v45 = vsub.f32 %v15938_v6, %v504_v5  ;;  %3102 = vrot.lane.b32.xlu0 %v504_v5, %s6158_s6  ;;  %v15941_v44 = vld [vmem:[#allocation58_spill] sm:$0xff]  ;;  %v10311_v53 = vpop.permute.xlu0 %2689 }
 0x20f   : > { %v612_v22 = vadd.f32 %v606_v50, %v10077_v38  ;;  %v614_v19 = vadd.f32 %v608_v63, %v10067_v62  ;;  %v2476_v61 = vadd.f32 %v15939_v58, %v2099_v3  ;;  %v2101_v41 = vadd.f32 %v15941_v44, %v15940_v17  ;;  %v15944_v58 = vld [vmem:[#allocation98_spill] sm:$0xff]  ;;  %v15945_v44 = vld [vmem:[#allocation201_spill] sm:$0xff] }
 0x210   : > { %v2597_v35 = vsub.f32 %v5933_v10, %v2587_v4  ;;  %v523_v33 = vmul.f32 %v517_v1, %v15703_v54  ;;  %v10313_v37 = vadd.f32 %v2871_v49, %v2477_v59  ;;  %v521_v50 = vmul.f32 %v515_v45, %v15703_v54  ;;  %v15943_v10 = vld [vmem:[#allocation190_spill] sm:$0xff]  ;;  %v5934_v45 = vld [vmem:[%s6307_s10 + $0x58] sm:$0x1]  ;;  %v10339_v6 = vpop.permute.xlu1 %2695 }
 0x211   : > { %v619_v62 = vmul.f32 %v15805_v43, %v612_v22  ;;  %v621_v38 = vmul.f32 %v15805_v43, %v614_v19  ;;  %v2761_v3 = vmul.f32 %v10281_v34, %v10281_v34  ;;  %v2870_v63 = vmul.f32 %v9993_v15, %v10281_v34 }
 0x212   : > { %15942 = vst [vmem:[#allocation136_spill] sm:$0xff] %v10313_v37  ;;  %v2479_v4 = vadd.f32 %v15943_v10, %v2102_v11  ;;  %v607_v5 = vmul.f32 %v583_v40, %v523_v33  ;;  %v10324_v1 = vmul.f32 %v2598_v51, %v9990_v39  ;;  %v605_v22 = vmul.f32 %v10249_v29, %v521_v50 }
 0x213   : > { %v626_v59 = vadd.f32 %v15814_v57, %v619_v62  ;;  %v628_v49 = vadd.f32 %v15814_v57, %v621_v38  ;;  %3106 = vrot.lane.b32.xlu0 %v503_v23, %s6158_s6  ;;  %v10331_v54 = vmul.f32 %v2597_v35, %v9990_v39  ;;  %v2600_v19 = vsub.f32 %v5934_v45, %v9863_v16  ;;  %v10361_v38 = vpop.permute.xlu0 %2693 }
 0x214   : > { %v2588_v11 = vsel %vm2167_vm2, %v9882_v26, %v9863_v16  ;;  %v613_v51 = vadd.f32 %v607_v5, %v10080_v36  ;;  %v611_v26 = vadd.f32 %v605_v22, %v10095_v60  ;;  %v10364_v50 = vadd.f32 %v2761_v3, %v10152_v14  ;;  %v15947_v5 = vld [vmem:[#allocation32_spill] sm:$0xff]  ;;  %v15949_v3 = vld [vmem:[#allocation174_spill] sm:$0xff]  ;;  %v15950_v22 = vld [vmem:[#allocation75_spill] sm:$0xff]  ;;  %v10393_v37 = vpop.permute.xlu1 %2724 }
 0x215   : > { %v10342_v17 = vmul.f32 %v626_v59, %v15944_v58  ;;  %v10345_v23 = vmul.f32 %v628_v49, %v15945_v44  ;;  %v10348_v35 = vmul.f32 %v626_v59, %v10008_v31  ;;  %v10351_v33 = vmul.f32 %v628_v49, %v10016_v46  ;;  %v15946_v31 = vld [vmem:[#allocation191_spill] sm:$0xff]  ;;  %v15948_v46 = vld [vmem:[#allocation153_spill] sm:$0xff]  ;;  %v5935_v58 = vld [vmem:[%s6307_s10 + $0x50] sm:$0x1] }
 0x216   : > { %v10354_v62 = vmul.f32 %v626_v59, %v10234_v55  ;;  %v10357_v16 = vmul.f32 %v628_v49, %v10241_v52  ;;  %v620_v36 = vmul.f32 %v15805_v43, %v613_v51  ;;  %v2478_v10 = vadd.f32 %v15946_v31, %v2101_v41  ;;  %v15951_v51 = vld [vmem:[#allocation152_spill] sm:$0xff] }
 0x217   : > { %v1339_v45 = vadd.f32 %v15948_v46, %v15947_v5  ;;  %v2599_v55 = vsub.f32 %v5935_v58, %v2588_v11  ;;  %v2764_v52 = vmul.f32 %v10324_v1, %v10324_v1  ;;  %v2873_v60 = vmul.f32 %v9993_v15, %v10324_v1  ;;  %v15952_v11 = vld [vmem:[#allocation205_spill] sm:$0xff]  ;;  %v15954_v58 = vld [vmem:[#allocation91_spill] sm:$0xff] }
 0x218   : > { %v618_v59 = vmul.f32 %v15805_v43, %v611_v26  ;;  %v627_v49 = vadd.f32 %v15814_v57, %v620_v36  ;;  %v2763_v14 = vmul.f32 %v10331_v54, %v10331_v54  ;;  %v1338_v44 = vadd.f32 %v15951_v51, %v15950_v22  ;;  %v15956_v43 = vld [vmem:[#allocation45_spill] sm:$0xff] }
 0x219   : > { %v1698_v41 = vadd.f32 %v15949_v3, %v1339_v45  ;;  %v2633_v31 = vsub.f32 %v15952_v11, %v9918_v47  ;;  %v10384_v5 = vmul.f32 %v2600_v19, %v9990_v39  ;;  %v15955_v45 = vld [vmem:[#allocation119_spill] sm:$0xff]  ;;  %v2097_v22 = vmul.f32 %v15893_v20, %v15956_v43  ;;  %v15958_v11 = vld [vmem:[#allocation108_spill] sm:$0xff] }
 0x21a   : > { %v625_v46 = vadd.f32 %v15814_v57, %v618_v59  ;;  %v10388_v26 = vmul.f32 %v627_v49, %v15954_v58  ;;  %v10391_v36 = vmul.f32 %v627_v49, %v10050_v48  ;;  %v1697_v3 = vadd.f32 %v15955_v45, %v1338_v44  ;;  %v10414_v45 = vpop.permute.xlu0 %2722 }
 0x21b   : > { %15953 = vst [vmem:[#allocation52_spill] sm:$0xff] %v10384_v5  ;;  %v10399_v51 = vmul.f32 %v2599_v55, %v9990_v39  ;;  %v10401_v19 = vmul.f32 %v627_v49, %v583_v40  ;;  %v2872_v59 = vmul.f32 %v9993_v15, %v10331_v54  ;;  %v10416_v43 = vadd.f32 %v2870_v63, %v2476_v61  ;;  %v15962_v63 = vld [vmem:[#allocation96_spill] sm:$0xff] }
 0x21c   : > { %v10406_v58 = vmul.f32 %v625_v46, %v15958_v11  ;;  %v10409_v48 = vmul.f32 %v625_v46, %v10040_v18  ;;  %v10412_v44 = vmul.f32 %v625_v46, %v10249_v29  ;;  %v10419_v40 = vadd.f32 %v2764_v52, %v10169_v8  ;;  %v15961_v11 = vld [vmem:[#allocation57_spill] sm:$0xff] }
 0x21d   : > { %15957 = vst [vmem:[#allocation210_spill] sm:$0xff] %v10399_v51  ;;  %15959 = vst [vmem:[#allocation212_spill] sm:$0xff] %v10416_v43  ;;  %v10422_v55 = vmul.f32 %v2633_v31, %v9990_v39  ;;  %v2623_v49 = vsel %vm2167_vm2, %v9935_v9, %v9918_v47  ;;  %v10427_v18 = vadd.f32 %v2873_v60, %v2479_v4  ;;  %v15963_v4 = vld [vmem:[#allocation121_spill] sm:$0xff]  ;;  %v15965_v31 = vld [vmem:[#allocation192_spill] sm:$0xff] }
 0x21e   : > { %v2104_v29 = vadd.f32 %v15961_v11, %v1698_v41  ;;  %v2766_v46 = vmul.f32 %v10384_v5, %v10384_v5  ;;  %v2875_v61 = vmul.f32 %v9993_v15, %v10384_v5  ;;  %v2103_v8 = vadd.f32 %v2097_v22, %v1697_v3  ;;  %v10454_v43 = vld [vmem:[%s6307_s10 + $0x60] sm:$0xfe]  ;;  %v10457_v22 = vpop.permute.xlu1 %2728 }
 0x21f   : > { %15960 = vst [vmem:[#allocation133_spill] sm:$0xff] %v10427_v18  ;;  %v2765_v47 = vmul.f32 %v10399_v51, %v10399_v51  ;;  %v2874_v9 = vmul.f32 %v9993_v15, %v10399_v51  ;;  %v1347_v52 = vadd.f32 %v15963_v4, %v15962_v63  ;;  %v10448_v60 = vadd.f32 %v2763_v14, %v10175_v12  ;;  %v15967_v18 = vld [vmem:[#allocation193_spill] sm:$0xff]  ;;  %v15968_v5 = vld [vmem:[#allocation112_spill] sm:$0xff]  ;;  %v10464_v4 = vld [vmem:[%s6307_s10 + $0x78] sm:$0xff] }
 0x220   : > { %v10450_v41 = vadd.f32 %v2872_v59, %v2478_v10  ;;  %v2481_v11 = vadd.f32 %v15965_v31, %v2104_v29  ;;  %15966 = vst [vmem:[#allocation151_spill] sm:$0xff] %v10454_v43  ;;  %v2632_v3 = vsub.f32 %v10454_v43, %v2623_v49  ;;  %v2480_v57 = vadd.f32 %v15967_v18, %v2103_v8  ;;  %v3309_v10 = vld [vmem:[%s10439_s25 + $0x8] sm:$0xff]  ;;  %v3308_v14 = vld [vmem:[%s10439_s25] sm:$0xff]  ;;  %v15972_v18 = vld [vmem:[#allocation34_spill] sm:$0xff] }
 0x221   : > { %v1706_v51 = vadd.f32 %v15968_v5, %v1347_v52  ;;  %v2774_v63 = vmul.f32 %v10422_v55, %v10422_v55  ;;  %15969 = vst [vmem:[#allocation40_spill] sm:$0xff] %v10464_v4  ;;  %v2635_v12 = vsub.f32 %v10464_v4, %v9976_v25  ;;  %v10471_v59 = vadd.f32 %v2766_v46, %v10188_v28  ;;  %v15971_v29 = vld [vmem:[#allocation197_spill] sm:$0xff]  ;;  %v10480_v52 = vpop.permute.xlu0 %2726  ;;  %v15974_v31 = vld [vmem:[#allocation126_spill] sm:$0xff]  ;;  %v15976_v46 = vld [vmem:[#allocation44_spill] sm:$0xff] }
 0x222   : > { %15964 = vst [vmem:[#allocation68_spill] sm:$0xff] %v10450_v41  ;;  %v10473_v49 = vadd.f32 %v2875_v61, %v2481_v11  ;;  %v1346_v5 = vadd.f32 %v15972_v18, %v15971_v29  ;;  %v2624_v8 = vsel %vm2167_vm2, %v9999_v56, %v9976_v25  ;;  %15973 = vst [vmem:[#allocation37_spill] sm:$0xff] %v10480_v52  ;;  %v15975_v4 = vld [vmem:[#allocation129_spill] sm:$0xff]  ;;  %v15978_v29 = vld [vmem:[#allocation79_spill] sm:$0xff]  ;;  %v3342_v56 = vrot.slane %v3309_v10, 7 }
 0x223   : > { %v10484_v41 = vadd.f32 %v15974_v31, %v10252_v13  ;;  %v10488_v28 = vadd.f32 %v15975_v4, %v10255_v21  ;;  %v10491_v61 = vadd.f32 %v2765_v47, %v15976_v46  ;;  %v10493_v11 = vadd.f32 %v2874_v9, %v2480_v57  ;;  %v3311_v43 = vld [vmem:[%s10439_s25 + $0x18] sm:$0xff]  ;;  %v15979_v13 = vld [vmem:[#allocation62_spill] sm:$0xff] }
 0x224   : > { %15970 = vst [vmem:[#allocation150_spill] sm:$0xff] %v10473_v49  ;;  %v1705_v18 = vadd.f32 %v15978_v29, %v1346_v5  ;;  %v10497_v25 = vmul.f32 %v2632_v3, %v9990_v39  ;;  %v3341_v49 = vrot.slane %v3308_v14, 7  ;;  %v2112_v31 = vadd.f32 %v15979_v13, %v1706_v51  ;;  %v10506_v47 = vld [vmem:[%s6307_s10 + $0x70] sm:$0xff]  ;;  %3349 = vrot.lane.b32.xlu1 %v3342_v56, %s6158_s6  ;;  %v15990_v13 = vld [vmem:[#allocation140_spill] sm:$0xff] }
 0x225   : > { %15977 = vst [vmem:[#allocation17_spill] sm:$0xff] %v10493_v11  ;;  %v2780_v52 = vadd.f32 %v2774_v63, %v10300_v24  ;;  %v10503_v21 = vmul.f32 %v2635_v12, %v9990_v39  ;;  %15980 = vst [vmem:[#allocation89_spill] sm:$0xff] %v10506_v47  ;;  %v2634_v57 = vsub.f32 %v10506_v47, %v2624_v8  ;;  %v15981_v9 = vld [vmem:[#allocation130_spill] sm:$0xff]  ;;  %v10520_v24 = vld [vmem:[%s6307_s10 + $0x88] sm:$0x1]  ;;  %v10524_v12 = vpop.permute.xlu1 %2732  ;;  %v3345_v29 = vrot.slane %v3311_v43, 7 }
 0x226   : > { %v10511_v4 = vadd.f32 %v15981_v9, %v10258_v30  ;;  %v15982_v3 = vld [vmem:[#allocation94_spill] sm:$0xff]  ;;  %3347 = vrot.lane.b32.xlu0 %v3341_v49, %s6158_s6  ;;  %15983 = vst [vmem:[#allocation179_spill] sm:$0xff] %v10520_v24  ;;  %15985 = vst [vmem:[#allocation25_spill] sm:$0xff] %v10524_v12  ;;  %v15987_v30 = vld [vmem:[#allocation105_spill] sm:$0xff]  ;;  %v1021_v9 = vadd.f32 %v15990_v13, %v10342_v17  ;;  %v2773_v47 = vmul.f32 %v10497_v25, %v10497_v25 }
 0x227   : > { %v10515_v10 = vadd.f32 %v15982_v3, %v10261_v42  ;;  %v15984_v51 = vld [vmem:[#allocation146_spill] sm:$0xff]  ;;  %v10532_v8 = vadd.f32 %v15987_v30, %v10274_v27  ;;  %v2883_v3 = vmul.f32 %v9993_v15, %v10422_v55  ;;  %v15991_v11 = vld [vmem:[#allocation63_spill] sm:$0xff]  ;;  %v15994_v27 = vld [vmem:[#allocation137_spill] sm:$0xff]  ;;  %v2786_v43 = vadd.f32 1e-09, %v2780_v52 }
 0x228   : > { %v2637_v63 = vsub.f32 %v10520_v24, %v15984_v51  ;;  %v15986_v14 = vld [vmem:[#allocation102_spill] sm:$0xff]  ;;  %v2111_v24 = vadd.f32 %v15991_v11, %v1705_v18  ;;  %v10549_v30 = vadd.f32 %v15994_v27, %v10345_v23  ;;  %v2776_v17 = vmul.f32 %v10503_v21, %v10503_v21  ;;  %v16000_v52 = vld [vmem:[#allocation139_spill] sm:$0xff] }
 0x229   : > { %v10528_v5 = vadd.f32 %v15986_v14, %v10271_v32  ;;  %15988 = vst [vmem:[#allocation155_spill] sm:$0xff] %v10532_v8  ;;  %v15989_v42 = vld [vmem:[#allocation194_spill] sm:$0xff]  ;;  %v10545_v14 = vpop.permute.xlu0 %2730  ;;  %v10569_v27 = vadd.f32 %v16000_v52, %v10357_v16  ;;  %v2779_v8 = vadd.f32 %v2773_v47, %v10364_v50  ;;  %v10581_v16 = vpop.permute.xlu1 %2934  ;;  %5783 = vrsqrt.f32 %v2786_v43  ;;  %v10596_v47 = vld [vmem:[%s6307_s10 + $0x80] sm:$0x1] }
 0x22a   : > { %v2489_v46 = vadd.f32 %v15989_v42, %v2112_v31  ;;  %v10543_v32 = vld [vmem:[%s10439_s25 + $0x10] sm:$0xff]  ;;  %15993 = vst [vmem:[#allocation183_spill] sm:$0xff] %v10545_v14  ;;  %15995 = vst [vmem:[#allocation211_spill] sm:$0xff] %v10549_v30  ;;  %v10554_v31 = vmul.f32 %v2634_v57, %v9990_v39  ;;  %v15999_v14 = vld [vmem:[#allocation144_spill] sm:$0xff]  ;;  %v10565_v23 = vmul.f32 %v2637_v63, %v9990_v39 }
 0x22b   : > { %15992 = vst [vmem:[#allocation157_spill] sm:$0xff] %v10543_v32  ;;  %v15996_v11 = vld [vmem:[#allocation142_spill] sm:$0xff]  ;;  %v1045_v12 = vadd.f32 %v15999_v14, %v10354_v62  ;;  %v16001_v57 = vld [vmem:[#allocation145_spill] sm:$0xff]  ;;  %v16003_v62 = vld [vmem:[#allocation172_spill] sm:$0xff] }
 0x22c   : > { %v1033_v18 = vadd.f32 %v15996_v11, %v10348_v35  ;;  %v15997_v42 = vld [vmem:[#allocation138_spill] sm:$0xff]  ;;  %v2625_v30 = vsel %vm2167_vm2, %v16001_v57, %v15984_v51  ;;  %v3346_v35 = vsel %vm359_vm0, %v3342_v56, %v3345_v29  ;;  %v16002_v11 = vld [vmem:[#allocation171_spill] sm:$0xff]  ;;  %16005 = vst [vmem:[#allocation50_spill] sm:$0xff] %v10581_v16  ;;  %v2782_v51 = vadd.f32 %v2776_v17, %v10419_v40  ;;  %v16006_v57 = vld [vmem:[#allocation128_spill] sm:$0xff] }
 0x22d   : > { %v10560_v13 = vadd.f32 %v15997_v42, %v10351_v33  ;;  %v3343_v33 = vrot.slane %v10543_v32, 7  ;;  %v1361_v42 = vadd.f32 %v16002_v11, %v1021_v9  ;;  %3353 = vrot.lane.b32.xlu1 %v3346_v35, %s6158_s6  ;;  %v2775_v56 = vmul.f32 %v10554_v31, %v10554_v31  ;;  %v5534_v9 = vld [vmem:[%s10439_s25 + $0x38] sm:$0xff]  ;;  %16008 = vst [vmem:[#allocation149_spill] sm:$0xff] %v10596_v47  ;;  %v10600_v43 = vpop.permute.xlu0 %2932  ;;  %v16013_v11 = vld [vmem:[#allocation132_spill] sm:$0xff]  ;;  %v16041_v16 = vld [vmem:[#allocation106_spill] sm:$0xff] }
 0x22e   : > { %v1373_v14 = vadd.f32 %v16003_v62, %v1033_v18  ;;  %v2778_v50 = vmul.f32 %v10565_v23, %v10565_v23  ;;  %v2636_v40 = vsub.f32 %v10596_v47, %v2625_v30  ;;  %16009 = vst [vmem:[#allocation182_spill] sm:$0xff] %v10600_v43  ;;  %v5533_v62 = vld [vmem:[%s10439_s25 + $0x30] sm:$0xff]  ;;  %v16014_v30 = vld [vmem:[#allocation135_spill] sm:$0xff]  ;;  %v2788_v47 = vadd.f32 1e-09, %v2782_v51  ;;  %v16022_v32 = vld [vmem:[#allocation12_spill] sm:$0xff] }
 0x22f   : > { %15998 = vst [vmem:[#allocation207_spill] sm:$0xff] %v10560_v13  ;;  %v16004_v13 = vld [vmem:[#allocation148_spill] sm:$0xff]  ;;  %v3344_v52 = vsel %vm359_vm0, %v3341_v49, %v3343_v33  ;;  %v10589_v18 = vadd.f32 %v16006_v57, %v1361_v42  ;;  %v16010_v49 = vld [vmem:[#allocation85_spill] sm:$0xff]  ;;  %v10614_v42 = vadd.f32 %v16013_v11, %v10391_v36  ;;  %v16015_v57 = vld [vmem:[#allocation134_spill] sm:$0xff] }
 0x230   : > { %v1385_v63 = vadd.f32 %v16004_v13, %v1045_v12  ;;  %v10591_v12 = vadd.f32 %v2883_v3, %v2489_v46  ;;  %3351 = vrot.lane.b32.xlu0 %v3344_v52, %s6158_s6  ;;  %v10603_v17 = vadd.f32 %v16010_v49, %v1373_v14  ;;  %v16011_v13 = vld [vmem:[#allocation115_spill] sm:$0xff]  ;;  %v1020_v52 = vadd.f32 %v16014_v30, %v10406_v58  ;;  %v10625_v49 = vld [vmem:[%s10439_s25 + $0x48] sm:$0xff] }
 0x231   : > { %v16012_v46 = vld [vmem:[#allocation131_spill] sm:$0xff]  ;;  %v2785_v14 = vadd.f32 1e-09, %v2779_v8  ;;  %3357 = vrot.lane.b32.xlu1 %v3345_v29, %s6158_s6  ;;  %v2781_v58 = vadd.f32 %v2775_v56, %v10448_v60  ;;  %v2784_v8 = vadd.f32 %v2778_v50, %v10471_v59  ;;  %v10638_v29 = vmul.f32 %v2636_v40, %v9990_v39  ;;  %v16026_v56 = vld [vmem:[#allocation80_spill] sm:$0xff] }
 0x232   : > { %16007 = vst [vmem:[#allocation19_spill] sm:$0xff] %v10591_v12  ;;  %v10606_v35 = vadd.f32 %v16011_v13, %v1385_v63  ;;  %v10610_v3 = vadd.f32 %v16012_v46, %v10388_v26  ;;  %v10621_v12 = vadd.f32 %v16015_v57, %v10401_v19  ;;  %v3386_v63 = vrot.slane %v5534_v9, 7  ;;  %v10628_v26 = vld [vmem:[%s10439_s25 + $0x40] sm:$0xff]  ;;  %v16018_v13 = vld [vmem:[#allocation141_spill] sm:$0xff]  ;;  %v16019_v46 = vld [vmem:[#allocation143_spill] sm:$0xff]  ;;  %v10641_v57 = vpop.permute.xlu1 %2938 }
 0x233   : > { %16017 = vst [vmem:[#allocation104_spill] sm:$0xff] %v10628_v26  ;;  %v1032_v36 = vadd.f32 %v16018_v13, %v10409_v48  ;;  %v1044_v11 = vadd.f32 %v16019_v46, %v10412_v44  ;;  %v16020_v30 = vld [vmem:[#allocation195_spill] sm:$0xff]  ;;  %v3385_v9 = vrot.slane %v5533_v62, 7  ;;  %16021 = vst [vmem:[#allocation209_spill] sm:$0xff] %v10641_v57  ;;  %v16023_v48 = vld [vmem:[#allocation70_spill] sm:$0xff]  ;;  %v3389_v60 = vrot.slane %v10625_v49, 7 }
 0x234   : > { %16016 = vst [vmem:[#allocation185_spill] sm:$0xff] %v10621_v12  ;;  %v2488_v19 = vadd.f32 %v16020_v30, %v2111_v24  ;;  %3355 = vrot.lane.b32.xlu0 %v3343_v33, %s6158_s6  ;;  %v2114_v13 = vadd.f32 %v16023_v48, %v16022_v32  ;;  %v16024_v12 = vld [vmem:[#allocation202_spill] sm:$0xff]  ;;  %v16025_v44 = vld [vmem:[#allocation159_spill] sm:$0xff]  ;;  %v3387_v24 = vrot.slane %v10628_v26, 7  ;;  %v1360_v59 = vadd.f32 %v16026_v56, %v1020_v52  ;;  %v16027_v50 = vld [vmem:[#allocation160_spill] sm:$0xff]  ;;  %v10654_v30 = vpop.permute.xlu0 %2936 }
 0x235   : > { %v1351_v51 = vadd.f32 %v16025_v44, %v16024_v12  ;;  %v1372_v40 = vadd.f32 %v16027_v50, %v1032_v36  ;;  %5785 = vrsqrt.f32 %v2785_v14  ;;  %v16028_v46 = vld [vmem:[#allocation66_spill] sm:$0xff]  ;;  %3393 = vrot.lane.b32.xlu1 %v3386_v63, %s6158_s6  ;;  %16030 = vst [vmem:[#allocation30_spill] sm:$0xff] %v10654_v30  ;;  %v2787_v32 = vadd.f32 1e-09, %v2781_v58  ;;  %v16031_v48 = vld [vmem:[#allocation120_spill] sm:$0xff]  ;;  %v16032_v56 = vld [vmem:[#allocation13_spill] sm:$0xff] }
 0x236   : > { %v16029_v33 = vld [vmem:[#allocation78_spill] sm:$0xff]  ;;  %5787 = vrsqrt.f32 %v2788_v47  ;;  %v3390_v49 = vsel %vm359_vm0, %v3386_v63, %v3389_v60  ;;  %v2882_v44 = vmul.f32 %v9993_v15, %v10497_v25  ;;  %v2790_v52 = vadd.f32 1e-09, %v2784_v8  ;;  %v16033_v36 = vld [vmem:[#allocation95_spill] sm:$0xff] }
 0x237   : > { %v2113_v62 = vadd.f32 %v16029_v33, %v16028_v46  ;;  %v1710_v12 = vadd.f32 %v16031_v48, %v1351_v51  ;;  %v1350_v14 = vadd.f32 %v16033_v36, %v16032_v56  ;;  %v2777_v50 = vmul.f32 %v10638_v29, %v10638_v29  ;;  %v16034_v46 = vld [vmem:[#allocation165_spill] sm:$0xff]  ;;  %v16035_v8 = vld [vmem:[#allocation83_spill] sm:$0xff]  ;;  %v16036_v48 = vld [vmem:[#allocation86_spill] sm:$0xff] }
 0x238   : > { %3391 = vrot.lane.b32.xlu0 %v3385_v9, %s6158_s6  ;;  %v1384_v47 = vadd.f32 %v16034_v46, %v1044_v11  ;;  %v2885_v58 = vmul.f32 %v9993_v15, %v10503_v21  ;;  %v2884_v63 = vmul.f32 %v9993_v15, %v10554_v31  ;;  %v3388_v51 = vsel %vm359_vm0, %v3385_v9, %v3387_v24  ;;  %v16037_v36 = vld [vmem:[#allocation87_spill] sm:$0xff]  ;;  %v10679_v11 = vpop.permute.xlu1 %2942 }
 0x239   : > { %v10672_v33 = vadd.f32 %v16035_v8, %v1360_v59  ;;  %v2491_v56 = vadd.f32 %v16036_v48, %v2114_v13  ;;  %v1709_v26 = vadd.f32 %v16037_v36, %v1350_v14  ;;  %v16038_v30 = vld [vmem:[#allocation47_spill] sm:$0xff]  ;;  %3397 = vrot.lane.b32.xlu1 %v3390_v49, %s6158_s6  ;;  %16039 = vst [vmem:[#allocation147_spill] sm:$0xff] %v10679_v11  ;;  %5789 = vrsqrt.f32 %v2787_v32  ;;  %v5538_v13 = vld [vmem:[%s10439_s25 + $0x68] sm:$0xff]  ;;  %v10687_v48 = vpop.eup %5783  ;;  %v16043_v14 = vld [vmem:[#allocation176_spill] sm:$0xff] }
 0x23a   : > { %v2109_v57 = vmul.f32 %v15893_v20, %v16038_v30  ;;  %v16040_v46 = vld [vmem:[#allocation55_spill] sm:$0xff]  ;;  %v2490_v9 = vadd.f32 %v16041_v16, %v2113_v62  ;;  %v10690_v36 = vadd.f32 %v16043_v14, %v1384_v47  ;;  %v10692_v20 = vadd.f32 %v2882_v44, %v2488_v19  ;;  %v10699_v62 = vpop.permute.xlu0 %2940  ;;  %v5537_v44 = vld [vmem:[%s10439_s25 + $0x60] sm:$0xff]  ;;  %v16056_v14 = vld [vmem:[#allocation162_spill] sm:$0xff] }
 0x23b   : > { %v10682_v43 = vadd.f32 %v16040_v46, %v1372_v40  ;;  %v16042_v59 = vld [vmem:[#allocation71_spill] sm:$0xff]  ;;  %5791 = vrsqrt.f32 %v2790_v52  ;;  %v2783_v40 = vadd.f32 %v2777_v50, %v10491_v61  ;;  %16045 = vst [vmem:[#allocation117_spill] sm:$0xff] %v10699_v62  ;;  %v10701_v30 = vadd.f32 %v2885_v58, %v2491_v56  ;;  %v16052_v56 = vld [vmem:[#allocation42_spill] sm:$0xff]  ;;  %v10843_v62 = vld [vmem:[%s6307_s10 + $0xe8] sm:$0x1] }
 0x23c   : > { %v2116_v8 = vadd.f32 %v16042_v59, %v1710_v12  ;;  %16044 = vst [vmem:[#allocation177_spill] sm:$0xff] %v10692_v20  ;;  %3395 = vrot.lane.b32.xlu0 %v3388_v51, %s6158_s6  ;;  %v10697_v16 = vld [vmem:[%s10439_s25 + $0x78] sm:$0xff]  ;;  %v10703_v32 = vadd.f32 %v2884_v63, %v2490_v9  ;;  %v16048_v12 = vld [vmem:[#allocation196_spill] sm:$0xff]  ;;  %v2887_v19 = vmul.f32 %v9993_v15, %v10565_v23  ;;  %v3429_v58 = vrot.slane %v5538_v13, 7  ;;  %v10719_v63 = vld [vmem:[%s10439_s25 + $0x70] sm:$0xff] }
 0x23d   : > { %16046 = vst [vmem:[#allocation214_spill] sm:$0xff] %v10701_v30  ;;  %v2115_v52 = vadd.f32 %v2109_v57, %v1709_v26  ;;  %v10710_v47 = vld [vmem:[%s6307_s10 + $0x98] sm:$0xfe]  ;;  %v2697_v51 = vsel %vm2167_vm2, %v10264_v2, %v10243_v0  ;;  %3401 = vrot.lane.b32.xlu1 %v3389_v60, %s6158_s6  ;;  %16051 = vst [vmem:[#allocation111_spill] sm:$0xff] %v10719_v63  ;;  %v10723_v46 = vmul.f32 %v10687_v48, %v16052_v56  ;;  %v10729_v9 = vld [vmem:[%s6307_s10 + $0xa8] sm:$0xff]  ;;  %v10740_v56 = vpop.permute.xlu1 %2968 }
 0x23e   : > { %16047 = vst [vmem:[#allocation53_spill] sm:$0xff] %v10703_v32  ;;  %v2493_v49 = vadd.f32 %v16048_v12, %v2116_v8  ;;  %16049 = vst [vmem:[#allocation154_spill] sm:$0xff] %v10710_v47  ;;  %v16050_v61 = vld [vmem:[#allocation215_spill] sm:$0xff]  ;;  %v16055_v59 = vld [vmem:[#allocation213_spill] sm:$0xff]  ;;  %v2789_v8 = vadd.f32 1e-09, %v2783_v40  ;;  %v2886_v13 = vmul.f32 %v9993_v15, %v10638_v29 }
 0x23f   : > { %v2670_v50 = vsub.f32 %v10710_v47, %v16050_v61  ;;  %v16053_v26 = vld [vmem:[#allocation51_spill] sm:$0xff]  ;;  %16054 = vst [vmem:[#allocation15_spill] sm:$0xff] %v10729_v9  ;;  %v2672_v2 = vsub.f32 %v10729_v9, %v16055_v59  ;;  %v2661_v12 = vsel %vm2167_vm2, %v16056_v14, %v16055_v59  ;;  %16057 = vst [vmem:[#allocation20_spill] sm:$0xff] %v10740_v56  ;;  %v10745_v32 = vld [vmem:[%s6307_s10 + $0xc8] sm:$0xfe]  ;;  %v10766_v14 = vpop.permute.xlu0 %2966 }
 0x240   : > { %v2660_v57 = vsel %vm2167_vm2, %v16053_v26, %v16050_v61  ;;  %3399 = vrot.lane.b32.xlu0 %v3387_v24, %s6158_s6  ;;  %v3428_v61 = vrot.slane %v5537_v44, 7  ;;  %v10742_v26 = vadd.f32 %v2887_v19, %v2493_v49  ;;  %16059 = vst [vmem:[#allocation54_spill] sm:$0xff] %v10745_v32  ;;  %v2707_v40 = vsub.f32 %v10745_v32, %v10243_v0  ;;  %v10750_v60 = vld [vmem:[%s6307_s10 + $0xc0] sm:$0xfe]  ;;  %v16061_v30 = vld [vmem:[#allocation199_spill] sm:$0xff] }
 0x241   : > { %16060 = vst [vmem:[#allocation158_spill] sm:$0xff] %v10750_v60  ;;  %v2706_v15 = vsub.f32 %v10750_v60, %v2697_v51  ;;  %v2492_v59 = vadd.f32 %v16061_v30, %v2115_v52  ;;  %v2676_v24 = vmul.f32 %v2670_v50, %v9990_v39  ;;  %v10757_v44 = vld [vmem:[%s6307_s10 + $0x90] sm:$0xfe]  ;;  %v10761_v19 = vld [vmem:[%s6307_s10 + $0xd8] sm:$0xff]  ;;  %3436 = vrot.lane.b32.xlu1 %v3429_v58, %s6158_s6  ;;  %16064 = vst [vmem:[#allocation109_spill] sm:$0xff] %v10766_v14 }
 0x242   : > { %16058 = vst [vmem:[#allocation188_spill] sm:$0xff] %v10742_v26  ;;  %16062 = vst [vmem:[#allocation56_spill] sm:$0xff] %v10757_v44  ;;  %v2669_v49 = vsub.f32 %v10757_v44, %v2660_v57  ;;  %v2709_v0 = vsub.f32 %v10761_v19, %v10297_v7  ;;  %v10768_v51 = vpop.eup %5785  ;;  %v2678_v30 = vmul.f32 %v2672_v2, %v9990_v39  ;;  %v16065_v52 = vld [vmem:[#allocation181_spill] sm:$0xff]  ;;  %v16066_v9 = vld [vmem:[#allocation48_spill] sm:$0xff]  ;;  %v16068_v60 = vrot.slane %v10697_v16, 7 }
 0x243   : > { %16063 = vst [vmem:[#allocation198_spill] sm:$0xff] %v10761_v19  ;;  %v2671_v50 = vsub.f32 %v16065_v52, %v2661_v12  ;;  %v16067_v26 = vld [vmem:[#allocation59_spill] sm:$0xff]  ;;  %v10778_v19 = vpop.eup %5787  ;;  %5793 = vrsqrt.f32 %v2789_v8  ;;  %v10780_v20 = vadd.f32 %v2886_v13, %v2492_v59  ;;  %v2816_v44 = vmul.f32 %v10723_v46, %v2676_v24  ;;  %v5948_v13 = vld [vmem:[%s6307_s10 + $0xb0] sm:$0x1]  ;;  %16079 = vst [vmem:[#allocation98_spill] sm:$0xff] %v10843_v62 }
 0x244   : > { %v2662_v57 = vsel %vm2167_vm2, %v16067_v26, %v16066_v9  ;;  %v3433_v32 = vsel %vm359_vm0, %v3429_v58, %v16068_v60  ;;  %v10784_v47 = vld [vmem:[%s6307_s10 + $0xb8] sm:$0x1]  ;;  %3434 = vrot.lane.b32.xlu0 %v3428_v61, %s6158_s6  ;;  %v2713_v12 = vmul.f32 %v2707_v40, %v9990_v39  ;;  %v2712_v26 = vmul.f32 %v2706_v15, %v9990_v39  ;;  %v10805_v40 = vld [vmem:[%s6307_s10 + $0xf8] sm:$0xfe]  ;;  %v16099_v14 = vld [vmem:[#allocation92_spill] sm:$0xff] }
 0x245   : > { %16069 = vst [vmem:[#allocation184_spill] sm:$0xff] %v10780_v20  ;;  %16070 = vst [vmem:[#allocation189_spill] sm:$0xff] %v10784_v47  ;;  %v2674_v2 = vsub.f32 %v10784_v47, %v16066_v9  ;;  %v2698_v58 = vsel %vm2167_vm2, %v10311_v53, %v10297_v7  ;;  %v16071_v60 = vrot.slane %v10719_v63, 7  ;;  %v2673_v59 = vsub.f32 %v5948_v13, %v2662_v57  ;;  %v16072_v24 = vld [vmem:[#allocation127_spill] sm:$0xff]  ;;  %v10809_v7 = vpop.permute.xlu1 %2972  ;;  %v16076_v57 = vld [vmem:[#allocation206_spill] sm:$0xff] }
 0x246   : > { %v10800_v52 = vmul.f32 %v10687_v48, %v16072_v24  ;;  %v2715_v9 = vmul.f32 %v2709_v0, %v9990_v39  ;;  %3440 = vrot.lane.b32.xlu1 %v3433_v32, %s6158_s6  ;;  %16073 = vst [vmem:[#allocation175_spill] sm:$0xff] %v10805_v40  ;;  %v2744_v15 = vsub.f32 %v10805_v40, %v10393_v37  ;;  %16074 = vst [vmem:[#allocation58_spill] sm:$0xff] %v10809_v7  ;;  %v16075_v53 = vld [vmem:[#allocation23_spill] sm:$0xff]  ;;  %v10826_v13 = vpop.eup %5789 }
 0x247   : > { %v3431_v8 = vsel %vm359_vm0, %v3428_v61, %v16071_v60  ;;  %v10813_v61 = vmul.f32 %v10768_v51, %v16075_v53  ;;  %v10817_v60 = vmul.f32 %v10778_v19, %v16076_v57  ;;  %v10821_v0 = vmul.f32 %v10768_v51, %v10281_v34  ;;  %v16077_v57 = vld [vmem:[#allocation67_spill] sm:$0xff]  ;;  %v10836_v34 = vpop.permute.xlu0 %2970 }
 0x248   : > { %v2699_v32 = vsel %vm2167_vm2, %v10361_v38, %v10339_v6  ;;  %v2675_v24 = vmul.f32 %v2669_v49, %v9990_v39  ;;  %v2677_v53 = vmul.f32 %v2671_v50, %v9990_v39  ;;  %v10832_v20 = vmul.f32 %v10778_v19, %v10324_v1  ;;  %3438 = vrot.lane.b32.xlu0 %v3431_v8, %s6158_s6  ;;  %v10838_v40 = vpop.eup %5791  ;;  %v5951_v8 = vld [vmem:[%s6307_s10 + $0xe0] sm:$0x1] }
 0x249   : > { %v2708_v47 = vsub.f32 %v16077_v57, %v2698_v58  ;;  %16078 = vst [vmem:[#allocation190_spill] sm:$0xff] %v10836_v34  ;;  %v2822_v38 = vmul.f32 %v10800_v52, %v2713_v12  ;;  %v2821_v7 = vmul.f32 %v10821_v0, %v2712_v26  ;;  %v2711_v49 = vsub.f32 %v10843_v62, %v10339_v6  ;;  %v16081_v62 = vld [vmem:[#allocation61_spill] sm:$0xff] }
 0x24a   : > { %v2734_v1 = vsel %vm2167_vm2, %v10414_v45, %v10393_v37  ;;  %v2680_v50 = vmul.f32 %v2674_v2, %v9990_v39  ;;  %v2824_v58 = vmul.f32 %v10832_v20, %v2715_v9  ;;  %v2710_v57 = vsub.f32 %v5951_v8, %v2699_v32  ;;  %v16082_v45 = vld [vmem:[#allocation200_spill] sm:$0xff] }
 0x24b   : > { %v2750_v12 = vmul.f32 %v2744_v15, %v9990_v39  ;;  %v16080_v26 = vrot.slane %v10697_v16, 7  ;;  %v2815_v34 = vmul.f32 %v10813_v61, %v2675_v24  ;;  %v2818_v6 = vmul.f32 %v10817_v60, %v2678_v30  ;;  %v10874_v15 = vld [vmem:[%s6307_s10 + $0xf0] sm:$0xfe]  ;;  %v16088_v8 = vld [vmem:[#allocation52_spill] sm:$0xff] }
 0x24c   : > { %v10861_v11 = vmul.f32 %v10826_v13, %v16081_v62  ;;  %v2679_v37 = vmul.f32 %v2673_v59, %v9990_v39  ;;  %v10866_v2 = vmul.f32 %v10838_v40, %v16082_v45  ;;  %v2714_v9 = vmul.f32 %v2708_v47, %v9990_v39  ;;  %16084 = vst [vmem:[#allocation191_spill] sm:$0xff] %v10874_v15  ;;  %v10880_v59 = vpop.permute.xlu1 %2976 }
 0x24d   : > { %3444 = vrot.lane.b32.xlu1 %v16080_v26, %s6158_s6  ;;  %v10871_v16 = vmul.f32 %v10687_v48, %v10422_v55  ;;  %v2743_v30 = vsub.f32 %v10874_v15, %v2734_v1  ;;  %v16085_v62 = vrot.slane %v10719_v63, 7  ;;  %16086 = vst [vmem:[#allocation32_spill] sm:$0xff] %v10880_v59  ;;  %v2828_v32 = vadd.f32 %v2822_v38, %v2816_v44  ;;  %v10895_v44 = vpop.permute.xlu0 %2974  ;;  %v16092_v38 = vld [vmem:[#allocation107_spill] sm:$0xff] }
 0x24e   : > { %16083 = vst [vmem:[#allocation201_spill] sm:$0xff] %v10866_v2  ;;  %v2827_v24 = vadd.f32 %v2821_v7, %v2815_v34  ;;  %v10884_v47 = vmul.f32 %v10826_v13, %v10331_v54  ;;  %v2717_v55 = vmul.f32 %v2711_v49, %v9990_v39  ;;  %v10887_v48 = vadd.f32 %v2824_v58, %v2818_v6  ;;  %v16091_v54 = vld [vmem:[#allocation123_spill] sm:$0xff]  ;;  %v10903_v58 = vld [vmem:[%s6307_s10 + $0x108] sm:$0xff] }
 0x24f   : > { %3442 = vrot.lane.b32.xlu0 %v16085_v62, %s6158_s6  ;;  %v10891_v1 = vmul.f32 %v10838_v40, %v16088_v8  ;;  %v2716_v26 = vmul.f32 %v2710_v57, %v9990_v39  ;;  %v2834_v45 = vmul.f32 %v10871_v16, %v2750_v12  ;;  %16090 = vst [vmem:[#allocation75_spill] sm:$0xff] %v10895_v44  ;;  %16093 = vst [vmem:[#allocation152_spill] sm:$0xff] %v10903_v58  ;;  %v16094_v12 = vld [vmem:[#allocation31_spill] sm:$0xff] }
 0x250   : > { %16087 = vst [vmem:[#allocation153_spill] sm:$0xff] %v10884_v47  ;;  %v2817_v7 = vmul.f32 %v10861_v11, %v2677_v53  ;;  %v1359_v34 = vadd.f32 %v16091_v54, %v10484_v41  ;;  %v1371_v49 = vadd.f32 %v16092_v38, %v10488_v28  ;;  %v2746_v6 = vsub.f32 %v10903_v58, %v10457_v22  ;;  %v10913_v15 = vld [vmem:[%s10439_s25 + $0x98] sm:$0xff]  ;;  %v10916_v41 = vld [vmem:[%s10439_s25 + $0x90] sm:$0xff]  ;;  %v10918_v54 = vpop.eup %5793  ;;  %v16096_v58 = vld [vmem:[#allocation101_spill] sm:$0xff] }
 0x251   : > { %16089 = vst [vmem:[#allocation174_spill] sm:$0xff] %v10891_v1  ;;  %v2820_v62 = vmul.f32 %v10866_v2, %v2680_v50  ;;  %v2823_v57 = vmul.f32 %v10884_v47, %v2714_v9  ;;  %v1383_v8 = vadd.f32 %v16094_v12, %v10511_v4  ;;  %v2749_v53 = vmul.f32 %v2743_v30, %v9990_v39  ;;  %v16095_v38 = vld [vmem:[#allocation103_spill] sm:$0xff]  ;;  %v16097_v9 = vld [vmem:[#allocation88_spill] sm:$0xff]  ;;  %v10932_v2 = vpop.permute.xlu1 %3001 }
 0x252   : > { %v2826_v28 = vmul.f32 %v10891_v1, %v2717_v55  ;;  %v1718_v63 = vadd.f32 %v16095_v38, %v1359_v34  ;;  %v1730_v44 = vadd.f32 %v16096_v58, %v1371_v49  ;;  %v10925_v50 = vmul.f32 %v10768_v51, %v10497_v25  ;;  %v16098_v30 = vld [vmem:[#allocation156_spill] sm:$0xff]  ;;  %16100 = vst [vmem:[#allocation205_spill] sm:$0xff] %v10932_v2  ;;  %v16101_v34 = vld [vmem:[#allocation37_spill] sm:$0xff]  ;;  %v10951_v38 = vpop.permute.xlu0 %2999 }
 0x253   : > { %v1742_v4 = vadd.f32 %v16097_v9, %v1383_v8  ;;  %v2840_v12 = vadd.f32 %v2834_v45, %v2828_v32  ;;  %v1358_v59 = vadd.f32 %v16098_v30, %v10515_v10  ;;  %v1370_v56 = vadd.f32 %v16099_v14, %v10528_v5  ;;  %v16102_v32 = vld [vmem:[#allocation82_spill] sm:$0xff]  ;;  %v16105_v14 = vld [vmem:[#allocation155_spill] sm:$0xff]  ;;  %v16106_v58 = vld [vmem:[#allocation124_spill] sm:$0xff]  ;;  %16107 = vst [vmem:[#allocation119_spill] sm:$0xff] %v10951_v38 }
 0x254   : > { %v2752_v55 = vmul.f32 %v2746_v6, %v9990_v39  ;;  %v2735_v49 = vsel %vm2167_vm2, %v16101_v34, %v10457_v22  ;;  %v14982_v25 = vrot.slane %v10913_v15, 7  ;;  %v10942_v45 = vmul.f32 %v10918_v54, %v16102_v32  ;;  %v16103_v10 = vld [vmem:[#allocation210_spill] sm:$0xff]  ;;  %v16108_v22 = vld [vmem:[#allocation24_spill] sm:$0xff]  ;;  %v16109_v30 = vld [vmem:[#allocation125_spill] sm:$0xff] }
 0x255   : > { %v10946_v5 = vmul.f32 %v10918_v54, %v16103_v10  ;;  %v1382_v6 = vadd.f32 %v16106_v58, %v16105_v14  ;;  %v2833_v8 = vmul.f32 %v10925_v50, %v2749_v53  ;;  %v2124_v9 = vadd.f32 %v16108_v22, %v1718_v63  ;;  %v16111_v10 = vld [vmem:[#allocation93_spill] sm:$0xff]  ;;  %v10969_v22 = vld [vmem:[%s6307_s10 + $0x100] sm:$0xff] }
 0x256   : > { %v1717_v34 = vadd.f32 %v16109_v30, %v1358_v59  ;;  %v10957_v51 = vmul.f32 %v10778_v19, %v10503_v21  ;;  %3479 = vrot.lane.b32.xlu1 %v14982_v25, %s6158_s6  ;;  %v16110_v32 = vrot.slane %v10916_v41, 7  ;;  %v1729_v14 = vadd.f32 %v16111_v10, %v1370_v56  ;;  %v16112_v58 = vld [vmem:[#allocation69_spill] sm:$0xff]  ;;  %16113 = vst [vmem:[#allocation45_spill] sm:$0xff] %v10969_v22  ;;  %v16114_v21 = vld [vmem:[#allocation18_spill] sm:$0xff]  ;;  %v16115_v30 = vld [vmem:[#allocation16_spill] sm:$0xff]  ;;  %v10979_v10 = vpop.permute.xlu1 %3005 }
 0x257   : > { %16104 = vst [vmem:[#allocation91_spill] sm:$0xff] %v10946_v5  ;;  %v2825_v53 = vmul.f32 %v10946_v5, %v2716_v26  ;;  %v1741_v63 = vadd.f32 %v16112_v58, %v1382_v6  ;;  %v2745_v59 = vsub.f32 %v10969_v22, %v2735_v49  ;;  %v2136_v19 = vadd.f32 %v16114_v21, %v1730_v44  ;;  %v16116_v2 = vld [vmem:[#allocation65_spill] sm:$0xff]  ;;  %v16117_v6 = vld [vmem:[#allocation114_spill] sm:$0xff]  ;;  %v16118_v5 = vld [vmem:[#allocation27_spill] sm:$0xff] }
 0x258   : > { %3477 = vrot.lane.b32.xlu0 %v16110_v32, %s6158_s6  ;;  %v2148_v38 = vadd.f32 %v16115_v30, %v1742_v4  ;;  %v2846_v25 = vmul.f32 %v2840_v12, %v16116_v2  ;;  %v2836_v1 = vmul.f32 %v10957_v51, %v2752_v55  ;;  %v2819_v32 = vmul.f32 %v10942_v45, %v2679_v37  ;;  %v16119_v22 = vld [vmem:[#allocation64_spill] sm:$0xff]  ;;  %v16120_v4 = vld [vmem:[#allocation14_spill] sm:$0xff]  ;;  %v16122_v37 = vld [vmem:[#allocation41_spill] sm:$0xff] }
 0x259   : > { %v2829_v47 = vadd.f32 %v2823_v57, %v2817_v7  ;;  %v10977_v26 = vadd.f32 %v2826_v28, %v2820_v62  ;;  %v2839_v56 = vadd.f32 %v2833_v8, %v2827_v24  ;;  %v2501_v58 = vadd.f32 %v16117_v6, %v2124_v9  ;;  %v16121_v55 = vld [vmem:[#allocation26_spill] sm:$0xff]  ;;  %v10990_v62 = vpop.permute.xlu0 %3003  ;;  %v16124_v57 = vld [vmem:[#allocation76_spill] sm:$0xff]  ;;  %v16125_v8 = vld [vmem:[#allocation77_spill] sm:$0xff] }
 0x25a   : > { %v2513_v49 = vadd.f32 %v16118_v5, %v2136_v19  ;;  %v2525_v44 = vadd.f32 %v16119_v22, %v2148_v38  ;;  %v2123_v21 = vadd.f32 %v16120_v4, %v1717_v34  ;;  %v10985_v12 = vadd.f32 %v2825_v53, %v2819_v32  ;;  %16123 = vst [vmem:[#allocation108_spill] sm:$0xff] %v10990_v62  ;;  %v16126_v9 = vld [vmem:[#allocation33_spill] sm:$0xff]  ;;  %v16129_v32 = vld [vmem:[#allocation72_spill] sm:$0xff]  ;;  %v16130_v4 = vld [vmem:[#allocation122_spill] sm:$0xff] }
 0x25b   : > { %v2135_v30 = vadd.f32 %v16121_v55, %v1729_v14  ;;  %v2147_v7 = vadd.f32 %v16122_v37, %v1741_v63  ;;  %v2751_v24 = vmul.f32 %v2745_v59, %v9990_v39  ;;  %v2852_v28 = vadd.f32 %v2846_v25, %v16124_v57  ;;  %v16127_v14 = vld [vmem:[#allocation39_spill] sm:$0xff]  ;;  %v16128_v63 = vld [vmem:[#allocation28_spill] sm:$0xff]  ;;  %v5544_v25 = vld [vmem:[%s10439_s25 + $0xa8] sm:$0xff] }
 0x25c   : > { %v2500_v5 = vadd.f32 %v16125_v8, %v2123_v21  ;;  %v2126_v38 = vadd.f32 %v16126_v9, %v10589_v18  ;;  %v2842_v34 = vadd.f32 %v2836_v1, %v10887_v48  ;;  %v2845_v53 = vmul.f32 %v2839_v56, %v16116_v2  ;;  %v16131_v18 = vld [vmem:[#allocation163_spill] sm:$0xff]  ;;  %v16133_v1 = vld [vmem:[#allocation25_spill] sm:$0xff]  ;;  %v16134_v56 = vld [vmem:[#allocation74_spill] sm:$0xff]  ;;  %v11026_v8 = vpop.permute.xlu1 %3009 }
 0x25d   : > { %v2138_v22 = vadd.f32 %v16127_v14, %v10603_v17  ;;  %v2150_v19 = vadd.f32 %v16128_v63, %v10606_v35  ;;  %v11004_v59 = vmul.f32 %v10826_v13, %v10554_v31  ;;  %v2512_v6 = vadd.f32 %v16129_v32, %v2135_v30  ;;  %v11013_v48 = vld [vmem:[%s6307_s10 + $0x118] sm:$0x1]  ;;  %16137 = vst [vmem:[#allocation96_spill] sm:$0xff] %v11026_v8  ;;  %v16138_v14 = vld [vmem:[#allocation38_spill] sm:$0xff] }
 0x25e   : > { %v2524_v21 = vadd.f32 %v16130_v4, %v2147_v7  ;;  %v11010_v55 = vadd.f32 %v16131_v18, %v2126_v38  ;;  %16132 = vst [vmem:[#allocation57_spill] sm:$0xff] %v11013_v48  ;;  %v2748_v17 = vsub.f32 %v11013_v48, %v16133_v1  ;;  %v16135_v37 = vld [vmem:[#allocation187_spill] sm:$0xff]  ;;  %v2895_v9 = vmul.f32 %v2852_v28, %v10723_v46  ;;  %v16142_v46 = vld [vmem:[#allocation46_spill] sm:$0xff] }
 0x25f   : > { %v11018_v35 = vadd.f32 %v16134_v56, %v2138_v22  ;;  %v11021_v31 = vadd.f32 %v16135_v37, %v2150_v19  ;;  %v16136_v13 = vld [vmem:[#allocation43_spill] sm:$0xff]  ;;  %v2835_v7 = vmul.f32 %v11004_v59, %v2751_v24  ;;  %v2848_v38 = vmul.f32 %v2842_v34, %v16116_v2  ;;  %v11038_v24 = vld [vmem:[%s10439_s25 + $0xa0] sm:$0xff]  ;;  %v11040_v37 = vpop.permute.xlu0 %3007  ;;  %v16148_v8 = vld [vmem:[#allocation178_spill] sm:$0xff] }
 0x260   : > { %v2125_v30 = vadd.f32 %v16136_v13, %v10672_v33  ;;  %v2137_v63 = vadd.f32 %v16138_v14, %v10682_v43  ;;  %v3475_v32 = vrot.slane %v5544_v25, 7  ;;  %v2907_v22 = vmul.f32 %v2852_v28, %v10800_v52  ;;  %v16139_v18 = vld [vmem:[#allocation211_spill] sm:$0xff]  ;;  %v16140_v33 = vld [vmem:[#allocation84_spill] sm:$0xff]  ;;  %16141 = vst [vmem:[#allocation121_spill] sm:$0xff] %v11040_v37  ;;  %v16143_v13 = vld [vmem:[#allocation73_spill] sm:$0xff] }
 0x261   : > { %v2919_v19 = vmul.f32 %v2852_v28, %v10871_v16  ;;  %v2851_v4 = vadd.f32 %v2845_v53, %v16124_v57  ;;  %v1363_v56 = vadd.f32 %v16140_v33, %v16139_v18  ;;  %v2149_v34 = vadd.f32 %v16142_v46, %v10690_v36  ;;  %v16144_v43 = vld [vmem:[#allocation81_spill] sm:$0xff]  ;;  %v16145_v28 = vld [vmem:[#allocation207_spill] sm:$0xff]  ;;  %v16146_v53 = vld [vmem:[#allocation168_spill] sm:$0xff] }
 0x262   : > { %v11045_v48 = vadd.f32 %v16143_v13, %v2125_v30  ;;  %v11048_v25 = vadd.f32 %v16144_v43, %v2137_v63  ;;  %v2754_v52 = vmul.f32 %v2748_v17, %v9990_v39  ;;  %v2841_v16 = vadd.f32 %v2835_v7, %v2829_v47  ;;  %v16147_v18 = vld [vmem:[#allocation170_spill] sm:$0xff]  ;;  %v16150_v46 = vld [vmem:[#allocation164_spill] sm:$0xff] }
 0x263   : > { %v1375_v14 = vadd.f32 %v16146_v53, %v16145_v28  ;;  %v1387_v33 = vadd.f32 %v16147_v18, %v10569_v27  ;;  %v1722_v37 = vadd.f32 %v16148_v8, %v1363_v56  ;;  %v2854_v62 = vadd.f32 %v2848_v38, %v16124_v57  ;;  %v11070_v38 = vpop.permute.xlu1 %3034  ;;  %v16152_v56 = vld [vmem:[#allocation183_spill] sm:$0xff]  ;;  %v11104_v18 = vld [vmem:[%s6307_s10 + $0x110] sm:$0x1] }
 0x264   : > { %v11059_v36 = vmul.f32 %v10838_v40, %v10565_v23  ;;  %v16149_v30 = vrot.slane %v10913_v15, 7  ;;  %v3473_v47 = vrot.slane %v11038_v24, 7  ;;  %v2894_v17 = vmul.f32 %v2851_v4, %v10813_v61  ;;  %v16151_v23 = vld [vmem:[#allocation180_spill] sm:$0xff]  ;;  %16161 = vst [vmem:[#allocation34_spill] sm:$0xff] %v11104_v18 }
 0x265   : > { %v2906_v7 = vmul.f32 %v2851_v4, %v10821_v0  ;;  %v2918_v27 = vmul.f32 %v2851_v4, %v10925_v50  ;;  %v1734_v8 = vadd.f32 %v16150_v46, %v1375_v14  ;;  %v1746_v40 = vadd.f32 %v16151_v23, %v1387_v33  ;;  %v16170_v23 = vld [vmem:[#allocation161_spill] sm:$0xff] }
 0x266   : > { %v3476_v63 = vsel %vm359_vm0, %v16149_v30, %v3475_v32  ;;  %v2838_v15 = vmul.f32 %v11059_v36, %v2754_v52  ;;  %v2736_v13 = vsel %vm2167_vm2, %v16152_v56, %v16133_v1  ;;  %v16153_v61 = vrot.slane %v10916_v41, 7  ;;  %v11088_v52 = vpop.permute.xlu0 %3032  ;;  %v16157_v1 = vld [vmem:[#allocation203_spill] sm:$0xff]  ;;  %v5545_v30 = vld [vmem:[%s10439_s25 + $0xc0] sm:$0xff] }
 0x267   : > { %3483 = vrot.lane.b32.xlu1 %v3476_v63, %s6158_s6  ;;  %v11080_v50 = vadd.f32 %v2895_v9, %v2501_v58  ;;  %v11082_v4 = vadd.f32 %v2907_v22, %v2513_v49  ;;  %v11084_v43 = vadd.f32 %v2919_v19, %v2525_v44  ;;  %v2847_v28 = vmul.f32 %v2841_v16, %v16116_v2  ;;  %v16158_v58 = vld [vmem:[#allocation21_spill] sm:$0xff]  ;;  %v16160_v19 = vld [vmem:[#allocation35_spill] sm:$0xff] }
 0x268   : > { %v3474_v0 = vsel %vm359_vm0, %v16153_v61, %v3473_v47  ;;  %v2897_v53 = vmul.f32 %v2854_v62, %v10817_v60  ;;  %v2909_v41 = vmul.f32 %v2854_v62, %v10832_v20  ;;  %v11093_v14 = vadd.f32 %v16157_v1, %v2149_v34  ;;  %v5546_v49 = vld [vmem:[%s10439_s25 + $0xc8] sm:$0xff]  ;;  %v16176_v1 = vld [vmem:[#allocation99_spill] sm:$0xff] }
 0x269   : > { %16154 = vst [vmem:[#allocation192_spill] sm:$0xff] %v11080_v50  ;;  %16155 = vst [vmem:[#allocation193_spill] sm:$0xff] %v11082_v4  ;;  %3481 = vrot.lane.b32.xlu0 %v3474_v0, %s6158_s6  ;;  %v2128_v9 = vadd.f32 %v16158_v58, %v1722_v37  ;;  %v11099_v44 = vadd.f32 %v2894_v17, %v2500_v5  ;;  %v2921_v22 = vmul.f32 %v2854_v62, %v10957_v51  ;;  %v16164_v37 = vld [vmem:[#allocation29_spill] sm:$0xff]  ;;  %v16165_v51 = vld [vmem:[#allocation204_spill] sm:$0xff] }
 0x26a   : > { %16156 = vst [vmem:[#allocation112_spill] sm:$0xff] %v11084_v43  ;;  %v2140_v16 = vadd.f32 %v16160_v19, %v1734_v8  ;;  %v2747_v60 = vsub.f32 %v11104_v18, %v2736_v13  ;;  %v11108_v20 = vadd.f32 %v2906_v7, %v2512_v6  ;;  %v11110_v34 = vadd.f32 %v2918_v27, %v2524_v21  ;;  %v16166_v17 = vld [vmem:[#allocation216_spill] sm:$0xff]  ;;  %v5548_v6 = vld [vmem:[%s10439_s25 + $0xd8] sm:$0xff]  ;;  %v11124_v7 = vpop.permute.xlu1 %3038  ;;  %v16169_v27 = vld [vmem:[#allocation217_spill] sm:$0xff]  ;;  %v11146_v13 = vpop.permute.xlu0 %3036 }
 0x26b   : > { %16159 = vst [vmem:[#allocation197_spill] sm:$0xff] %v11099_v44  ;;  %3487 = vrot.lane.b32.xlu1 %v3475_v32, %s6158_s6  ;;  %v2152_v33 = vadd.f32 %v16164_v37, %v1746_v40  ;;  %v2844_v5 = vadd.f32 %v2838_v15, %v10977_v26  ;;  %v2853_v63 = vadd.f32 %v2847_v28, %v16124_v57  ;;  %v3515_v32 = vrot.slane %v5546_v49, 7  ;;  %v16172_v15 = vld [vmem:[#allocation167_spill] sm:$0xff]  ;;  %v16174_v28 = vld [vmem:[#allocation50_spill] sm:$0xff]  ;;  %v11161_v49 = vld [vmem:[%s6307_s10 + $0x8] sm:$0xfe] }
 0x26c   : > { %16162 = vst [vmem:[#allocation126_spill] sm:$0xff] %v11108_v20  ;;  %16163 = vst [vmem:[#allocation129_spill] sm:$0xff] %v11110_v34  ;;  %v11117_v62 = vadd.f32 %v16165_v51, %v2128_v9  ;;  %v11120_v46 = vadd.f32 %v16166_v17, %v2140_v16  ;;  %v11127_v21 = vadd.f32 %v2897_v53, %v11010_v55  ;;  %v16175_v53 = vld [vmem:[#allocation182_spill] sm:$0xff]  ;;  %v16179_v16 = vld [vmem:[#allocation185_spill] sm:$0xff] }
 0x26d   : > { %3485 = vrot.lane.b32.xlu0 %v3473_v47, %s6158_s6  ;;  %v11130_v26 = vadd.f32 %v2909_v41, %v11018_v35  ;;  %v11133_v8 = vadd.f32 %v16169_v27, %v2152_v33  ;;  %v1362_v40 = vadd.f32 %v16170_v23, %v10610_v3  ;;  %v11140_v47 = vadd.f32 %v2921_v22, %v11021_v31  ;;  %v16173_v3 = vld [vmem:[#allocation90_spill] sm:$0xff]  ;;  %v11182_v27 = vld [vmem:[%s6307_s10] sm:$0xfe]  ;;  %v16227_v34 = vld [vmem:[#allocation97_spill] sm:$0xff] }
 0x26e   : > { %16167 = vst [vmem:[#allocation44_spill] sm:$0xff] %v11127_v21  ;;  %v1374_v55 = vadd.f32 %v16172_v15, %v10614_v42  ;;  %v2753_v56 = vmul.f32 %v2747_v60, %v9990_v39  ;;  %v3514_v35 = vrot.slane %v5545_v30, 7  ;;  %v2850_v61 = vmul.f32 %v2844_v5, %v16116_v2  ;;  %v16177_v39 = vld [vmem:[#allocation36_spill] sm:$0xff]  ;;  %16178 = vst [vmem:[#allocation130_spill] sm:$0xff] %v11161_v49  ;;  %v11167_v19 = vld [vmem:[%s10439_s25 + $0xd0] sm:$0xff] }
 0x26f   : > { %16168 = vst [vmem:[#allocation79_spill] sm:$0xff] %v11130_v26  ;;  %16171 = vst [vmem:[#allocation62_spill] sm:$0xff] %v11140_v47  ;;  %3522 = vrot.lane.b32.xlu1 %v3515_v32, %s6158_s6  ;;  %v1721_v0 = vadd.f32 %v16173_v3, %v1362_v40  ;;  %v2944_v31 = vsel %vm2167_vm2, %v16175_v53, %v16174_v28  ;;  %v3518_v41 = vrot.slane %v5548_v6, 7  ;;  %v16180_v60 = vld [vmem:[#allocation169_spill] sm:$0xff]  ;;  %v11174_v5 = vstv %s11096_s7  ;;  %v16183_v51 = vld [vmem:[#allocation110_spill] sm:$0xff]  ;;  %v11186_v40 = vpop.permute.xlu1 %3042  ;;  %s269_s7 = sand.u32 1, %s6144_s19  }
 0x270   : > { %v2896_v42 = vmul.f32 %v2853_v63, %v10861_v11  ;;  %v2121_v58 = vmul.f32 %v16177_v39, %v16176_v1  ;;  %v11158_v9 = vmul.f32 %v10918_v54, %v10638_v29  ;;  %v2954_v22 = vsub.f32 %v11161_v49, %v16174_v28  ;;  %v16181_v11 = vld [vmem:[#allocation100_spill] sm:$0xff]  ;;  %v16182_v54 = vld [vmem:[#allocation113_spill] sm:$0xff]  ;;  %16184 = vst [vmem:[#allocation94_spill] sm:$0xff] %v11182_v27  ;;  %v5555_v44 = vld [vmem:[%s10439_s25 + $0x30] sm:$0xfc] }
 0x271   : > { %3520 = vrot.lane.b32.xlu0 %v3514_v35, %s6158_s6  ;;  %v1386_v37 = vadd.f32 %v16180_v60, %v16179_v16  ;;  %v2133_v33 = vmul.f32 %v16177_v39, %v16181_v11  ;;  %v3519_v29 = vsel %vm359_vm0, %v3515_v32, %v3518_v41  ;;  %v1733_v30 = vadd.f32 %v16182_v54, %v1374_v55  ;;  %v16185_v15 = vld [vmem:[#allocation153_spill] sm:$0xff]  ;;  %v5550_v16 = vld [vmem:[%s10439_s25 + $0xf8] sm:$0xff]  ;;  %v11200_v60 = vpop.permute.xlu0 %3040 }
 0x272   : > { %v2145_v17 = vmul.f32 %v16177_v39, %v16183_v51  ;;  %v2837_v6 = vmul.f32 %v11158_v9, %v2753_v56  ;;  %v2953_v23 = vsub.f32 %v11182_v27, %v2944_v31  ;;  %v2908_v32 = vmul.f32 %v2853_v63, %v16185_v15  ;;  %v16187_v56 = vld [vmem:[#allocation118_spill] sm:$0xff]  ;;  %v16211_v26 = vld [vmem:[#allocation117_spill] sm:$0xff] }
 0x273   : > { %3526 = vrot.lane.b32.xlu1 %v3519_v29, %s6158_s6  ;;  %v2920_v3 = vmul.f32 %v2853_v63, %v11004_v59  ;;  %v2856_v55 = vadd.f32 %v2850_v61, %v16124_v57  ;;  %v3516_v28 = vrot.slane %v11167_v19, 7  ;;  %v11193_v53 = vadd.f32 %v2896_v42, %v11045_v48  ;;  %v11206_v59 = vld [vmem:[%s6307_s10 + $0x18] sm:$0xff]  ;;  %v16189_v63 = vld [vmem:[#allocation209_spill] sm:$0xff]  ;;  %v16190_v48 = vld [vmem:[#allocation30_spill] sm:$0xff] }
 0x274   : > { %v1745_v1 = vadd.f32 %v16187_v56, %v1386_v37  ;;  %v2127_v39 = vadd.f32 %v2121_v58, %v1721_v0  ;;  %v11197_v31 = vmul.f32 %v11174_v5, %v2954_v22  ;;  %v11203_v11 = vstv %s11137_s30  ;;  %16188 = vst [vmem:[#allocation102_spill] sm:$0xff] %v11206_v59  ;;  %v16191_v29 = vld [vmem:[#allocation201_spill] sm:$0xff]  ;;  %v16192_v51 = vld [vmem:[#allocation174_spill] sm:$0xff]  ;;  %s5633_s30 = smul.u32 48, %s269_s7 }
 0x275   : > { %16186 = vst [vmem:[#allocation146_spill] sm:$0xff] %v11193_v53  ;;  %v2956_v61 = vsub.f32 %v11206_v59, %v16189_v63  ;;  %v2945_v42 = vsel %vm2167_vm2, %v16190_v48, %v16189_v63  ;;  %v3517_v0 = vsel %vm359_vm0, %v3514_v35, %v3516_v28  ;;  %v2139_v58 = vadd.f32 %v2133_v33, %v1733_v30  ;;  %v5549_v63 = vld [vmem:[%s10439_s25 + $0xf0] sm:$0xff] }
 0x276   : > { %v2843_v22 = vadd.f32 %v2837_v6, %v10985_v12  ;;  %v11216_v37 = vmul.f32 %v11174_v5, %v2953_v23  ;;  %3524 = vrot.lane.b32.xlu0 %v3517_v0, %s6158_s6  ;;  %v2899_v54 = vmul.f32 %v2856_v55, %v16191_v29  ;;  %v2911_v15 = vmul.f32 %v2856_v55, %v16192_v51  ;;  %v11230_v30 = vld [vmem:[%s6307_s10 + $0x10] sm:$0xff]  ;;  %v11233_v6 = vpop.permute.xlu1 %3067 }
 0x277   : > { %3530 = vrot.lane.b32.xlu1 %v3518_v41, %s6158_s6  ;;  %v2923_v56 = vmul.f32 %v2856_v55, %v11059_v36  ;;  %v3558_v53 = vrot.slane %v5550_v16, 7  ;;  %v11225_v35 = vadd.f32 %v2908_v32, %v11048_v25  ;;  %v2151_v12 = vadd.f32 %v2145_v17, %v1745_v1  ;;  %16194 = vst [vmem:[#allocation194_spill] sm:$0xff] %v11230_v30  ;;  %v16196_v36 = vld [vmem:[#allocation60_spill] sm:$0xff]  ;;  %v16197_v16 = vld [vmem:[#allocation166_spill] sm:$0xff] }
 0x278   : > { %v3235_v33 = vmul.f32 %v11203_v11, %v11197_v31  ;;  %v2955_v41 = vsub.f32 %v11230_v30, %v2945_v42  ;;  %v11236_v23 = vadd.f32 %v2920_v3, %v11093_v14  ;;  %v11239_v55 = vadd.f32 %v16196_v36, %v2127_v39  ;;  %v16198_v32 = vld [vmem:[#allocation116_spill] sm:$0xff]  ;;  %v5552_v3 = vld [vmem:[%s10439_s25 + $0x108] sm:$0xff]  ;;  %v11255_v39 = vpop.permute.xlu0 %3065  ;;  %v16202_v29 = vld [vmem:[#allocation186_spill] sm:$0xff] }
 0x279   : > { %16193 = vst [vmem:[#allocation105_spill] sm:$0xff] %v11225_v35  ;;  %v11242_v25 = vadd.f32 %v16197_v16, %v2139_v58  ;;  %v11245_v17 = vmul.f32 %v11174_v5, %v2956_v61  ;;  %v11248_v1 = vadd.f32 %v16198_v32, %v2151_v12  ;;  %v2849_v48 = vmul.f32 %v2843_v22, %v16116_v2  ;;  %v11294_v12 = vld [vmem:[%s6307_s10 + $0x28] sm:$0x1] }
 0x27a   : > { %16195 = vst [vmem:[#allocation140_spill] sm:$0xff] %v11236_v23  ;;  %v3234_v42 = vmul.f32 %v11203_v11, %v11216_v37  ;;  %3528 = vrot.lane.b32.xlu0 %v3516_v28, %s6158_s6  ;;  %v3557_v14 = vrot.slane %v5549_v63, 7  ;;  %v11258_v0 = vadd.f32 %v2899_v54, %v11117_v62  ;;  %v11261_v61 = vadd.f32 %v2911_v15, %v11120_v46  ;;  %v11272_v28 = vld [vmem:[%s10439_s25 + $0x100] sm:$0xff]  ;;  %v16205_v54 = vld [vmem:[#allocation109_spill] sm:$0xff]  ;;  %v11309_v35 = vpop.permute.xlu1 %3071 }
 0x27b   : > { %v11264_v58 = vadd.f32 %v2923_v56, %v11133_v8  ;;  %v11268_v22 = vmul.f32 %v11197_v31, %v11197_v31  ;;  %3565 = vrot.lane.b32.xlu1 %v3558_v53, %s6158_s6  ;;  %v11275_v51 = vadd.f32 %v3235_v33, %v16202_v29  ;;  %v11279_v62 = vmul.f32 %v11216_v37, %v11216_v37  ;;  %v16204_v8 = vld [vmem:[#allocation20_spill] sm:$0xff]  ;;  %v16207_v33 = vld [vmem:[#allocation147_spill] sm:$0xff]  ;;  %v16208_v32 = vld [vmem:[#allocation173_spill] sm:$0xff] }
 0x27c   : > { %16199 = vst [vmem:[#allocation63_spill] sm:$0xff] %v11258_v0  ;;  %16200 = vst [vmem:[#allocation137_spill] sm:$0xff] %v11261_v61  ;;  %v11282_v46 = vmul.f32 %v11174_v5, %v2955_v41  ;;  %v2978_v15 = vsel %vm2167_vm2, %v16205_v54, %v16204_v8  ;;  %v11289_v56 = vmul.f32 %v11245_v17, %v11245_v17  ;;  %v3561_v16 = vrot.slane %v5552_v3, 7  ;;  %v11303_v54 = vld [vmem:[%s6307_s10 + $0x38] sm:$0xfe]  ;;  %v11325_v23 = vld [vmem:[%s6307_s10 + $0x48] sm:$0xff] }
 0x27d   : > { %16201 = vst [vmem:[#allocation142_spill] sm:$0xff] %v11264_v58  ;;  %16203 = vst [vmem:[#allocation138_spill] sm:$0xff] %v11275_v51  ;;  %v3237_v63 = vmul.f32 %v11203_v11, %v11245_v17  ;;  %v2958_v36 = vsub.f32 %v11294_v12, %v16207_v33  ;;  %v2855_v41 = vadd.f32 %v2849_v48, %v16124_v57  ;;  %v3559_v0 = vrot.slane %v11272_v28, 7  ;;  %v11315_v48 = vld [vmem:[%s6307_s10 + $0x30] sm:$0xfe]  ;;  %v16214_v51 = vld [vmem:[#allocation119_spill] sm:$0xff] }
 0x27e   : > { %16206 = vst [vmem:[#allocation144_spill] sm:$0xff] %v11294_v12  ;;  %v11300_v29 = vadd.f32 %v3234_v42, %v16208_v32  ;;  %16210 = vst [vmem:[#allocation145_spill] sm:$0xff] %v11303_v54  ;;  %v2988_v61 = vsub.f32 %v11303_v54, %v16204_v8  ;;  %3563 = vrot.lane.b32.xlu0 %v3557_v14, %s6158_s6  ;;  %v2946_v3 = vsel %vm2167_vm2, %v16211_v26, %v16207_v33  ;;  %v16216_v12 = vld [vmem:[#allocation58_spill] sm:$0xff]  ;;  %v11336_v33 = vpop.permute.xlu0 %3069  ;;  %v16222_v54 = vld [vmem:[#allocation91_spill] sm:$0xff] }
 0x27f   : > { %16212 = vst [vmem:[#allocation171_spill] sm:$0xff] %v11315_v48  ;;  %v2987_v42 = vsub.f32 %v11315_v48, %v2978_v15  ;;  %v3562_v32 = vsel %vm359_vm0, %v3558_v53, %v3561_v16  ;;  %v3236_v58 = vmul.f32 %v11203_v11, %v11282_v46  ;;  %16215 = vst [vmem:[#allocation172_spill] sm:$0xff] %v11325_v23  ;;  %v11332_v15 = vld [vmem:[%s6307_s10 + $0x68] sm:$0xfe] }
 0x280   : > { %16209 = vst [vmem:[#allocation139_spill] sm:$0xff] %v11300_v29  ;;  %v16213_v29 = vld [vmem:[#allocation205_spill] sm:$0xff]  ;;  %v2990_v30 = vsub.f32 %v11325_v23, %v16216_v12  ;;  %3569 = vrot.lane.b32.xlu1 %v3562_v32, %s6158_s6  ;;  %v3560_v26 = vsel %vm359_vm0, %v3557_v14, %v3559_v0  ;;  %16217 = vst [vmem:[#allocation148_spill] sm:$0xff] %v11332_v15  ;;  %v11343_v48 = vmul.f32 %v11282_v46, %v11282_v46  ;;  %v16221_v32 = vld [vmem:[#allocation151_spill] sm:$0xff] }
 0x281   : > { %v3011_v8 = vsel %vm2167_vm2, %v16214_v51, %v16213_v29  ;;  %v3021_v53 = vsub.f32 %v11332_v15, %v16213_v29  ;;  %v16218_v51 = vld [vmem:[#allocation22_spill] sm:$0xff]  ;;  %v11346_v23 = vmul.f32 %v11174_v5, %v2958_v36  ;;  %v2898_v47 = vmul.f32 %v2855_v41, %v10942_v45  ;;  %v11352_v29 = vld [vmem:[%s6307_s10 + $0x20] sm:$0x1]  ;;  %v16250_v2 = vld [vmem:[#allocation49_spill] sm:$0xff] }
 0x282   : > { %v11339_v27 = vadd.f32 %v3237_v63, %v16218_v51  ;;  %v3020_v14 = vsub.f32 %v16221_v32, %v3011_v8  ;;  %v2910_v21 = vmul.f32 %v2855_v41, %v16222_v54  ;;  %16223 = vst [vmem:[#allocation115_spill] sm:$0xff] %v11352_v29  ;;  %v2957_v15 = vsub.f32 %v11352_v29, %v2946_v3  ;;  %v11360_v51 = vld [vmem:[%s10439_s25 + $0x20] sm:$0x3]  ;;  %v16224_v8 = vld [vmem:[#allocation190_spill] sm:$0xff]  ;;  %v3773_v29 = vld [vmem:[%s10439_s25] sm:$0xfc] }
 0x283   : > { %16220 = vst [vmem:[#allocation85_spill] sm:$0xff] %v11346_v23  ;;  %v11356_v63 = vmul.f32 %v2988_v61, %v11174_v5  ;;  %3567 = vrot.lane.b32.xlu0 %v3560_v26, %s6158_s6  ;;  %v11363_v36 = vmul.f32 %v2987_v42, %v11174_v5  ;;  %v2979_v45 = vsel %vm2167_vm2, %v16224_v8, %v16216_v12  ;;  %v16225_v54 = vld [vmem:[#allocation40_spill] sm:$0xff]  ;;  %v11383_v12 = vpop.permute.xlu1 %3075 }
 0x284   : > { %16219 = vst [vmem:[#allocation128_spill] sm:$0xff] %v11339_v27  ;;  %v3023_v32 = vsub.f32 %v16225_v54, %v10979_v10  ;;  %v16226_v27 = vld [vmem:[#allocation157_spill] sm:$0xff]  ;;  %v2922_v61 = vmul.f32 %v2855_v41, %v11158_v9  ;;  %v11374_v26 = vadd.f32 %v3236_v58, %v16227_v34  ;;  %v11377_v59 = vmul.f32 %v2990_v30, %v11174_v5  ;;  %v16229_v34 = vld [vmem:[#allocation108_spill] sm:$0xff]  ;;  %v11405_v54 = vpop.permute.xlu0 %3073 }
 0x285   : > { %v3795_v3 = vrot.slane %v16226_v27, 1  ;;  %v11380_v42 = vmul.f32 %v3021_v53, %v11174_v5  ;;  %3573 = vrot.lane.b32.xlu1 %v3561_v16, %s6158_s6  ;;  %v11387_v27 = vmul.f32 %v11346_v23, %v11346_v23  ;;  %v11390_v9 = vmul.f32 %v3020_v14, %v11174_v5  ;;  %v11401_v53 = vld [vmem:[%s6307_s10 + $0x40] sm:$0xff]  ;;  %16231 = vst [vmem:[#allocation135_spill] sm:$0xff] %v11405_v54 }
 0x286   : > { %16228 = vst [vmem:[#allocation131_spill] sm:$0xff] %v11374_v26  ;;  %v3012_v30 = vsel %vm2167_vm2, %v16229_v34, %v10979_v10  ;;  %v3797_v58 = vrot.slane %v11360_v51, 1  ;;  %v3239_v41 = vmul.f32 %v11203_v11, %v11346_v23  ;;  %v3138_v16 = vmul.f32 %v11356_v63, %v11356_v63  ;;  %16230 = vst [vmem:[#allocation132_spill] sm:$0xff] %v11401_v53  ;;  %v16232_v34 = vld [vmem:[#allocation32_spill] sm:$0xff]  ;;  %v16233_v51 = vld [vmem:[#allocation75_spill] sm:$0xff] }
 0x287   : > { %v2989_v8 = vsub.f32 %v11401_v53, %v2979_v45  ;;  %3571 = vrot.lane.b32.xlu0 %v3559_v0, %s6158_s6  ;;  %v3794_v14 = vrot.slane %v3773_v29, 1  ;;  %v3137_v10 = vmul.f32 %v11363_v36, %v11363_v36  ;;  %v2980_v26 = vsel %vm2167_vm2, %v16233_v51, %v16232_v34  ;;  %v16234_v45 = vld [vmem:[#allocation89_spill] sm:$0xff]  ;;  %v5563_v23 = vld [vmem:[%s10439_s25 + $0xb0] sm:$0x3] }
 0x288   : > { %v11413_v20 = vmul.f32 %v3023_v32, %v11174_v5  ;;  %v3798_v49 = vsel %vm1404_vm1, %v3795_v3, %v3797_v58  ;;  %v3140_v0 = vmul.f32 %v11377_v59, %v11377_v59  ;;  %v3150_v29 = vmul.f32 %v11380_v42, %v11380_v42 }
 0x289   : > { %v3022_v53 = vsub.f32 %v16234_v45, %v3012_v30  ;;  %3801 = vrot.lane.b32.xlu1 %v3798_v49, %s6157_s11  ;;  %v3796_v51 = vsel %vm1404_vm1, %v3794_v14, %v3795_v3  ;;  %v11425_v32 = vadd.f32 %v2898_v47, %v11239_v55  ;;  %v11428_v43 = vadd.f32 %v2910_v21, %v11242_v25  ;;  %v11440_v49 = vld [vmem:[%s6307_s10 + $0x58] sm:$0x1]  ;;  %v5557_v55 = vld [vmem:[%s10439_s25 + $0x50] sm:$0x3]  ;;  %v11446_v25 = vpop.permute.xlu1 %3100 }
 0x28a   : > { %v11431_v4 = vmul.f32 %v11174_v5, %v2957_v15  ;;  %v3149_v50 = vmul.f32 %v11390_v9, %v11390_v9  ;;  %v3144_v18 = vadd.f32 %v3138_v16, %v11268_v22  ;;  %v11437_v30 = vmul.f32 %v2989_v8, %v11174_v5  ;;  %16238 = vst [vmem:[#allocation195_spill] sm:$0xff] %v11440_v49  ;;  %v11450_v3 = vld [vmem:[%s6307_s10 + $0x50] sm:$0x1]  ;;  %v16240_v8 = vld [vmem:[#allocation104_spill] sm:$0xff] }
 0x28b   : > { %16235 = vst [vmem:[#allocation134_spill] sm:$0xff] %v11425_v32  ;;  %16236 = vst [vmem:[#allocation141_spill] sm:$0xff] %v11428_v43  ;;  %v2992_v47 = vsub.f32 %v11440_v49, %v16232_v34  ;;  %3799 = vrot.lane.b32.xlu0 %v3796_v51, %s6157_s11  ;;  %v3824_v21 = vrot.slane %v5555_v44, 1  ;;  %v3143_v15 = vadd.f32 %v3137_v10, %v11279_v62  ;;  %v3825_v14 = vrot.slane %v16240_v8, 1  ;;  %v11463_v62 = vpop.permute.xlu0 %3098  ;;  %v16243_v43 = vld [vmem:[#allocation121_spill] sm:$0xff]  ;;  %v16244_v49 = vld [vmem:[#allocation208_spill] sm:$0xff] }
 0x28c   : > { %16237 = vst [vmem:[#allocation143_spill] sm:$0xff] %v11431_v4  ;;  %16239 = vst [vmem:[#allocation12_spill] sm:$0xff] %v11450_v3  ;;  %v2991_v22 = vsub.f32 %v11450_v3, %v2980_v26  ;;  %v3152_v16 = vmul.f32 %v11413_v20, %v11413_v20  ;;  %v11457_v34 = vadd.f32 %v2922_v61, %v11248_v1  ;;  %v16242_v26 = vld [vmem:[#allocation96_spill] sm:$0xff]  ;;  %v3827_v8 = vrot.slane %v5557_v55, 1  ;;  %v16248_v55 = vld [vmem:[#allocation149_spill] sm:$0xff] }
 0x28d   : > { %v3146_v44 = vadd.f32 %v3140_v0, %v11289_v56  ;;  %v3156_v45 = vadd.f32 %v3150_v29, %v3144_v18  ;;  %v11461_v51 = vmul.f32 %v3022_v53, %v11174_v5  ;;  %v3155_v10 = vadd.f32 %v3149_v50, %v3143_v15  ;;  %v16246_v56 = vld [vmem:[#allocation179_spill] sm:$0xff]  ;;  %v11480_v61 = vld [vmem:[%s10439_s25 + $0x80] sm:$0x3] }
 0x28e   : > { %16241 = vst [vmem:[#allocation70_spill] sm:$0xff] %v11457_v34  ;;  %v3013_v32 = vsel %vm2167_vm2, %v16243_v43, %v16242_v26  ;;  %v3826_v3 = vsel %vm1404_vm1, %v3824_v21, %v3825_v14  ;;  %v11470_v57 = vadd.f32 %v3239_v41, %v16244_v49  ;;  %v3135_v18 = vmul.f32 %v11431_v4, %v11431_v4  ;;  %v5558_v43 = vld [vmem:[%s10439_s25 + $0x60] sm:$0xfc] }
 0x28f   : > { %v3238_v1 = vmul.f32 %v11203_v11, %v11431_v4  ;;  %v3025_v50 = vsub.f32 %v16246_v56, %v16242_v26  ;;  %3829 = vrot.lane.b32.xlu1 %v3826_v3, %s6157_s11  ;;  %v3139_v53 = vmul.f32 %v11437_v30, %v11437_v30  ;;  %v11486_v41 = vmul.f32 %v2992_v47, %v11174_v5  ;;  %v5561_v26 = vld [vmem:[%s10439_s25 + $0x90] sm:$0xfc]  ;;  %v11497_v56 = vpop.permute.xlu1 %3104  ;;  %v16249_v47 = vld [vmem:[#allocation111_spill] sm:$0xff] }
 0x290   : > { %16245 = vst [vmem:[#allocation202_spill] sm:$0xff] %v11470_v57  ;;  %v11489_v0 = vmul.f32 %v2991_v22, %v11174_v5  ;;  %v3158_v29 = vadd.f32 %v3152_v16, %v3146_v44  ;;  %3803 = vrot.lane.b32.xlu0 %v3797_v58, %s6157_s11  ;;  %v3162_v49 = vadd.f32 1e-09, %v3156_v45  ;;  %v3151_v21 = vmul.f32 %v11461_v51, %v11461_v51  ;;  %v11511_v44 = vpop.permute.xlu0 %3102 }
 0x291   : > { %v3024_v15 = vsub.f32 %v16248_v55, %v3013_v32  ;;  %v3828_v3 = vsel %vm1404_vm1, %v3825_v14, %v3827_v8  ;;  %v3161_v57 = vadd.f32 1e-09, %v3155_v10  ;;  %v3854_v34 = vrot.slane %v16249_v47, 1 }
 0x292   : > { %16247 = vst [vmem:[#allocation159_spill] sm:$0xff] %v11489_v0  ;;  %v3856_v22 = vrot.slane %v11480_v61, 1  ;;  %v3853_v4 = vrot.slane %v5558_v43, 1  ;;  %v3247_v58 = vmul.f32 %v11203_v11, %v11356_v63  ;;  %v3246_v16 = vmul.f32 %v11203_v11, %v11363_v36 }
 0x293   : > { %v3249_v32 = vmul.f32 %v11203_v11, %v11377_v59  ;;  %v11508_v14 = vmul.f32 %v3025_v50, %v11174_v5  ;;  %3833 = vrot.lane.b32.xlu1 %v3827_v8, %s6157_s11  ;;  %v3145_v45 = vadd.f32 %v3139_v53, %v11343_v48  ;;  %v3142_v10 = vmul.f32 %v11486_v41, %v11486_v41 }
 0x294   : > { %3831 = vrot.lane.b32.xlu0 %v3828_v3, %s6157_s11  ;;  %v3857_v61 = vsel %vm1404_vm1, %v3854_v34, %v3856_v22  ;;  %v3882_v43 = vrot.slane %v5561_v26, 1  ;;  %5795 = vrsqrt.f32 %v3162_v49  ;;  %v11519_v55 = vmul.f32 %v3024_v15, %v11174_v5  ;;  %v16252_v26 = vld [vmem:[#allocation136_spill] sm:$0xff]  ;;  %v16254_v15 = vld [vmem:[#allocation133_spill] sm:$0xff] }
 0x295   : > { %v3855_v50 = vsel %vm1404_vm1, %v3853_v4, %v3854_v34  ;;  %v3883_v8 = vrot.slane %v11038_v24, 1  ;;  %v3141_v47 = vmul.f32 %v11489_v0, %v11489_v0  ;;  %5797 = vrsqrt.f32 %v3161_v57  ;;  %v11538_v4 = vpop.permute.xlu1 %3108  ;;  %v16256_v57 = vld [vmem:[#allocation212_spill] sm:$0xff] }
 0x296   : > { %v3164_v48 = vadd.f32 1e-09, %v3158_v29  ;;  %v3157_v53 = vadd.f32 %v3151_v21, %v3145_v45  ;;  %v11527_v3 = vadd.f32 %v3238_v1, %v16250_v2  ;;  %v11530_v49 = vadd.f32 %v3247_v58, %v16252_v26  ;;  %v11555_v45 = vld [vmem:[%s10439_s25 + $0xe0] sm:$0x3] }
 0x297   : > { %v11533_v54 = vadd.f32 %v3249_v32, %v16254_v15  ;;  %v3154_v24 = vmul.f32 %v11508_v14, %v11508_v14  ;;  %3860 = vrot.lane.b32.xlu1 %v3857_v61, %s6157_s11  ;;  %v11541_v34 = vadd.f32 %v3246_v16, %v16256_v57  ;;  %v3248_v2 = vmul.f32 %v11203_v11, %v11437_v30  ;;  %v11557_v61 = vpop.permute.xlu0 %3106 }
 0x298   : > { %16251 = vst [vmem:[#allocation80_spill] sm:$0xff] %v11527_v3  ;;  %16253 = vst [vmem:[#allocation160_spill] sm:$0xff] %v11530_v49  ;;  %v3251_v1 = vmul.f32 %v11203_v11, %v11486_v41  ;;  %3858 = vrot.lane.b32.xlu0 %v3855_v50, %s6157_s11  ;;  %v3884_v29 = vsel %vm1404_vm1, %v3882_v43, %v3883_v8  ;;  %v3148_v21 = vadd.f32 %v3142_v10, %v11387_v27  ;;  %v5564_v43 = vld [vmem:[%s10439_s25 + $0xc0] sm:$0xfc]  ;;  %v16262_v3 = vld [vmem:[#allocation17_spill] sm:$0xff] }
 0x299   : > { %16255 = vst [vmem:[#allocation66_spill] sm:$0xff] %v11533_v54  ;;  %16257 = vst [vmem:[#allocation78_spill] sm:$0xff] %v11541_v34  ;;  %v3250_v58 = vmul.f32 %v11203_v11, %v11489_v0  ;;  %v3153_v32 = vmul.f32 %v11519_v55, %v11519_v55  ;;  %v3885_v16 = vrot.slane %v5563_v23, 1  ;;  %v3147_v26 = vadd.f32 %v3141_v47, %v3135_v18  ;;  %v16258_v18 = vld [vmem:[#allocation68_spill] sm:$0xff]  ;;  %v11584_v0 = vpop.permute.xlu1 %3349  ;;  %v16268_v34 = vld [vmem:[#allocation177_spill] sm:$0xff] }
 0x29a   : > { %v3259_v15 = vmul.f32 %v11203_v11, %v11380_v42  ;;  %5799 = vrsqrt.f32 %v3164_v48  ;;  %v3163_v50 = vadd.f32 1e-09, %v3157_v53  ;;  %v3258_v27 = vmul.f32 %v11203_v11, %v11390_v9  ;;  %v16260_v48 = vld [vmem:[#allocation150_spill] sm:$0xff] }
 0x29b   : > { %v3261_v10 = vmul.f32 %v11203_v11, %v11413_v20  ;;  %v3160_v57 = vadd.f32 %v3154_v24, %v3148_v21  ;;  %v3044_v23 = vsel %vm2167_vm2, %v11088_v52, %v11070_v38  ;;  %3887 = vrot.lane.b32.xlu1 %v3884_v29, %s6157_s11  ;;  %v11571_v47 = vadd.f32 %v3248_v2, %v16258_v18  ;;  %v5567_v29 = vld [vmem:[%s10439_s25 + $0xf0] sm:$0xfc]  ;;  %v16264_v2 = vld [vmem:[#allocation19_spill] sm:$0xff] }
 0x29c   : > { %v11574_v53 = vadd.f32 %v3251_v1, %v16260_v48  ;;  %3862 = vrot.lane.b32.xlu0 %v3856_v22, %s6157_s11  ;;  %v3912_v54 = vrot.slane %v11167_v19, 1  ;;  %v11580_v24 = vadd.f32 %v3250_v58, %v16262_v3  ;;  %v3159_v21 = vadd.f32 %v3153_v32, %v3147_v26  ;;  %v16266_v22 = vld [vmem:[#allocation154_spill] sm:$0xff]  ;;  %v16267_v19 = vld [vmem:[#allocation56_spill] sm:$0xff] }
 0x29d   : > { %16259 = vst [vmem:[#allocation120_spill] sm:$0xff] %v11571_v47  ;;  %v3886_v52 = vsel %vm1404_vm1, %v3883_v8, %v3885_v16  ;;  %v3911_v49 = vrot.slane %v5564_v43, 1  ;;  %v11587_v18 = vadd.f32 %v3259_v15, %v16264_v2  ;;  %5801 = vrsqrt.f32 %v3163_v50  ;;  %v16270_v58 = vld [vmem:[#allocation214_spill] sm:$0xff]  ;;  %v11601_v15 = vpop.permute.xlu0 %3347  ;;  %v16292_v47 = vld [vmem:[#allocation85_spill] sm:$0xff] }
 0x29e   : > { %16261 = vst [vmem:[#allocation13_spill] sm:$0xff] %v11574_v53  ;;  %16263 = vst [vmem:[#allocation95_spill] sm:$0xff] %v11580_v24  ;;  %v3054_v1 = vsub.f32 %v16266_v22, %v11070_v38  ;;  %v3053_v48 = vsub.f32 %v16267_v19, %v3044_v23  ;;  %v11593_v3 = vadd.f32 %v3258_v27, %v16268_v34  ;;  %v3166_v8 = vadd.f32 1e-09, %v3160_v57  ;;  %v16272_v26 = vld [vmem:[#allocation54_spill] sm:$0xff] }
 0x29f   : > { %16265 = vst [vmem:[#allocation165_spill] sm:$0xff] %v11587_v18  ;;  %v11596_v32 = vadd.f32 %v3261_v10, %v16270_v58  ;;  %v3087_v43 = vsub.f32 %v16272_v26, %v11233_v6  ;;  %3891 = vrot.lane.b32.xlu1 %v3885_v16, %s6157_s11  ;;  %v3077_v38 = vsel %vm2167_vm2, %v11255_v39, %v11233_v6  ;;  %v16273_v34 = vrot.slane %v11555_v45, 1  ;;  %v5569_v39 = vld [vmem:[%s10439_s25 + $0x110] sm:$0x3] }
 0x2a0   : > { %16269 = vst [vmem:[#allocation83_spill] sm:$0xff] %v11593_v3  ;;  %3889 = vrot.lane.b32.xlu0 %v3886_v52, %s6157_s11  ;;  %v3940_v27 = vrot.slane %v5567_v29, 1  ;;  %v3941_v10 = vrot.slane %v11272_v28, 1  ;;  %v11613_v57 = vmul.f32 %v11203_v11, %v11461_v51  ;;  %v11617_v16 = vmul.f32 %v11203_v11, %v11508_v14  ;;  %v11680_v18 = vld [vmem:[%s10439_s25 + $0x10] sm:$0xff] }
 0x2a1   : > { %16271 = vst [vmem:[#allocation86_spill] sm:$0xff] %v11596_v32  ;;  %v3915_v50 = vsel %vm1404_vm1, %v3912_v54, %v16273_v34  ;;  %v3165_v23 = vadd.f32 1e-09, %v3159_v21  ;;  %v3913_v6 = vsel %vm1404_vm1, %v3911_v49, %v3912_v54  ;;  %v5796_v52 = vpop.eup %5795  ;;  %v11623_v2 = vmul.f32 %v11203_v11, %v11519_v55  ;;  %v16274_v54 = vld [vmem:[#allocation158_spill] sm:$0xff]  ;;  %v16275_v11 = vld [vmem:[#allocation175_spill] sm:$0xff]  ;;  %v11647_v34 = vld [vmem:[%s6307_s10 + $0xa0] sm:$0xff] }
 0x2a2   : > { %v3060_v29 = vmul.f32 %v3054_v1, %v11174_v5  ;;  %v3059_v28 = vmul.f32 %v3053_v48, %v11174_v5  ;;  %v11630_v22 = vsel %vm2167_vm2, %v11146_v13, %v11124_v7  ;;  %v5798_v19 = vpop.eup %5797  ;;  %v3093_v21 = vmul.f32 %v3087_v43, %v11174_v5  ;;  %v11640_v48 = vpop.permute.xlu1 %3353  ;;  %v16276_v13 = vld [vmem:[#allocation15_spill] sm:$0xff] }
 0x2a3   : > { %v3086_v49 = vsub.f32 %v16274_v54, %v3077_v38  ;;  %3918 = vrot.lane.b32.xlu1 %v3915_v50, %s6157_s11  ;;  %v3120_v58 = vsub.f32 %v16275_v11, %v11446_v25  ;;  %v3110_v1 = vsel %vm2167_vm2, %v11463_v62, %v11446_v25  ;;  %5803 = vrsqrt.f32 %v3166_v8  ;;  %v16277_v62 = vld [vmem:[#allocation189_spill] sm:$0xff]  ;;  %v16279_v54 = vld [vmem:[#allocation191_spill] sm:$0xff]  ;;  %v4143_v50 = vld [vmem:[%s10439_s25] sm:$0xf0] }
 0x2a4   : > { %v3056_v26 = vsub.f32 %v16276_v13, %v11124_v7  ;;  %3916 = vrot.lane.b32.xlu0 %v3913_v6, %s6157_s11  ;;  %v3942_v43 = vsel %vm1404_vm1, %v3940_v27, %v3941_v10  ;;  %v3943_v38 = vrot.slane %v5569_v39, 1  ;;  %5805 = vrsqrt.f32 %v3165_v23  ;;  %v11656_v7 = vpop.permute.xlu0 %3351  ;;  %v16278_v23 = vld [vmem:[#allocation198_spill] sm:$0xff]  ;;  %v4144_v13 = vld [vmem:[%s10439_s25 + $0x8] sm:$0xf0]  ;;  %v11669_v25 = vld [vmem:[%s10439_s25 + $0x18] sm:$0xff] }
 0x2a5   : > { %v11654_v8 = vmul.f32 %v5796_v52, %v11356_v63  ;;  %v11659_v6 = vmul.f32 %v5796_v52, %v11197_v31  ;;  %v11662_v27 = vmul.f32 %v5798_v19, %v11216_v37  ;;  %v3089_v39 = vsub.f32 %v16278_v23, %v11309_v35 }
 0x2a6   : > { %v3119_v11 = vsub.f32 %v16279_v54, %v3110_v1  ;;  %v11674_v3 = vmul.f32 %v5798_v19, %v11363_v36  ;;  %v3092_v31 = vmul.f32 %v3086_v49, %v11174_v5  ;;  %v3126_v37 = vmul.f32 %v3120_v58, %v11174_v5  ;;  %v16281_v49 = vld [vmem:[#allocation152_spill] sm:$0xff]  ;;  %v11695_v53 = vpop.permute.xlu1 %3357 }
 0x2a7   : > { %v5800_v32 = vpop.eup %5799  ;;  %v3198_v63 = vmul.f32 %v11654_v8, %v3093_v21  ;;  %3945 = vrot.lane.b32.xlu1 %v3942_v43, %s6157_s11  ;;  %v3078_v1 = vsel %vm2167_vm2, %v11336_v33, %v11309_v35  ;;  %v16280_v23 = vrot.slane %v11555_v45, 1  ;;  %v11689_v21 = vmul.f32 %v5796_v52, %v11380_v42 }
 0x2a8   : > { %v3944_v36 = vsel %vm1404_vm1, %v3941_v10, %v3943_v38  ;;  %v3122_v43 = vsub.f32 %v16281_v49, %v11497_v56  ;;  %v4189_v58 = vrot.slane %v4144_v13, 3  ;;  %v15008_v54 = vrot.slane %v11669_v25, 3  ;;  %v11714_v49 = vld [vmem:[%s6307_s10 + $0xd0] sm:$0xff] }
 0x2a9   : > { %3920 = vrot.lane.b32.xlu0 %v16280_v23, %s6157_s11  ;;  %v4186_v24 = vrot.slane %v4143_v50, 3  ;;  %v3192_v35 = vmul.f32 %v11659_v6, %v3060_v29  ;;  %v11699_v33 = vmul.f32 %v5800_v32, %v11245_v17  ;;  %v3125_v42 = vmul.f32 %v3119_v11, %v11174_v5  ;;  %v11710_v29 = vpop.permute.xlu0 %3355  ;;  %16282 = vst [vmem:[#allocation87_spill] sm:$0xff] %v11714_v49 }
 0x2aa   : > { %v5802_v10 = vpop.eup %5801  ;;  %v3197_v52 = vmul.f32 %v11674_v3, %v3092_v31  ;;  %v11705_v13 = vmul.f32 %v5800_v32, %v11377_v59  ;;  %v3095_v23 = vmul.f32 %v3089_v39, %v11174_v5  ;;  %v3210_v50 = vmul.f32 %v11689_v21, %v3126_v37 }
 0x2ab   : > { %3949 = vrot.lane.b32.xlu1 %v3943_v38, %s6157_s11  ;;  %v3191_v17 = vmul.f32 %v11662_v27, %v3059_v28  ;;  %v3088_v11 = vsub.f32 %v11714_v49, %v3078_v1  ;;  %v11718_v45 = vmul.f32 %v5798_v19, %v11390_v9  ;;  %v4191_v59 = vsel %vm4185_vm3, %v4189_v58, %v15008_v54 }
 0x2ac   : > { %v3204_v39 = vadd.f32 %v3198_v63, %v3192_v35  ;;  %v3128_v38 = vmul.f32 %v3122_v43, %v11174_v5  ;;  %v3111_v28 = vsel %vm2167_vm2, %v11511_v44, %v11497_v56  ;;  %v16283_v31 = vrot.slane %v11680_v18, 3  ;;  %v11744_v44 = vpop.permute.xlu1 %3393 }
 0x2ad   : > { %3947 = vrot.lane.b32.xlu0 %v3944_v36, %s6157_s11  ;;  %v3062_v9 = vmul.f32 %v3056_v26, %v11174_v5  ;;  %v11733_v19 = vmul.f32 %v5802_v10, %v11282_v46  ;;  %v3046_v1 = vsel %vm2167_vm2, %v11200_v60, %v11186_v40  ;;  %v3209_v63 = vmul.f32 %v11718_v45, %v3125_v42  ;;  %v16285_v60 = vld [vmem:[#allocation135_spill] sm:$0xff]  ;;  %v16286_v42 = vld [vmem:[#allocation45_spill] sm:$0xff]  ;;  %s11850_s11 = sld [smem:[#allocation2 + $0x8]] }
 0x2ae   : > { %v4188_v37 = vsel %vm4185_vm3, %v4186_v24, %v16283_v31  ;;  %v3203_v36 = vadd.f32 %v3197_v52, %v3191_v17  ;;  %v3200_v43 = vmul.f32 %v11705_v13, %v3095_v23  ;;  %v3216_v58 = vadd.f32 %v3210_v50, %v3204_v39  ;;  %v16284_v24 = vld [vmem:[#allocation98_spill] sm:$0xff] }
 0x2af   : > { %v11741_v56 = vmul.f32 %v5800_v32, %v11413_v20  ;;  %4198 = vrot.lane.b32.xlu1 %v4191_v59, %s6158_s6  ;;  %v3094_v46 = vmul.f32 %v3088_v11, %v11174_v5  ;;  %v3091_v26 = vsub.f32 %v16284_v24, %v11383_v12  ;;  %v3079_v35 = vsel %vm2167_vm2, %v16285_v60, %v11383_v12  ;;  %v11764_v59 = vpop.permute.xlu0 %3391  ;;  %v4148_v60 = vld [vmem:[%s10439_s25 + $0x28] sm:$0xf] }
 0x2b0   : > { %v3121_v52 = vsub.f32 %v16286_v42, %v3111_v28  ;;  %v5804_v20 = vpop.eup %5803  ;;  %v3194_v32 = vmul.f32 %v11699_v33, %v3062_v9  ;;  %v16287_v23 = vsub.f32 %v11647_v34, %v11630_v22  ;;  %v16288_v17 = vsub.f32 %v16277_v62, %v11186_v40  ;;  %v11769_v28 = vld [vmem:[%s6307_s10 + $0xb0] sm:$0x1]  ;;  %v16289_v9 = vld [vmem:[#allocation57_spill] sm:$0xff]  ;;  %v4147_v40 = vld [vmem:[%s10439_s25 + $0x20] sm:$0xf]  ;;  %v11794_v49 = vpop.permute.xlu1 %3397 }
 0x2b1   : > { %4196 = vrot.lane.b32.xlu0 %v4188_v37, %s6158_s6  ;;  %v3212_v12 = vmul.f32 %v11741_v56, %v3128_v38  ;;  %v11766_v39 = vpop.eup %5805  ;;  %v3057_v31 = vsub.f32 %v11769_v28, %v3046_v1  ;;  %v11773_v37 = vmul.f32 %v5802_v10, %v11437_v30  ;;  %v3215_v22 = vadd.f32 %v3209_v63, %v3203_v36  ;;  %v11781_v42 = vld [vmem:[%s6307_s10 + $0xe0] sm:$0x1] }
 0x2b2   : > { %v3061_v50 = vmul.f32 %v16287_v23, %v11174_v5  ;;  %v3064_v11 = vmul.f32 %v16288_v17, %v11174_v5  ;;  %v3124_v24 = vsub.f32 %v16289_v9, %v11538_v4  ;;  %v3206_v38 = vadd.f32 %v3200_v43, %v3194_v32  ;;  %16290 = vst [vmem:[#allocation47_spill] sm:$0xff] %v11781_v42  ;;  %v16291_v17 = vld [vmem:[#allocation65_spill] sm:$0xff] }
 0x2b3   : > { %v3090_v23 = vsub.f32 %v11781_v42, %v3079_v35  ;;  %v3222_v54 = vmul.f32 %v3216_v58, %v16291_v17  ;;  %v11786_v1 = vmul.f32 %v5804_v20, %v16292_v47  ;;  %v3199_v30 = vmul.f32 %v11773_v37, %v3094_v46  ;;  %v16300_v42 = vld [vmem:[#allocation34_spill] sm:$0xff] }
 0x2b4   : > { %v3193_v62 = vmul.f32 %v11733_v19, %v3061_v50  ;;  %v3097_v63 = vmul.f32 %v3091_v26, %v11174_v5  ;;  %v3127_v36 = vmul.f32 %v3121_v52, %v11174_v5  ;;  %v11792_v9 = vmul.f32 %v5804_v20, %v11486_v41  ;;  %v16294_v41 = vld [vmem:[#allocation76_spill] sm:$0xff] }
 0x2b5   : > { %v3218_v50 = vadd.f32 %v3212_v12, %v3206_v38  ;;  %v4194_v43 = vrot.slane %v4148_v60, 3  ;;  %v4192_v32 = vrot.slane %v4147_v40, 3  ;;  %v3221_v35 = vmul.f32 %v3215_v22, %v16291_v17 }
 0x2b6   : > { %16293 = vst [vmem:[#allocation55_spill] sm:$0xff] %v11792_v9  ;;  %v11798_v58 = vmul.f32 %v5802_v10, %v11461_v51  ;;  %v3130_v47 = vmul.f32 %v3124_v24, %v11174_v5  ;;  %v3112_v46 = vsel %vm2167_vm2, %v11557_v61, %v11538_v4  ;;  %v3096_v26 = vmul.f32 %v3090_v23, %v11174_v5  ;;  %v11812_v51 = vpop.permute.xlu0 %3395  ;;  %v16297_v10 = vld [vmem:[#allocation143_spill] sm:$0xff] }
 0x2b7   : > { %v3228_v52 = vadd.f32 %v3222_v54, %v16294_v41  ;;  %v16295_v12 = vrot.slane %v11669_v25, 3  ;;  %v16296_v40 = vrot.slane %v11680_v18, 3  ;;  %v11816_v24 = vmul.f32 %v11766_v39, %v16297_v10  ;;  %v16298_v23 = vld [vmem:[#allocation159_spill] sm:$0xff] }
 0x2b8   : > { %v3202_v4 = vmul.f32 %v11792_v9, %v3097_v63  ;;  %v3211_v61 = vmul.f32 %v11798_v58, %v3127_v36  ;;  %v11821_v54 = vmul.f32 %v5804_v20, %v11508_v14  ;;  %v3063_v38 = vmul.f32 %v3057_v31, %v11174_v5  ;;  %v11837_v9 = vld [vmem:[%s10439_s25 + $0x48] sm:$0xff] }
 0x2b9   : > { %v4195_v60 = vsel %vm4185_vm3, %v16295_v12, %v4194_v43  ;;  %v4193_v22 = vsel %vm4185_vm3, %v16296_v40, %v4192_v32  ;;  %v11827_v12 = vmul.f32 %v11766_v39, %v16298_v23  ;;  %v3224_v40 = vmul.f32 %v3218_v50, %v16291_v17  ;;  %v16301_v31 = vld [vmem:[#allocation53_spill] sm:$0xff] }
 0x2ba   : > { %4202 = vrot.lane.b32.xlu1 %v4195_v60, %s6158_s6  ;;  %v3123_v10 = vsub.f32 %v16300_v42, %v3112_v46  ;;  %4200 = vrot.lane.b32.xlu0 %v4193_v22, %s6158_s6  ;;  %v3196_v63 = vmul.f32 %v11786_v1, %v3064_v11  ;;  %v3205_v36 = vadd.f32 %v3199_v30, %v3193_v62  ;;  %v5573_v60 = vld [vmem:[%s10439_s25 + $0x38] sm:$0xf0]  ;;  %v11846_v11 = vpop.permute.xlu1 %3401  ;;  %v5572_v22 = vld [vmem:[%s10439_s25 + $0x30] sm:$0xf0] }
 0x2bb   : > { %16299 = vst [vmem:[#allocation106_spill] sm:$0xff] %v11827_v12  ;;  %v3227_v14 = vadd.f32 %v3221_v35, %v16294_v41  ;;  %v3214_v20 = vmul.f32 %v11821_v54, %v3130_v47  ;;  %v11841_v23 = vadd.f32 %v11613_v57, %v16301_v31  ;;  %v3201_v50 = vmul.f32 %v11827_v12, %v3096_v26 }
 0x2bc   : > { %v3271_v42 = vmul.f32 %v3228_v52, %v11659_v6  ;;  %v3283_v46 = vmul.f32 %v3228_v52, %v11654_v8  ;;  %v3195_v62 = vmul.f32 %v11816_v24, %v3063_v38  ;;  %v3208_v30 = vadd.f32 %v3202_v4, %v3196_v63  ;;  %v11858_v4 = vpop.permute.xlu0 %3399  ;;  %v16309_v63 = vld [vmem:[#allocation193_spill] sm:$0xff] }
 0x2bd   : > { %16302 = vst [vmem:[#allocation71_spill] sm:$0xff] %v11841_v23  ;;  %v3295_v35 = vmul.f32 %v3228_v52, %v11689_v21  ;;  %v3217_v47 = vadd.f32 %v3211_v61, %v3205_v36  ;;  %v3230_v57 = vadd.f32 %v3224_v40, %v16294_v41  ;;  %v3129_v26 = vmul.f32 %v3123_v10, %v11174_v5  ;;  %v16303_v21 = vld [vmem:[#allocation188_spill] sm:$0xff] }
 0x2be   : > { %4206 = vrot.lane.b32.xlu1 %v4194_v43, %s6158_s6  ;;  %4204 = vrot.lane.b32.xlu0 %v4192_v32, %s6158_s6  ;;  %v4239_v8 = vrot.slane %v5573_v60, 3  ;;  %v4240_v6 = vrot.slane %v11837_v9, 3  ;;  %v11862_v52 = vadd.f32 %v11617_v16, %v16303_v21  ;;  %v16305_v43 = vld [vmem:[#allocation184_spill] sm:$0xff]  ;;  %v3270_v5 = vmul.f32 %v3227_v14, %v11662_v27 }
 0x2bf   : > { %v11866_v61 = vadd.f32 %v11623_v2, %v16305_v43  ;;  %v3220_v38 = vadd.f32 %v3214_v20, %v3208_v30  ;;  %v3207_v32 = vadd.f32 %v3201_v50, %v3195_v62  ;;  %v16307_v40 = vld [vmem:[#allocation192_spill] sm:$0xff]  ;;  %v11873_v36 = vadd.f32 %v3283_v46, %v16309_v63  ;;  %v5577_v50 = vld [vmem:[%s10439_s25 + $0x58] sm:$0xf]  ;;  %v16317_v63 = vld [vmem:[#allocation126_spill] sm:$0xff] }
 0x2c0   : > { %16304 = vst [vmem:[#allocation176_spill] sm:$0xff] %v11862_v52  ;;  %v11870_v10 = vadd.f32 %v3271_v42, %v16307_v40  ;;  %v11877_v60 = vmul.f32 %v11766_v39, %v11519_v55  ;;  %v11882_v16 = vld [vmem:[%s10439_s25 + $0x40] sm:$0xff]  ;;  %v3282_v2 = vmul.f32 %v3227_v14, %v11674_v3  ;;  %v3223_v27 = vmul.f32 %v3217_v47, %v16291_v17  ;;  %v11889_v42 = vld [vmem:[%s10439_s25 + $0x50] sm:$0xf]  ;;  %v11898_v3 = vpop.permute.xlu1 %3436  ;;  %v16313_v47 = vld [vmem:[#allocation197_spill] sm:$0xff]  ;;  %v11912_v40 = vpop.permute.xlu0 %3434 }
 0x2c1   : > { %16306 = vst [vmem:[#allocation196_spill] sm:$0xff] %v11866_v61  ;;  %16310 = vst [vmem:[#allocation42_spill] sm:$0xff] %v11873_v36  ;;  %v4241_v20 = vsel %vm4185_vm3, %v4239_v8, %v4240_v6  ;;  %v4236_v31 = vrot.slane %v5572_v22, 3  ;;  %v16311_v46 = vld [vmem:[#allocation112_spill] sm:$0xff]  ;;  %v3294_v55 = vmul.f32 %v3227_v14, %v11718_v45  ;;  %v3273_v39 = vmul.f32 %v3230_v57, %v11699_v33  ;;  %v16316_v33 = vld [vmem:[#allocation130_spill] sm:$0xff] }
 0x2c2   : > { %16308 = vst [vmem:[#allocation215_spill] sm:$0xff] %v11870_v10  ;;  %v11892_v62 = vadd.f32 %v3295_v35, %v16311_v46  ;;  %v3213_v30 = vmul.f32 %v11877_v60, %v3129_v26  ;;  %4248 = vrot.lane.b32.xlu1 %v4241_v20, %s6158_s6  ;;  %v11901_v8 = vadd.f32 %v3270_v5, %v16313_v47  ;;  %v4237_v21 = vrot.slane %v11882_v16, 3  ;;  %v5582_v10 = vld [vmem:[%s10439_s25 + $0x80] sm:$0xf]  ;;  %v4653_v61 = vld [vmem:[%s10439_s25 + $0x8] sm:$0xfc] }
 0x2c3   : > { %v11904_v22 = vmul.f32 %v3230_v57, %v11705_v13  ;;  %v3226_v35 = vmul.f32 %v3220_v38, %v16291_v17  ;;  %v3297_v45 = vmul.f32 %v3230_v57, %v11741_v56  ;;  %v3369_v14 = vsub.f32 %v16316_v33, %v11584_v0  ;;  %v16319_v57 = vld [vmem:[#allocation102_spill] sm:$0xff] }
 0x2c4   : > { %16312 = vst [vmem:[#allocation51_spill] sm:$0xff] %v11892_v62  ;;  %16314 = vst [vmem:[#allocation213_spill] sm:$0xff] %v11901_v8  ;;  %v4244_v26 = vrot.slane %v5577_v50, 3  ;;  %v4242_v43 = vrot.slane %v11889_v42, 3  ;;  %v11915_v5 = vadd.f32 %v3282_v2, %v16317_v63  ;;  %v11918_v13 = vadd.f32 %v3223_v27, %v16294_v41  ;;  %v16320_v27 = vld [vmem:[#allocation129_spill] sm:$0xff]  ;;  %v16326_v63 = vld [vmem:[#allocation62_spill] sm:$0xff] }
 0x2c5   : > { %16315 = vst [vmem:[#allocation162_spill] sm:$0xff] %v11904_v22  ;;  %v11921_v20 = vstv %s11850_s11  ;;  %v4238_v38 = vsel %vm4185_vm3, %v4236_v31, %v4237_v21  ;;  %v3219_v56 = vadd.f32 %v3213_v30, %v3207_v32  ;;  %v3371_v46 = vsub.f32 %v16319_v57, %v11640_v48  ;;  %v16335_v8 = vld [vmem:[#allocation132_spill] sm:$0xff]  ;;  %s14596_s11 = scalar_lea.vmem [#allocation8], %s5633_s30 }
 0x2c6   : > { %16318 = vst [vmem:[#allocation199_spill] sm:$0xff] %v11915_v5  ;;  %4246 = vrot.lane.b32.xlu0 %v4238_v38, %s6158_s6  ;;  %v4245_v50 = vsel %vm4185_vm3, %v4240_v6, %v4244_v26  ;;  %v3403_v2 = vsel %vm2167_vm2, %v11764_v59, %v11744_v44  ;;  %v11932_v42 = vadd.f32 %v3294_v55, %v16320_v27  ;;  %v16323_v6 = vld [vmem:[#allocation44_spill] sm:$0xff]  ;;  %v16329_v38 = vld [vmem:[#allocation171_spill] sm:$0xff] }
 0x2c7   : > { %v11935_v47 = vadd.f32 %v3226_v35, %v16294_v41  ;;  %v3359_v32 = vsel %vm2167_vm2, %v11601_v15, %v11584_v0  ;;  %4252 = vrot.lane.b32.xlu1 %v4245_v50, %s6158_s6  ;;  %v4243_v31 = vsel %vm4185_vm3, %v4237_v21, %v4242_v43  ;;  %v11943_v30 = vadd.f32 %v3273_v39, %v16323_v6  ;;  %v16325_v35 = vld [vmem:[#allocation145_spill] sm:$0xff]  ;;  %v11954_v15 = vpop.permute.xlu1 %3440  ;;  %v11968_v50 = vld [vmem:[%s10439_s25 + $0x78] sm:$0xff] }
 0x2c8   : > { %16321 = vst [vmem:[#allocation181_spill] sm:$0xff] %v11932_v42  ;;  %v11946_v59 = vmul.f32 %v11921_v20, %v3369_v14  ;;  %v3360_v55 = vsel %vm2167_vm2, %v11656_v7, %v11640_v48  ;;  %v3413_v33 = vsub.f32 %v16325_v35, %v11744_v44  ;;  %v5579_v0 = vld [vmem:[%s10439_s25 + $0x68] sm:$0xf0]  ;;  %v11957_v21 = vadd.f32 %v3297_v45, %v16326_v63  ;;  %v16330_v7 = vld [vmem:[#allocation94_spill] sm:$0xff]  ;;  %v16331_v45 = vld [vmem:[#allocation172_spill] sm:$0xff]  ;;  %v11982_v63 = vpop.permute.xlu0 %3438 }
 0x2c9   : > { %16322 = vst [vmem:[#allocation48_spill] sm:$0xff] %v11935_v47  ;;  %16324 = vst [vmem:[#allocation59_spill] sm:$0xff] %v11943_v30  ;;  %v11961_v39 = vmul.f32 %v11918_v13, %v11733_v19  ;;  %v11964_v14 = vstv %s11879_s26  ;;  %v3412_v57 = vsub.f32 %v16329_v38, %v3403_v2  ;;  %v3225_v48 = vmul.f32 %v3219_v56, %v16291_v17  ;;  %v5578_v19 = vld [vmem:[%s10439_s25 + $0x60] sm:$0xf0]  ;;  %v11980_v35 = vld [vmem:[%s10439_s25 + $0x70] sm:$0xff]  ;;  %s5290_s26 = sshll.u32 %s14596_s11, 4  ;;  %s14615_s26 = int_to_ptr.vmem [resolvable:$true] %s5290_s26 }
 0x2ca   : > { %16327 = vst [vmem:[#allocation127_spill] sm:$0xff] %v11957_v21  ;;  %v3368_v44 = vsub.f32 %v16330_v7, %v3359_v32  ;;  %v11973_v27 = vmul.f32 %v11921_v20, %v3371_v46  ;;  %4250 = vrot.lane.b32.xlu0 %v4243_v31, %s6158_s6  ;;  %v3415_v6 = vsub.f32 %v16331_v45, %v11794_v49  ;;  %v16332_v46 = vld [vmem:[#allocation194_spill] sm:$0xff]  ;;  %v4288_v31 = vrot.slane %v5579_v0, 3 }
 0x2cb   : > { %16328 = vst [vmem:[#allocation23_spill] sm:$0xff] %v11961_v39  ;;  %v11986_v2 = vmul.f32 %v11918_v13, %v11798_v58  ;;  %v11990_v56 = vmul.f32 %v11935_v47, %v11821_v54  ;;  %v3370_v32 = vsub.f32 %v16332_v46, %v3360_v55  ;;  %4256 = vrot.lane.b32.xlu1 %v4244_v26, %s6158_s6  ;;  %v4289_v45 = vrot.slane %v11968_v50, 3  ;;  %v5583_v46 = vld [vmem:[%s10439_s25 + $0x88] sm:$0xf] }
 0x2cc   : > { %v3597_v38 = vmul.f32 %v11946_v59, %v11946_v59  ;;  %v11998_v7 = vmul.f32 %v11964_v14, %v11946_v59  ;;  %v12001_v58 = vmul.f32 %v3413_v33, %v11921_v20  ;;  %v12005_v54 = vmul.f32 %v3412_v57, %v11921_v20  ;;  %v12041_v22 = vpop.permute.xlu0 %3442 }
 0x2cd   : > { %v3404_v26 = vsel %vm2167_vm2, %v11812_v51, %v11794_v49  ;;  %v4285_v55 = vrot.slane %v5578_v19, 3  ;;  %v4286_v0 = vrot.slane %v11980_v35, 3  ;;  %v12013_v36 = vadd.f32 %v3225_v48, %v16294_v41  ;;  %v12025_v49 = vpop.permute.xlu1 %3444  ;;  %v16334_v48 = vld [vmem:[#allocation144_spill] sm:$0xff] }
 0x2ce   : > { %v12016_v30 = vmul.f32 %v11921_v20, %v3368_v44  ;;  %v3599_v33 = vmul.f32 %v11973_v27, %v11973_v27  ;;  %4254 = vrot.lane.b32.xlu0 %v4242_v43, %s6158_s6  ;;  %v12022_v57 = vmul.f32 %v3415_v6, %v11921_v20  ;;  %v12028_v51 = vmul.f32 %v11921_v20, %v3370_v32 }
 0x2cf   : > { %16333 = vst [vmem:[#allocation206_spill] sm:$0xff] %v12013_v36  ;;  %v3373_v19 = vsub.f32 %v16334_v48, %v11695_v53  ;;  %v4290_v44 = vsel %vm4185_vm3, %v4288_v31, %v4289_v45  ;;  %v4287_v5 = vsel %vm4185_vm3, %v4285_v55, %v4286_v0  ;;  %v3361_v43 = vsel %vm2167_vm2, %v11710_v29, %v11695_v53  ;;  %v16336_v55 = vld [vmem:[#allocation148_spill] sm:$0xff] }
 0x2d0   : > { %v3603_v6 = vmul.f32 %v12001_v58, %v12001_v58  ;;  %v3414_v39 = vsub.f32 %v16335_v8, %v3404_v26  ;;  %4297 = vrot.lane.b32.xlu1 %v4290_v44, %s6158_s6  ;;  %v4293_v32 = vrot.slane %v5583_v46, 3  ;;  %v3602_v31 = vmul.f32 %v12005_v54, %v12005_v54  ;;  %v12055_v26 = vld [vmem:[%s6307_s10 + $0x60] sm:$0xfe]  ;;  %v12059_v44 = vld [vmem:[%s6307_s10 + $0x78] sm:$0xff] }
 0x2d1   : > { %v4291_v48 = vrot.slane %v5582_v10, 3  ;;  %v3456_v12 = vsub.f32 %v16336_v55, %v11898_v3  ;;  %v3446_v53 = vsel %vm2167_vm2, %v11912_v40, %v11898_v3  ;;  %v3605_v29 = vmul.f32 %v12022_v57, %v12022_v57  ;;  %16337 = vst [vmem:[#allocation67_spill] sm:$0xff] %v12055_v26  ;;  %16338 = vst [vmem:[#allocation61_spill] sm:$0xff] %v12059_v44  ;;  %v16339_v40 = vld [vmem:[#allocation195_spill] sm:$0xff] }
 0x2d2   : > { %4295 = vrot.lane.b32.xlu0 %v4287_v5, %s6158_s6  ;;  %v4294_v8 = vsel %vm4185_vm3, %v4289_v45, %v4293_v32  ;;  %v3455_v46 = vsub.f32 %v12055_v26, %v3446_v53  ;;  %v3458_v10 = vsub.f32 %v12059_v44, %v11954_v15  ;;  %v12065_v3 = vmul.f32 %v11964_v14, %v11973_v27 }
 0x2d3   : > { %v3417_v55 = vsub.f32 %v16339_v40, %v11846_v11  ;;  %v4292_v5 = vsel %vm4185_vm3, %v4286_v0, %v4291_v48  ;;  %v12071_v45 = vmul.f32 %v3456_v12, %v11921_v20  ;;  %v3596_v53 = vmul.f32 %v12016_v30, %v12016_v30  ;;  %v12085_v40 = vpop.permute.xlu1 %3479  ;;  %v16340_v0 = vld [vmem:[#allocation115_spill] sm:$0xff] }
 0x2d4   : > { %v12076_v26 = vmul.f32 %v11921_v20, %v3373_v19  ;;  %4301 = vrot.lane.b32.xlu1 %v4294_v8, %s6158_s6  ;;  %v12080_v44 = vmul.f32 %v3455_v46, %v11921_v20  ;;  %v12083_v21 = vmul.f32 %v3458_v10, %v11921_v20  ;;  %v3372_v12 = vsub.f32 %v16340_v0, %v3361_v43  ;;  %v12099_v43 = vpop.permute.xlu0 %3477 }
 0x2d5   : > { %v3609_v42 = vadd.f32 %v3603_v6, %v3597_v38  ;;  %v12089_v62 = vmul.f32 %v3414_v39, %v11921_v20  ;;  %v3615_v19 = vmul.f32 %v12071_v45, %v12071_v45  ;;  %v3598_v8 = vmul.f32 %v12028_v51, %v12028_v51 }
 0x2d6   : > { %v3608_v46 = vadd.f32 %v3602_v31, %v3596_v53  ;;  %v3611_v52 = vadd.f32 %v3605_v29, %v3599_v33  ;;  %4299 = vrot.lane.b32.xlu0 %v4292_v5, %s6158_s6  ;;  %v3614_v10 = vmul.f32 %v12080_v44, %v12080_v44  ;;  %v12102_v39 = vmul.f32 %v3417_v55, %v11921_v20  ;;  %v4652_v33 = vld [vmem:[%s10439_s25] sm:$0xfc] }
 0x2d7   : > { %v3405_v38 = vsel %vm2167_vm2, %v11858_v4, %v11846_v11  ;;  %v3621_v6 = vadd.f32 %v3615_v19, %v3609_v42  ;;  %v3617_v31 = vmul.f32 %v12083_v21, %v12083_v21  ;;  %v3601_v29 = vmul.f32 %v12076_v26, %v12076_v26  ;;  %v12122_v42 = vld [vmem:[%s6307_s10 + $0x70] sm:$0xff] }
 0x2d8   : > { %v3620_v5 = vadd.f32 %v3614_v10, %v3608_v46  ;;  %4305 = vrot.lane.b32.xlu1 %v4293_v32, %s6158_s6  ;;  %v3447_v55 = vsel %vm2167_vm2, %v11982_v63, %v11954_v15  ;;  %v4683_v53 = vrot.slane %v4653_v61, 1  ;;  %v12117_v0 = vmul.f32 %v11921_v20, %v3372_v12  ;;  %16341 = vst [vmem:[#allocation200_spill] sm:$0xff] %v12122_v42  ;;  %v16342_v32 = vld [vmem:[#allocation12_spill] sm:$0xff] }
 0x2d9   : > { %v3604_v11 = vmul.f32 %v12089_v62, %v12089_v62  ;;  %v3623_v4 = vadd.f32 %v3617_v31, %v3611_v52  ;;  %v3457_v19 = vsub.f32 %v12122_v42, %v3447_v55  ;;  %v3416_v46 = vsub.f32 %v16342_v32, %v3405_v38  ;;  %v12129_v12 = vpop.permute.xlu1 %3483  ;;  %v12137_v31 = vld [vmem:[%s6307_s10 + $0x88] sm:$0x1] }
 0x2da   : > { %4303 = vrot.lane.b32.xlu0 %v4291_v48, %s6158_s6  ;;  %v4684_v15 = vrot.slane %v11669_v25, 1  ;;  %v4680_v61 = vrot.slane %v4652_v33, 1  ;;  %v4681_v63 = vrot.slane %v11680_v18, 1  ;;  %v3607_v10 = vmul.f32 %v12102_v39, %v12102_v39  ;;  %16343 = vst [vmem:[#allocation52_spill] sm:$0xff] %v12137_v31  ;;  %v4655_v48 = vld [vmem:[%s10439_s25 + $0x28] sm:$0x3] }
 0x2db   : > { %v3627_v23 = vadd.f32 1e-09, %v3621_v6  ;;  %v12134_v52 = vmul.f32 %v3457_v19, %v11921_v20  ;;  %v3460_v38 = vsub.f32 %v12137_v31, %v12025_v49  ;;  %v4654_v25 = vld [vmem:[%s10439_s25 + $0x20] sm:$0x3]  ;;  %v3626_v33 = vadd.f32 1e-09, %v3620_v5  ;;  %v12148_v32 = vpop.permute.xlu0 %3481 }
 0x2dc   : > { %v4685_v18 = vsel %vm1404_vm1, %v4683_v53, %v4684_v15  ;;  %v4682_v55 = vsel %vm1404_vm1, %v4680_v61, %v4681_v63  ;;  %v3448_v6 = vsel %vm2167_vm2, %v12041_v22, %v12025_v49  ;;  %v3610_v19 = vadd.f32 %v3604_v11, %v3598_v8  ;;  %v12161_v22 = vld [vmem:[%s6307_s10 + $0x80] sm:$0x1] }
 0x2dd   : > { %v3629_v42 = vadd.f32 1e-09, %v3623_v4  ;;  %v3616_v41 = vmul.f32 %v12134_v52, %v12134_v52  ;;  %4692 = vrot.lane.b32.xlu1 %v4685_v18, %s6159_s8  ;;  %v12154_v5 = vmul.f32 %v3460_v38, %v11921_v20  ;;  %v12157_v53 = vmul.f32 %v3416_v46, %v11921_v20  ;;  %v12164_v4 = vpop.permute.xlu1 %3487 }
 0x2de   : > { %4690 = vrot.lane.b32.xlu0 %v4682_v55, %s6159_s8  ;;  %v3459_v49 = vsub.f32 %v12161_v22, %v3448_v6  ;;  %v4688_v8 = vrot.slane %v4655_v48, 1  ;;  %v4686_v11 = vrot.slane %v4654_v25, 1  ;;  %v3613_v61 = vadd.f32 %v3607_v10, %v3601_v29  ;;  %v5605_v6 = vld [vmem:[%s10439_s25 + $0x38] sm:$0xfc]  ;;  %v16345_v10 = vld [vmem:[#allocation140_spill] sm:$0xff] }
 0x2df   : > { %5807 = vrsqrt.f32 %v3627_v23  ;;  %v3622_v18 = vadd.f32 %v3616_v41, %v3610_v19  ;;  %v3619_v38 = vmul.f32 %v12154_v5, %v12154_v5  ;;  %v12174_v48 = vpop.permute.xlu0 %3485  ;;  %v12178_v29 = vmul.f32 %v11918_v13, %v11773_v37  ;;  %v5604_v13 = vld [vmem:[%s10439_s25 + $0x30] sm:$0xfc] }
 0x2e0   : > { %5809 = vrsqrt.f32 %v3626_v33  ;;  %v12169_v46 = vmul.f32 %v3459_v49, %v11921_v20  ;;  %v4689_v55 = vsel %vm1404_vm1, %v4684_v15, %v4688_v8  ;;  %v4687_v31 = vsel %vm1404_vm1, %v4681_v63, %v4686_v11  ;;  %v16347_v63 = vld [vmem:[#allocation142_spill] sm:$0xff] }
 0x2e1   : > { %16344 = vst [vmem:[#allocation123_spill] sm:$0xff] %v12178_v29  ;;  %5811 = vrsqrt.f32 %v3629_v42  ;;  %v3628_v41 = vadd.f32 1e-09, %v3622_v18  ;;  %v3625_v23 = vadd.f32 %v3619_v38, %v3613_v61  ;;  %4696 = vrot.lane.b32.xlu1 %v4689_v55, %s6159_s8  ;;  %v12183_v25 = vadd.f32 %v11986_v2, %v16345_v10  ;;  %v12197_v42 = vpop.permute.xlu1 %3522  ;;  %v16349_v19 = vld [vmem:[#allocation138_spill] sm:$0xff]  ;;  %v12220_v38 = vld [vmem:[%s10439_s25 + $0x58] sm:$0x3] }
 0x2e2   : > { %v12187_v15 = vmul.f32 %v11935_v47, %v11786_v1  ;;  %v12191_v33 = vadd.f32 %v11990_v56, %v16347_v63  ;;  %v3298_v37 = vmul.f32 %v12013_v36, %v11877_v60  ;;  %4694 = vrot.lane.b32.xlu0 %v4687_v31, %s6159_s8  ;;  %v12201_v2 = vmul.f32 %v12013_v36, %v11816_v24  ;;  %v16351_v31 = vld [vmem:[#allocation128_spill] sm:$0xff]  ;;  %v12225_v63 = vld [vmem:[%s10439_s25 + $0x50] sm:$0x3]  ;;  %v12246_v47 = vld [vmem:[%s6307_s10 + $0x98] sm:$0xfe] }
 0x2e3   : > { %v12205_v1 = vadd.f32 %v11998_v7, %v16349_v19  ;;  %v3606_v56 = vmul.f32 %v12157_v53, %v12157_v53  ;;  %v4732_v49 = vrot.slane %v5605_v6, 1  ;;  %v3699_v60 = vmul.f32 %v11964_v14, %v12016_v30  ;;  %v3521_v7 = vpop.permute.xlu0 %3520  ;;  %16354 = vst [vmem:[#allocation88_spill] sm:$0xff] %v12246_v47 }
 0x2e4   : > { %16346 = vst [vmem:[#allocation107_spill] sm:$0xff] %v12187_v15  ;;  %16348 = vst [vmem:[#allocation31_spill] sm:$0xff] %v12201_v2  ;;  %v12213_v61 = vadd.f32 %v12065_v3, %v16351_v31  ;;  %v3600_v18 = vmul.f32 %v12117_v0, %v12117_v0  ;;  %v3618_v24 = vmul.f32 %v12169_v46, %v12169_v46  ;;  %5813 = vrsqrt.f32 %v3628_v41  ;;  %v16353_v3 = vld [vmem:[#allocation70_spill] sm:$0xff] }
 0x2e5   : > { %16350 = vst [vmem:[#allocation103_spill] sm:$0xff] %v12205_v1  ;;  %v3631_v55 = vadd.f32 1e-09, %v3625_v23  ;;  %4700 = vrot.lane.b32.xlu1 %v4688_v8, %s6159_s8  ;;  %v4733_v6 = vrot.slane %v11837_v9, 1  ;;  %v4729_v10 = vrot.slane %v5604_v13, 1  ;;  %v12228_v19 = vadd.f32 %v3298_v37, %v16353_v3  ;;  %v12237_v23 = vpop.permute.xlu1 %3526 }
 0x2e6   : > { %16352 = vst [vmem:[#allocation101_spill] sm:$0xff] %v12213_v61  ;;  %v3701_v31 = vmul.f32 %v11964_v14, %v12028_v51  ;;  %v3489_v41 = vsel %vm2167_vm2, %v12099_v43, %v12085_v40  ;;  %4698 = vrot.lane.b32.xlu0 %v4686_v11, %s6159_s8  ;;  %v4730_v8 = vrot.slane %v11882_v16, 1  ;;  %v3704_v9 = vmul.f32 %v11964_v14, %v12076_v26  ;;  %v12303_v1 = vld [vmem:[%s6307_s10 + $0xb8] sm:$0x1] }
 0x2e7   : > { %v3612_v13 = vadd.f32 %v3606_v56, %v3600_v18  ;;  %v4734_v37 = vsel %vm1404_vm1, %v4732_v49, %v4733_v6  ;;  %v4737_v3 = vrot.slane %v12220_v38, 1  ;;  %v3712_v2 = vmul.f32 %v11964_v14, %v12001_v58  ;;  %v12253_v56 = vld [vmem:[%s6307_s10 + $0x90] sm:$0xfe]  ;;  %v16356_v38 = vld [vmem:[#allocation139_spill] sm:$0xff]  ;;  %16365 = vst [vmem:[#allocation124_spill] sm:$0xff] %v12303_v1 }
 0x2e8   : > { %v3499_v43 = vsub.f32 %v12246_v47, %v12085_v40  ;;  %v4731_v16 = vsel %vm1404_vm1, %v4729_v10, %v4730_v8  ;;  %v4735_v11 = vrot.slane %v12225_v63, 1  ;;  %5815 = vrsqrt.f32 %v3631_v55  ;;  %16355 = vst [vmem:[#allocation156_spill] sm:$0xff] %v12253_v56  ;;  %v16358_v40 = vld [vmem:[#allocation131_spill] sm:$0xff]  ;;  %v12269_v55 = vld [vmem:[%s6307_s10 + $0xc8] sm:$0xfe] }
 0x2e9   : > { %v3624_v15 = vadd.f32 %v3618_v24, %v3612_v13  ;;  %v3498_v49 = vsub.f32 %v12253_v56, %v3489_v41  ;;  %v3490_v18 = vsel %vm2167_vm2, %v12148_v32, %v12129_v12  ;;  %4741 = vrot.lane.b32.xlu1 %v4734_v37, %s6159_s8  ;;  %v12261_v29 = vadd.f32 %v3699_v60, %v16356_v38  ;;  %v3525_v32 = vpop.permute.xlu0 %3524  ;;  %v12273_v41 = vpop.permute.xlu1 %3530  ;;  %v16360_v13 = vld [vmem:[#allocation202_spill] sm:$0xff] }
 0x2ea   : > { %v12264_v10 = vadd.f32 %v3701_v31, %v16358_v40  ;;  %4739 = vrot.lane.b32.xlu0 %v4731_v16, %s6159_s8  ;;  %v4738_v24 = vsel %vm1404_vm1, %v4733_v6, %v4737_v3  ;;  %16359 = vst [vmem:[#allocation37_spill] sm:$0xff] %v12269_v55  ;;  %v3542_v63 = vsub.f32 %v12269_v55, %v12197_v42  ;;  %v5609_v16 = vld [vmem:[%s10439_s25 + $0x68] sm:$0xfc]  ;;  %v16362_v40 = vld [vmem:[#allocation160_spill] sm:$0xff]  ;;  %v12323_v55 = vld [vmem:[%s6307_s10 + $0xd8] sm:$0xff] }
 0x2eb   : > { %16357 = vst [vmem:[#allocation92_spill] sm:$0xff] %v12261_v29  ;;  %v12276_v60 = vadd.f32 %v3704_v9, %v16360_v13  ;;  %v12280_v31 = vmul.f32 %v11964_v14, %v12117_v0  ;;  %v4736_v37 = vsel %vm1404_vm1, %v4730_v8, %v4735_v11  ;;  %v3532_v6 = vsel %vm2167_vm2, %v3521_v7, %v12197_v42  ;;  %v12293_v9 = vld [vmem:[%s6307_s10 + $0xa8] sm:$0xff]  ;;  %v5608_v8 = vld [vmem:[%s10439_s25 + $0x60] sm:$0xfc] }
 0x2ec   : > { %v12286_v38 = vpop.eup %5807  ;;  %v12289_v36 = vadd.f32 %v3712_v2, %v16362_v40  ;;  %v3505_v29 = vmul.f32 %v3499_v43, %v11921_v20  ;;  %16364 = vst [vmem:[#allocation155_spill] sm:$0xff] %v12293_v9  ;;  %v3501_v13 = vsub.f32 %v12293_v9, %v12129_v12  ;;  %v3630_v42 = vadd.f32 1e-09, %v3624_v15  ;;  %v12318_v15 = vld [vmem:[%s6307_s10 + $0xc0] sm:$0xfe]  ;;  %16367 = vst [vmem:[#allocation125_spill] sm:$0xff] %v12323_v55 }
 0x2ed   : > { %16361 = vst [vmem:[#allocation82_spill] sm:$0xff] %v12276_v60  ;;  %v3500_v60 = vsub.f32 %v11647_v34, %v3490_v18  ;;  %v12299_v61 = vpop.eup %5809  ;;  %v3504_v7 = vmul.f32 %v3498_v49, %v11921_v20  ;;  %v3503_v2 = vsub.f32 %v12303_v1, %v12164_v4  ;;  %v12310_v43 = vsel %vm2167_vm2, %v12174_v48, %v12164_v4  ;;  %v12333_v9 = vpop.permute.xlu1 %3565 }
 0x2ee   : > { %16363 = vst [vmem:[#allocation210_spill] sm:$0xff] %v12289_v36  ;;  %4745 = vrot.lane.b32.xlu1 %v4738_v24, %s6159_s8  ;;  %v12313_v34 = vpop.eup %5811  ;;  %4743 = vrot.lane.b32.xlu0 %v4736_v37, %s6159_s8  ;;  %v3548_v12 = vmul.f32 %v3542_v63, %v11921_v20  ;;  %16366 = vst [vmem:[#allocation24_spill] sm:$0xff] %v12318_v15  ;;  %v3541_v49 = vsub.f32 %v12318_v15, %v3532_v6  ;;  %v4779_v18 = vrot.slane %v5609_v16, 1  ;;  %v3529_v36 = vpop.permute.xlu0 %3528  ;;  %v12331_v37 = vld [vmem:[%s10439_s25 + $0x88] sm:$0x3] }
 0x2ef   : > { %v4780_v40 = vrot.slane %v11968_v50, 1  ;;  %v3544_v4 = vsub.f32 %v12323_v55, %v12237_v23  ;;  %v3533_v48 = vsel %vm2167_vm2, %v3525_v32, %v12237_v23  ;;  %v4776_v24 = vrot.slane %v5608_v8, 1  ;;  %v12357_v32 = vld [vmem:[%s10439_s25 + $0x80] sm:$0x3] }
 0x2f0   : > { %v4777_v63 = vrot.slane %v11980_v35, 1  ;;  %v12337_v50 = vmul.f32 %v12286_v38, %v11946_v59  ;;  %v3507_v6 = vmul.f32 %v3501_v13, %v11921_v20  ;;  %v3506_v16 = vmul.f32 %v3500_v60, %v11921_v20 }
 0x2f1   : > { %v12343_v15 = vmul.f32 %v12286_v38, %v12001_v58  ;;  %5817 = vrsqrt.f32 %v3630_v42  ;;  %v12347_v35 = vmul.f32 %v12299_v61, %v12016_v30  ;;  %v12351_v23 = vmul.f32 %v12313_v34, %v11973_v27  ;;  %v12359_v60 = vpop.eup %5813  ;;  %v16372_v30 = vld [vmem:[#allocation87_spill] sm:$0xff] }
 0x2f2   : > { %16368 = vst [vmem:[#allocation93_spill] sm:$0xff] %v12337_v50  ;;  %4749 = vrot.lane.b32.xlu1 %v4737_v3, %s6159_s8  ;;  %4747 = vrot.lane.b32.xlu0 %v4735_v11, %s6159_s8  ;;  %v3543_v13 = vsub.f32 %v16372_v30, %v3533_v48  ;;  %v4781_v8 = vsel %vm1404_vm1, %v4779_v18, %v4780_v40  ;;  %v3564_v42 = vpop.permute.xlu0 %3563  ;;  %v12378_v18 = vld [vmem:[%s6307_s10 + $0xe8] sm:$0x1]  ;;  %v3570_v30 = vpop.permute.xlu1 %3569 }
 0x2f3   : > { %16369 = vst [vmem:[#allocation69_spill] sm:$0xff] %v12343_v15  ;;  %16370 = vst [vmem:[#allocation18_spill] sm:$0xff] %v12347_v35  ;;  %v3663_v58 = vmul.f32 %v12343_v15, %v3548_v12  ;;  %v12367_v59 = vmul.f32 %v3503_v2, %v11921_v20  ;;  %v3547_v3 = vmul.f32 %v3541_v49, %v11921_v20  ;;  %v4782_v2 = vrot.slane %v12357_v32, 1 }
 0x2f4   : > { %16371 = vst [vmem:[#allocation16_spill] sm:$0xff] %v12351_v23  ;;  %v3550_v55 = vmul.f32 %v3544_v4, %v11921_v20  ;;  %v4778_v1 = vsel %vm1404_vm1, %v4776_v24, %v4777_v63  ;;  %v3657_v12 = vmul.f32 %v12337_v50, %v3505_v29  ;;  %v12375_v11 = vmul.f32 %v12299_v61, %v12005_v54 }
 0x2f5   : > { %16374 = vst [vmem:[#allocation27_spill] sm:$0xff] %v12378_v18  ;;  %v3546_v48 = vsub.f32 %v12378_v18, %v12273_v41  ;;  %v12384_v49 = vmul.f32 %v12347_v35, %v3504_v7  ;;  %v12387_v4 = vmul.f32 %v12351_v23, %v3507_v6  ;;  %v12391_v29 = vmul.f32 %v12359_v60, %v12028_v51  ;;  %v12398_v27 = vpop.eup %5815  ;;  %v12408_v23 = vld [vmem:[%s6307_s10 + $0xf8] sm:$0xfe]  ;;  %v12445_v18 = vld [vmem:[%s10439_s25 + $0xa0] sm:$0xff] }
 0x2f6   : > { %16373 = vst [vmem:[#allocation114_spill] sm:$0xff] %v12375_v11  ;;  %v12395_v24 = vmul.f32 %v12313_v34, %v12022_v57  ;;  %4788 = vrot.lane.b32.xlu1 %v4781_v8, %s6159_s8  ;;  %v12400_v32 = vadd.f32 %v3663_v58, %v3657_v12  ;;  %v3549_v7 = vmul.f32 %v3543_v13, %v11921_v20  ;;  %v16377_v6 = vrot.slane %v12331_v37, 1  ;;  %v3568_v35 = vpop.permute.xlu0 %3567  ;;  %v5585_v12 = vld [vmem:[%s10439_s25 + $0x98] sm:$0xf0] }
 0x2f7   : > { %16375 = vst [vmem:[#allocation64_spill] sm:$0xff] %v12391_v29  ;;  %4786 = vrot.lane.b32.xlu0 %v4778_v1, %s6159_s8  ;;  %16378 = vst [vmem:[#allocation26_spill] sm:$0xff] %v12408_v23  ;;  %v3585_v8 = vsub.f32 %v12408_v23, %v12333_v9  ;;  %v3662_v15 = vmul.f32 %v12375_v11, %v3547_v3  ;;  %v4783_v13 = vsel %vm1404_vm1, %v4777_v63, %v4782_v2  ;;  %v12426_v3 = vld [vmem:[%s6307_s10 + $0xf0] sm:$0xfe]  ;;  %v12430_v63 = vld [vmem:[%s10439_s25 + $0xa8] sm:$0xff] }
 0x2f8   : > { %16376 = vst [vmem:[#allocation14_spill] sm:$0xff] %v12395_v24  ;;  %v4785_v51 = vsel %vm1404_vm1, %v4780_v40, %v16377_v6  ;;  %v3665_v58 = vmul.f32 %v12395_v24, %v3550_v55  ;;  %v3575_v1 = vsel %vm2167_vm2, %v3564_v42, %v12333_v9  ;;  %v12420_v40 = vmul.f32 %v12359_v60, %v12089_v62  ;;  %v5584_v24 = vld [vmem:[%s10439_s25 + $0x90] sm:$0xf0]  ;;  %v3574_v9 = vpop.permute.xlu1 %3573 }
 0x2f9   : > { %v3552_v6 = vmul.f32 %v3546_v48, %v11921_v20  ;;  %v3534_v50 = vsel %vm2167_vm2, %v3529_v36, %v12273_v41  ;;  %16380 = vst [vmem:[#allocation77_spill] sm:$0xff] %v12426_v3  ;;  %v3584_v55 = vsub.f32 %v12426_v3, %v3575_v1  ;;  %16381 = vst [vmem:[#allocation33_spill] sm:$0xff] %v12430_v63  ;;  %v12440_v48 = vld [vmem:[%s6307_s10 + $0x108] sm:$0xff] }
 0x2fa   : > { %16379 = vst [vmem:[#allocation41_spill] sm:$0xff] %v12420_v40  ;;  %v3658_v42 = vmul.f32 %v12391_v29, %v3506_v16  ;;  %v12436_v11 = vmul.f32 %v12398_v27, %v12076_v26  ;;  %4792 = vrot.lane.b32.xlu1 %v4785_v51, %s6159_s8  ;;  %16383 = vst [vmem:[#allocation28_spill] sm:$0xff] %v12440_v48  ;;  %v3587_v36 = vsub.f32 %v12440_v48, %v3570_v30  ;;  %v12451_v29 = vld [vmem:[%s6307_s10 + $0x100] sm:$0xff]  ;;  %v3572_v23 = vpop.permute.xlu0 %3571 }
 0x2fb   : > { %v3576_v41 = vsel %vm2167_vm2, %v3568_v35, %v3570_v30  ;;  %v3664_v1 = vmul.f32 %v12420_v40, %v3549_v7  ;;  %4790 = vrot.lane.b32.xlu0 %v4783_v13, %s6159_s8  ;;  %v3591_v16 = vmul.f32 %v3585_v8, %v11921_v20  ;;  %16384 = vst [vmem:[#allocation72_spill] sm:$0xff] %v12451_v29  ;;  %v4337_v51 = vrot.slane %v5585_v12, 3  ;;  %v16386_v13 = vld [vmem:[#allocation47_spill] sm:$0xff] }
 0x2fc   : > { %16382 = vst [vmem:[#allocation39_spill] sm:$0xff] %v12436_v11  ;;  %v3586_v26 = vsub.f32 %v12451_v29, %v3576_v41  ;;  %v12456_v48 = vmul.f32 %v12398_v27, %v12102_v39  ;;  %v3590_v35 = vmul.f32 %v3584_v55, %v11921_v20  ;;  %v4338_v30 = vrot.slane %v12430_v63, 3  ;;  %v12467_v29 = vpop.permute.xlu1 %3801 }
 0x2fd   : > { %v4334_v7 = vrot.slane %v5584_v24, 3  ;;  %v3545_v40 = vsub.f32 %v16386_v13, %v3534_v50  ;;  %v12463_v8 = vmul.f32 %v12286_v38, %v12071_v45  ;;  %v3593_v41 = vmul.f32 %v3587_v36, %v11921_v20  ;;  %v12479_v38 = vld [vmem:[%s6307_s10 + $0x118] sm:$0x1] }
 0x2fe   : > { %16385 = vst [vmem:[#allocation122_spill] sm:$0xff] %v12456_v48  ;;  %v3667_v3 = vmul.f32 %v12456_v48, %v3552_v6  ;;  %v12472_v55 = vmul.f32 %v12299_v61, %v12080_v44  ;;  %v16387_v24 = vrot.slane %v12331_v37, 1  ;;  %v3592_v50 = vmul.f32 %v3586_v26, %v11921_v20  ;;  %16388 = vst [vmem:[#allocation163_spill] sm:$0xff] %v12479_v38  ;;  %v5589_v13 = vld [vmem:[%s10439_s25 + $0xb8] sm:$0xf]  ;;  %v5818_v12 = vpop.eup %5817  ;;  %v12494_v26 = vpop.permute.xlu0 %3799 }
 0x2ff   : > { %v3589_v36 = vsub.f32 %v12479_v38, %v3574_v9  ;;  %v3675_v63 = vmul.f32 %v12463_v8, %v3591_v16  ;;  %4794 = vrot.lane.b32.xlu0 %v4782_v2, %s6159_s8  ;;  %v12487_v61 = vmul.f32 %v12313_v34, %v12083_v21  ;;  %v12491_v37 = vmul.f32 %v12359_v60, %v12134_v52 }
 0x300   : > { %4796 = vrot.lane.b32.xlu1 %v16387_v24, %s6159_s8  ;;  %v4339_v6 = vsel %vm4185_vm3, %v4337_v51, %v4338_v30  ;;  %v3674_v24 = vmul.f32 %v12472_v55, %v3590_v35  ;;  %v16389_v48 = vrot.slane %v12445_v18, 3  ;;  %v3577_v34 = vsel %vm2167_vm2, %v3572_v23, %v3574_v9  ;;  %v12508_v51 = vld [vmem:[%s6307_s10 + $0x110] sm:$0x1] }
 0x301   : > { %v3595_v2 = vmul.f32 %v3589_v36, %v11921_v20  ;;  %v3677_v38 = vmul.f32 %v12487_v61, %v3593_v41  ;;  %v12505_v60 = vmul.f32 %v12398_v27, %v12154_v5  ;;  %v3588_v47 = vsub.f32 %v12508_v51, %v3577_v34  ;;  %v5588_v9 = vld [vmem:[%s10439_s25 + $0xb0] sm:$0xf] }
 0x302   : > { %v4336_v16 = vsel %vm4185_vm3, %v4334_v7, %v16389_v48  ;;  %v4342_v56 = vrot.slane %v5589_v13, 3  ;;  %v3661_v35 = vmul.f32 %v12436_v11, %v12367_v59  ;;  %v3668_v48 = vadd.f32 %v3662_v15, %v12384_v49  ;;  %v12524_v59 = vpop.permute.xlu1 %3829  ;;  %v16430_v11 = vld [vmem:[#allocation127_spill] sm:$0xff] }
 0x303   : > { %v3671_v7 = vadd.f32 %v3665_v58, %v12387_v4  ;;  %v3676_v23 = vmul.f32 %v12491_v37, %v3592_v50  ;;  %v12519_v27 = vmul.f32 %v5818_v12, %v12117_v0  ;;  %v3670_v41 = vadd.f32 %v3664_v1, %v3658_v42  ;;  %4344 = vrot.lane.b32.xlu0 %v4336_v16, %s6158_s6  ;;  %v12531_v50 = vpop.permute.xlu0 %3803 }
 0x304   : > { %4346 = vrot.lane.b32.xlu1 %v4339_v6, %s6158_s6  ;;  %v3551_v36 = vmul.f32 %v3545_v40, %v11921_v20  ;;  %v3679_v13 = vmul.f32 %v12505_v60, %v3595_v2  ;;  %v12527_v15 = vmul.f32 %v5818_v12, %v12157_v53  ;;  %v3681_v49 = vadd.f32 %v3675_v63, %v12400_v32 }
 0x305   : > { %16390 = vst [vmem:[#allocation25_spill] sm:$0xff] %v12519_v27  ;;  %v3680_v4 = vadd.f32 %v3674_v24, %v3668_v48  ;;  %v4343_v58 = vsel %vm4185_vm3, %v4338_v30, %v4342_v56  ;;  %v3673_v0 = vadd.f32 %v3667_v3, %v3661_v35  ;;  %v3683_v42 = vadd.f32 %v3677_v38, %v3671_v7  ;;  %v16395_v7 = vld [vmem:[#allocation78_spill] sm:$0xff] }
 0x306   : > { %16391 = vst [vmem:[#allocation74_spill] sm:$0xff] %v12527_v15  ;;  %v3594_v40 = vmul.f32 %v3588_v47, %v11921_v20  ;;  %v4340_v1 = vrot.slane %v5588_v9, 3  ;;  %v3711_v6 = vmul.f32 %v11964_v14, %v12005_v54  ;;  %v3714_v16 = vmul.f32 %v11964_v14, %v12022_v57  ;;  %v12549_v54 = vpop.permute.xlu1 %3833 }
 0x307   : > { %v3713_v2 = vmul.f32 %v11964_v14, %v12089_v62  ;;  %v3682_v32 = vadd.f32 %v3676_v23, %v3670_v41  ;;  %v16392_v3 = vsub.f32 %v11769_v28, %v12310_v43  ;;  %v3666_v47 = vmul.f32 %v12527_v15, %v3551_v36  ;;  %v12557_v28 = vpop.permute.xlu0 %3831  ;;  %v5590_v15 = vld [vmem:[%s10439_s25 + $0xc0] sm:$0xf0] }
 0x308   : > { %4350 = vrot.lane.b32.xlu1 %v4343_v58, %s6158_s6  ;;  %v3685_v30 = vadd.f32 %v3679_v13, %v3673_v0  ;;  %v12547_v38 = vmul.f32 %v5818_v12, %v12169_v46  ;;  %v3716_v57 = vmul.f32 %v11964_v14, %v12102_v39  ;;  %v3715_v62 = vmul.f32 %v11964_v14, %v12157_v53  ;;  %v16394_v39 = vld [vmem:[#allocation80_spill] sm:$0xff] }
 0x309   : > { %v3508_v63 = vmul.f32 %v16392_v3, %v11921_v20  ;;  %v3687_v24 = vmul.f32 %v3681_v49, %v16291_v17  ;;  %v3686_v34 = vmul.f32 %v3680_v4, %v16291_v17  ;;  %v3689_v43 = vmul.f32 %v3683_v42, %v16291_v17  ;;  %v16396_v4 = vld [vmem:[#allocation66_spill] sm:$0xff]  ;;  %v16398_v0 = vld [vmem:[#allocation120_spill] sm:$0xff]  ;;  %v16405_v3 = vld [vmem:[#allocation95_spill] sm:$0xff] }
 0x30a   : > { %v3678_v12 = vmul.f32 %v12547_v38, %v3594_v40  ;;  %v16393_v35 = vrot.slane %v12445_v18, 3  ;;  %v12569_v53 = vadd.f32 %v12280_v31, %v16394_v39  ;;  %v12572_v23 = vadd.f32 %v3711_v6, %v16395_v7  ;;  %v12582_v31 = vpop.permute.xlu1 %3860  ;;  %v16400_v40 = vld [vmem:[#allocation76_spill] sm:$0xff]  ;;  %v12642_v39 = vld [vmem:[%s6307_s10 + $0x18] sm:$0xff] }
 0x30b   : > { %v3660_v20 = vmul.f32 %v12519_v27, %v3508_v63  ;;  %v3688_v9 = vmul.f32 %v3682_v32, %v16291_v17  ;;  %v3724_v41 = vmul.f32 %v11964_v14, %v12071_v45  ;;  %v3723_v36 = vmul.f32 %v11964_v14, %v12080_v44  ;;  %v12596_v45 = vpop.permute.xlu0 %3858  ;;  %v16403_v44 = vld [vmem:[#allocation13_spill] sm:$0xff]  ;;  %16415 = vst [vmem:[#allocation164_spill] sm:$0xff] %v12642_v39 }
 0x30c   : > { %v4341_v48 = vsel %vm4185_vm3, %v16393_v35, %v4340_v1  ;;  %4354 = vrot.lane.b32.xlu1 %v4342_v56, %s6158_s6  ;;  %v3691_v49 = vmul.f32 %v3685_v30, %v16291_v17  ;;  %v12585_v58 = vadd.f32 %v3714_v16, %v16396_v4  ;;  %v12588_v42 = vadd.f32 %v3713_v2, %v16398_v0  ;;  %v12637_v35 = vld [vmem:[%s6307_s10 + $0x10] sm:$0xff]  ;;  %v16421_v4 = vld [vmem:[#allocation176_spill] sm:$0xff] }
 0x30d   : > { %4348 = vrot.lane.b32.xlu0 %v4341_v48, %s6158_s6  ;;  %v3672_v13 = vadd.f32 %v3666_v47, %v3660_v20  ;;  %v12591_v6 = vadd.f32 %v3687_v24, %v16400_v40  ;;  %v12594_v56 = vadd.f32 %v3686_v34, %v16400_v40  ;;  %v12599_v32 = vadd.f32 %v3716_v57, %v16403_v44  ;;  %v16411_v20 = vld [vmem:[#allocation83_spill] sm:$0xff]  ;;  %v5591_v44 = vld [vmem:[%s10439_s25 + $0xc8] sm:$0xf0] }
 0x30e   : > { %16397 = vst [vmem:[#allocation187_spill] sm:$0xff] %v12585_v58  ;;  %16399 = vst [vmem:[#allocation43_spill] sm:$0xff] %v12588_v42  ;;  %v12602_v63 = vadd.f32 %v3715_v62, %v16405_v3  ;;  %v12605_v16 = vadd.f32 %v3689_v43, %v16400_v40  ;;  %v3726_v47 = vmul.f32 %v11964_v14, %v12083_v21  ;;  %v16409_v62 = vld [vmem:[#allocation165_spill] sm:$0xff]  ;;  %v12630_v43 = vpop.permute.xlu1 %3887  ;;  %v12652_v7 = vstv %s12565_s9  ;;  %v16423_v3 = vld [vmem:[#allocation196_spill] sm:$0xff] }
 0x30f   : > { %16401 = vst [vmem:[#allocation38_spill] sm:$0xff] %v12591_v6  ;;  %16402 = vst [vmem:[#allocation211_spill] sm:$0xff] %v12594_v56  ;;  %v3684_v2 = vadd.f32 %v3678_v12, %v3672_v13  ;;  %v3725_v30 = vmul.f32 %v11964_v14, %v12134_v52  ;;  %v3728_v24 = vmul.f32 %v11964_v14, %v12154_v5  ;;  %v12915_v58 = vld [vmem:[%s10439_s25 + $0x108] sm:$0xff]  ;;  %v5596_v42 = vld [vmem:[%s10439_s25 + $0xf0] sm:$0xf0] }
 0x310   : > { %16404 = vst [vmem:[#allocation84_spill] sm:$0xff] %v12599_v32  ;;  %16406 = vst [vmem:[#allocation46_spill] sm:$0xff] %v12602_v63  ;;  %v12614_v57 = vadd.f32 %v3688_v9, %v16400_v40  ;;  %v12620_v34 = vadd.f32 %v3724_v41, %v16409_v62  ;;  %v12623_v21 = vadd.f32 %v3723_v36, %v16411_v20  ;;  %v12655_v9 = vld [vmem:[%s6307_s10] sm:$0xfe]  ;;  %v16417_v36 = vld [vmem:[#allocation86_spill] sm:$0xff] }
 0x311   : > { %16407 = vst [vmem:[#allocation73_spill] sm:$0xff] %v12605_v16  ;;  %4352 = vrot.lane.b32.xlu0 %v4340_v1, %s6158_s6  ;;  %v3727_v52 = vmul.f32 %v11964_v14, %v12169_v46  ;;  %v12628_v5 = vadd.f32 %v3691_v49, %v16400_v40  ;;  %v3760_v12 = vmul.f32 %v12591_v6, %v12463_v8  ;;  %16414 = vst [vmem:[#allocation178_spill] sm:$0xff] %v12637_v35  ;;  %v12646_v46 = vpop.permute.xlu0 %3862  ;;  %v12677_v20 = vld [vmem:[%s6307_s10 + $0x8] sm:$0xfe] }
 0x312   : > { %16408 = vst [vmem:[#allocation81_spill] sm:$0xff] %v12614_v57  ;;  %16410 = vst [vmem:[#allocation207_spill] sm:$0xff] %v12620_v34  ;;  %v3759_v1 = vmul.f32 %v12594_v56, %v12472_v55  ;;  %v3810_v48 = vsub.f32 %v12637_v35, %v12467_v29  ;;  %v3811_v14 = vsub.f32 %v12642_v39, %v12467_v29  ;;  %v16419_v29 = vld [vmem:[#allocation71_spill] sm:$0xff] }
 0x313   : > { %16412 = vst [vmem:[#allocation168_spill] sm:$0xff] %v12623_v21  ;;  %16413 = vst [vmem:[#allocation170_spill] sm:$0xff] %v12628_v5  ;;  %v3762_v8 = vmul.f32 %v12605_v16, %v12487_v61  ;;  %v3690_v55 = vmul.f32 %v3684_v2, %v16291_v17  ;;  %v3808_v41 = vsub.f32 %v12655_v9, %v12494_v26 }
 0x314   : > { %16416 = vst [vmem:[#allocation180_spill] sm:$0xff] %v12655_v9  ;;  %v12660_v13 = vadd.f32 %v3726_v47, %v16417_v36  ;;  %v12663_v49 = vadd.f32 %v3725_v30, %v16419_v29  ;;  %v12666_v0 = vadd.f32 %v3728_v24, %v16421_v4  ;;  %v3761_v61 = vmul.f32 %v12614_v57, %v12491_v37  ;;  %v12682_v30 = vld [vmem:[%s6307_s10 + $0x30] sm:$0xfe]  ;;  %v12687_v37 = vld [vmem:[%s10439_s25 + $0xd8] sm:$0xff] }
 0x315   : > { %v12672_v2 = vadd.f32 %v3727_v52, %v16423_v3  ;;  %v3764_v62 = vmul.f32 %v12628_v5, %v12505_v60  ;;  %16425 = vst [vmem:[#allocation29_spill] sm:$0xff] %v12677_v20  ;;  %v3809_v47 = vsub.f32 %v12677_v20, %v12494_v26  ;;  %16426 = vst [vmem:[#allocation204_spill] sm:$0xff] %v12682_v30  ;;  %v12689_v52 = vpop.permute.xlu1 %3891  ;;  %v16428_v36 = vld [vmem:[#allocation51_spill] sm:$0xff]  ;;  %v16429_v60 = vld [vmem:[#allocation181_spill] sm:$0xff]  ;;  %v12704_v5 = vpop.permute.xlu0 %3889 }
 0x316   : > { %16418 = vst [vmem:[#allocation183_spill] sm:$0xff] %v12660_v13  ;;  %16420 = vst [vmem:[#allocation203_spill] sm:$0xff] %v12663_v49  ;;  %v3838_v24 = vsub.f32 %v12682_v30, %v12524_v59  ;;  %v12692_v29 = vadd.f32 %v3760_v12, %v16428_v36  ;;  %v12695_v4 = vadd.f32 %v3759_v1, %v16429_v60  ;;  %v4386_v1 = vrot.slane %v5591_v44, 3  ;;  %v12716_v36 = vld [vmem:[%s10439_s25 + $0xd0] sm:$0xff]  ;;  %v12725_v60 = vld [vmem:[%s6307_s10 + $0x38] sm:$0xfe] }
 0x317   : > { %16422 = vst [vmem:[#allocation21_spill] sm:$0xff] %v12666_v0  ;;  %16424 = vst [vmem:[#allocation35_spill] sm:$0xff] %v12672_v2  ;;  %v12698_v3 = vmul.f32 %v12652_v7, %v3810_v48  ;;  %v12701_v26 = vmul.f32 %v12652_v7, %v3811_v14  ;;  %v12707_v27 = vadd.f32 %v3762_v8, %v16430_v11  ;;  %v12722_v14 = vstv %s12616_s12  ;;  %v12772_v2 = vld [vmem:[%s6307_s10 + $0x48] sm:$0xff]  ;;  %v12778_v30 = vld [vmem:[%s10439_s25 + $0xe0] sm:$0xf] }
 0x318   : > { %16427 = vst [vmem:[#allocation216_spill] sm:$0xff] %v12687_v37  ;;  %v12710_v57 = vadd.f32 %v3690_v55, %v16400_v40  ;;  %v12713_v12 = vmul.f32 %v12652_v7, %v3808_v41  ;;  %16433 = vst [vmem:[#allocation167_spill] sm:$0xff] %v12716_v36  ;;  %v12719_v48 = vadd.f32 %v3761_v61, %v12183_v25  ;;  %v4387_v8 = vrot.slane %v12687_v37, 3  ;;  %v5595_v13 = vld [vmem:[%s10439_s25 + $0xe8] sm:$0xf]  ;;  %v16444_v49 = vld [vmem:[#allocation200_spill] sm:$0xff] }
 0x319   : > { %16431 = vst [vmem:[#allocation217_spill] sm:$0xff] %v12707_v27  ;;  %16435 = vst [vmem:[#allocation50_spill] sm:$0xff] %v12725_v60  ;;  %v3839_v11 = vsub.f32 %v12725_v60, %v12524_v59  ;;  %v12731_v55 = vadd.f32 %v3764_v62, %v12191_v33  ;;  %v12734_v41 = vmul.f32 %v12652_v7, %v3809_v47  ;;  %v4383_v25 = vrot.slane %v5590_v15, 3  ;;  %v12739_v61 = vpop.permute.xlu1 %3918  ;;  %v12749_v47 = vpop.permute.xlu0 %3916  ;;  %v16456_v20 = vld [vmem:[#allocation88_spill] sm:$0xff] }
 0x31a   : > { %16432 = vst [vmem:[#allocation161_spill] sm:$0xff] %v12710_v57  ;;  %16434 = vst [vmem:[#allocation90_spill] sm:$0xff] %v12719_v48  ;;  %v12737_v44 = vmul.f32 %v3838_v24, %v12652_v7  ;;  %v3968_v16 = vmul.f32 %v12698_v3, %v12698_v3  ;;  %v12745_v59 = vmul.f32 %v12701_v26, %v12701_v26  ;;  %v4384_v62 = vrot.slane %v12716_v36, 3  ;;  %v12799_v36 = vld [vmem:[%s6307_s10 + $0x28] sm:$0x1] }
 0x31b   : > { %16436 = vst [vmem:[#allocation182_spill] sm:$0xff] %v12731_v55  ;;  %v4388_v33 = vsel %vm4185_vm3, %v4386_v1, %v4387_v8  ;;  %v3763_v15 = vmul.f32 %v12710_v57, %v12547_v38  ;;  %v4071_v24 = vmul.f32 %v12722_v14, %v12698_v3  ;;  %v12757_v56 = vmul.f32 %v12722_v14, %v12701_v26  ;;  %v12767_v38 = vld [vmem:[%s6307_s10 + $0x40] sm:$0xff] }
 0x31c   : > { %v3966_v6 = vmul.f32 %v12713_v12, %v12713_v12  ;;  %4395 = vrot.lane.b32.xlu1 %v4388_v33, %s6158_s6  ;;  %v12763_v1 = vmul.f32 %v3839_v11, %v12652_v7  ;;  %v4385_v0 = vsel %vm4185_vm3, %v4383_v25, %v4384_v62  ;;  %16438 = vst [vmem:[#allocation36_spill] sm:$0xff] %v12767_v38  ;;  %16439 = vst [vmem:[#allocation185_spill] sm:$0xff] %v12772_v2 }
 0x31d   : > { %16437 = vst [vmem:[#allocation99_spill] sm:$0xff] %v12757_v56  ;;  %v3840_v57 = vsub.f32 %v12767_v38, %v12557_v28  ;;  %v3841_v56 = vsub.f32 %v12772_v2, %v12557_v28  ;;  %v3967_v11 = vmul.f32 %v12734_v41, %v12734_v41  ;;  %v12784_v33 = vmul.f32 %v12722_v14, %v12713_v12  ;;  %v12791_v28 = vpop.permute.xlu1 %3945  ;;  %v12794_v2 = vld [vmem:[%s6307_s10 + $0x20] sm:$0x1] }
 0x31e   : > { %v3972_v25 = vmul.f32 %v12737_v44, %v12737_v44  ;;  %v4081_v38 = vmul.f32 %v12722_v14, %v12737_v44  ;;  %4393 = vrot.lane.b32.xlu0 %v4385_v0, %s6158_s6  ;;  %16441 = vst [vmem:[#allocation100_spill] sm:$0xff] %v12794_v2  ;;  %v3812_v60 = vsub.f32 %v12794_v2, %v12531_v50  ;;  %16442 = vst [vmem:[#allocation113_spill] sm:$0xff] %v12799_v36  ;;  %v12809_v0 = vpop.permute.xlu0 %3920 }
 0x31f   : > { %16440 = vst [vmem:[#allocation169_spill] sm:$0xff] %v12784_v33  ;;  %v3813_v33 = vsub.f32 %v12799_v36, %v12531_v50  ;;  %v12804_v34 = vmul.f32 %v3840_v57, %v12652_v7  ;;  %v12807_v21 = vmul.f32 %v3841_v56, %v12652_v7  ;;  %v12812_v27 = vadd.f32 %v4071_v24, %v12264_v10  ;;  %v12827_v57 = vld [vmem:[%s6307_s10 + $0x50] sm:$0x1] }
 0x320   : > { %v4391_v48 = vrot.slane %v5595_v13, 3  ;;  %v4389_v2 = vrot.slane %v12778_v30, 3  ;;  %v3869_v37 = vsub.f32 %v16444_v49, %v12582_v31  ;;  %v12818_v35 = vadd.f32 %v3763_v15, %v12228_v19  ;;  %16447 = vst [vmem:[#allocation209_spill] sm:$0xff] %v12827_v57  ;;  %v12836_v49 = vld [vmem:[%s6307_s10 + $0x58] sm:$0x1]  ;;  %16455 = vst [vmem:[#allocation166_spill] sm:$0xff] %v12915_v58 }
 0x321   : > { %16443 = vst [vmem:[#allocation110_spill] sm:$0xff] %v12812_v27  ;;  %v12822_v50 = vmul.f32 %v12722_v14, %v12734_v41  ;;  %v3973_v56 = vmul.f32 %v12763_v1, %v12763_v1  ;;  %v3842_v10 = vsub.f32 %v12827_v57, %v12549_v54  ;;  %v3978_v13 = vadd.f32 %v3972_v25, %v3966_v6  ;;  %v12853_v57 = vpop.permute.xlu1 %3949  ;;  %v16450_v27 = vld [vmem:[#allocation61_spill] sm:$0xff] }
 0x322   : > { %16445 = vst [vmem:[#allocation153_spill] sm:$0xff] %v12818_v35  ;;  %v12833_v30 = vmul.f32 %v12722_v14, %v12763_v1  ;;  %16448 = vst [vmem:[#allocation30_spill] sm:$0xff] %v12836_v49  ;;  %v3843_v19 = vsub.f32 %v12836_v49, %v12549_v54  ;;  %v3974_v15 = vmul.f32 %v12804_v34, %v12804_v34 }
 0x323   : > { %16446 = vst [vmem:[#allocation118_spill] sm:$0xff] %v12822_v50  ;;  %v12843_v24 = vadd.f32 %v4081_v38, %v12572_v23  ;;  %v12846_v50 = vmul.f32 %v12652_v7, %v3812_v60  ;;  %v12849_v6 = vmul.f32 %v12652_v7, %v3813_v33  ;;  %v3975_v25 = vmul.f32 %v12807_v21, %v12807_v21  ;;  %v12862_v60 = vpop.permute.xlu0 %3947  ;;  %v16451_v33 = vld [vmem:[#allocation67_spill] sm:$0xff] }
 0x324   : > { %v4392_v54 = vsel %vm4185_vm3, %v4387_v8, %v4391_v48  ;;  %v4390_v49 = vsel %vm4185_vm3, %v4384_v62, %v4389_v2  ;;  %v3870_v36 = vsub.f32 %v16450_v27, %v12582_v31  ;;  %v12860_v23 = vmul.f32 %v3869_v37, %v12652_v7  ;;  %v12872_v62 = vld [vmem:[%s6307_s10 + $0x68] sm:$0xfe] }
 0x325   : > { %16449 = vst [vmem:[#allocation201_spill] sm:$0xff] %v12843_v24  ;;  %v12865_v38 = vmul.f32 %v3842_v10, %v12652_v7  ;;  %4399 = vrot.lane.b32.xlu1 %v4392_v54, %s6158_s6  ;;  %4397 = vrot.lane.b32.xlu0 %v4390_v49, %s6158_s6  ;;  %v3867_v8 = vsub.f32 %v16451_v33, %v12596_v45  ;;  %16452 = vst [vmem:[#allocation174_spill] sm:$0xff] %v12872_v62 }
 0x326   : > { %v3868_v27 = vsub.f32 %v12872_v62, %v12596_v45  ;;  %v12877_v31 = vmul.f32 %v3843_v19, %v12652_v7  ;;  %v3980_v37 = vadd.f32 %v3974_v15, %v3968_v16  ;;  %v12880_v10 = vmul.f32 %v3870_v36, %v12652_v7 }
 0x327   : > { %v3986_v54 = vmul.f32 %v12860_v23, %v12860_v23  ;;  %v3979_v49 = vadd.f32 %v3973_v56, %v3967_v11  ;;  %v3970_v24 = vmul.f32 %v12846_v50, %v12846_v50  ;;  %v12887_v33 = vmul.f32 %v3867_v8, %v12652_v7  ;;  %v5597_v56 = vld [vmem:[%s10439_s25 + $0xf8] sm:$0xf0]  ;;  %v12918_v9 = vpop.permute.xlu0 %4196 }
 0x328   : > { %v12890_v39 = vmul.f32 %v3868_v27, %v12652_v7  ;;  %v3981_v45 = vadd.f32 %v3975_v25, %v12745_v59  ;;  %v3987_v16 = vmul.f32 %v12880_v10, %v12880_v10  ;;  %v3871_v11 = vsub.f32 %v12161_v22, %v12646_v46  ;;  %v12907_v25 = vpop.permute.xlu1 %4198 }
 0x329   : > { %v3992_v36 = vadd.f32 %v3986_v54, %v3980_v37  ;;  %v3971_v19 = vmul.f32 %v12849_v6, %v12849_v6  ;;  %v3976_v15 = vmul.f32 %v12865_v38, %v12865_v38  ;;  %v3984_v8 = vmul.f32 %v12887_v33, %v12887_v33  ;;  %4403 = vrot.lane.b32.xlu1 %v4391_v48, %s6158_s6  ;;  %v16454_v54 = vld [vmem:[#allocation156_spill] sm:$0xff] }
 0x32a   : > { %v3985_v59 = vmul.f32 %v12890_v39, %v12890_v39  ;;  %16453 = vst [vmem:[#allocation60_spill] sm:$0xff] %v12907_v25  ;;  %v3977_v22 = vmul.f32 %v12877_v31, %v12877_v31  ;;  %v3993_v27 = vadd.f32 %v3987_v16, %v3981_v45  ;;  %4401 = vrot.lane.b32.xlu0 %v4389_v2, %s6158_s6  ;;  %v4435_v35 = vrot.slane %v5597_v56, 3  ;;  %v16457_v45 = vld [vmem:[#allocation52_spill] sm:$0xff] }
 0x32b   : > { %v3998_v37 = vadd.f32 1e-09, %v3992_v36  ;;  %v3896_v62 = vsub.f32 %v16454_v54, %v12630_v43  ;;  %v3990_v55 = vadd.f32 %v3984_v8, %v3978_v13  ;;  %v3897_v25 = vsub.f32 %v16456_v20, %v12630_v43  ;;  %v12928_v36 = vld [vmem:[%s10439_s25 + $0x100] sm:$0xff] }
 0x32c   : > { %v3991_v48 = vadd.f32 %v3985_v59, %v3979_v49  ;;  %v3999_v32 = vadd.f32 1e-09, %v3993_v27  ;;  %v3872_v2 = vsub.f32 %v16457_v45, %v12646_v46  ;;  %v12925_v16 = vmul.f32 %v3871_v11, %v12652_v7  ;;  %16458 = vst [vmem:[#allocation116_spill] sm:$0xff] %v12928_v36  ;;  %v12940_v59 = vpop.permute.xlu1 %4202  ;;  %v5600_v27 = vld [vmem:[%s10439_s25 + $0x110] sm:$0xf] }
 0x32d   : > { %5819 = vrsqrt.f32 %v3998_v37  ;;  %v3996_v54 = vadd.f32 1e-09, %v3990_v55  ;;  %v4436_v13 = vrot.slane %v12915_v58, 3  ;;  %v4432_v49 = vrot.slane %v5596_v42, 3  ;;  %v6006_v55 = vld [vmem:[%s6307_s10 + $0xb0] sm:$0x1]  ;;  %v12947_v37 = vpop.permute.xlu0 %4200 }
 0x32e   : > { %v3997_v63 = vadd.f32 1e-09, %v3991_v48  ;;  %v3982_v8 = vadd.f32 %v3976_v15, %v3970_v24  ;;  %5821 = vrsqrt.f32 %v3999_v32  ;;  %v12932_v43 = vmul.f32 %v3872_v2, %v12652_v7  ;;  %v5601_v15 = vld [vmem:[%s10439_s25 + $0x118] sm:$0xf] }
 0x32f   : > { %v3988_v46 = vmul.f32 %v12925_v16, %v12925_v16  ;;  %5823 = vrsqrt.f32 %v3996_v54  ;;  %v4437_v20 = vsel %vm4185_vm3, %v4435_v35, %v4436_v13  ;;  %v4433_v11 = vrot.slane %v12928_v36, 3 }
 0x330   : > { %v3900_v56 = vsub.f32 %v6006_v55, %v12689_v52  ;;  %v3983_v42 = vadd.f32 %v3977_v22, %v3971_v19  ;;  %5825 = vrsqrt.f32 %v3997_v63  ;;  %v3989_v32 = vmul.f32 %v12932_v43, %v12932_v43  ;;  %4444 = vrot.lane.b32.xlu1 %v4437_v20, %s6158_s6  ;;  %v16459_v63 = vld [vmem:[#allocation124_spill] sm:$0xff]  ;;  %v12972_v55 = vpop.permute.xlu1 %4206 }
 0x331   : > { %v3994_v24 = vadd.f32 %v3988_v46, %v3982_v8  ;;  %v12950_v35 = vmul.f32 %v3896_v62, %v12652_v7  ;;  %v12953_v48 = vmul.f32 %v3897_v25, %v12652_v7  ;;  %v4434_v19 = vsel %vm4185_vm3, %v4432_v49, %v4433_v11  ;;  %v12963_v8 = vld [vmem:[%s6307_s10 + $0xa0] sm:$0xff]  ;;  %v16461_v49 = vld [vmem:[#allocation155_spill] sm:$0xff]  ;;  %16462 = vst [vmem:[#allocation20_spill] sm:$0xff] %v12972_v55 }
 0x332   : > { %v3901_v22 = vsub.f32 %v16459_v63, %v12689_v52  ;;  %v3995_v45 = vadd.f32 %v3989_v32, %v3983_v42  ;;  %4442 = vrot.lane.b32.xlu0 %v4434_v19, %s6158_s6  ;;  %v12960_v54 = vmul.f32 %v3900_v56, %v12652_v7  ;;  %16460 = vst [vmem:[#allocation186_spill] sm:$0xff] %v12963_v8  ;;  %v4440_v52 = vrot.slane %v5601_v15, 3  ;;  %v6008_v32 = vld [vmem:[%s6307_s10 + $0xd0] sm:$0xff] }
 0x333   : > { %v4000_v2 = vadd.f32 1e-09, %v3994_v24  ;;  %v3898_v62 = vsub.f32 %v12963_v8, %v12704_v5  ;;  %v3899_v46 = vsub.f32 %v16461_v49, %v12704_v5  ;;  %v4438_v20 = vrot.slane %v5600_v27, 3  ;;  %v16463_v5 = vld [vmem:[#allocation125_spill] sm:$0xff]  ;;  %v5613_v27 = vld [vmem:[%s10439_s25 + $0x98] sm:$0xfc] }
 0x334   : > { %v12968_v25 = vmul.f32 %v3901_v22, %v12652_v7  ;;  %v4001_v42 = vadd.f32 1e-09, %v3995_v45  ;;  %v3927_v24 = vsub.f32 %v6008_v32, %v12739_v61  ;;  %v4441_v63 = vsel %vm4185_vm3, %v4436_v13, %v4440_v52  ;;  %v16465_v49 = vld [vmem:[#allocation37_spill] sm:$0xff]  ;;  %v13004_v58 = vpop.permute.xlu1 %4248 }
 0x335   : > { %5827 = vrsqrt.f32 %v4000_v2  ;;  %v3904_v56 = vmul.f32 %v3898_v62, %v12652_v7  ;;  %v3905_v19 = vmul.f32 %v3899_v46, %v12652_v7  ;;  %v4439_v22 = vsel %vm4185_vm3, %v4433_v11, %v4438_v20  ;;  %4448 = vrot.lane.b32.xlu1 %v4441_v63, %s6158_s6  ;;  %v16464_v2 = vld [vmem:[#allocation24_spill] sm:$0xff]  ;;  %v12990_v46 = vpop.permute.xlu0 %4204  ;;  %16470 = vst [vmem:[#allocation147_spill] sm:$0xff] %v13004_v58 }
 0x336   : > { %v3928_v15 = vsub.f32 %v16463_v5, %v12739_v61  ;;  %5829 = vrsqrt.f32 %v4001_v42  ;;  %4446 = vrot.lane.b32.xlu0 %v4439_v22, %s6158_s6  ;;  %v3933_v45 = vmul.f32 %v3927_v24, %v12652_v7  ;;  %v3925_v62 = vsub.f32 %v16464_v2, %v12749_v47  ;;  %16466 = vst [vmem:[#allocation109_spill] sm:$0xff] %v12990_v46  ;;  %v16467_v61 = vld [vmem:[#allocation77_spill] sm:$0xff]  ;;  %v16468_v42 = vld [vmem:[#allocation26_spill] sm:$0xff]  ;;  %v6009_v5 = vld [vmem:[%s6307_s10 + $0xe0] sm:$0x1] }
 0x337   : > { %v3926_v13 = vsub.f32 %v16465_v49, %v12749_v47  ;;  %v3954_v32 = vsub.f32 %v16467_v61, %v12791_v28  ;;  %v3955_v63 = vsub.f32 %v16468_v42, %v12791_v28  ;;  %v3929_v22 = vsub.f32 %v6009_v5, %v12809_v0  ;;  %v5612_v24 = vld [vmem:[%s10439_s25 + $0x90] sm:$0xfc]  ;;  %v16469_v47 = vld [vmem:[#allocation27_spill] sm:$0xff]  ;;  %v16471_v42 = vld [vmem:[#allocation33_spill] sm:$0xff] }
 0x338   : > { %v3934_v11 = vmul.f32 %v3928_v15, %v12652_v7  ;;  %v3931_v8 = vmul.f32 %v3925_v62, %v12652_v7  ;;  %v3930_v49 = vsub.f32 %v16469_v47, %v12809_v0  ;;  %v4826_v36 = vrot.slane %v5613_v27, 1 }
 0x339   : > { %v3932_v2 = vmul.f32 %v3926_v13, %v12652_v7  ;;  %v3960_v61 = vmul.f32 %v3954_v32, %v12652_v7  ;;  %v3961_v46 = vmul.f32 %v3955_v63, %v12652_v7  ;;  %v3935_v28 = vmul.f32 %v3929_v22, %v12652_v7  ;;  %4452 = vrot.lane.b32.xlu1 %v4440_v52, %s6158_s6  ;;  %v16474_v22 = vld [vmem:[#allocation163_spill] sm:$0xff] }
 0x33a   : > { %v5820_v15 = vpop.eup %5819  ;;  %v15087_v5 = vrot.slane %v16471_v42, 1  ;;  %4450 = vrot.lane.b32.xlu0 %v4438_v20, %s6158_s6  ;;  %v3936_v0 = vmul.f32 %v3930_v49, %v12652_v7  ;;  %v4823_v27 = vrot.slane %v5612_v24, 1  ;;  %v3959_v47 = vsub.f32 %v16474_v22, %v12853_v57  ;;  %v13047_v22 = vpop.permute.xlu1 %4252 }
 0x33b   : > { %v13011_v55 = vmul.f32 %v5820_v15, %v12698_v3  ;;  %v13014_v62 = vmul.f32 %v5820_v15, %v12804_v34  ;;  %v5822_v13 = vpop.eup %5821  ;;  %v3958_v3 = vsub.f32 %v12508_v51, %v12853_v57 }
 0x33c   : > { %v4828_v32 = vsel %vm1404_vm1, %v4826_v36, %v15087_v5  ;;  %v5824_v58 = vpop.eup %5823  ;;  %v13028_v52 = vmul.f32 %v5822_v13, %v12701_v26  ;;  %v13032_v24 = vmul.f32 %v5822_v13, %v12807_v21  ;;  %v13035_v36 = vpop.permute.xlu0 %4246  ;;  %v16479_v26 = vrot.slane %v12445_v18, 1 }
 0x33d   : > { %16472 = vst [vmem:[#allocation173_spill] sm:$0xff] %v13011_v55  ;;  %16473 = vst [vmem:[#allocation117_spill] sm:$0xff] %v13014_v62  ;;  %v4028_v20 = vmul.f32 %v13011_v55, %v3904_v56  ;;  %v4034_v49 = vmul.f32 %v13014_v62, %v3933_v45  ;;  %v5826_v5 = vpop.eup %5825  ;;  %v13038_v63 = vmul.f32 %v5824_v58, %v12713_v12  ;;  %4835 = vrot.lane.b32.xlu1 %v4828_v32, %s6159_s8 }
 0x33e   : > { %16475 = vst [vmem:[#allocation205_spill] sm:$0xff] %v13028_v52  ;;  %16476 = vst [vmem:[#allocation119_spill] sm:$0xff] %v13032_v24  ;;  %v13041_v51 = vmul.f32 %v5824_v58, %v12737_v44  ;;  %v4020_v57 = vmul.f32 %v5824_v58, %v12887_v33  ;;  %v4825_v56 = vsel %vm1404_vm1, %v4823_v27, %v16479_v26 }
 0x33f   : > { %16477 = vst [vmem:[#allocation58_spill] sm:$0xff] %v13038_v63  ;;  %v13050_v55 = vmul.f32 %v5826_v5, %v12734_v41  ;;  %v4029_v45 = vmul.f32 %v13028_v52, %v3905_v19  ;;  %v4035_v62 = vmul.f32 %v13032_v24, %v3934_v11  ;;  %v13054_v12 = vadd.f32 %v4034_v49, %v4028_v20  ;;  %v13072_v52 = vpop.permute.xlu1 %4256 }
 0x340   : > { %16478 = vst [vmem:[#allocation22_spill] sm:$0xff] %v13041_v51  ;;  %v4026_v58 = vmul.f32 %v13038_v63, %v12950_v35  ;;  %v13060_v44 = vmul.f32 %v5826_v5, %v12763_v1  ;;  %v4032_v27 = vmul.f32 %v13041_v51, %v3931_v8  ;;  %v4021_v26 = vmul.f32 %v5826_v5, %v12890_v39  ;;  %v13068_v32 = vpop.permute.xlu0 %4250  ;;  %v5615_v51 = vld [vmem:[%s10439_s25 + $0xb8] sm:$0x3] }
 0x341   : > { %16480 = vst [vmem:[#allocation151_spill] sm:$0xff] %v13050_v55  ;;  %4833 = vrot.lane.b32.xlu0 %v4825_v56, %s6159_s8  ;;  %v4027_v41 = vmul.f32 %v13050_v55, %v12953_v48  ;;  %v4041_v19 = vadd.f32 %v4035_v62, %v4029_v45  ;;  %v4044_v11 = vmul.f32 %v4020_v57, %v3960_v61 }
 0x342   : > { %16481 = vst [vmem:[#allocation91_spill] sm:$0xff] %v13060_v44  ;;  %v3964_v20 = vmul.f32 %v3958_v3, %v12652_v7  ;;  %v5828_v49 = vpop.eup %5827  ;;  %v4033_v35 = vmul.f32 %v13060_v44, %v3932_v2  ;;  %v4038_v1 = vadd.f32 %v4032_v27, %v4026_v58  ;;  %v4045_v24 = vmul.f32 %v4021_v26, %v3961_v46 }
 0x343   : > { %v3965_v8 = vmul.f32 %v3959_v47, %v12652_v7  ;;  %v13075_v5 = vmul.f32 %v5828_v49, %v12846_v50  ;;  %v13078_v48 = vmul.f32 %v5828_v49, %v12865_v38  ;;  %v4024_v61 = vmul.f32 %v5828_v49, %v12925_v16  ;;  %v5830_v3 = vpop.eup %5829  ;;  %v16484_v47 = vld [vmem:[#allocation72_spill] sm:$0xff]  ;;  %v13108_v63 = vpop.permute.xlu1 %4297 }
 0x344   : > { %v13082_v62 = vmul.f32 %v5820_v15, %v12860_v23  ;;  %v4039_v56 = vadd.f32 %v4033_v35, %v4027_v41  ;;  %v4050_v2 = vadd.f32 %v4044_v11, %v4038_v1  ;;  %v13085_v46 = vmul.f32 %v5822_v13, %v12880_v10  ;;  %v13098_v41 = vpop.permute.xlu0 %4254 }
 0x345   : > { %16482 = vst [vmem:[#allocation190_spill] sm:$0xff] %v13075_v5  ;;  %16483 = vst [vmem:[#allocation40_spill] sm:$0xff] %v13078_v48  ;;  %v3956_v45 = vsub.f32 %v16484_v47, %v12862_v60  ;;  %v13090_v58 = vmul.f32 %v5830_v3, %v12849_v6  ;;  %v4030_v27 = vmul.f32 %v13075_v5, %v12960_v54  ;;  %v16487_v54 = vld [vmem:[#allocation28_spill] sm:$0xff] }
 0x346   : > { %v13095_v49 = vmul.f32 %v5830_v3, %v12877_v31  ;;  %v4036_v15 = vmul.f32 %v13078_v48, %v3935_v28  ;;  %v4051_v11 = vadd.f32 %v4045_v24, %v4039_v56  ;;  %v4056_v13 = vmul.f32 %v4050_v2, %v16291_v17  ;;  %v16488_v28 = vld [vmem:[#allocation210_spill] sm:$0xff] }
 0x347   : > { %16485 = vst [vmem:[#allocation157_spill] sm:$0xff] %v13090_v58  ;;  %v4025_v35 = vmul.f32 %v5830_v3, %v12932_v43  ;;  %v4048_v1 = vmul.f32 %v4024_v61, %v3964_v20  ;;  %v4031_v47 = vmul.f32 %v13090_v58, %v12968_v25  ;;  %v3957_v5 = vsub.f32 %v16487_v54, %v12862_v60 }
 0x348   : > { %16486 = vst [vmem:[#allocation97_spill] sm:$0xff] %v13095_v49  ;;  %v4037_v44 = vmul.f32 %v13095_v49, %v3936_v0  ;;  %v4042_v55 = vadd.f32 %v4036_v15, %v4030_v27  ;;  %v13112_v24 = vadd.f32 %v12833_v30, %v16488_v28  ;;  %v4057_v56 = vmul.f32 %v4051_v11, %v16291_v17  ;;  %v13120_v27 = vpop.permute.xlu0 %4295 }
 0x349   : > { %v13116_v20 = vadd.f32 %v4056_v13, %v16400_v40  ;;  %v4049_v25 = vmul.f32 %v4025_v35, %v3965_v8  ;;  %v3962_v2 = vmul.f32 %v3956_v45, %v12652_v7  ;;  %v3963_v60 = vmul.f32 %v3957_v5, %v12652_v7  ;;  %v5614_v45 = vld [vmem:[%s10439_s25 + $0xb0] sm:$0x3]  ;;  %v13134_v7 = vpop.permute.xlu1 %4301 }
 0x34a   : > { %v4043_v3 = vadd.f32 %v4037_v44, %v4031_v47  ;;  %v4054_v0 = vadd.f32 %v4048_v1, %v4042_v55  ;;  %v4073_v15 = vmul.f32 %v12722_v14, %v12846_v50  ;;  %v13125_v30 = vadd.f32 %v4057_v56, %v16400_v40 }
 0x34b   : > { %16489 = vst [vmem:[#allocation108_spill] sm:$0xff] %v13116_v20  ;;  %v4129_v11 = vmul.f32 %v13116_v20, %v4020_v57  ;;  %v4831_v54 = vrot.slane %v5615_v51, 1  ;;  %v4046_v55 = vmul.f32 %v13082_v62, %v3962_v2  ;;  %v4047_v44 = vmul.f32 %v13085_v46, %v3963_v60  ;;  %v16496_v2 = vld [vmem:[#allocation46_spill] sm:$0xff] }
 0x34c   : > { %16490 = vst [vmem:[#allocation32_spill] sm:$0xff] %v13125_v30  ;;  %v4055_v13 = vadd.f32 %v4049_v25, %v4043_v3  ;;  %v4060_v8 = vmul.f32 %v4054_v0, %v16291_v17  ;;  %v4085_v50 = vmul.f32 %v12722_v14, %v12865_v38  ;;  %v4086_v5 = vmul.f32 %v12722_v14, %v12877_v31  ;;  %v13149_v25 = vpop.permute.xlu0 %4299  ;;  %v16541_v20 = vld [vmem:[#allocation166_spill] sm:$0xff] }
 0x34d   : > { %v4130_v51 = vmul.f32 %v13125_v30, %v4021_v26  ;;  %v13142_v57 = vadd.f32 %v4129_v11, %v12695_v4  ;;  %v4052_v28 = vadd.f32 %v4046_v55, %v13054_v12  ;;  %v4053_v56 = vadd.f32 %v4047_v44, %v4041_v19  ;;  %v16498_v11 = vld [vmem:[#allocation84_spill] sm:$0xff]  ;;  %v16499_v55 = vld [vmem:[#allocation153_spill] sm:$0xff] }
 0x34e   : > { %v4061_v1 = vmul.f32 %v4055_v13, %v16291_v17  ;;  %v13146_v47 = vadd.f32 %v4060_v8, %v16400_v40  ;;  %v13152_v38 = vadd.f32 %v4073_v15, %v12569_v53  ;;  %v16494_v26 = vrot.slane %v16471_v42, 1 }
 0x34f   : > { %16491 = vst [vmem:[#allocation75_spill] sm:$0xff] %v13142_v57  ;;  %v13155_v31 = vadd.f32 %v4130_v51, %v12692_v29  ;;  %v4829_v3 = vrot.slane %v5614_v45, 1  ;;  %v4083_v0 = vmul.f32 %v12722_v14, %v12804_v34  ;;  %v4084_v12 = vmul.f32 %v12722_v14, %v12807_v21  ;;  %v13169_v29 = vpop.permute.xlu1 %4305  ;;  %v16504_v51 = vld [vmem:[#allocation29_spill] sm:$0xff]  ;;  %v16526_v57 = vld [vmem:[#allocation110_spill] sm:$0xff] }
 0x350   : > { %16492 = vst [vmem:[#allocation89_spill] sm:$0xff] %v13146_v47  ;;  %v4832_v4 = vsel %vm1404_vm1, %v16494_v26, %v4831_v54  ;;  %v13165_v19 = vadd.f32 %v4061_v1, %v16400_v40  ;;  %v4133_v53 = vmul.f32 %v13146_v47, %v4024_v61  ;;  %v13172_v42 = vadd.f32 %v4085_v50, %v16496_v2  ;;  %v13191_v45 = vpop.permute.xlu0 %4303  ;;  %v16505_v1 = vld [vmem:[#allocation182_spill] sm:$0xff]  ;;  %v16507_v26 = vld [vmem:[#allocation180_spill] sm:$0xff]  ;;  %v5617_v2 = vld [vmem:[%s10439_s25 + $0xc8] sm:$0xfc] }
 0x351   : > { %16493 = vst [vmem:[#allocation104_spill] sm:$0xff] %v13155_v31  ;;  %4839 = vrot.lane.b32.xlu1 %v4832_v4, %s6159_s8  ;;  %v4058_v60 = vmul.f32 %v4052_v28, %v16291_v17  ;;  %v4059_v34 = vmul.f32 %v4053_v56, %v16291_v17  ;;  %v16497_v15 = vrot.slane %v12445_v18, 1  ;;  %v13180_v13 = vadd.f32 %v4086_v5, %v16498_v11  ;;  %v16503_v5 = vld [vmem:[#allocation60_spill] sm:$0xff] }
 0x352   : > { %16495 = vst [vmem:[#allocation96_spill] sm:$0xff] %v13165_v19  ;;  %v4095_v61 = vmul.f32 %v12722_v14, %v12860_v23  ;;  %v4134_v8 = vmul.f32 %v13165_v19, %v4025_v35  ;;  %v13186_v44 = vadd.f32 %v4133_v53, %v16499_v55  ;;  %v4218_v23 = vsub.f32 %v16504_v51, %v16503_v5  ;;  %v16524_v19 = vld [vmem:[#allocation109_spill] sm:$0xff] }
 0x353   : > { %v4830_v21 = vsel %vm1404_vm1, %v16497_v15, %v4829_v3  ;;  %v13194_v18 = vadd.f32 %v4058_v60, %v16400_v40  ;;  %v13197_v50 = vadd.f32 %v4059_v34, %v16400_v40  ;;  %v4208_v35 = vsel %vm2167_vm2, %v12918_v9, %v16503_v5  ;;  %v16508_v60 = vld [vmem:[#allocation43_spill] sm:$0xff] }
 0x354   : > { %16500 = vst [vmem:[#allocation121_spill] sm:$0xff] %v13186_v44  ;;  %4837 = vrot.lane.b32.xlu0 %v4830_v21, %s6159_s8  ;;  %v13205_v28 = vadd.f32 %v4134_v8, %v16505_v1  ;;  %v13208_v56 = vstv %s13132_s13  ;;  %v4217_v4 = vsub.f32 %v16507_v26, %v4208_v35  ;;  %v4209_v53 = vsel %vm2167_vm2, %v12947_v37, %v12940_v59  ;;  %v16509_v15 = vld [vmem:[#allocation187_spill] sm:$0xff]  ;;  %v13226_v8 = vpop.permute.xlu1 %4692  ;;  %v13239_v55 = vpop.permute.xlu0 %4690  ;;  %v16512_v1 = vld [vmem:[#allocation216_spill] sm:$0xff]  ;;  %s6084_s13 = scalar_lea.vmem %s14615_s26, 768 }
 0x355   : > { %16501 = vst [vmem:[#allocation208_spill] sm:$0xff] %v13194_v18  ;;  %16502 = vst [vmem:[#allocation179_spill] sm:$0xff] %v13197_v50  ;;  %4843 = vrot.lane.b32.xlu1 %v4831_v54, %s6159_s8  ;;  %v13217_v34 = vadd.f32 %v4083_v0, %v16508_v60  ;;  %v13220_v9 = vadd.f32 %v4084_v12, %v16509_v15  ;;  %v4093_v21 = vmul.f32 %v12722_v14, %v12887_v33  ;;  %v16510_v12 = vld [vmem:[#allocation164_spill] sm:$0xff]  ;;  %p6085_p12 = scmp.ne.s32.totalorder %s14615_s26, %s6084_s13 }
 0x356   : > { %16506 = vst [vmem:[#allocation149_spill] sm:$0xff] %v13205_v28  ;;  %v4094_v11 = vmul.f32 %v12722_v14, %v12890_v39  ;;  %v13230_v54 = vmul.f32 %v12722_v14, %v12880_v10  ;;  %v4131_v37 = vmul.f32 %v13194_v18, %v13082_v62  ;;  %v4132_v0 = vmul.f32 %v13197_v50, %v13085_v46  ;;  %v16511_v10 = vld [vmem:[#allocation178_spill] sm:$0xff]  ;;  %v5616_v60 = vld [vmem:[%s10439_s25 + $0xc0] sm:$0xfc]  ;;  %v16513_v46 = vld [vmem:[#allocation203_spill] sm:$0xff] }
 0x357   : > { %v4220_v33 = vsub.f32 %v16510_v12, %v12940_v59  ;;  %v13242_v39 = vmul.f32 %v13208_v56, %v4218_v23  ;;  %v4219_v5 = vsub.f32 %v16511_v10, %v4209_v53  ;;  %v4873_v35 = vrot.slane %v5617_v2, 1  ;;  %v16516_v59 = vld [vmem:[#allocation217_spill] sm:$0xff]  ;;  %v16518_v23 = vld [vmem:[#allocation168_spill] sm:$0xff]  ;;  %v16519_v53 = vld [vmem:[#allocation207_spill] sm:$0xff]  ;;  %p6086_p3 = pnand %p6085_p12, %p16811_p2 }
 0x358   : > { %4841 = vrot.lane.b32.xlu0 %v4829_v3, %s6159_s8  ;;  %v4874_v62 = vrot.slane %v16512_v1, 1  ;;  %v13248_v15 = vadd.f32 %v4095_v61, %v16513_v46  ;;  %v16514_v3 = vld [vmem:[#allocation90_spill] sm:$0xff]  ;;  %v13254_v48 = vadd.f32 %v4132_v0, %v16516_v59  ;;  %v13257_v44 = vmul.f32 %v13208_v56, %v4217_v4  ;;  %v13274_v0 = vpop.permute.xlu1 %4696  ;;  %v5618_v46 = vld [vmem:[%s10439_s25 + $0xe0] sm:$0x3]  ;;  %v16521_v59 = vld [vmem:[#allocation167_spill] sm:$0xff] }
 0x359   : > { %v13251_v49 = vadd.f32 %v4131_v37, %v16514_v3  ;;  %v13260_v28 = vadd.f32 %v4093_v21, %v16518_v23  ;;  %v13263_v2 = vadd.f32 %v4094_v11, %v16519_v53  ;;  %v13267_v10 = vmul.f32 %v12722_v14, %v12925_v16  ;;  %v5619_v37 = vld [vmem:[%s10439_s25 + $0xe8] sm:$0x3]  ;;  %v13284_v3 = vpop.permute.xlu0 %4694  ;;  %v16522_v53 = vld [vmem:[#allocation20_spill] sm:$0xff]  ;;  %p6087_p4 = pneg %p6086_p3 }
 0x35a   : > { %16517 = vst [vmem:[#allocation49_spill] sm:$0xff] %v13254_v48  ;;  %v13271_v61 = vmul.f32 %v12722_v14, %v12932_v43  ;;  %v13277_v1 = vstv %s13189_s14  ;;  %v13280_v4 = vmul.f32 %v13208_v56, %v4219_v5  ;;  %v4875_v21 = vsel %vm1404_vm1, %v4873_v35, %v4874_v62  ;;  %v16523_v50 = vld [vmem:[#allocation113_spill] sm:$0xff]  ;;  %s6160_s14 = smov [#allocation8]  }
 0x35b   : > { %16515 = vst [vmem:[#allocation111_spill] sm:$0xff] %v13251_v49  ;;  %v4870_v11 = vrot.slane %v5616_v60, 1  ;;  %v4476_v16 = vmul.f32 %v13242_v39, %v13242_v39  ;;  %v13289_v43 = vmul.f32 %v13208_v56, %v4220_v33  ;;  %4882 = vrot.lane.b32.xlu1 %v4875_v21, %s6159_s8  ;;  %v4871_v23 = vrot.slane %v16521_v59, 1  ;;  %v16525_v59 = vld [vmem:[#allocation100_spill] sm:$0xff] }
 0x35c   : > { %16520 = vst [vmem:[#allocation136_spill] sm:$0xff] %v13280_v4  ;;  %v4222_v5 = vsub.f32 %v16523_v50, %v16522_v53  ;;  %v4475_v35 = vmul.f32 %v13257_v44, %v13257_v44  ;;  %v4580_v60 = vmul.f32 %v13277_v1, %v13280_v4  ;;  %v4210_v58 = vsel %vm2167_vm2, %v16524_v19, %v16522_v53  ;;  %v13307_v48 = vpop.permute.xlu1 %4700  ;;  %v16528_v19 = vld [vmem:[#allocation147_spill] sm:$0xff] }
 0x35d   : > { %v4878_v49 = vrot.slane %v5619_v37, 1  ;;  %v4872_v33 = vsel %vm1404_vm1, %v4870_v11, %v4871_v23  ;;  %v4221_v18 = vsub.f32 %v16525_v59, %v4210_v58  ;;  %v4876_v47 = vrot.slane %v5618_v46, 1  ;;  %v16529_v37 = vld [vmem:[#allocation50_spill] sm:$0xff] }
 0x35e   : > { %v13304_v21 = vmul.f32 %v13208_v56, %v4222_v5  ;;  %v13310_v31 = vadd.f32 %v4580_v60, %v16526_v57  ;;  %4880 = vrot.lane.b32.xlu0 %v4872_v33, %s6159_s8  ;;  %v4268_v53 = vsub.f32 %v16529_v37, %v16528_v19  ;;  %v4258_v11 = vsel %vm2167_vm2, %v13035_v36, %v16528_v19  ;;  %v13319_v5 = vpop.permute.xlu0 %4698  ;;  %v16532_v33 = vld [vmem:[#allocation204_spill] sm:$0xff]  ;;  %v16533_v19 = vld [vmem:[#allocation185_spill] sm:$0xff] }
 0x35f   : > { %v4879_v40 = vsel %vm1404_vm1, %v4874_v62, %v4878_v49  ;;  %v4478_v58 = vmul.f32 %v13289_v43, %v13289_v43  ;;  %v4477_v57 = vmul.f32 %v13280_v4, %v13280_v4  ;;  %v13326_v46 = vmul.f32 %v13208_v56, %v4221_v18  ;;  %v5621_v4 = vld [vmem:[%s10439_s25 + $0xf8] sm:$0xfc] }
 0x360   : > { %16527 = vst [vmem:[#allocation133_spill] sm:$0xff] %v13310_v31  ;;  %4886 = vrot.lane.b32.xlu1 %v4879_v40, %s6159_s8  ;;  %v4877_v62 = vsel %vm1404_vm1, %v4871_v23, %v4876_v47  ;;  %v13331_v60 = vmul.f32 %v4268_v53, %v13208_v56  ;;  %v4267_v36 = vsub.f32 %v16532_v33, %v4258_v11  ;;  %v16534_v53 = vld [vmem:[#allocation36_spill] sm:$0xff]  ;;  %v13351_v33 = vpop.permute.xlu1 %4741 }
 0x361   : > { %16530 = vst [vmem:[#allocation212_spill] sm:$0xff] %v13326_v46  ;;  %v4270_v37 = vsub.f32 %v16533_v19, %v13047_v22  ;;  %v4259_v17 = vsel %vm2167_vm2, %v13068_v32, %v13047_v22  ;;  %v13342_v18 = vmul.f32 %v13304_v21, %v13304_v21  ;;  %v13346_v40 = vmul.f32 %v13326_v46, %v13326_v46 }
 0x362   : > { %16531 = vst [vmem:[#allocation68_spill] sm:$0xff] %v13331_v60  ;;  %v4582_v23 = vmul.f32 %v13277_v1, %v13326_v46  ;;  %v4269_v11 = vsub.f32 %v16534_v53, %v4259_v17  ;;  %16535 = vst [vmem:[#allocation150_spill] sm:$0xff] %v13351_v33  ;;  %4884 = vrot.lane.b32.xlu0 %v4877_v62, %s6159_s8  ;;  %v4482_v22 = vmul.f32 %v13331_v60, %v13331_v60  ;;  %v13364_v46 = vpop.permute.xlu0 %4739  ;;  %v5620_v33 = vld [vmem:[%s10439_s25 + $0xf0] sm:$0xfc] }
 0x363   : > { %v4591_v32 = vmul.f32 %v13277_v1, %v13331_v60  ;;  %v13359_v19 = vmul.f32 %v4267_v36, %v13208_v56  ;;  %v13362_v30 = vmul.f32 %v4270_v37, %v13208_v56  ;;  %16538 = vst [vmem:[#allocation154_spill] sm:$0xff] %v13364_v46  ;;  %v4920_v53 = vrot.slane %v5621_v4, 1 }
 0x364   : > { %v13367_v17 = vadd.f32 %v4582_v23, %v13152_v38  ;;  %4890 = vrot.lane.b32.xlu1 %v4878_v49, %s6159_s8  ;;  %v13371_v62 = vmul.f32 %v4269_v11, %v13208_v56  ;;  %v4921_v60 = vrot.slane %v16541_v20, 1  ;;  %v4488_v36 = vadd.f32 %v4482_v22, %v4476_v16  ;;  %v13391_v23 = vpop.permute.xlu1 %4745  ;;  %v16544_v22 = vld [vmem:[#allocation201_spill] sm:$0xff] }
 0x365   : > { %16536 = vst [vmem:[#allocation17_spill] sm:$0xff] %v13359_v19  ;;  %16537 = vst [vmem:[#allocation19_spill] sm:$0xff] %v13362_v30  ;;  %v13376_v37 = vadd.f32 %v4591_v32, %v13112_v24  ;;  %v4481_v46 = vmul.f32 %v13359_v19, %v13359_v19  ;;  %v4590_v38 = vmul.f32 %v13277_v1, %v13359_v19  ;;  %v5623_v24 = vld [vmem:[%s10439_s25 + $0x118] sm:$0x3]  ;;  %v4917_v19 = vrot.slane %v5620_v33, 1  ;;  %v16549_v33 = vld [vmem:[#allocation30_spill] sm:$0xff] }
 0x366   : > { %16539 = vst [vmem:[#allocation56_spill] sm:$0xff] %v13367_v17  ;;  %16540 = vst [vmem:[#allocation177_spill] sm:$0xff] %v13371_v62  ;;  %v4484_v49 = vmul.f32 %v13362_v30, %v13362_v30  ;;  %v4593_v4 = vmul.f32 %v13277_v1, %v13362_v30  ;;  %v4483_v20 = vmul.f32 %v13371_v62, %v13371_v62  ;;  %4888 = vrot.lane.b32.xlu0 %v4876_v47, %s6159_s8  ;;  %v13399_v17 = vld [vmem:[%s10439_s25 + $0x110] sm:$0x3]  ;;  %v13401_v30 = vpop.permute.xlu0 %4743  ;;  %v16548_v47 = vld [vmem:[#allocation116_spill] sm:$0xff]  ;;  %s14373_s25 = sld [smem:[#allocation7 + $0x3]] }
 0x367   : > { %16542 = vst [vmem:[#allocation214_spill] sm:$0xff] %v13376_v37  ;;  %v4592_v16 = vmul.f32 %v13277_v1, %v13371_v62  ;;  %16543 = vst [vmem:[#allocation54_spill] sm:$0xff] %v13391_v23  ;;  %v4487_v11 = vadd.f32 %v4481_v46, %v4475_v35  ;;  %v13394_v32 = vadd.f32 %v4590_v38, %v16544_v22  ;;  %v4918_v46 = vrot.slane %v16548_v47, 1 }
 0x368   : > { %v4922_v37 = vsel %vm1404_vm1, %v4920_v53, %v4921_v60  ;;  %v13403_v31 = vadd.f32 %v4484_v49, %v4478_v58  ;;  %v13406_v62 = vadd.f32 %v4593_v4, %v13220_v9  ;;  %v13408_v23 = vadd.f32 %v4483_v20, %v4477_v57  ;;  %v16550_v9 = vld [vmem:[#allocation209_spill] sm:$0xff]  ;;  %v16551_v4 = vld [vmem:[#allocation174_spill] sm:$0xff]  ;;  %v13427_v20 = vpop.permute.xlu1 %4749 }
 0x369   : > { %16545 = vst [vmem:[#allocation158_spill] sm:$0xff] %v13394_v32  ;;  %v13411_v35 = vadd.f32 %v4592_v16, %v13217_v34  ;;  %4929 = vrot.lane.b32.xlu1 %v4922_v37, %s6159_s8  ;;  %v4272_v53 = vsub.f32 %v16549_v33, %v13072_v52  ;;  %v4260_v58 = vsel %vm2167_vm2, %v13098_v41, %v13072_v52  ;;  %v4925_v38 = vrot.slane %v5623_v24, 1  ;;  %v13435_v41 = vld [vmem:[%s6307_s10 + $0x60] sm:$0xfe] }
 0x36a   : > { %16546 = vst [vmem:[#allocation175_spill] sm:$0xff] %v13406_v62  ;;  %v4271_v49 = vsub.f32 %v16550_v9, %v4260_v58  ;;  %v4923_v57 = vrot.slane %v13399_v17, 1  ;;  %v4317_v34 = vsub.f32 %v16551_v4, %v13108_v63  ;;  %v4307_v37 = vsel %vm2167_vm2, %v13120_v27, %v13108_v63  ;;  %v13438_v24 = vpop.permute.xlu0 %4747  ;;  %v13457_v58 = vld [vmem:[%s6307_s10 + $0x78] sm:$0xff] }
 0x36b   : > { %16547 = vst [vmem:[#allocation15_spill] sm:$0xff] %v13411_v35  ;;  %v4919_v16 = vsel %vm1404_vm1, %v4917_v19, %v4918_v46  ;;  %v13431_v22 = vmul.f32 %v4272_v53, %v13208_v56  ;;  %v4926_v52 = vsel %vm1404_vm1, %v4921_v60, %v4925_v38  ;;  %v4316_v17 = vsub.f32 %v13435_v41, %v4307_v37 }
 0x36c   : > { %4927 = vrot.lane.b32.xlu0 %v4919_v16, %s6159_s8  ;;  %v13442_v63 = vmul.f32 %v4271_v49, %v13208_v56  ;;  %v4924_v27 = vsel %vm1404_vm1, %v4918_v46, %v4923_v57  ;;  %v13447_v19 = vmul.f32 %v4317_v34, %v13208_v56  ;;  %v4319_v9 = vsub.f32 %v13457_v58, %v13134_v7 }
 0x36d   : > { %4933 = vrot.lane.b32.xlu1 %v4926_v52, %s6159_s8  ;;  %v4486_v60 = vmul.f32 %v13431_v22, %v13431_v22  ;;  %v4595_v47 = vmul.f32 %v13277_v1, %v13431_v22  ;;  %v13454_v53 = vmul.f32 %v4316_v17, %v13208_v56 }
 0x36e   : > { %16552 = vst [vmem:[#allocation189_spill] sm:$0xff] %v13447_v19  ;;  %v4485_v46 = vmul.f32 %v13442_v63, %v13442_v63  ;;  %v4594_v49 = vmul.f32 %v13277_v1, %v13442_v63  ;;  %v4494_v34 = vmul.f32 %v13447_v19, %v13447_v19  ;;  %v4603_v37 = vmul.f32 %v13277_v1, %v13447_v19  ;;  %v16573_v19 = vld [vmem:[#allocation101_spill] sm:$0xff] }
 0x36f   : > { %16553 = vst [vmem:[#allocation198_spill] sm:$0xff] %v13454_v53  ;;  %v4492_v16 = vadd.f32 %v4486_v60, %v13342_v18  ;;  %v13473_v52 = vadd.f32 %v4595_v47, %v13180_v13  ;;  %v4493_v17 = vmul.f32 %v13454_v53, %v13454_v53  ;;  %v4602_v35 = vmul.f32 %v13277_v1, %v13454_v53  ;;  %v13491_v60 = vpop.permute.xlu1 %4788 }
 0x370   : > { %v4491_v62 = vadd.f32 %v4485_v46, %v13346_v40  ;;  %v13483_v32 = vadd.f32 %v4594_v49, %v13172_v42  ;;  %4931 = vrot.lane.b32.xlu0 %v4924_v27, %s6159_s8  ;;  %v13486_v18 = vadd.f32 %v4494_v34, %v4488_v36  ;;  %v13489_v13 = vadd.f32 %v4603_v37, %v13263_v2  ;;  %v13505_v36 = vpop.permute.xlu0 %4786  ;;  %v16559_v2 = vld [vmem:[#allocation183_spill] sm:$0xff]  ;;  %v13510_v46 = vld [vmem:[%s6307_s10 + $0x70] sm:$0xff]  ;;  %v13528_v49 = vld [vmem:[%s6307_s10 + $0x80] sm:$0x1] }
 0x371   : > { %16554 = vst [vmem:[#allocation191_spill] sm:$0xff] %v13473_v52  ;;  %v13493_v47 = vadd.f32 %v4493_v17, %v4487_v11  ;;  %v13496_v52 = vadd.f32 %v4602_v35, %v13260_v28  ;;  %4937 = vrot.lane.b32.xlu1 %v4925_v38, %s6159_s8  ;;  %v13500_v42 = vmul.f32 %v4319_v9, %v13208_v56  ;;  %v13514_v28 = vld [vmem:[%s6307_s10 + $0x88] sm:$0x1] }
 0x372   : > { %16555 = vst [vmem:[#allocation152_spill] sm:$0xff] %v13483_v32  ;;  %16556 = vst [vmem:[#allocation98_spill] sm:$0xff] %v13489_v13  ;;  %v4308_v40 = vsel %vm2167_vm2, %v13149_v25, %v13134_v7  ;;  %v4102_v27 = vadd.f32 %v13230_v54, %v16559_v2  ;;  %v4321_v35 = vsub.f32 %v13514_v28, %v13169_v29  ;;  %v16560_v7 = vld [vmem:[#allocation35_spill] sm:$0xff]  ;;  %v16561_v37 = vld [vmem:[#allocation21_spill] sm:$0xff] }
 0x373   : > { %16557 = vst [vmem:[#allocation135_spill] sm:$0xff] %v13496_v52  ;;  %16558 = vst [vmem:[#allocation45_spill] sm:$0xff] %v13500_v42  ;;  %v4318_v11 = vsub.f32 %v13510_v46, %v4308_v40  ;;  %v4309_v38 = vsel %vm2167_vm2, %v13191_v45, %v13169_v29  ;;  %v4103_v25 = vadd.f32 %v13267_v10, %v16560_v7 }
 0x374   : > { %v4496_v54 = vmul.f32 %v13500_v42, %v13500_v42  ;;  %v4605_v9 = vmul.f32 %v13277_v1, %v13500_v42  ;;  %v4320_v34 = vsub.f32 %v13528_v49, %v4309_v38  ;;  %v4104_v17 = vadd.f32 %v13271_v61, %v16561_v37  ;;  %4935 = vrot.lane.b32.xlu0 %v4923_v57, %s6159_s8  ;;  %v13572_v37 = vpop.permute.xlu0 %4790 }
 0x375   : > { %v4579_v29 = vmul.f32 %v13277_v1, %v13242_v39  ;;  %v13537_v45 = vmul.f32 %v4318_v11, %v13208_v56  ;;  %v13540_v10 = vmul.f32 %v4321_v35, %v13208_v56  ;;  %v13551_v61 = vstv %s13461_s15  ;;  %v13561_v35 = vpop.permute.xlu1 %4792  ;;  %s6088_s15 = sshll.u32 %s6160_s14, 4  ;;  %s6089_s15 = int_to_ptr.vmem [resolvable:$false] %s6088_s15 }
 0x376   : > { %v13543_v40 = vadd.f32 %v4496_v54, %v13403_v31  ;;  %v13545_v2 = vadd.f32 %v4605_v9, %v4102_v27  ;;  %v13548_v38 = vmul.f32 %v4320_v34, %v13208_v56  ;;  %v13568_v9 = vstv %s13479_s16  ;;  %s6090_s16 = scalar_lea.vmem %s6089_s15, 1536  ;;  %p6091_p9 = scmp.lt.s32.totalorder %s14615_s26, %s6089_s15 }
 0x377   : > { %16562 = vst [vmem:[#allocation57_spill] sm:$0xff] %v13537_v45  ;;  %16563 = vst [vmem:[#allocation85_spill] sm:$0xff] %v13540_v10  ;;  %v4495_v7 = vmul.f32 %v13537_v45, %v13537_v45  ;;  %v4604_v57 = vmul.f32 %v13277_v1, %v13537_v45  ;;  %v4498_v11 = vmul.f32 %v13540_v10, %v13540_v10  ;;  %v16570_v45 = vld [vmem:[#allocation118_spill] sm:$0xff]  ;;  %p6092_p7 = scmp.lt.s32.totalorder %s6090_s16, %s6084_s13 }
 0x378   : > { %16564 = vst [vmem:[#allocation143_spill] sm:$0xff] %v13545_v2  ;;  %16565 = vst [vmem:[#allocation159_spill] sm:$0xff] %v13548_v38  ;;  %v4607_v31 = vmul.f32 %v13277_v1, %v13540_v10  ;;  %v4497_v27 = vmul.f32 %v13548_v38, %v13548_v38  ;;  %v4606_v54 = vmul.f32 %v13277_v1, %v13548_v38  ;;  %v16569_v10 = vld [vmem:[#allocation103_spill] sm:$0xff] }
 0x379   : > { %16566 = vst [vmem:[#allocation34_spill] sm:$0xff] %v13568_v9  ;;  %v4713_v34 = vsub.f32 %v16504_v51, %v13226_v8  ;;  %v13575_v2 = vadd.f32 %v4495_v7, %v13408_v23  ;;  %v13578_v52 = vadd.f32 %v4604_v57, %v13248_v15  ;;  %v13580_v13 = vadd.f32 %v4498_v11, %v4492_v16  ;;  %v16574_v23 = vld [vmem:[#allocation99_spill] sm:$0xff]  ;;  %v16577_v11 = vld [vmem:[#allocation92_spill] sm:$0xff]  ;;  %p6093_p5 = por %p6092_p7, %p6091_p9 }
 0x37a   : > { %v13582_v32 = vadd.f32 %v4607_v31, %v4104_v17  ;;  %v4076_v38 = vadd.f32 %v16570_v45, %v16569_v10  ;;  %v13586_v42 = vadd.f32 %v4497_v27, %v4491_v62  ;;  %v13588_v53 = vadd.f32 %v4606_v54, %v4103_v25  ;;  %v16578_v31 = vld [vmem:[#allocation169_spill] sm:$0xff] }
 0x37b   : > { %16567 = vst [vmem:[#allocation53_spill] sm:$0xff] %v13578_v52  ;;  %v13591_v51 = vmul.f32 %v13551_v61, %v4713_v34  ;;  %v4078_v7 = vadd.f32 %v16574_v23, %v16573_v19  ;;  %v4581_v15 = vmul.f32 %v13277_v1, %v13289_v43  ;;  %v4715_v16 = vsub.f32 %v16510_v12, %v13274_v0  ;;  %p6094_p6 = pnand %p6093_p5, %p6087_p4 }
 0x37c   : > { %16568 = vst [vmem:[#allocation188_spill] sm:$0xff] %v13582_v32  ;;  %16571 = vst [vmem:[#allocation184_spill] sm:$0xff] %v13588_v53  ;;  %v4074_v62 = vmul.f32 %v12722_v14, %v12849_v6  ;;  %v4585_v17 = vadd.f32 %v4579_v29, %v4076_v38  ;;  %v4703_v45 = vsel %vm4702_vm4, %v13239_v55, %v13226_v8  ;;  %v13615_v6 = vpop.permute.xlu1 %4796  ;;  %v6015_v8 = vld [vmem:[%s6307_s10 + $0x10] sm:$0xff] }
 0x37d   : > { %16572 = vst [vmem:[#allocation192_spill] sm:$0xff] %v13591_v51  ;;  %v5064_v25 = vmul.f32 %v13568_v9, %v13591_v51  ;;  %v4578_v19 = vmul.f32 %v13277_v1, %v13257_v44  ;;  %v4712_v10 = vsub.f32 %v16507_v26, %v4703_v45  ;;  %v13610_v57 = vmul.f32 %v13551_v61, %v4715_v16  ;;  %v13624_v26 = vpop.permute.xlu0 %4794  ;;  %v16584_v45 = vld [vmem:[#allocation106_spill] sm:$0xff] }
 0x37e   : > { %v4704_v14 = vsel %vm4702_vm4, %v13284_v3, %v13274_v0  ;;  %v4583_v12 = vmul.f32 %v13277_v1, %v13304_v21  ;;  %v4717_v38 = vsub.f32 %v16523_v50, %v13307_v48  ;;  %v4075_v27 = vadd.f32 %v16578_v31, %v16577_v11  ;;  %v16580_v1 = vld [vmem:[#allocation82_spill] sm:$0xff] }
 0x37f   : > { %16575 = vst [vmem:[#allocation193_spill] sm:$0xff] %v13610_v57  ;;  %v13619_v29 = vadd.f32 %v5064_v25, %v4585_v17  ;;  %v4714_v55 = vsub.f32 %v6015_v8, %v4704_v14  ;;  %v4587_v54 = vadd.f32 %v4581_v15, %v4078_v7  ;;  %v13629_v0 = vmul.f32 %v13551_v61, %v4712_v10  ;;  %v16609_v32 = vld [vmem:[#allocation38_spill] sm:$0xff] }
 0x380   : > { %v5066_v3 = vmul.f32 %v13568_v9, %v13610_v57  ;;  %v4080_v34 = vadd.f32 %v4074_v62, %v16580_v1  ;;  %v13638_v16 = vmul.f32 %v13551_v61, %v4717_v38  ;;  %v4705_v50 = vsel %vm4702_vm4, %v13319_v5, %v13307_v48  ;;  %v16585_v62 = vld [vmem:[#allocation206_spill] sm:$0xff]  ;;  %v16586_v38 = vld [vmem:[#allocation79_spill] sm:$0xff]  ;;  %v13664_v31 = vpop.permute.xlu1 %4346 }
 0x381   : > { %16576 = vst [vmem:[#allocation112_spill] sm:$0xff] %v13619_v29  ;;  %16579 = vst [vmem:[#allocation197_spill] sm:$0xff] %v13629_v0  ;;  %v13635_v23 = vmul.f32 %v13551_v61, %v4714_v55  ;;  %v4584_v17 = vadd.f32 %v4578_v19, %v4075_v27  ;;  %v5063_v7 = vmul.f32 %v13568_v9, %v13629_v0  ;;  %v16587_v48 = vld [vmem:[#allocation162_spill] sm:$0xff]  ;;  %v4506_v19 = vadd.f32 1e-09, %v13486_v18  ;;  %v16592_v27 = vld [vmem:[#allocation23_spill] sm:$0xff] }
 0x382   : > { %16582 = vst [vmem:[#allocation126_spill] sm:$0xff] %v13638_v16  ;;  %v13645_v15 = vadd.f32 %v5066_v3, %v4587_v54  ;;  %v4716_v25 = vsub.f32 %v16525_v59, %v4705_v50  ;;  %v3286_v10 = vmul.f32 %v16585_v62, %v16584_v45  ;;  %v4589_v14 = vadd.f32 %v4583_v12, %v4080_v34  ;;  %v16591_v12 = vld [vmem:[#allocation146_spill] sm:$0xff]  ;;  %v16593_v3 = vld [vmem:[#allocation105_spill] sm:$0xff]  ;;  %v16594_v1 = vld [vmem:[#allocation123_spill] sm:$0xff] }
 0x383   : > { %16581 = vst [vmem:[#allocation130_spill] sm:$0xff] %v13635_v23  ;;  %v5065_v8 = vmul.f32 %v13568_v9, %v13635_v23  ;;  %v5068_v55 = vmul.f32 %v13568_v9, %v13638_v16  ;;  %v13656_v5 = vadd.f32 %v16587_v48, %v16586_v38  ;;  %v13659_v11 = vadd.f32 %v5063_v7, %v4584_v17  ;;  %v16595_v50 = vld [vmem:[#allocation133_spill] sm:$0xff]  ;;  %v13675_v38 = vpop.permute.xlu0 %4344  ;;  %v16598_v18 = vld [vmem:[#allocation63_spill] sm:$0xff]  ;;  %v16602_v48 = vld [vmem:[#allocation48_spill] sm:$0xff] }
 0x384   : > { %16583 = vst [vmem:[#allocation102_spill] sm:$0xff] %v13645_v15  ;;  %v13662_v59 = vmul.f32 %v13551_v61, %v4716_v25  ;;  %v3278_v54 = vadd.f32 %v16592_v27, %v16591_v12  ;;  %v3290_v34 = vadd.f32 %v16594_v1, %v16593_v3  ;;  %v16599_v17 = vld [vmem:[#allocation107_spill] sm:$0xff]  ;;  %v4505_v12 = vadd.f32 1e-09, %v13493_v47  ;;  %v16604_v3 = vld [vmem:[#allocation134_spill] sm:$0xff] }
 0x385   : > { %16588 = vst [vmem:[#allocation129_spill] sm:$0xff] %v13656_v5  ;;  %16589 = vst [vmem:[#allocation44_spill] sm:$0xff] %v13659_v11  ;;  %v13671_v45 = vadd.f32 %v5065_v8, %v16595_v50  ;;  %v13673_v62 = vadd.f32 %v5068_v55, %v4589_v14  ;;  %v13679_v7 = vadd.f32 %v16599_v17, %v16598_v18  ;;  %v16601_v25 = vld [vmem:[#allocation55_spill] sm:$0xff]  ;;  %v16606_v14 = vld [vmem:[#allocation141_spill] sm:$0xff]  ;;  %5831 = vrsqrt.f32 %v4506_v19 }
 0x386   : > { %16590 = vst [vmem:[#allocation145_spill] sm:$0xff] %v13662_v59  ;;  %v13683_v53 = vmul.f32 %v16602_v48, %v16601_v25  ;;  %v5067_v27 = vmul.f32 %v13568_v9, %v13662_v59  ;;  %v16605_v8 = vld [vmem:[#allocation31_spill] sm:$0xff]  ;;  %v13691_v55 = vadd.f32 %v3286_v10, %v16606_v14  ;;  %v16608_v50 = vld [vmem:[#allocation93_spill] sm:$0xff]  ;;  %v16612_v25 = vld [vmem:[#allocation18_spill] sm:$0xff]  ;;  %5833 = vrsqrt.f32 %v4505_v12 }
 0x387   : > { %16596 = vst [vmem:[#allocation62_spill] sm:$0xff] %v13671_v45  ;;  %16597 = vst [vmem:[#allocation171_spill] sm:$0xff] %v13673_v62  ;;  %v3280_v1 = vadd.f32 %v16605_v8, %v16604_v3  ;;  %v13695_v52 = vmul.f32 %v16609_v32, %v16608_v50  ;;  %v16610_v18 = vld [vmem:[#allocation69_spill] sm:$0xff]  ;;  %v16613_v48 = vld [vmem:[#allocation211_spill] sm:$0xff]  ;;  %v4508_v62 = vadd.f32 1e-09, %v13543_v40 }
 0x388   : > { %16600 = vst [vmem:[#allocation94_spill] sm:$0xff] %v13679_v7  ;;  %16603 = vst [vmem:[#allocation172_spill] sm:$0xff] %v13683_v53  ;;  %v13699_v17 = vmul.f32 %v16609_v32, %v16610_v18  ;;  %v3735_v47 = vmul.f32 %v16613_v48, %v16612_v25  ;;  %v16614_v45 = vld [vmem:[#allocation56_spill] sm:$0xff]  ;;  %v16616_v10 = vld [vmem:[#allocation114_spill] sm:$0xff]  ;;  %v4507_v32 = vadd.f32 1e-09, %v13575_v2 }
 0x389   : > { %16607 = vst [vmem:[#allocation194_spill] sm:$0xff] %v13691_v55  ;;  %v13705_v3 = vadd.f32 %v5067_v27, %v16614_v45  ;;  %v3747_v8 = vmul.f32 %v16613_v48, %v16616_v10  ;;  %v16617_v14 = vld [vmem:[#allocation16_spill] sm:$0xff]  ;;  %v16618_v50 = vld [vmem:[#allocation73_spill] sm:$0xff]  ;;  %v16619_v18 = vld [vmem:[#allocation150_spill] sm:$0xff]  ;;  %v4510_v48 = vadd.f32 1e-09, %v13580_v13  ;;  %v13724_v10 = vpop.permute.xlu1 %4350  ;;  %5835 = vrsqrt.f32 %v4508_v62 }
 0x38a   : > { %16611 = vst [vmem:[#allocation144_spill] sm:$0xff] %v13699_v17  ;;  %v13711_v11 = vmul.f32 %v16618_v50, %v16617_v14  ;;  %v16620_v15 = vld [vmem:[#allocation154_spill] sm:$0xff]  ;;  %v16623_v45 = vld [vmem:[#allocation64_spill] sm:$0xff]  ;;  %v16624_v27 = vld [vmem:[#allocation81_spill] sm:$0xff]  ;;  %v4509_v29 = vadd.f32 1e-09, %v13586_v42  ;;  %5837 = vrsqrt.f32 %v4507_v32  ;;  %v4765_v32 = vsub.f32 %v16549_v33, %v13427_v20 }
 0x38b   : > { %16615 = vst [vmem:[#allocation132_spill] sm:$0xff] %v13705_v3  ;;  %v4751_v25 = vsel %vm4702_vm4, %v16620_v15, %v16619_v18  ;;  %v16621_v19 = vld [vmem:[#allocation14_spill] sm:$0xff]  ;;  %v3737_v3 = vmul.f32 %v16624_v27, %v16623_v45  ;;  %v16625_v14 = vld [vmem:[#allocation41_spill] sm:$0xff]  ;;  %v6016_v9 = vld [vmem:[%s6307_s10 + $0x38] sm:$0xfe]  ;;  %v13734_v45 = vpop.permute.xlu0 %4348  ;;  %5839 = vrsqrt.f32 %v4510_v48 }
 0x38c   : > { %v13719_v40 = vmul.f32 %v16618_v50, %v16621_v19  ;;  %v3749_v2 = vmul.f32 %v16624_v27, %v16625_v14  ;;  %v4761_v15 = vsub.f32 %v6016_v9, %v16619_v18  ;;  %v16626_v50 = vld [vmem:[#allocation54_spill] sm:$0xff]  ;;  %v16627_v12 = vld [vmem:[#allocation213_spill] sm:$0xff]  ;;  %v4808_v18 = vsub.f32 %v16551_v4, %v13491_v60  ;;  %v14038_v7 = vld [vmem:[%s6307_s10 + $0xf8] sm:$0xfe] }
 0x38d   : > { %v4752_v19 = vsel %vm4702_vm4, %v13401_v30, %v16626_v50  ;;  %v13737_v55 = vadd.f32 %v3735_v47, %v16627_v12  ;;  %v16628_v13 = vld [vmem:[#allocation25_spill] sm:$0xff]  ;;  %v6017_v27 = vld [vmem:[%s6307_s10 + $0x30] sm:$0xfe]  ;;  %v4753_v30 = vsel %vm4702_vm4, %v13438_v24, %v13427_v20  ;;  %v16630_v47 = vld [vmem:[#allocation199_spill] sm:$0xff]  ;;  %5841 = vrsqrt.f32 %v4509_v29  ;;  %16675 = vst [vmem:[#allocation51_spill] sm:$0xff] %v14038_v7 }
 0x38e   : > { %16622 = vst [vmem:[#allocation148_spill] sm:$0xff] %v13719_v40  ;;  %v16629_v53 = vld [vmem:[#allocation161_spill] sm:$0xff]  ;;  %v4760_v14 = vsub.f32 %v6017_v27, %v4751_v25  ;;  %v13750_v12 = vadd.f32 %v3747_v8, %v16630_v47  ;;  %v13755_v25 = vadd.f32 %v3737_v3, %v3278_v54  ;;  %v13757_v27 = vadd.f32 %v3749_v2, %v3290_v34  ;;  %v16634_v24 = vld [vmem:[#allocation39_spill] sm:$0xff]  ;;  %v16637_v8 = vld [vmem:[#allocation122_spill] sm:$0xff]  ;;  %v13774_v54 = vpop.permute.xlu1 %4354 }
 0x38f   : > { %v3739_v40 = vmul.f32 %v16629_v53, %v16628_v13  ;;  %v6018_v42 = vld [vmem:[%s6307_s10 + $0x48] sm:$0xff]  ;;  %v6019_v13 = vld [vmem:[%s6307_s10 + $0x40] sm:$0xff]  ;;  %v6020_v33 = vld [vmem:[%s6307_s10 + $0x50] sm:$0x1]  ;;  %v13788_v47 = vpop.permute.xlu0 %4352 }
 0x390   : > { %v4763_v9 = vsub.f32 %v6018_v42, %v16626_v50  ;;  %16631 = vst [vmem:[#allocation195_spill] sm:$0xff] %v13750_v12  ;;  %v4762_v62 = vsub.f32 %v6019_v13, %v4752_v19  ;;  %16632 = vst [vmem:[#allocation115_spill] sm:$0xff] %v13757_v27  ;;  %v13760_v50 = vmul.f32 %v4761_v15, %v13551_v61  ;;  %v16635_v42 = vld [vmem:[#allocation170_spill] sm:$0xff]  ;;  %v16646_v13 = vld [vmem:[#allocation108_spill] sm:$0xff] }
 0x391   : > { %v13764_v4 = vmul.f32 %v16635_v42, %v16634_v24  ;;  %v13768_v48 = vmul.f32 %v16635_v42, %v16637_v8  ;;  %v13771_v19 = vmul.f32 %v4760_v14, %v13551_v61  ;;  %v4764_v20 = vsub.f32 %v6020_v33, %v4753_v30  ;;  %v16641_v29 = vld [vmem:[#allocation74_spill] sm:$0xff]  ;;  %v16652_v42 = vld [vmem:[#allocation32_spill] sm:$0xff]  ;;  %v16653_v8 = vld [vmem:[#allocation91_spill] sm:$0xff] }
 0x392   : > { %16633 = vst [vmem:[#allocation12_spill] sm:$0xff] %v13760_v50  ;;  %v13776_v34 = vadd.f32 %v3739_v40, %v3280_v1  ;;  %v13780_v3 = vmul.f32 %v16629_v53, %v16641_v29  ;;  %v13783_v2 = vmul.f32 %v4763_v9, %v13551_v61  ;;  %v13786_v15 = vmul.f32 %v4808_v18, %v13551_v61  ;;  %v16645_v14 = vld [vmem:[#allocation58_spill] sm:$0xff]  ;;  %v16651_v9 = vld [vmem:[#allocation151_spill] sm:$0xff]  ;;  %v13972_v27 = vld [vmem:[%s6307_s10 + $0xc8] sm:$0xfe] }
 0x393   : > { %16636 = vst [vmem:[#allocation140_spill] sm:$0xff] %v13764_v4  ;;  %16638 = vst [vmem:[#allocation142_spill] sm:$0xff] %v13768_v48  ;;  %v13792_v24 = vmul.f32 %v16646_v13, %v16645_v14  ;;  %v16647_v30 = vld [vmem:[#allocation22_spill] sm:$0xff]  ;;  %v13799_v40 = vmul.f32 %v4762_v62, %v13551_v61  ;;  %v13802_v53 = vmul.f32 %v4765_v32, %v13551_v61  ;;  %v14033_v4 = vld [vmem:[%s6307_s10 + $0xe0] sm:$0x1] }
 0x394   : > { %16639 = vst [vmem:[#allocation138_spill] sm:$0xff] %v13771_v19  ;;  %16640 = vst [vmem:[#allocation128_spill] sm:$0xff] %v13776_v34  ;;  %v13796_v1 = vmul.f32 %v16646_v13, %v16647_v30  ;;  %v13806_v18 = vmul.f32 %v16652_v42, %v16651_v9  ;;  %v13810_v33 = vmul.f32 %v16652_v42, %v16653_v8  ;;  %v13826_v9 = vpop.eup %5831  ;;  %v14006_v17 = vld [vmem:[%s6307_s10 + $0xd0] sm:$0xff] }
 0x395   : > { %16642 = vst [vmem:[#allocation70_spill] sm:$0xff] %v13780_v3  ;;  %16643 = vst [vmem:[#allocation139_spill] sm:$0xff] %v13783_v2  ;;  %v4967_v29 = vmul.f32 %v13760_v50, %v13760_v50  ;;  %v4810_v14 = vsub.f32 %v13457_v58, %v13561_v35  ;;  %v4961_v62 = vmul.f32 %v13591_v51, %v13591_v51  ;;  %v13968_v3 = vld [vmem:[%s6307_s10 + $0xb0] sm:$0x1] }
 0x396   : > { %16644 = vst [vmem:[#allocation131_spill] sm:$0xff] %v13786_v15  ;;  %16648 = vst [vmem:[#allocation202_spill] sm:$0xff] %v13796_v1  ;;  %v4966_v32 = vmul.f32 %v13771_v19, %v13771_v19  ;;  %v13821_v13 = vmul.f32 %v4764_v20, %v13551_v61  ;;  %v4798_v30 = vsel %vm4702_vm4, %v13505_v36, %v13491_v60  ;;  %v13846_v19 = vpop.eup %5833 }
 0x397   : > { %16649 = vst [vmem:[#allocation160_spill] sm:$0xff] %v13799_v40  ;;  %16650 = vst [vmem:[#allocation87_spill] sm:$0xff] %v13802_v53  ;;  %v4960_v42 = vmul.f32 %v13629_v0, %v13629_v0  ;;  %v4963_v58 = vmul.f32 %v13610_v57, %v13610_v57  ;;  %v4969_v8 = vmul.f32 %v13783_v2, %v13783_v2  ;;  %v13844_v57 = vpop.permute.xlu1 %4395 }
 0x398   : > { %16654 = vst [vmem:[#allocation47_spill] sm:$0xff] %v13810_v33  ;;  %16655 = vst [vmem:[#allocation80_spill] sm:$0xff] %v13821_v13  ;;  %v4979_v51 = vmul.f32 %v13786_v15, %v13786_v15  ;;  %v4962_v20 = vmul.f32 %v13635_v23, %v13635_v23  ;;  %v4965_v60 = vmul.f32 %v13638_v16, %v13638_v16  ;;  %v4394_v16 = vpop.permute.xlu0 %4393  ;;  %v13995_v33 = vld [vmem:[%s6307_s10 + $0xd8] sm:$0xff] }
 0x399   : > { %v4968_v36 = vmul.f32 %v13799_v40, %v13799_v40  ;;  %v4971_v0 = vmul.f32 %v13802_v53, %v13802_v53  ;;  %v4964_v15 = vmul.f32 %v13662_v59, %v13662_v59  ;;  %v4973_v2 = vadd.f32 %v4967_v29, %v4961_v62  ;;  %v13867_v29 = vpop.eup %5835  ;;  %16665 = vst [vmem:[#allocation165_spill] sm:$0xff] %v13968_v3 }
 0x39a   : > { %v4807_v23 = vsub.f32 %v13435_v41, %v4798_v30  ;;  %v13852_v50 = vmul.f32 %v4810_v14, %v13551_v61  ;;  %v13854_v48 = vadd.f32 %v4966_v32, %v4960_v42  ;;  %v4970_v53 = vmul.f32 %v13821_v13, %v13821_v13  ;;  %v13874_v32 = vld [vmem:[%s6307_s10 + $0x98] sm:$0xfe]  ;;  %v16663_v13 = vld [vmem:[#allocation212_spill] sm:$0xff]  ;;  %16666 = vst [vmem:[#allocation83_spill] sm:$0xff] %v13972_v27 }
 0x39b   : > { %v13861_v40 = vsel %vm4702_vm4, %v13572_v37, %v13561_v35  ;;  %v13865_v59 = vmul.f32 %v13826_v9, %v13242_v39  ;;  %v13869_v41 = vadd.f32 %v4969_v8, %v4963_v58  ;;  %v4985_v14 = vadd.f32 %v4979_v51, %v4973_v2  ;;  %16657 = vst [vmem:[#allocation66_spill] sm:$0xff] %v13874_v32  ;;  %v13878_v35 = vpop.eup %5837 }
 0x39c   : > { %16656 = vst [vmem:[#allocation78_spill] sm:$0xff] %v13852_v50  ;;  %v4812_v62 = vsub.f32 %v13514_v28, %v13615_v6  ;;  %v4366_v30 = vsub.f32 %v13874_v32, %v13664_v31  ;;  %v13880_v37 = vadd.f32 %v4968_v36, %v4962_v20  ;;  %v13882_v39 = vadd.f32 %v4971_v0, %v4965_v60  ;;  %v13893_v51 = vpop.eup %5839  ;;  %v13913_v20 = vld [vmem:[%s6307_s10 + $0x90] sm:$0xfe]  ;;  %v4400_v36 = vpop.permute.xlu1 %4399  ;;  %v13947_v32 = vld [vmem:[%s6307_s10 + $0xb8] sm:$0x1] }
 0x39d   : > { %v13887_v42 = vsel %vm4702_vm4, %v13624_v26, %v13615_v6  ;;  %v13891_v28 = vmul.f32 %v13846_v19, %v13257_v44  ;;  %v13896_v2 = vmul.f32 %v4807_v23, %v13551_v61  ;;  %v13900_v58 = vmul.f32 %v13852_v50, %v13852_v50  ;;  %v13907_v26 = vpop.eup %5841  ;;  %16658 = vst [vmem:[#allocation120_spill] sm:$0xff] %v13913_v20 }
 0x39e   : > { %v4356_v6 = vsel %vm2167_vm2, %v13675_v38, %v13664_v31  ;;  %v13909_v44 = vadd.f32 %v4970_v53, %v4964_v15  ;;  %v4372_v8 = vmul.f32 %v4366_v30, %v13208_v56  ;;  %v13918_v60 = vmul.f32 %v13867_v29, %v13289_v43  ;;  %v13926_v38 = vld [vmem:[%s6307_s10 + $0xa8] sm:$0xff]  ;;  %v16660_v53 = vld [vmem:[#allocation136_spill] sm:$0xff]  ;;  %16662 = vst [vmem:[#allocation95_spill] sm:$0xff] %v13947_v32 }
 0x39f   : > { %v4365_v23 = vsub.f32 %v13913_v20, %v4356_v6  ;;  %v13920_v0 = vadd.f32 1e-09, %v4985_v14  ;;  %v13923_v31 = vmul.f32 %v4812_v62, %v13551_v61  ;;  %16659 = vst [vmem:[#allocation13_spill] sm:$0xff] %v13926_v38  ;;  %v4368_v15 = vsub.f32 %v13926_v38, %v13724_v10  ;;  %v4398_v6 = vpop.permute.xlu0 %4397  ;;  %16670 = vst [vmem:[#allocation71_spill] sm:$0xff] %v13995_v33 }
 0x3a0   : > { %v13932_v30 = vmul.f32 %v13878_v35, %v16660_v53  ;;  %v4357_v62 = vsel %vm2167_vm2, %v13734_v45, %v13724_v10  ;;  %v13942_v50 = vmul.f32 %v13893_v51, %v13304_v21  ;;  %v16661_v53 = vld [vmem:[#allocation186_spill] sm:$0xff]  ;;  %v4370_v43 = vsub.f32 %v13947_v32, %v13774_v54  ;;  %16672 = vst [vmem:[#allocation176_spill] sm:$0xff] %v14006_v17 }
 0x3a1   : > { %v4371_v14 = vmul.f32 %v4365_v23, %v13208_v56  ;;  %v4374_v38 = vmul.f32 %v4368_v15, %v13208_v56  ;;  %v4367_v20 = vsub.f32 %v16661_v53, %v4357_v62  ;;  %v13953_v23 = vmul.f32 %v13907_v26, %v16663_v13  ;;  %v16664_v15 = vld [vmem:[#allocation68_spill] sm:$0xff] }
 0x3a2   : > { %v4536_v10 = vmul.f32 %v13865_v59, %v4372_v8  ;;  %v4358_v21 = vsel %vm2167_vm2, %v13788_v47, %v13774_v54  ;;  %v13962_v62 = vmul.f32 %v13826_v9, %v16664_v15  ;;  %v4376_v13 = vmul.f32 %v4370_v43, %v13208_v56  ;;  %v16667_v47 = vld [vmem:[#allocation17_spill] sm:$0xff] }
 0x3a3   : > { %v4535_v45 = vmul.f32 %v13891_v28, %v4371_v14  ;;  %v4538_v53 = vmul.f32 %v13918_v60, %v4374_v38  ;;  %v4373_v32 = vmul.f32 %v4367_v20, %v13208_v56  ;;  %v4369_v8 = vsub.f32 %v13968_v3, %v4358_v21  ;;  %v4404_v14 = vpop.permute.xlu1 %4403  ;;  %v16668_v38 = vld [vmem:[#allocation19_spill] sm:$0xff]  ;;  %v4402_v1 = vpop.permute.xlu0 %4401 }
 0x3a4   : > { %v4415_v54 = vsub.f32 %v13972_v27, %v13844_v57  ;;  %v13978_v15 = vmul.f32 %v13846_v19, %v16667_v47  ;;  %v4405_v20 = vsel %vm2167_vm2, %v4394_v16, %v13844_v57  ;;  %v13984_v43 = vmul.f32 %v13867_v29, %v16668_v38  ;;  %v13990_v27 = vld [vmem:[%s6307_s10 + $0xc0] sm:$0xfe]  ;;  %v16671_v16 = vld [vmem:[#allocation177_spill] sm:$0xff] }
 0x3a5   : > { %v4537_v21 = vmul.f32 %v13932_v30, %v4373_v32  ;;  %v4540_v3 = vmul.f32 %v13942_v50, %v4376_v13  ;;  %v4375_v5 = vmul.f32 %v4369_v8, %v13208_v56  ;;  %16669 = vst [vmem:[#allocation86_spill] sm:$0xff] %v13990_v27  ;;  %v4414_v47 = vsub.f32 %v13990_v27, %v4405_v20 }
 0x3a6   : > { %v4421_v12 = vmul.f32 %v4415_v54, %v13208_v56  ;;  %v4417_v57 = vsub.f32 %v13995_v33, %v4400_v36  ;;  %v14000_v38 = vmul.f32 %v13878_v35, %v16671_v16  ;;  %v4406_v32 = vsel %vm2167_vm2, %v4398_v6, %v4400_v36  ;;  %v14016_v33 = vld [vmem:[%s6307_s10 + $0xe8] sm:$0x1] }
 0x3a7   : > { %v4539_v13 = vmul.f32 %v13953_v23, %v4375_v5  ;;  %v4420_v8 = vmul.f32 %v4414_v47, %v13208_v56  ;;  %v4416_v20 = vsub.f32 %v14006_v17, %v4406_v32  ;;  %v14011_v54 = vmul.f32 %v13893_v51, %v13431_v22  ;;  %16673 = vst [vmem:[#allocation196_spill] sm:$0xff] %v14016_v33  ;;  %v16674_v32 = vld [vmem:[#allocation189_spill] sm:$0xff] }
 0x3a8   : > { %v4542_v27 = vmul.f32 %v13962_v62, %v4421_v12  ;;  %v4423_v16 = vmul.f32 %v4417_v57, %v13208_v56  ;;  %v4419_v5 = vsub.f32 %v14016_v33, %v4404_v14  ;;  %v14021_v36 = vmul.f32 %v13907_v26, %v13442_v63  ;;  %v4445_v57 = vpop.permute.xlu1 %4444 }
 0x3a9   : > { %v4541_v6 = vmul.f32 %v13978_v15, %v4420_v8  ;;  %v4422_v47 = vmul.f32 %v4416_v20, %v13208_v56  ;;  %v4407_v22 = vsel %vm2167_vm2, %v4402_v1, %v4404_v14  ;;  %v14028_v12 = vmul.f32 %v13826_v9, %v16674_v32  ;;  %v16676_v9 = vld [vmem:[#allocation198_spill] sm:$0xff] }
 0x3aa   : > { %v4548_v17 = vadd.f32 %v4542_v27, %v4536_v10  ;;  %v4544_v34 = vmul.f32 %v13984_v43, %v4423_v16  ;;  %v4425_v33 = vmul.f32 %v4419_v5, %v13208_v56  ;;  %v4418_v63 = vsub.f32 %v14033_v4, %v4407_v22  ;;  %v4443_v27 = vpop.permute.xlu0 %4442 }
 0x3ab   : > { %v4547_v8 = vadd.f32 %v4541_v6, %v4535_v45  ;;  %v4543_v20 = vmul.f32 %v14000_v38, %v4422_v47  ;;  %v4464_v1 = vsub.f32 %v14038_v7, %v4445_v57  ;;  %v14043_v14 = vmul.f32 %v13846_v19, %v16676_v9  ;;  %v14050_v6 = vld [vmem:[%s6307_s10 + $0xf0] sm:$0xfe]  ;;  %v16677_v7 = vld [vmem:[#allocation45_spill] sm:$0xff] }
 0x3ac   : > { %v4550_v10 = vadd.f32 %v4544_v34, %v4538_v53  ;;  %v4546_v16 = vmul.f32 %v14011_v54, %v4425_v33  ;;  %v4424_v5 = vmul.f32 %v4418_v63, %v13208_v56  ;;  %v4454_v32 = vsel %vm2167_vm2, %v4443_v27, %v4445_v57  ;;  %v16678_v33 = vld [vmem:[#allocation57_spill] sm:$0xff] }
 0x3ad   : > { %v4549_v22 = vadd.f32 %v4543_v20, %v4537_v21  ;;  %v4470_v45 = vmul.f32 %v4464_v1, %v13208_v56  ;;  %v4463_v47 = vsub.f32 %v14050_v6, %v4454_v32  ;;  %v14055_v19 = vmul.f32 %v13867_v29, %v16677_v7  ;;  %v16679_v57 = vld [vmem:[#allocation85_spill] sm:$0xff]  ;;  %v4449_v29 = vpop.permute.xlu1 %4448  ;;  %v16680_v1 = vld [vmem:[#allocation159_spill] sm:$0xff] }
 0x3ae   : > { %v4552_v9 = vadd.f32 %v4546_v16, %v4540_v3  ;;  %v4545_v34 = vmul.f32 %v14021_v36, %v4424_v5  ;;  %v14060_v53 = vmul.f32 %v13878_v35, %v16678_v33  ;;  %v14064_v21 = vmul.f32 %v13893_v51, %v16679_v57  ;;  %v4447_v3 = vpop.permute.xlu0 %4446  ;;  %v14081_v5 = vld [vmem:[%s6307_s10 + $0x108] sm:$0xff]  ;;  %v14089_v57 = vld [vmem:[%s6307_s10 + $0x100] sm:$0xff] }
 0x3af   : > { %v4978_v63 = vmul.f32 %v13896_v2, %v13896_v2  ;;  %v4554_v20 = vmul.f32 %v14028_v12, %v4470_v45  ;;  %v4469_v7 = vmul.f32 %v4463_v47, %v13208_v56  ;;  %v14072_v27 = vmul.f32 %v13907_v26, %v16680_v1 }
 0x3b0   : > { %v16681_v35 = vsub.f32 %v13510_v46, %v13861_v40  ;;  %v4551_v51 = vadd.f32 %v4545_v34, %v4539_v13  ;;  %v4466_v32 = vsub.f32 %v14081_v5, %v4449_v29  ;;  %v4455_v45 = vsel %vm2167_vm2, %v4447_v3, %v4449_v29 }
 0x3b1   : > { %v4987_v47 = vadd.f32 %v13900_v58, %v13869_v41  ;;  %v4560_v33 = vadd.f32 %v4554_v20, %v4548_v17  ;;  %v4553_v26 = vmul.f32 %v14043_v14, %v4469_v7  ;;  %v4465_v46 = vsub.f32 %v14089_v57, %v4455_v45  ;;  %v16684_v58 = vld [vmem:[#allocation65_spill] sm:$0xff]  ;;  %v16686_v45 = vld [vmem:[#allocation76_spill] sm:$0xff] }
 0x3b2   : > { %v14078_v16 = vmul.f32 %v16681_v35, %v13551_v61  ;;  %5843 = vrsqrt.f32 %v13920_v0  ;;  %v4983_v40 = vmul.f32 %v13923_v31, %v13923_v31  ;;  %v16682_v13 = vsub.f32 %v13528_v49, %v13887_v42  ;;  %v4453_v0 = vpop.permute.xlu1 %4452  ;;  %v4451_v3 = vpop.permute.xlu0 %4450  ;;  %v14109_v49 = vld [vmem:[%s6307_s10 + $0x118] sm:$0x1] }
 0x3b3   : > { %v4472_v17 = vmul.f32 %v4466_v32, %v13208_v56  ;;  %v4984_v41 = vadd.f32 %v4978_v63, %v13854_v48  ;;  %v4566_v20 = vmul.f32 %v4560_v33, %v16684_v58  ;;  %v4559_v7 = vadd.f32 %v4553_v26, %v4547_v8  ;;  %16685 = vst [vmem:[#allocation127_spill] sm:$0xff] %v14109_v49  ;;  %v14117_v33 = vld [vmem:[%s6307_s10 + $0x110] sm:$0x1] }
 0x3b4   : > { %v14099_v34 = vmul.f32 %v16682_v13, %v13551_v61  ;;  %v4471_v29 = vmul.f32 %v4465_v46, %v13208_v56  ;;  %v4980_v1 = vmul.f32 %v14078_v16, %v14078_v16  ;;  %v4468_v42 = vsub.f32 %v14109_v49, %v4453_v0 }
 0x3b5   : > { %v4556_v35 = vmul.f32 %v14055_v19, %v4472_v17  ;;  %v4456_v32 = vsel %vm2167_vm2, %v4451_v3, %v4453_v0  ;;  %v4572_v48 = vadd.f32 %v4566_v20, %v16686_v45  ;;  %v4565_v63 = vmul.f32 %v4559_v7, %v16684_v58 }
 0x3b6   : > { %16683 = vst [vmem:[#allocation181_spill] sm:$0xff] %v14099_v34  ;;  %v4555_v8 = vmul.f32 %v14060_v53, %v4471_v29  ;;  %v4467_v26 = vsub.f32 %v14117_v33, %v4456_v32  ;;  %v4989_v46 = vadd.f32 %v4983_v40, %v13882_v39  ;;  %v4982_v13 = vmul.f32 %v14099_v34, %v14099_v34 }
 0x3b7   : > { %v4562_v17 = vadd.f32 %v4556_v35, %v4550_v10  ;;  %v4474_v49 = vmul.f32 %v4468_v42, %v13208_v56  ;;  %v14125_v0 = vmul.f32 %v4572_v48, %v13865_v59  ;;  %v14128_v20 = vmul.f32 %v4572_v48, %v13962_v62  ;;  %v16687_v10 = vld [vmem:[#allocation104_spill] sm:$0xff] }
 0x3b8   : > { %v4639_v7 = vmul.f32 %v4572_v48, %v14028_v12  ;;  %v4571_v29 = vadd.f32 %v4565_v63, %v16686_v45  ;;  %v4561_v32 = vadd.f32 %v4555_v8, %v4549_v22  ;;  %v4473_v40 = vmul.f32 %v4467_v26, %v13208_v56  ;;  %v16688_v26 = vld [vmem:[#allocation75_spill] sm:$0xff] }
 0x3b9   : > { %v4568_v3 = vmul.f32 %v4562_v17, %v16684_v58  ;;  %v4558_v39 = vmul.f32 %v14064_v21, %v4474_v49  ;;  %v4990_v49 = vadd.f32 1e-09, %v4984_v41  ;;  %v4993_v8 = vadd.f32 1e-09, %v4987_v47 }
 0x3ba   : > { %v14136_v35 = vadd.f32 %v4639_v7, %v16687_v10  ;;  %v4614_v59 = vmul.f32 %v4571_v29, %v13891_v28  ;;  %v14140_v42 = vmul.f32 %v4571_v29, %v13978_v15  ;;  %v4638_v62 = vmul.f32 %v4571_v29, %v14043_v14 }
 0x3bb   : > { %v4574_v12 = vadd.f32 %v4568_v3, %v16686_v45  ;;  %v4567_v48 = vmul.f32 %v4561_v32, %v16684_v58  ;;  %v4564_v63 = vadd.f32 %v4558_v39, %v4552_v9  ;;  %v4557_v22 = vmul.f32 %v14072_v27, %v4473_v40  ;;  %v16689_v3 = vld [vmem:[#allocation49_spill] sm:$0xff] }
 0x3bc   : > { %v4986_v56 = vadd.f32 %v4980_v1, %v13880_v37  ;;  %v14148_v17 = vadd.f32 %v4638_v62, %v16688_v26  ;;  %v4995_v29 = vadd.f32 1e-09, %v4989_v46  ;;  %v4988_v9 = vadd.f32 %v4982_v13, %v13909_v44  ;;  %v16691_v39 = vld [vmem:[#allocation89_spill] sm:$0xff]  ;;  %v16693_v13 = vld [vmem:[#allocation208_spill] sm:$0xff] }
 0x3bd   : > { %v4617_v28 = vmul.f32 %v4574_v12, %v13918_v60  ;;  %v14152_v15 = vmul.f32 %v4574_v12, %v13984_v43  ;;  %v4641_v14 = vmul.f32 %v4574_v12, %v14055_v19  ;;  %v4573_v7 = vadd.f32 %v4567_v48, %v16686_v45  ;;  %v16690_v19 = vld [vmem:[#allocation190_spill] sm:$0xff]  ;;  %v16697_v26 = vld [vmem:[#allocation96_spill] sm:$0xff] }
 0x3be   : > { %v4570_v41 = vmul.f32 %v4564_v63, %v16684_v58  ;;  %v4563_v47 = vadd.f32 %v4557_v22, %v4551_v51  ;;  %v4109_v40 = vmul.f32 %v16691_v39, %v16690_v19  ;;  %5845 = vrsqrt.f32 %v4993_v8  ;;  %v16692_v51 = vld [vmem:[#allocation173_spill] sm:$0xff]  ;;  %v14181_v22 = vpop.permute.xlu1 %4835 }
 0x3bf   : > { %v14159_v37 = vadd.f32 %v4641_v14, %v16689_v3  ;;  %v4616_v1 = vmul.f32 %v4573_v7, %v13932_v30  ;;  %v4628_v60 = vmul.f32 %v4573_v7, %v14000_v38  ;;  %v4640_v43 = vmul.f32 %v4573_v7, %v14060_v53  ;;  %v14164_v32 = vpop.eup %5843  ;;  %v16694_v30 = vld [vmem:[#allocation111_spill] sm:$0xff]  ;;  %v16696_v8 = vld [vmem:[#allocation157_spill] sm:$0xff] }
 0x3c0   : > { %v4576_v44 = vadd.f32 %v4570_v41, %v16686_v45  ;;  %v4569_v46 = vmul.f32 %v4563_v47, %v16684_v58  ;;  %v4107_v10 = vmul.f32 %v16693_v13, %v16692_v51  ;;  %5847 = vrsqrt.f32 %v4990_v49  ;;  %v16698_v7 = vld [vmem:[#allocation205_spill] sm:$0xff]  ;;  %v16699_v49 = vld [vmem:[#allocation179_spill] sm:$0xff] }
 0x3c1   : > { %v4992_v62 = vadd.f32 1e-09, %v4986_v56  ;;  %v14173_v12 = vadd.f32 %v4640_v43, %v16694_v30  ;;  %v4110_v14 = vmul.f32 %v16697_v26, %v16696_v8  ;;  %v4108_v56 = vmul.f32 %v16699_v49, %v16698_v7  ;;  %v16700_v47 = vld [vmem:[#allocation149_spill] sm:$0xff]  ;;  %v4834_v43 = vpop.permute.xlu0 %4833  ;;  %v16704_v30 = vld [vmem:[#allocation215_spill] sm:$0xff]  ;;  %v16708_v8 = vld [vmem:[#allocation94_spill] sm:$0xff] }
 0x3c2   : > { %v4619_v38 = vmul.f32 %v4576_v44, %v13942_v50  ;;  %v14177_v53 = vmul.f32 %v4576_v44, %v14011_v54  ;;  %v4643_v48 = vmul.f32 %v4576_v44, %v14064_v21  ;;  %v4575_v63 = vadd.f32 %v4569_v46, %v16686_v45  ;;  %v16702_v19 = vld [vmem:[#allocation117_spill] sm:$0xff]  ;;  %v16703_v46 = vld [vmem:[#allocation119_spill] sm:$0xff]  ;;  %v16709_v7 = vld [vmem:[#allocation140_spill] sm:$0xff] }
 0x3c3   : > { %16695 = vst [vmem:[#allocation200_spill] sm:$0xff] %v14173_v12  ;;  %5849 = vrsqrt.f32 %v4995_v29  ;;  %v4994_v41 = vadd.f32 1e-09, %v4988_v9  ;;  %v4119_v44 = vmul.f32 %v16693_v13, %v16702_v19  ;;  %v4120_v51 = vmul.f32 %v16699_v49, %v16703_v46  ;;  %v16705_v9 = vld [vmem:[#allocation121_spill] sm:$0xff]  ;;  %v16710_v49 = vld [vmem:[#allocation128_spill] sm:$0xff] }
 0x3c4   : > { %v14188_v3 = vadd.f32 %v4643_v48, %v16700_v47  ;;  %v4618_v50 = vmul.f32 %v4575_v63, %v13953_v23  ;;  %v4630_v54 = vmul.f32 %v4575_v63, %v14021_v36  ;;  %v4642_v21 = vmul.f32 %v4575_v63, %v14072_v27  ;;  %v16707_v36 = vld [vmem:[#allocation59_spill] sm:$0xff] }
 0x3c5   : > { %5851 = vrsqrt.f32 %v4992_v62  ;;  %v3742_v29 = vadd.f32 %v13695_v52, %v16704_v30  ;;  %v4111_v23 = vadd.f32 %v13792_v24, %v13737_v55  ;;  %v3744_v27 = vadd.f32 %v13711_v11, %v16707_v36  ;;  %v14211_v52 = vpop.permute.xlu1 %4839  ;;  %v16712_v55 = vld [vmem:[#allocation42_spill] sm:$0xff]  ;;  %v16713_v24 = vld [vmem:[#allocation144_spill] sm:$0xff]  ;;  %v16719_v36 = vld [vmem:[#allocation129_spill] sm:$0xff] }
 0x3c6   : > { %16701 = vst [vmem:[#allocation61_spill] sm:$0xff] %v14188_v3  ;;  %v14200_v48 = vadd.f32 %v4642_v21, %v16705_v9  ;;  %v4113_v63 = vadd.f32 %v4107_v10, %v13755_v25  ;;  %5853 = vrsqrt.f32 %v4994_v41  ;;  %v3746_v62 = vadd.f32 %v16709_v7, %v16708_v8  ;;  %v16714_v30 = vld [vmem:[#allocation40_spill] sm:$0xff]  ;;  %v16718_v9 = vld [vmem:[#allocation202_spill] sm:$0xff]  ;;  %v16721_v8 = vld [vmem:[#allocation137_spill] sm:$0xff] }
 0x3c7   : > { %v4112_v13 = vadd.f32 %v13806_v18, %v3742_v29  ;;  %v4115_v47 = vadd.f32 %v4109_v40, %v16710_v49  ;;  %v14213_v21 = vadd.f32 %v4614_v59, %v4111_v23  ;;  %v4114_v19 = vadd.f32 %v4108_v56, %v3744_v27  ;;  %v14226_v40 = vpop.permute.xlu0 %4837  ;;  %v16716_v59 = vld [vmem:[#allocation47_spill] sm:$0xff]  ;;  %v16720_v27 = vld [vmem:[#allocation148_spill] sm:$0xff]  ;;  %v16727_v49 = vld [vmem:[#allocation70_spill] sm:$0xff] }
 0x3c8   : > { %16706 = vst [vmem:[#allocation67_spill] sm:$0xff] %v14200_v48  ;;  %v14215_v46 = vadd.f32 %v4616_v1, %v4113_v63  ;;  %v3754_v11 = vadd.f32 %v16713_v24, %v16712_v55  ;;  %v4121_v25 = vmul.f32 %v16691_v39, %v16714_v30  ;;  %v4116_v10 = vadd.f32 %v4110_v14, %v3746_v62  ;;  %v16717_v1 = vld [vmem:[#allocation195_spill] sm:$0xff]  ;;  %v16722_v39 = vld [vmem:[#allocation172_spill] sm:$0xff] }
 0x3c9   : > { %v14222_v18 = vadd.f32 %v14125_v0, %v4112_v13  ;;  %v14224_v41 = vadd.f32 %v4618_v50, %v4115_v47  ;;  %v14228_v29 = vadd.f32 %v4617_v28, %v4114_v19  ;;  %v4123_v23 = vadd.f32 %v16718_v9, %v16717_v1  ;;  %v16723_v0 = vld [vmem:[#allocation97_spill] sm:$0xff]  ;;  %v16725_v13 = vld [vmem:[#allocation115_spill] sm:$0xff]  ;;  %v16726_v28 = vld [vmem:[#allocation194_spill] sm:$0xff]  ;;  %v14252_v30 = vpop.permute.xlu1 %4843 }
 0x3ca   : > { %16711 = vst [vmem:[#allocation156_spill] sm:$0xff] %v14215_v46  ;;  %v4124_v56 = vadd.f32 %v16716_v59, %v3754_v11  ;;  %v3756_v63 = vadd.f32 %v16720_v27, %v16719_v36  ;;  %v3293_v7 = vadd.f32 %v16722_v39, %v16721_v8  ;;  %v4122_v14 = vmul.f32 %v16697_v26, %v16723_v0  ;;  %v16732_v9 = vld [vmem:[#allocation12_spill] sm:$0xff]  ;;  %v16734_v36 = vld [vmem:[#allocation138_spill] sm:$0xff]  ;;  %v16735_v27 = vld [vmem:[#allocation139_spill] sm:$0xff] }
 0x3cb   : > { %16715 = vst [vmem:[#allocation88_spill] sm:$0xff] %v14224_v41  ;;  %v14239_v50 = vadd.f32 %v4619_v38, %v4116_v10  ;;  %v4125_v62 = vadd.f32 %v4119_v44, %v16725_v13  ;;  %v3757_v47 = vadd.f32 %v16727_v49, %v16726_v28  ;;  %v14248_v55 = vadd.f32 %v14140_v42, %v4123_v23  ;;  %v14250_v11 = vpop.eup %5845  ;;  %v16730_v38 = vld [vmem:[#allocation142_spill] sm:$0xff]  ;;  %v16737_v39 = vld [vmem:[#allocation87_spill] sm:$0xff]  ;;  %v16739_v0 = vld [vmem:[#allocation80_spill] sm:$0xff] }
 0x3cc   : > { %v14245_v19 = vadd.f32 %v14128_v20, %v4124_v56  ;;  %v4126_v24 = vadd.f32 %v4120_v51, %v3756_v63  ;;  %v3758_v26 = vadd.f32 %v16730_v38, %v3293_v7  ;;  %v16733_v20 = vld [vmem:[#allocation34_spill] sm:$0xff]  ;;  %v16736_v63 = vld [vmem:[#allocation160_spill] sm:$0xff]  ;;  %v4842_v7 = vpop.permute.xlu0 %4841  ;;  %v4845_v28 = vsel %vm4702_vm4, %v4834_v43, %v14181_v22  ;;  %v16748_v48 = vld [vmem:[#allocation15_spill] sm:$0xff] }
 0x3cd   : > { %16724 = vst [vmem:[#allocation52_spill] sm:$0xff] %v14239_v50  ;;  %16728 = vst [vmem:[#allocation124_spill] sm:$0xff] %v14248_v55  ;;  %v14254_v59 = vadd.f32 %v4628_v60, %v4125_v62  ;;  %v5848_v10 = vpop.eup %5847  ;;  %v4127_v1 = vadd.f32 %v4121_v25, %v3757_v47  ;;  %v5076_v56 = vmul.f32 %v16733_v20, %v16732_v9  ;;  %v16740_v62 = vld [vmem:[#allocation131_spill] sm:$0xff]  ;;  %v16757_v46 = vld [vmem:[#allocation78_spill] sm:$0xff] }
 0x3ce   : > { %v14258_v44 = vadd.f32 %v14152_v15, %v4126_v24  ;;  %v5075_v42 = vmul.f32 %v16733_v20, %v16734_v36  ;;  %v4128_v51 = vadd.f32 %v4122_v14, %v3758_v26  ;;  %v5078_v60 = vmul.f32 %v16733_v20, %v16735_v27  ;;  %v16742_v24 = vld [vmem:[#allocation66_spill] sm:$0xff]  ;;  %v16746_v55 = vld [vmem:[#allocation175_spill] sm:$0xff] }
 0x3cf   : > { %16729 = vst [vmem:[#allocation155_spill] sm:$0xff] %v14254_v59  ;;  %v5077_v8 = vmul.f32 %v16733_v20, %v16736_v63  ;;  %v5080_v15 = vmul.f32 %v16733_v20, %v16737_v39  ;;  %v14272_v25 = vadd.f32 %v4630_v54, %v4127_v1  ;;  %v5079_v13 = vmul.f32 %v16733_v20, %v16739_v0  ;;  %v16743_v26 = vld [vmem:[#allocation214_spill] sm:$0xff]  ;;  %v4883_v54 = vpop.permute.xlu1 %4882 }
 0x3d0   : > { %16731 = vst [vmem:[#allocation125_spill] sm:$0xff] %v14258_v44  ;;  %v14264_v23 = vpop.eup %5849  ;;  %v5088_v14 = vmul.f32 %v16733_v20, %v16740_v62  ;;  %v14281_v49 = vadd.f32 %v14177_v53, %v4128_v51  ;;  %v4855_v38 = vsub.f32 %v16742_v24, %v14181_v22  ;;  %v14286_v59 = vadd.f32 %v5076_v56, %v16743_v26  ;;  %v16750_v53 = vld [vmem:[#allocation120_spill] sm:$0xff]  ;;  %v16755_v56 = vld [vmem:[#allocation98_spill] sm:$0xff] }
 0x3d1   : > { %16738 = vst [vmem:[#allocation24_spill] sm:$0xff] %v14272_v25  ;;  %v16744_v25 = vld [vmem:[#allocation158_spill] sm:$0xff]  ;;  %v14292_v41 = vadd.f32 %v5078_v60, %v16746_v55  ;;  %v14295_v43 = vadd.f32 %v5077_v8, %v16748_v48  ;;  %v4854_v51 = vsub.f32 %v16750_v53, %v4845_v28  ;;  %v16753_v22 = vld [vmem:[#allocation152_spill] sm:$0xff]  ;;  %v14313_v55 = vmul.f32 %v16733_v20, %v13896_v2  ;;  %v16763_v28 = vld [vmem:[#allocation193_spill] sm:$0xff] }
 0x3d2   : > { %16741 = vst [vmem:[#allocation37_spill] sm:$0xff] %v14281_v49  ;;  %v5852_v47 = vpop.eup %5851  ;;  %v14289_v44 = vadd.f32 %v5075_v42, %v16744_v25  ;;  %v16751_v49 = vld [vmem:[#allocation191_spill] sm:$0xff]  ;;  %v14302_v24 = vadd.f32 %v5079_v13, %v16753_v22  ;;  %v14305_v26 = vadd.f32 %v5088_v14, %v16755_v56  ;;  %v14309_v42 = vmul.f32 %v16733_v20, %v16757_v46  ;;  %v16761_v60 = vld [vmem:[#allocation192_spill] sm:$0xff]  ;;  %v4881_v25 = vpop.permute.xlu0 %4880  ;;  %v16762_v13 = vld [vmem:[#allocation197_spill] sm:$0xff] }
 0x3d3   : > { %v5854_v1 = vpop.eup %5853  ;;  %16747 = vst [vmem:[#allocation26_spill] sm:$0xff] %v14292_v41  ;;  %16749 = vst [vmem:[#allocation27_spill] sm:$0xff] %v14295_v43  ;;  %v14299_v50 = vadd.f32 %v5080_v15, %v16751_v49  ;;  %v14317_v48 = vmul.f32 %v16733_v20, %v13923_v31  ;;  %v14321_v8 = vmul.f32 %v14164_v32, %v16761_v60  ;;  %v16764_v53 = vld [vmem:[#allocation130_spill] sm:$0xff]  ;;  %v16765_v56 = vld [vmem:[#allocation83_spill] sm:$0xff] }
 0x3d4   : > { %16745 = vst [vmem:[#allocation77_spill] sm:$0xff] %v14289_v44  ;;  %16754 = vst [vmem:[#allocation163_spill] sm:$0xff] %v14302_v24  ;;  %v4861_v15 = vmul.f32 %v4855_v38, %v13551_v61  ;;  %v14325_v14 = vmul.f32 %v5848_v10, %v16762_v13  ;;  %v14329_v49 = vmul.f32 %v14250_v11, %v16763_v28  ;;  %v16766_v60 = vld [vmem:[#allocation126_spill] sm:$0xff]  ;;  %v16767_v38 = vld [vmem:[#allocation145_spill] sm:$0xff] }
 0x3d5   : > { %16752 = vst [vmem:[#allocation33_spill] sm:$0xff] %v14299_v50  ;;  %16756 = vst [vmem:[#allocation72_spill] sm:$0xff] %v14305_v26  ;;  %v14332_v22 = vmul.f32 %v5852_v47, %v16764_v53  ;;  %v4902_v24 = vsub.f32 %v16765_v56, %v4883_v54  ;;  %v4860_v50 = vmul.f32 %v4854_v51, %v13551_v61  ;;  %v6038_v44 = vld [vmem:[%s6307_s10 + $0xa0] sm:$0xff]  ;;  %s5410_s10 = sld [smem:[#allocation7 + $0x4]] }
 0x3d6   : > { %16758 = vst [vmem:[#allocation28_spill] sm:$0xff] %v14309_v42  ;;  %16759 = vst [vmem:[#allocation210_spill] sm:$0xff] %v14313_v55  ;;  %v14338_v42 = vmul.f32 %v14264_v23, %v16766_v60  ;;  %v14341_v55 = vmul.f32 %v5854_v1, %v16767_v38  ;;  %v14345_v13 = vmul.f32 %v14164_v32, %v16732_v9 }
 0x3d7   : > { %16760 = vst [vmem:[#allocation46_spill] sm:$0xff] %v14317_v48  ;;  %v4887_v48 = vpop.permute.xlu1 %4886  ;;  %v14350_v28 = vmul.f32 %v5848_v10, %v16734_v36  ;;  %v14354_v53 = vmul.f32 %v14250_v11, %v16735_v27  ;;  %v14357_v51 = vmul.f32 %v5852_v47, %v16736_v63  ;;  %v14361_v56 = vmul.f32 %v14264_v23, %v16737_v39  ;;  %v4885_v27 = vpop.permute.xlu0 %4884 }
 0x3d8   : > { %v5021_v9 = vmul.f32 %v14321_v8, %v4861_v15  ;;  %v4846_v36 = vsel %vm4702_vm4, %v14226_v40, %v14211_v52  ;;  %v4892_v60 = vsel %vm4702_vm4, %v4881_v25, %v4883_v54  ;;  %v14371_v38 = vmul.f32 %v5854_v1, %v16739_v0  ;;  %v16769_v54 = vld [vmem:[#allocation71_spill] sm:$0xff] }
 0x3d9   : > { %v4908_v63 = vmul.f32 %v4902_v24, %v13551_v61  ;;  %v4893_v39 = vsel %vm4702_vm4, %v4885_v27, %v4887_v48  ;;  %v14379_v15 = vmul.f32 %v14164_v32, %v16740_v62  ;;  %v14382_v43 = vmul.f32 %v5848_v10, %v13896_v2  ;;  %v16770_v27 = vld [vmem:[#allocation13_spill] sm:$0xff]  ;;  %v16771_v62 = vld [vmem:[#allocation86_spill] sm:$0xff] }
 0x3da   : > { %16768 = vst [vmem:[#allocation84_spill] sm:$0xff] %v14371_v38  ;;  %v5020_v40 = vmul.f32 %v14325_v14, %v4860_v50  ;;  %v4847_v0 = vsel %vm4702_vm4, %v4842_v7, %v14252_v30  ;;  %v4904_v25 = vsub.f32 %v16769_v54, %v4887_v48  ;;  %v14390_v24 = vmul.f32 %v14250_v11, %v16757_v46  ;;  %v16772_v50 = vld [vmem:[#allocation176_spill] sm:$0xff]  ;;  %v16774_v11 = vld [vmem:[#allocation95_spill] sm:$0xff] }
 0x3db   : > { %v4891_v26 = vpop.permute.xlu1 %4890  ;;  %v4857_v41 = vsub.f32 %v16770_v27, %v14211_v52  ;;  %v4856_v32 = vsub.f32 %v6038_v44, %v4846_v36  ;;  %v4901_v2 = vsub.f32 %v16771_v62, %v4892_v60  ;;  %v14397_v10 = vmul.f32 %v5852_v47, %v14078_v16  ;;  %v16773_v7 = vld [vmem:[#allocation196_spill] sm:$0xff]  ;;  %v4889_v48 = vpop.permute.xlu0 %4888  ;;  %v16775_v36 = vld [vmem:[#allocation165_spill] sm:$0xff] }
 0x3dc   : > { %v4903_v3 = vsub.f32 %v16772_v50, %v4893_v39  ;;  %v4906_v12 = vsub.f32 %v16773_v7, %v4891_v26  ;;  %v14403_v46 = vmul.f32 %v14264_v23, %v13923_v31  ;;  %v14406_v52 = vmul.f32 %v5854_v1, %v14099_v34  ;;  %v16776_v31 = vld [vmem:[#allocation51_spill] sm:$0xff] }
 0x3dd   : > { %v4859_v44 = vsub.f32 %v16774_v11, %v14252_v30  ;;  %v4858_v47 = vsub.f32 %v16775_v36, %v4847_v0  ;;  %v5027_v60 = vmul.f32 %v14345_v13, %v4908_v63  ;;  %v4894_v39 = vsel %vm4702_vm4, %v4889_v48, %v4891_v26 }
 0x3de   : > { %v4910_v27 = vmul.f32 %v4904_v25, %v13551_v61  ;;  %v4905_v62 = vsub.f32 %v14033_v4, %v4894_v39  ;;  %v14417_v50 = vstv %s14347_s17  ;;  %v4863_v1 = vmul.f32 %v4857_v41, %v13551_v61 }
 0x3df   : > { %v4930_v54 = vpop.permute.xlu1 %4929  ;;  %v4862_v30 = vmul.f32 %v4856_v32, %v13551_v61  ;;  %v4907_v7 = vmul.f32 %v4901_v2, %v13551_v61  ;;  %v14423_v0 = vstv %s14363_s23  ;;  %v4909_v63 = vmul.f32 %v4903_v3, %v13551_v61  ;;  %v4928_v32 = vpop.permute.xlu0 %4927 }
 0x3e0   : > { %v4949_v23 = vsub.f32 %v16776_v31, %v4930_v54  ;;  %v4912_v26 = vmul.f32 %v4906_v12, %v13551_v61  ;;  %v14429_v48 = vstv %s14373_s25  ;;  %v4865_v4 = vmul.f32 %v4859_v44, %v13551_v61 }
 0x3e1   : > { %v4864_v11 = vmul.f32 %v4858_v47, %v13551_v61  ;;  %v5033_v36 = vadd.f32 %v5027_v60, %v5021_v9  ;;  %v4911_v41 = vmul.f32 %v4905_v62, %v13551_v61  ;;  %v5029_v2 = vmul.f32 %v14354_v53, %v4910_v27 }
 0x3e2   : > { %v4955_v25 = vmul.f32 %v4949_v23, %v13551_v61  ;;  %v4939_v3 = vsel %vm4702_vm4, %v4928_v32, %v4930_v54  ;;  %v5023_v23 = vmul.f32 %v14329_v49, %v4863_v1  ;;  %v5022_v34 = vmul.f32 %v14332_v22, %v4862_v30 }
 0x3e3   : > { %v4934_v39 = vpop.permute.xlu1 %4933  ;;  %v5026_v44 = vmul.f32 %v14350_v28, %v4907_v7  ;;  %v4948_v9 = vsub.f32 %v14050_v6, %v4939_v3  ;;  %v5028_v47 = vmul.f32 %v14357_v51, %v4909_v63  ;;  %v5031_v60 = vmul.f32 %v14361_v56, %v4912_v26  ;;  %v4932_v30 = vpop.permute.xlu0 %4931  ;;  %v16777_v3 = vld [vmem:[#allocation127_spill] sm:$0xff] }
 0x3e4   : > { %v5039_v31 = vmul.f32 %v14379_v15, %v4955_v25  ;;  %v4951_v12 = vsub.f32 %v14081_v5, %v4934_v39  ;;  %v5025_v25 = vmul.f32 %v14338_v42, %v4865_v4  ;;  %v5024_v54 = vmul.f32 %v14341_v55, %v4864_v11 }
 0x3e5   : > { %v5030_v5 = vmul.f32 %v14371_v38, %v4911_v41  ;;  %v4954_v1 = vmul.f32 %v4948_v9, %v13551_v61  ;;  %v5035_v32 = vadd.f32 %v5029_v2, %v5023_v23  ;;  %v4940_v63 = vsel %vm4702_vm4, %v4932_v30, %v4934_v39 }
 0x3e6   : > { %v5045_v62 = vadd.f32 %v5039_v31, %v5033_v36  ;;  %v4957_v27 = vmul.f32 %v4951_v12, %v13551_v61  ;;  %v5032_v36 = vadd.f32 %v5026_v44, %v5020_v40  ;;  %v4950_v4 = vsub.f32 %v14089_v57, %v4940_v63  ;;  %v16778_v63 = vld [vmem:[#allocation112_spill] sm:$0xff] }
 0x3e7   : > { %v4938_v26 = vpop.permute.xlu1 %4937  ;;  %v5038_v31 = vmul.f32 %v14382_v43, %v4954_v1  ;;  %v5034_v12 = vadd.f32 %v5028_v47, %v5022_v34  ;;  %v5037_v41 = vadd.f32 %v5031_v60, %v5025_v25  ;;  %v5036_v2 = vadd.f32 %v5030_v5, %v5024_v54  ;;  %v4936_v39 = vpop.permute.xlu0 %4935 }
 0x3e8   : > { %v5051_v7 = vmul.f32 %v5045_v62, %v16684_v58  ;;  %v5041_v6 = vmul.f32 %v14390_v24, %v4957_v27  ;;  %v4953_v11 = vsub.f32 %v16777_v3, %v4938_v26  ;;  %v4956_v62 = vmul.f32 %v4950_v4, %v13551_v61 }
 0x3e9   : > { %v5044_v23 = vadd.f32 %v5038_v31, %v5032_v36  ;;  %v4941_v57 = vsel %vm4702_vm4, %v4936_v39, %v4938_v26 }
 0x3ea   : > { %v5057_v9 = vadd.f32 %v5051_v7, %v16686_v45  ;;  %v5047_v38 = vadd.f32 %v5041_v6, %v5035_v32  ;;  %v4959_v27 = vmul.f32 %v4953_v11, %v13551_v61  ;;  %v5040_v47 = vmul.f32 %v14397_v10, %v4956_v62 }
 0x3eb   : > { %v5050_v34 = vmul.f32 %v5044_v23, %v16684_v58  ;;  %v4952_v25 = vsub.f32 %v14117_v33, %v4941_v57 }
 0x3ec   : > { %v5124_v40 = vmul.f32 %v5057_v9, %v14379_v15  ;;  %v5053_v44 = vmul.f32 %v5047_v38, %v16684_v58  ;;  %v5100_v1 = vmul.f32 %v5057_v9, %v14321_v8  ;;  %v5043_v60 = vmul.f32 %v14403_v46, %v4959_v27 }
 0x3ed   : > { %v5112_v38 = vmul.f32 %v5057_v9, %v14345_v13  ;;  %v5056_v30 = vadd.f32 %v5050_v34, %v16686_v45  ;;  %v5046_v8 = vadd.f32 %v5040_v47, %v5034_v12  ;;  %v4958_v7 = vmul.f32 %v4952_v25, %v13551_v61  ;;  %v16784_v34 = vld [vmem:[#allocation52_spill] sm:$0xff] }
 0x3ee   : > { %v14467_v54 = vadd.f32 %v5124_v40, %v14136_v35  ;;  %v5059_v5 = vadd.f32 %v5053_v44, %v16686_v45  ;;  %v5106_v15 = vadd.f32 %v5100_v1, %v14222_v18  ;;  %v5049_v32 = vadd.f32 %v5043_v60, %v5037_v41 }
 0x3ef   : > { %v5118_v35 = vadd.f32 %v5112_v38, %v14245_v19  ;;  %v5123_v36 = vmul.f32 %v5056_v30, %v14382_v43  ;;  %v5052_v18 = vmul.f32 %v5046_v8, %v16684_v58  ;;  %v5042_v31 = vmul.f32 %v14406_v52, %v4958_v7 }
 0x3f0   : > { %v5126_v6 = vmul.f32 %v5059_v5, %v14390_v24  ;;  %v5136_v26 = vadd.f32 %v5106_v15, %v16778_v63  ;;  %v5102_v33 = vmul.f32 %v5059_v5, %v14329_v49  ;;  %v5055_v13 = vmul.f32 %v5049_v32, %v16684_v58  ;;  %v16785_v15 = vld [vmem:[#allocation62_spill] sm:$0xff]  ;;  %v16786_v32 = vld [vmem:[#allocation171_spill] sm:$0xff] }
 0x3f1   : > { %v5099_v24 = vmul.f32 %v5056_v30, %v14325_v14  ;;  %v14489_v49 = vadd.f32 %v5123_v36, %v14148_v17  ;;  %v5058_v19 = vadd.f32 %v5052_v18, %v16686_v45  ;;  %v5048_v11 = vadd.f32 %v5042_v31, %v5036_v2  ;;  %v16780_v2 = vld [vmem:[#allocation44_spill] sm:$0xff]  ;;  %v16791_v31 = vld [vmem:[#allocation155_spill] sm:$0xff] }
 0x3f2   : > { %v14483_v4 = vadd.f32 %v5126_v6, %v14159_v37  ;;  %v5143_v61 = vadd.f32 %v14417_v50, %v5136_v26  ;;  %v5108_v3 = vadd.f32 %v5102_v33, %v14228_v29  ;;  %v5061_v43 = vadd.f32 %v5055_v13, %v16686_v45  ;;  %v16779_v37 = vld [vmem:[#allocation102_spill] sm:$0xff]  ;;  %v16787_v26 = vld [vmem:[#allocation67_spill] sm:$0xff]  ;;  %v16789_v18 = vld [vmem:[#allocation124_spill] sm:$0xff] }
 0x3f3   : > { %v5105_v41 = vadd.f32 %v5099_v24, %v14213_v21  ;;  %v5183_v23 = vadd.f32 %v5118_v35, %v14286_v59  ;;  %v5125_v14 = vmul.f32 %v5058_v19, %v14397_v10  ;;  %v5054_v17 = vmul.f32 %v5048_v11, %v16684_v58  ;;  %v16781_v59 = vld [vmem:[#allocation200_spill] sm:$0xff]  ;;  %v16782_v10 = vld [vmem:[#allocation61_spill] sm:$0xff] }
 0x3f4   : > { %v5150_v12 = vmul.f32 %v14423_v0, %v5143_v61  ;;  %v5138_v9 = vadd.f32 %v5108_v3, %v16779_v37  ;;  %v5128_v29 = vmul.f32 %v5061_v43, %v14403_v46  ;;  %v5101_v62 = vmul.f32 %v5058_v19, %v14332_v22  ;;  %v16783_v58 = vld [vmem:[#allocation156_spill] sm:$0xff]  ;;  %v16793_v3 = vld [vmem:[#allocation77_spill] sm:$0xff]  ;;  %v16795_v37 = vld [vmem:[#allocation26_spill] sm:$0xff] }
 0x3f5   : > { %v5089_v27 = vmul.f32 %v16733_v20, %v14078_v16  ;;  %v5135_v39 = vadd.f32 %v5105_v41, %v16780_v2  ;;  %v5104_v40 = vmul.f32 %v5061_v43, %v14338_v42  ;;  %v5131_v44 = vadd.f32 %v5125_v14, %v16781_v59  ;;  %v16788_v35 = vld [vmem:[#allocation88_spill] sm:$0xff]  ;;  %v16801_v59 = vld [vmem:[#allocation135_spill] sm:$0xff] }
 0x3f6   : > { %5163 = vrot.lane.b32.xlu1 %v5150_v12, %s6158_s6  ;;  %v5145_v21 = vadd.f32 %v14417_v50, %v5138_v9  ;;  %v5134_v57 = vadd.f32 %v5128_v29, %v16782_v10  ;;  %v5060_v46 = vadd.f32 %v5054_v17, %v16686_v45  ;;  %v5107_v1 = vadd.f32 %v5101_v62, %v16783_v58  ;;  %v16794_v11 = vld [vmem:[#allocation84_spill] sm:$0xff]  ;;  %v16797_v29 = vld [vmem:[#allocation37_spill] sm:$0xff]  ;;  %v16802_v10 = vld [vmem:[#allocation210_spill] sm:$0xff] }
 0x3f7   : > { %v5142_v22 = vadd.f32 %v14417_v50, %v5135_v39  ;;  %v5110_v47 = vadd.f32 %v5104_v40, %v16784_v34  ;;  %v5190_v60 = vadd.f32 %v14429_v48, %v5183_v23  ;;  %v5111_v8 = vmul.f32 %v5056_v30, %v14350_v28  ;;  %v16790_v30 = vld [vmem:[#allocation125_spill] sm:$0xff]  ;;  %v16796_v23 = vld [vmem:[#allocation27_spill] sm:$0xff] }
 0x3f8   : > { %v5152_v16 = vmul.f32 %v14423_v0, %v5145_v21  ;;  %v5127_v25 = vmul.f32 %v5060_v46, %v14406_v52  ;;  %v5137_v42 = vadd.f32 %v5107_v1, %v16785_v15  ;;  %v5103_v38 = vmul.f32 %v5060_v46, %v14341_v55  ;;  %v16798_v62 = vld [vmem:[#allocation181_spill] sm:$0xff]  ;;  %v16800_v21 = vld [vmem:[#allocation72_spill] sm:$0xff]  ;;  %v16803_v58 = vld [vmem:[#allocation143_spill] sm:$0xff] }
 0x3f9   : > { %v5149_v45 = vmul.f32 %v14423_v0, %v5142_v22  ;;  %v5140_v7 = vadd.f32 %v5110_v47, %v16786_v32  ;;  %v5114_v6 = vmul.f32 %v5059_v5, %v14354_v53  ;;  %v5113_v63 = vmul.f32 %v5058_v19, %v14357_v51  ;;  %v16792_v5 = vld [vmem:[#allocation132_spill] sm:$0xff]  ;;  %v16806_v34 = vld [vmem:[#allocation53_spill] sm:$0xff] }
 0x3fa   : > { %5167 = vrot.lane.b32.xlu1 %v5152_v16, %s6158_s6  ;;  %v5133_v33 = vadd.f32 %v5127_v25, %v16787_v26  ;;  %v5144_v52 = vadd.f32 %v14417_v50, %v5137_v42  ;;  %v5109_v36 = vadd.f32 %v5103_v38, %v16788_v35  ;;  %v5117_v55 = vadd.f32 %v5111_v8, %v16789_v18  ;;  %v16804_v1 = vld [vmem:[#allocation28_spill] sm:$0xff]  ;;  %v16805_v16 = vld [vmem:[#allocation33_spill] sm:$0xff]  ;;  %v16808_v25 = vld [vmem:[#allocation46_spill] sm:$0xff] }
 0x3fb   : > { %5161 = vrot.lane.b32.xlu0 %v5149_v45, %s6158_s6  ;;  %v5147_v28 = vadd.f32 %v14417_v50, %v5140_v7  ;;  %v5120_v13 = vadd.f32 %v5114_v6, %v16790_v30  ;;  %v5119_v61 = vadd.f32 %v5113_v63, %v16791_v31  ;;  %v5116_v53 = vmul.f32 %v5061_v43, %v14361_v56  ;;  %v16799_v43 = vld [vmem:[#allocation24_spill] sm:$0xff] }
 0x3fc   : > { %v5151_v51 = vmul.f32 %v14423_v0, %v5144_v52  ;;  %v5139_v24 = vadd.f32 %v5109_v36, %v16792_v5  ;;  %v5182_v19 = vadd.f32 %v5117_v55, %v16793_v3  ;;  %v5115_v12 = vmul.f32 %v5060_v46, %v16794_v11  ;;  %v16807_v47 = vld [vmem:[#allocation188_spill] sm:$0xff] }
 0x3fd   : > { %v5154_v41 = vmul.f32 %v14423_v0, %v5147_v28  ;;  %v5185_v9 = vadd.f32 %v5120_v13, %v16795_v37  ;;  %v5184_v14 = vadd.f32 %v5119_v61, %v16796_v23  ;;  %v5122_v17 = vadd.f32 %v5116_v53, %v16797_v29  ;;  %v16810_v6 = vld [vmem:[#allocation184_spill] sm:$0xff] }
 0x3fe   : > { %v5091_v2 = vmul.f32 %v16733_v20, %v16798_v62  ;;  %v5146_v56 = vadd.f32 %v14417_v50, %v5139_v24  ;;  %v5121_v39 = vadd.f32 %v5115_v12, %v16799_v43  ;;  %v5230_v40 = vadd.f32 %v14467_v54, %v16800_v21  ;;  %v16809_v54 = vld [vmem:[#allocation163_spill] sm:$0xff] }
 0x3ff   : > { %v5093_v46 = vadd.f32 %v16802_v10, %v16801_v59  ;;  %v5096_v22 = vadd.f32 %v16804_v1, %v16803_v58  ;;  %5165 = vrot.lane.b32.xlu0 %v5151_v51, %s6158_s6  ;;  %5171 = vrot.lane.b32.xlu1 %v5154_v41, %s6158_s6  ;;  %v5187_v20 = vadd.f32 %v5122_v17, %v16805_v16 }
 0x400   : > { %v5095_v50 = vadd.f32 %v5089_v27, %v16806_v34  ;;  %v5098_v15 = vadd.f32 %v16808_v25, %v16807_v47  ;;  %v5153_v42 = vmul.f32 %v14423_v0, %v5146_v56  ;;  %v5186_v38 = vadd.f32 %v5121_v39, %v16809_v54 }
 0x401   : > { %v5196_v8 = vmul.f32 %v5190_v60, %v14423_v0  ;;  %v5189_v45 = vadd.f32 %v14429_v48, %v5182_v19  ;;  %v5192_v32 = vadd.f32 %v14429_v48, %v5185_v9  ;;  %v5229_v7 = vadd.f32 %v14489_v49, %v5093_v46 }
 0x402   : > { %v5097_v63 = vadd.f32 %v5091_v2, %v16810_v6  ;;  %v5232_v26 = vadd.f32 %v14483_v4, %v5096_v22  ;;  %v5231_v27 = vadd.f32 %v5131_v44, %v5095_v50  ;;  %v5234_v52 = vadd.f32 %v5134_v57, %v5098_v15 }
 0x403   : > { %5169 = vrot.lane.b32.xlu0 %v5153_v42, %s6158_s6  ;;  %5209 = vrot.lane.b32.xlu1 %v5196_v8, %s6158_s6  ;;  %v5195_v36 = vmul.f32 %v5189_v45, %v14423_v0  ;;  %v5198_v60 = vmul.f32 %v5192_v32, %v14423_v0  ;;  %v5191_v18 = vadd.f32 %v14429_v48, %v5184_v14  ;;  %v5235_v49 = vstv %s5410_s10 }
 0x404   : > { %v5233_v35 = vadd.f32 %v5133_v33, %v5097_v63  ;;  %v5194_v55 = vadd.f32 %v14429_v48, %v5187_v20  ;;  %v5193_v57 = vadd.f32 %v14429_v48, %v5186_v38  ;;  %v5237_v33 = vadd.f32 %v5235_v49, %v5230_v40 }
 0x405   : > { %v5197_v4 = vmul.f32 %v5191_v18, %v14423_v0  ;;  %v5236_v13 = vadd.f32 %v5235_v49, %v5229_v7  ;;  %v5239_v31 = vadd.f32 %v5235_v49, %v5232_v26  ;;  %v5238_v53 = vadd.f32 %v5235_v49, %v5231_v27 }
 0x406   : > { %v5200_v44 = vmul.f32 %v5194_v55, %v14423_v0  ;;  %v5199_v28 = vmul.f32 %v5193_v57, %v14423_v0  ;;  %v5243_v30 = vmul.f32 %v5237_v33, %v14423_v0  ;;  %v5241_v51 = vadd.f32 %v5235_v49, %v5234_v52 }
 0x407   : > { %5207 = vrot.lane.b32.xlu0 %v5195_v36, %s6158_s6  ;;  %5213 = vrot.lane.b32.xlu1 %v5198_v60, %s6158_s6  ;;  %v5242_v61 = vmul.f32 %v5236_v13, %v14423_v0  ;;  %v5245_v48 = vmul.f32 %v5239_v31, %v14423_v0  ;;  %v5244_v5 = vmul.f32 %v5238_v53, %v14423_v0 }
 0x408   : > { %v5247_v24 = vmul.f32 %v5241_v51, %v14423_v0  ;;  %v5240_v3 = vadd.f32 %v5235_v49, %v5233_v35 }
 0x40a   : > { %v5246_v19 = vmul.f32 %v5240_v3, %v14423_v0 }
 0x40b   : > { %5211 = vrot.lane.b32.xlu0 %v5197_v4, %s6158_s6  ;;  %5217 = vrot.lane.b32.xlu1 %v5200_v44, %s6158_s6 }
 0x40f   : > { %5215 = vrot.lane.b32.xlu0 %v5199_v28, %s6158_s6  ;;  %5256 = vrot.lane.b32.xlu1 %v5243_v30, %s6158_s6 }
 0x413   : > { %5254 = vrot.lane.b32.xlu0 %v5242_v61, %s6158_s6  ;;  %5260 = vrot.lane.b32.xlu1 %v5245_v48, %s6158_s6 }
 0x417   : > { %5258 = vrot.lane.b32.xlu0 %v5244_v5, %s6158_s6  ;;  %5264 = vrot.lane.b32.xlu1 %v5247_v24, %s6158_s6 }
 0x41b   : > { %5262 = vrot.lane.b32.xlu0 %v5246_v19, %s6158_s6  ;;  %s5635_s6 = smul.u32 768, %s6214_s22  ;;  %s14626_s22 = scalar_lea.sflag [#allocation3], %s269_s7 }
 0x41d   : > { %s14620_s12 = scalar_lea.hbm %s14671_s5, %s5635_s6 }
 0x468   : > { %v5164_v11 = vpop.permute.xlu1 %5163 }
 0x46c   : > { %v5168_v12 = vpop.permute.xlu1 %5167 }
 0x46d   : > { %v5162_v41 = vpop.permute.xlu0 %5161 }
 0x46e   : > { %v5173_v37 = vsel %vm2167_vm2, %v5162_v41, %v5164_v11 }
 0x46f   : > { %5179 = vst [vmem:[%s14596_s11 - $0x1] sm:$0xfe] %v5173_v37 }
 0x471   : > { %v5166_v9 = vpop.permute.xlu0 %5165  ;;  %v5172_v0 = vpop.permute.xlu1 %5171 }
 0x472   : > { %v5174_v23 = vsel %vm2167_vm2, %v5166_v9, %v5168_v12 }
 0x473   : > { %5180 = vst [vmem:[%s14596_s11 + $0x7] sm:$0xff] %v5174_v23 }
 0x475   : > { %v5170_v14 = vpop.permute.xlu0 %5169  ;;  %v5210_v29 = vpop.permute.xlu1 %5209 }
 0x476   : > { %v5175_v17 = vsel %vm2167_vm2, %v5170_v14, %v5172_v0 }
 0x477   : > { %5181 = vst [vmem:[%s14596_s11 + $0xf] sm:$0x1] %v5175_v17 }
 0x479   : > { %v5208_v62 = vpop.permute.xlu0 %5207  ;;  %v5214_v2 = vpop.permute.xlu1 %5213 }
 0x47a   : > { %v5219_v56 = vsel %vm2167_vm2, %v5208_v62, %v5210_v29 }
 0x47b   : > { %5624 = vst [vmem:[%s14596_s11 + $0xf] sm:$0xfe] %v5219_v56 }
 0x47d   : > { %v5212_v43 = vpop.permute.xlu0 %5211  ;;  %v5218_v39 = vpop.permute.xlu1 %5217 }
 0x47e   : > { %v5220_v21 = vsel %vm2167_vm2, %v5212_v43, %v5214_v2 }
 0x47f   : > { %5625 = vst [vmem:[%s14596_s11 + $0x17] sm:$0xff] %v5220_v21 }
 0x481   : > { %v5216_v40 = vpop.permute.xlu0 %5215  ;;  %v5257_v59 = vpop.permute.xlu1 %5256 }
 0x482   : > { %v5221_v10 = vsel %vm2167_vm2, %v5216_v40, %v5218_v39 }
 0x483   : > { %5626 = vst [vmem:[%s14596_s11 + $0x1f] sm:$0x1] %v5221_v10 }
 0x485   : > { %v5255_v46 = vpop.permute.xlu0 %5254  ;;  %v5261_v58 = vpop.permute.xlu1 %5260 }
 0x486   : > { %v5266_v1 = vsel %vm2167_vm2, %v5255_v46, %v5257_v59 }
 0x487   : > { %5627 = vst [vmem:[%s14596_s11 + $0x1f] sm:$0xfe] %v5266_v1 }
 0x489   : > { %v5259_v22 = vpop.permute.xlu0 %5258  ;;  %v5265_v20 = vpop.permute.xlu1 %5264 }
 0x48a   : > { %v5267_v16 = vsel %vm2167_vm2, %v5259_v22, %v5261_v58 }
 0x48b   : > { %5628 = vst [vmem:[%s14596_s11 + $0x27] sm:$0xff] %v5267_v16 }
 0x48d   : > { %v5263_v34 = vpop.permute.xlu0 %5262 }
 0x48e   : > { %v5268_v50 = vsel %vm2167_vm2, %v5263_v34, %v5265_v20 }
 0x48f   : > { %5629 = vst [vmem:[%s14596_s11 + $0x2f] sm:$0x1] %v5268_v50 }
 0x490   : > { %6097 = shalt.err (!%p6094_p6)
}
 0x491   : > { %s6098_s17 = scalar_lea.hbm %s14620_s12, 768  ;;  %s6102_s10 = scalar_lea.hbm %s14671_s5, 1536 }
 0x492   : > { %p6099_p10 = scmp.ne.s32.totalorder %s14620_s12, %s6098_s17  ;;  %p6103_p11 = scmp.lt.s32.totalorder %s14620_s12, %s14671_s5 }
 0x493   : > { %p6104_p13 = scmp.lt.s32.totalorder %s6102_s10, %s6098_s17 }
 0x494   : > { %p6100_p8 = pnand %p6099_p10, %p16811_p2 }
 0x495   : > { %p6105_p1 = por %p6104_p13, %p6103_p11 }
 0x496   : > { %p6101_p0 = pneg %p6100_p8 }
 0x498   : > { %p6106_p12 = pnand %p6105_p1, %p6101_p0 }
 0x49a   : > { %6109 = shalt.err (!%p6106_p12)
}
 0x49b   : > { %s6161_s11 = smov 128   ;;  %s6162_s6 = smov 8  }
 0x49c   : > { %5648 = dma.vmem_to_hbm [thread:$0]  (%p16811_p2), %s14615_s26, 768, %s14620_s12, %s14626_s22, %s6161_s11, %s6161_s11, %s6162_s6  }
 0x49d PF: > { %p5670_p3 = scmp.ge.s32.totalorder %s6152_s21, 2  ;;  %s5305_s8 = sand.u32 1, %s6140_s18  }
 0x49e   : > { %p16812_p4 = scmp.ne.s32.totalorder %s15167_s29, 0  ;;  %s5306_s9 = scalar_lea.sflag [#allocation3], %s5305_s8 }
 0x4a0   : > { %p5661_p9 = pnand %p5670_p3, %p16812_p4 }
 0x4a2   : > { %p5662_p7 = pneg %p5661_p9 }
 0x4a4   : > { %6135 = dma.done.wait (%p5662_p7), %s5306_s9, 768  }
 0x4a5   : > { %6137 = vsyncadd (%p5662_p7), %s5306_s9, 4294966528  ;;  %p17_p5 = scmp.ge.s32.totalorder %s6218_s24, 4   ;;  %s16813_s18 = smov %s6144_s19 }
 0x4a6   : > { %s16814_s19 = smov %s6148_s20  ;;  %s16815_s20 = smov %s6229_s27 }
 0x4a7   : > { %s16816_s21 = smov %s6218_s24  ;;  %19 = sbr.rel (!%p17_p5) target bundleno = 5 (0x5), region = 103 }
 0x4ac   :  { %5311 = vsyncpa [#allocation3], 1 }
 0x4ad   :  { %5313 = vsyncpa [#allocation3 + $0x1], 1 }
 0x4ae   :  { %5314 = vsyncpa [#allocation4], 1 }
 0x4af   :  { %5316 = vsyncpa [#allocation4 + $0x1], 1 }
 0x4b0   :  { %5317 = vsyncpa [#allocation6], 1 }

</bundles_post_ra>
